<compile_context>
chip_gen: v6e
topology: v6e:2x2x1
jax: 0.10.0
libtpu: 0.0.40
codegen_flags: <defaults>
</compile_context>

<pallas_src>
import jax
import jax.numpy as jnp
from jax.experimental import pallas as pl
from jax.experimental.pallas import tpu as pltpu


# Static network geometry: 22x22 input -> three (conv3x3 valid -> pool2x2) -> 1x1.
H_IN = 22
Q1, W1P = 10, 16            # stage-1 pooled spatial (10x10); pooled-w padded to 16
OH2, Q2 = 8, 4              # stage-2 conv output 8x8, pooled 4x4
OH3 = 2                     # stage-3 conv output 2x2, pooled 1x1
C1P, C2P, C3P = 128, 128, 256   # lane-padded channels (real: 50, 100, 200)
F1P, F2P, F3P = 128, 128, 128   # lane-padded FC widths (real: 100, 50, 10)
K1P = 128                   # stage-1 im2col contraction (9 real taps) padded to 128


# ----------------------------------------------------------------------------
# The single fused kernel
# ----------------------------------------------------------------------------
def _net_kernel(p1_ref, w1_ref, b1_ref, w2_ref, b2_ref, w3_ref, b3_ref,
                fw1_ref, fb1_ref, fw2_ref, fb2_ref, fw3_ref, fb3_ref,
                o_ref, a1_ref, c2_ref):
    B = a1_ref.shape[0]

    # ---- Stage 1: conv1 + bias + ReLU + pool.  Patches arrive pool-grouped
    # (rows ordered d, b, qh, qw), so pooling is a max over 4 contiguous,
    # tile-aligned row chunks of one long matmul result.
    g = B * Q1 * W1P
    h1 = jnp.dot(p1_ref[...], w1_ref[...], preferred_element_type=jnp.float32)  # (4g, C1P)
    m1 = jnp.maximum(jnp.maximum(h1[0:g], h1[g:2 * g]),
                     jnp.maximum(h1[2 * g:3 * g], h1[3 * g:4 * g]))
    # relu(max_d(conv_d) + b) == pool(relu(conv + b)): bias shared, ReLU monotone.
    a1_ref[...] = jnp.maximum(m1 + b1_ref[...], 0.0).reshape(B, Q1, W1P, C1P)

    # ---- Stage 2: conv2 as 9 shifted matmuls over the VMEM-resident a1.
    acc2 = None
    for kh in range(3):
        for kw in range(3):
            slab = a1_ref[:, kh:kh + OH2, kw:kw + OH2, :].reshape(B * OH2 * OH2, C1P)
            part = jnp.dot(slab.astype(jnp.bfloat16), w2_ref[kh * 3 + kw],
                           preferred_element_type=jnp.float32)
            acc2 = part if acc2 is None else acc2 + part
    c2_ref[...] = jnp.maximum(acc2 + b2_ref[...], 0.0).reshape(B, OH2, OH2, C2P)

    # 2x2 max-pool of the stage-2 output; the 16 pooled (B, C2P) rows stay as
    # VMEM-resident values (they are also the stage-3 conv operands).
    a2 = [[None] * Q2 for _ in range(Q2)]
    for qh in range(Q2):
        for qw in range(Q2):
            v = jnp.maximum(
                jnp.maximum(c2_ref[:, 2 * qh,     2 * qw, :], c2_ref[:, 2 * qh,     2 * qw + 1, :]),
                jnp.maximum(c2_ref[:, 2 * qh + 1, 2 * qw, :], c2_ref[:, 2 * qh + 1, 2 * qw + 1, :]))
            a2[qh][qw] = v.astype(jnp.bfloat16)

    # ---- Stage 3: conv3 over the 2x2 output grid (these 4 positions are also
    # the final pool window), then bias + ReLU -> (B, 256) = flattened features.
    accs = []
    for oh in range(OH3):
        for ow in range(OH3):
            acc = None
            for kh in range(3):
                for kw in range(3):
                    part = jnp.dot(a2[oh + kh][ow + kw], w3_ref[kh * 3 + kw],
                                   preferred_element_type=jnp.float32)
                    acc = part if acc is None else acc + part
            accs.append(acc)
    m3 = jnp.maximum(jnp.maximum(accs[0], accs[1]), jnp.maximum(accs[2], accs[3]))
    h3 = jnp.maximum(m3 + b3_ref[...], 0.0)                                     # (B, C3P)

    # ---- FC head: fc1 -> ReLU -> fc2 -> ReLU -> fc3 (lane-padded to 128).
    h = jnp.dot(h3.astype(jnp.bfloat16), fw1_ref[...], preferred_element_type=jnp.float32)
    h = jnp.maximum(h + fb1_ref[...], 0.0)
    h = jnp.dot(h.astype(jnp.bfloat16), fw2_ref[...], preferred_element_type=jnp.float32)
    h = jnp.maximum(h + fb2_ref[...], 0.0)
    h = jnp.dot(h.astype(jnp.bfloat16), fw3_ref[...], preferred_element_type=jnp.float32)
    o_ref[...] = h + fb3_ref[...]                                               # (B, 128) lane-dense


# ----------------------------------------------------------------------------
# pallas_call wrapper (grid=(): one full-array VMEM block per operand)
# ----------------------------------------------------------------------------
def _full_spec(shape):
    zeros = (0,) * len(shape)
    return pl.BlockSpec(shape, lambda *_: zeros)


def _stage1_patches(x_bhw):
    """(B, 22, 22) f32 -> (4*B*Q1*W1P, K1P) bf16 pool-grouped conv1 patches.

    Rows ordered (d=dh*2+dw, b, qh, qw) with qw zero-padded 10->16 and the 9-tap
    contraction zero-padded to 128 lanes (pad rows/lanes are never read back as
    real data: weights/bias pads are zero and pad spatial rows are out of range).
    """
    B = x_bhw.shape[0]
    OH = H_IN - 2
    taps = jnp.stack([x_bhw[:, kh:kh + OH, kw:kw + OH]
                      for kh in range(3) for kw in range(3)], axis=-1)       # (B,20,20,9)
    g = taps.reshape(B, Q1, 2, Q1, 2, 9).transpose(2, 4, 0, 1, 3, 5)         # (2,2,B,Q1,Q1,9)
    g = g.reshape(4, B, Q1, Q1, 9)
    g = jnp.pad(g, ((0, 0), (0, 0), (0, 0), (0, W1P - Q1), (0, K1P - 9)))
    return g.reshape(4 * B * Q1 * W1P, K1P).astype(jnp.bfloat16)


@jax.jit
def net_forward(x_nchw, params):
    B = x_nchw.shape[0]
    p1 = _stage1_patches(x_nchw[:, 0].astype(jnp.float32))

    args = (p1,
            params["w1"], params["b1"], params["w2"], params["b2"],
            params["w3"], params["b3"],
            params["fw1"], params["fb1"], params["fw2"], params["fb2"],
            params["fw3"], params["fb3"])
    out = pl.pallas_call(
        _net_kernel,
        out_shape=jax.ShapeDtypeStruct((B, F3P), jnp.float32),
        in_specs=[_full_spec(a.shape) for a in args],
        out_specs=_full_spec((B, F3P)),
        scratch_shapes=[pltpu.VMEM((B, Q1, W1P, C1P), jnp.float32),   # pooled conv1 acts
                        pltpu.VMEM((B, OH2, OH2, C2P), jnp.float32)], # conv2 (pre-pool) acts
    )(*args)
    return out[:, :10]


# ----------------------------------------------------------------------------
# Parameter init (PyTorch-default-style uniform bounds), pre-padded / bf16.
# ----------------------------------------------------------------------------
def init_params(key):
    ks = jax.random.split(key, 12)

    def u(k, shape, fan_in):
        bound = 1.0 / jnp.sqrt(jnp.float32(fan_in))
        return jax.random.uniform(k, shape, jnp.float32, -bound, bound)

    cw1 = u(ks[0], (50, 1, 3, 3), 1 * 9);      cb1 = u(ks[1], (50,), 1 * 9)
    cw2 = u(ks[2], (100, 50, 3, 3), 50 * 9);   cb2 = u(ks[3], (100,), 50 * 9)
    cw3 = u(ks[4], (200, 100, 3, 3), 100 * 9); cb3 = u(ks[5], (200,), 100 * 9)
    fw1 = u(ks[6], (100, 200), 200);           fb1 = u(ks[7], (100,), 200)
    fw2 = u(ks[8], (50, 100), 100);            fb2 = u(ks[9], (50,), 100)
    fw3 = u(ks[10], (10, 50), 50);             fb3 = u(ks[11], (10,), 50)

    def conv_taps(w_oihw, cin_pad, cout_pad):
        # OIHW -> (9, cin, cout) per-tap matrices, zero-padded to lane-dense dims.
        t = jnp.transpose(w_oihw, (2, 3, 1, 0)).reshape(9, w_oihw.shape[1], w_oihw.shape[0])
        return jnp.pad(t, ((0, 0), (0, cin_pad - t.shape[1]),
                           (0, cout_pad - t.shape[2]))).astype(jnp.bfloat16)

    def fc_w(w_oi, in_pad, out_pad):
        t = w_oi.T
        return jnp.pad(t, ((0, in_pad - t.shape[0]),
                           (0, out_pad - t.shape[1]))).astype(jnp.bfloat16)

    def pad_b(b, n_pad):
        return jnp.pad(b, (0, n_pad - b.shape[0])).reshape(1, n_pad).astype(jnp.float32)

    # Stage-1 weight in im2col layout (K rows ordered kh,kw,cin=1), K padded to 128.
    w1 = jnp.transpose(cw1, (2, 3, 1, 0)).reshape(9, 50)
    w1 = jnp.pad(w1, ((0, K1P - 9), (0, C1P - 50))).astype(jnp.bfloat16)

    return {
        "w1": w1,                        "b1": pad_b(cb1, C1P),
        "w2": conv_taps(cw2, C1P, C2P),  "b2": pad_b(cb2, C2P),
        "w3": conv_taps(cw3, C1P, C3P),  "b3": pad_b(cb3, C3P),
        "fw1": fc_w(fw1, C3P, F1P),      "fb1": pad_b(fb1, F1P),
        "fw2": fc_w(fw2, F1P, F2P),      "fb2": pad_b(fb2, F2P),
        "fw3": fc_w(fw3, F2P, F3P),      "fb3": pad_b(fb3, F3P),
    }


if __name__ == "__main__":
    key = jax.random.PRNGKey(0)
    pkey, xkey = jax.random.split(key)
    params = init_params(pkey)
    # 22x22 input: three (conv3x3 valid -> pool2x2) stages reduce it to 1x1, so the
    # flattened features match fc1's expected 200 inputs, as the PyTorch module implies.
    x = jax.random.normal(xkey, (2, 1, 22, 22), dtype=jnp.float32)
    out = jax.block_until_ready(net_forward(x, params))
    assert out.shape == (2, 10) and out.dtype == jnp.float32
    print("KERNEL_OK")
</pallas_src>

<mosaic_0001>
module attributes {stable_mosaic.version = 11 : i64} {
  func.func @_net_kernel(%arg0: memref<1280x128xbf16, #tpu.memory_space<vmem>>, %arg1: memref<128x128xbf16, #tpu.memory_space<vmem>>, %arg2: memref<1x128xf32, #tpu.memory_space<vmem>>, %arg3: memref<9x128x128xbf16, #tpu.memory_space<vmem>>, %arg4: memref<1x128xf32, #tpu.memory_space<vmem>>, %arg5: memref<9x128x256xbf16, #tpu.memory_space<vmem>>, %arg6: memref<1x256xf32, #tpu.memory_space<vmem>>, %arg7: memref<256x128xbf16, #tpu.memory_space<vmem>>, %arg8: memref<1x128xf32, #tpu.memory_space<vmem>>, %arg9: memref<128x128xbf16, #tpu.memory_space<vmem>>, %arg10: memref<1x128xf32, #tpu.memory_space<vmem>>, %arg11: memref<128x128xbf16, #tpu.memory_space<vmem>>, %arg12: memref<1x128xf32, #tpu.memory_space<vmem>>, %arg13: memref<2x128xf32, #tpu.memory_space<vmem>>, %arg14: memref<2x10x16x128xf32, #tpu.memory_space<vmem>>, %arg15: memref<2x8x8x128xf32, #tpu.memory_space<vmem>>) attributes {dimension_semantics = [], scalar_prefetch = 0 : i64, scratch_operands = 2 : i64, tpu.core_type = #tpu.core_type<tc>} {
    %c0 = arith.constant 0 : index
    %c0_0 = arith.constant 0 : index
    %0 = vector.load %arg0[%c0, %c0_0] : memref<1280x128xbf16, #tpu.memory_space<vmem>>, vector<1280x128xbf16>
    %c0_1 = arith.constant 0 : index
    %c0_2 = arith.constant 0 : index
    %1 = vector.load %arg1[%c0_1, %c0_2] : memref<128x128xbf16, #tpu.memory_space<vmem>>, vector<128x128xbf16>
    %cst = arith.constant dense<0.000000e+00> : vector<1280x128xf32>
    %2 = tpu.matmul %0, %1, %cst {dimension_numbers = #tpu.dot_dimension_numbers<[1], [0], [0], [1], [0, 0, 1, 1], [], []>} : vector<1280x128xbf16>, vector<128x128xbf16>, vector<1280x128xf32> -> vector<1280x128xf32>
    %3 = vector.extract_strided_slice %2 {offsets = [0, 0], sizes = [320, 128], strides = [1, 1]} : vector<1280x128xf32> to vector<320x128xf32>
    %4 = vector.extract_strided_slice %2 {offsets = [320, 0], sizes = [320, 128], strides = [1, 1]} : vector<1280x128xf32> to vector<320x128xf32>
    %5 = arith.maximumf %3, %4 : vector<320x128xf32>
    %6 = vector.extract_strided_slice %2 {offsets = [640, 0], sizes = [320, 128], strides = [1, 1]} : vector<1280x128xf32> to vector<320x128xf32>
    %7 = vector.extract_strided_slice %2 {offsets = [960, 0], sizes = [320, 128], strides = [1, 1]} : vector<1280x128xf32> to vector<320x128xf32>
    %8 = arith.maximumf %6, %7 : vector<320x128xf32>
    %9 = arith.maximumf %5, %8 : vector<320x128xf32>
    %c0_3 = arith.constant 0 : index
    %c0_4 = arith.constant 0 : index
    %10 = vector.load %arg2[%c0_3, %c0_4] : memref<1x128xf32, #tpu.memory_space<vmem>>, vector<1x128xf32>
    %11 = vector.broadcast %10 : vector<1x128xf32> to vector<320x128xf32>
    %12 = arith.addf %9, %11 : vector<320x128xf32>
    %cst_5 = arith.constant 0.000000e+00 : f32
    %13 = vector.broadcast %cst_5 : f32 to vector<320x128xf32>
    %14 = arith.maximumf %12, %13 : vector<320x128xf32>
    %15 = vector.shape_cast %14 : vector<320x128xf32> to vector<2x10x16x128xf32>
    %c0_6 = arith.constant 0 : index
    %c0_7 = arith.constant 0 : index
    %c0_8 = arith.constant 0 : index
    %c0_9 = arith.constant 0 : index
    %16 = vector.load %arg14[%c0_6, %c0_7, %c0_8, %c0_9] : memref<2x10x16x128xf32, #tpu.memory_space<vmem>>, vector<2x10x16x128xf32>
    tpu.vector_store %arg14[%c0_6, %c0_7, %c0_8, %c0_9], %15 {strides = array<i32>} : memref<2x10x16x128xf32, #tpu.memory_space<vmem>>, vector<2x10x16x128xf32>,
    %c0_10 = arith.constant 0 : index
    %c0_11 = arith.constant 0 : index
    %c0_12 = arith.constant 0 : index
    %c0_13 = arith.constant 0 : index
    %17 = vector.load %arg14[%c0_10, %c0_11, %c0_12, %c0_13] : memref<2x10x16x128xf32, #tpu.memory_space<vmem>>, vector<2x8x8x128xf32>
    %18 = vector.shape_cast %17 : vector<2x8x8x128xf32> to vector<128x128xf32>
    %19 = arith.truncf %18 : vector<128x128xf32> to vector<128x128xbf16>
    %c0_14 = arith.constant 0 : index
    %c0_15 = arith.constant 0 : index
    %c0_16 = arith.constant 0 : index
    %20 = vector.load %arg3[%c0_14, %c0_15, %c0_16] : memref<9x128x128xbf16, #tpu.memory_space<vmem>>, vector<1x128x128xbf16>
    %21 = vector.shape_cast %20 : vector<1x128x128xbf16> to vector<128x128xbf16>
    %cst_17 = arith.constant dense<0.000000e+00> : vector<128x128xf32>
    %22 = tpu.matmul %19, %21, %cst_17 {dimension_numbers = #tpu.dot_dimension_numbers<[1], [0], [0], [1], [0, 0, 1, 1], [], []>} : vector<128x128xbf16>, vector<128x128xbf16>, vector<128x128xf32> -> vector<128x128xf32>
    %c0_18 = arith.constant 0 : index
    %c0_19 = arith.constant 0 : index
    %c1 = arith.constant 1 : index
    %c0_20 = arith.constant 0 : index
    %23 = vector.load %arg14[%c0_18, %c0_19, %c1, %c0_20] : memref<2x10x16x128xf32, #tpu.memory_space<vmem>>, vector<2x8x8x128xf32>
    %24 = vector.shape_cast %23 : vector<2x8x8x128xf32> to vector<128x128xf32>
    %25 = arith.truncf %24 : vector<128x128xf32> to vector<128x128xbf16>
    %c1_21 = arith.constant 1 : index
    %c0_22 = arith.constant 0 : index
    %c0_23 = arith.constant 0 : index
    %26 = vector.load %arg3[%c1_21, %c0_22, %c0_23] : memref<9x128x128xbf16, #tpu.memory_space<vmem>>, vector<1x128x128xbf16>
    %27 = vector.shape_cast %26 : vector<1x128x128xbf16> to vector<128x128xbf16>
    %cst_24 = arith.constant dense<0.000000e+00> : vector<128x128xf32>
    %28 = tpu.matmul %25, %27, %cst_24 {dimension_numbers = #tpu.dot_dimension_numbers<[1], [0], [0], [1], [0, 0, 1, 1], [], []>} : vector<128x128xbf16>, vector<128x128xbf16>, vector<128x128xf32> -> vector<128x128xf32>
    %29 = arith.addf %22, %28 : vector<128x128xf32>
    %c0_25 = arith.constant 0 : index
    %c0_26 = arith.constant 0 : index
    %c2 = arith.constant 2 : index
    %c0_27 = arith.constant 0 : index
    %30 = vector.load %arg14[%c0_25, %c0_26, %c2, %c0_27] : memref<2x10x16x128xf32, #tpu.memory_space<vmem>>, vector<2x8x8x128xf32>
    %31 = vector.shape_cast %30 : vector<2x8x8x128xf32> to vector<128x128xf32>
    %32 = arith.truncf %31 : vector<128x128xf32> to vector<128x128xbf16>
    %c2_28 = arith.constant 2 : index
    %c0_29 = arith.constant 0 : index
    %c0_30 = arith.constant 0 : index
    %33 = vector.load %arg3[%c2_28, %c0_29, %c0_30] : memref<9x128x128xbf16, #tpu.memory_space<vmem>>, vector<1x128x128xbf16>
    %34 = vector.shape_cast %33 : vector<1x128x128xbf16> to vector<128x128xbf16>
    %cst_31 = arith.constant dense<0.000000e+00> : vector<128x128xf32>
    %35 = tpu.matmul %32, %34, %cst_31 {dimension_numbers = #tpu.dot_dimension_numbers<[1], [0], [0], [1], [0, 0, 1, 1], [], []>} : vector<128x128xbf16>, vector<128x128xbf16>, vector<128x128xf32> -> vector<128x128xf32>
    %36 = arith.addf %29, %35 : vector<128x128xf32>
    %c0_32 = arith.constant 0 : index
    %c1_33 = arith.constant 1 : index
    %c0_34 = arith.constant 0 : index
    %c0_35 = arith.constant 0 : index
    %37 = vector.load %arg14[%c0_32, %c1_33, %c0_34, %c0_35] : memref<2x10x16x128xf32, #tpu.memory_space<vmem>>, vector<2x8x8x128xf32>
    %38 = vector.shape_cast %37 : vector<2x8x8x128xf32> to vector<128x128xf32>
    %39 = arith.truncf %38 : vector<128x128xf32> to vector<128x128xbf16>
    %c3 = arith.constant 3 : index
    %c0_36 = arith.constant 0 : index
    %c0_37 = arith.constant 0 : index
    %40 = vector.load %arg3[%c3, %c0_36, %c0_37] : memref<9x128x128xbf16, #tpu.memory_space<vmem>>, vector<1x128x128xbf16>
    %41 = vector.shape_cast %40 : vector<1x128x128xbf16> to vector<128x128xbf16>
    %cst_38 = arith.constant dense<0.000000e+00> : vector<128x128xf32>
    %42 = tpu.matmul %39, %41, %cst_38 {dimension_numbers = #tpu.dot_dimension_numbers<[1], [0], [0], [1], [0, 0, 1, 1], [], []>} : vector<128x128xbf16>, vector<128x128xbf16>, vector<128x128xf32> -> vector<128x128xf32>
    %43 = arith.addf %36, %42 : vector<128x128xf32>
    %c0_39 = arith.constant 0 : index
    %c1_40 = arith.constant 1 : index
    %c1_41 = arith.constant 1 : index
    %c0_42 = arith.constant 0 : index
    %44 = vector.load %arg14[%c0_39, %c1_40, %c1_41, %c0_42] : memref<2x10x16x128xf32, #tpu.memory_space<vmem>>, vector<2x8x8x128xf32>
    %45 = vector.shape_cast %44 : vector<2x8x8x128xf32> to vector<128x128xf32>
    %46 = arith.truncf %45 : vector<128x128xf32> to vector<128x128xbf16>
    %c4 = arith.constant 4 : index
    %c0_43 = arith.constant 0 : index
    %c0_44 = arith.constant 0 : index
    %47 = vector.load %arg3[%c4, %c0_43, %c0_44] : memref<9x128x128xbf16, #tpu.memory_space<vmem>>, vector<1x128x128xbf16>
    %48 = vector.shape_cast %47 : vector<1x128x128xbf16> to vector<128x128xbf16>
    %cst_45 = arith.constant dense<0.000000e+00> : vector<128x128xf32>
    %49 = tpu.matmul %46, %48, %cst_45 {dimension_numbers = #tpu.dot_dimension_numbers<[1], [0], [0], [1], [0, 0, 1, 1], [], []>} : vector<128x128xbf16>, vector<128x128xbf16>, vector<128x128xf32> -> vector<128x128xf32>
    %50 = arith.addf %43, %49 : vector<128x128xf32>
    %c0_46 = arith.constant 0 : index
    %c1_47 = arith.constant 1 : index
    %c2_48 = arith.constant 2 : index
    %c0_49 = arith.constant 0 : index
    %51 = vector.load %arg14[%c0_46, %c1_47, %c2_48, %c0_49] : memref<2x10x16x128xf32, #tpu.memory_space<vmem>>, vector<2x8x8x128xf32>
    %52 = vector.shape_cast %51 : vector<2x8x8x128xf32> to vector<128x128xf32>
    %53 = arith.truncf %52 : vector<128x128xf32> to vector<128x128xbf16>
    %c5 = arith.constant 5 : index
    %c0_50 = arith.constant 0 : index
    %c0_51 = arith.constant 0 : index
    %54 = vector.load %arg3[%c5, %c0_50, %c0_51] : memref<9x128x128xbf16, #tpu.memory_space<vmem>>, vector<1x128x128xbf16>
    %55 = vector.shape_cast %54 : vector<1x128x128xbf16> to vector<128x128xbf16>
    %cst_52 = arith.constant dense<0.000000e+00> : vector<128x128xf32>
    %56 = tpu.matmul %53, %55, %cst_52 {dimension_numbers = #tpu.dot_dimension_numbers<[1], [0], [0], [1], [0, 0, 1, 1], [], []>} : vector<128x128xbf16>, vector<128x128xbf16>, vector<128x128xf32> -> vector<128x128xf32>
    %57 = arith.addf %50, %56 : vector<128x128xf32>
    %c0_53 = arith.constant 0 : index
    %c2_54 = arith.constant 2 : index
    %c0_55 = arith.constant 0 : index
    %c0_56 = arith.constant 0 : index
    %58 = vector.load %arg14[%c0_53, %c2_54, %c0_55, %c0_56] : memref<2x10x16x128xf32, #tpu.memory_space<vmem>>, vector<2x8x8x128xf32>
    %59 = vector.shape_cast %58 : vector<2x8x8x128xf32> to vector<128x128xf32>
    %60 = arith.truncf %59 : vector<128x128xf32> to vector<128x128xbf16>
    %c6 = arith.constant 6 : index
    %c0_57 = arith.constant 0 : index
    %c0_58 = arith.constant 0 : index
    %61 = vector.load %arg3[%c6, %c0_57, %c0_58] : memref<9x128x128xbf16, #tpu.memory_space<vmem>>, vector<1x128x128xbf16>
    %62 = vector.shape_cast %61 : vector<1x128x128xbf16> to vector<128x128xbf16>
    %cst_59 = arith.constant dense<0.000000e+00> : vector<128x128xf32>
    %63 = tpu.matmul %60, %62, %cst_59 {dimension_numbers = #tpu.dot_dimension_numbers<[1], [0], [0], [1], [0, 0, 1, 1], [], []>} : vector<128x128xbf16>, vector<128x128xbf16>, vector<128x128xf32> -> vector<128x128xf32>
    %64 = arith.addf %57, %63 : vector<128x128xf32>
    %c0_60 = arith.constant 0 : index
    %c2_61 = arith.constant 2 : index
    %c1_62 = arith.constant 1 : index
    %c0_63 = arith.constant 0 : index
    %65 = vector.load %arg14[%c0_60, %c2_61, %c1_62, %c0_63] : memref<2x10x16x128xf32, #tpu.memory_space<vmem>>, vector<2x8x8x128xf32>
    %66 = vector.shape_cast %65 : vector<2x8x8x128xf32> to vector<128x128xf32>
    %67 = arith.truncf %66 : vector<128x128xf32> to vector<128x128xbf16>
    %c7 = arith.constant 7 : index
    %c0_64 = arith.constant 0 : index
    %c0_65 = arith.constant 0 : index
    %68 = vector.load %arg3[%c7, %c0_64, %c0_65] : memref<9x128x128xbf16, #tpu.memory_space<vmem>>, vector<1x128x128xbf16>
    %69 = vector.shape_cast %68 : vector<1x128x128xbf16> to vector<128x128xbf16>
    %cst_66 = arith.constant dense<0.000000e+00> : vector<128x128xf32>
    %70 = tpu.matmul %67, %69, %cst_66 {dimension_numbers = #tpu.dot_dimension_numbers<[1], [0], [0], [1], [0, 0, 1, 1], [], []>} : vector<128x128xbf16>, vector<128x128xbf16>, vector<128x128xf32> -> vector<128x128xf32>
    %71 = arith.addf %64, %70 : vector<128x128xf32>
    %c0_67 = arith.constant 0 : index
    %c2_68 = arith.constant 2 : index
    %c2_69 = arith.constant 2 : index
    %c0_70 = arith.constant 0 : index
    %72 = vector.load %arg14[%c0_67, %c2_68, %c2_69, %c0_70] : memref<2x10x16x128xf32, #tpu.memory_space<vmem>>, vector<2x8x8x128xf32>
    %73 = vector.shape_cast %72 : vector<2x8x8x128xf32> to vector<128x128xf32>
    %74 = arith.truncf %73 : vector<128x128xf32> to vector<128x128xbf16>
    %c8 = arith.constant 8 : index
    %c0_71 = arith.constant 0 : index
    %c0_72 = arith.constant 0 : index
    %75 = vector.load %arg3[%c8, %c0_71, %c0_72] : memref<9x128x128xbf16, #tpu.memory_space<vmem>>, vector<1x128x128xbf16>
    %76 = vector.shape_cast %75 : vector<1x128x128xbf16> to vector<128x128xbf16>
    %cst_73 = arith.constant dense<0.000000e+00> : vector<128x128xf32>
    %77 = tpu.matmul %74, %76, %cst_73 {dimension_numbers = #tpu.dot_dimension_numbers<[1], [0], [0], [1], [0, 0, 1, 1], [], []>} : vector<128x128xbf16>, vector<128x128xbf16>, vector<128x128xf32> -> vector<128x128xf32>
    %78 = arith.addf %71, %77 : vector<128x128xf32>
    %c0_74 = arith.constant 0 : index
    %c0_75 = arith.constant 0 : index
    %79 = vector.load %arg4[%c0_74, %c0_75] : memref<1x128xf32, #tpu.memory_space<vmem>>, vector<1x128xf32>
    %80 = vector.broadcast %79 : vector<1x128xf32> to vector<128x128xf32>
    %81 = arith.addf %78, %80 : vector<128x128xf32>
    %cst_76 = arith.constant 0.000000e+00 : f32
    %82 = vector.broadcast %cst_76 : f32 to vector<128x128xf32>
    %83 = arith.maximumf %81, %82 : vector<128x128xf32>
    %84 = vector.shape_cast %83 : vector<128x128xf32> to vector<2x8x8x128xf32>
    %c0_77 = arith.constant 0 : index
    %c0_78 = arith.constant 0 : index
    %c0_79 = arith.constant 0 : index
    %c0_80 = arith.constant 0 : index
    %85 = vector.load %arg15[%c0_77, %c0_78, %c0_79, %c0_80] : memref<2x8x8x128xf32, #tpu.memory_space<vmem>>, vector<2x8x8x128xf32>
    tpu.vector_store %arg15[%c0_77, %c0_78, %c0_79, %c0_80], %84 {strides = array<i32>} : memref<2x8x8x128xf32, #tpu.memory_space<vmem>>, vector<2x8x8x128xf32>,
    %c0_81 = arith.constant 0 : index
    %c0_82 = arith.constant 0 : index
    %c0_83 = arith.constant 0 : index
    %c0_84 = arith.constant 0 : index
    %86 = vector.load %arg15[%c0_81, %c0_82, %c0_83, %c0_84] : memref<2x8x8x128xf32, #tpu.memory_space<vmem>>, vector<2x1x1x128xf32>
    %87 = vector.shape_cast %86 : vector<2x1x1x128xf32> to vector<2x128xf32>
    %c0_85 = arith.constant 0 : index
    %c0_86 = arith.constant 0 : index
    %c1_87 = arith.constant 1 : index
    %c0_88 = arith.constant 0 : index
    %88 = vector.load %arg15[%c0_85, %c0_86, %c1_87, %c0_88] : memref<2x8x8x128xf32, #tpu.memory_space<vmem>>, vector<2x1x1x128xf32>
    %89 = vector.shape_cast %88 : vector<2x1x1x128xf32> to vector<2x128xf32>
    %90 = arith.maximumf %87, %89 : vector<2x128xf32>
    %c0_89 = arith.constant 0 : index
    %c1_90 = arith.constant 1 : index
    %c0_91 = arith.constant 0 : index
    %c0_92 = arith.constant 0 : index
    %91 = vector.load %arg15[%c0_89, %c1_90, %c0_91, %c0_92] : memref<2x8x8x128xf32, #tpu.memory_space<vmem>>, vector<2x1x1x128xf32>
    %92 = vector.shape_cast %91 : vector<2x1x1x128xf32> to vector<2x128xf32>
    %c0_93 = arith.constant 0 : index
    %c1_94 = arith.constant 1 : index
    %c1_95 = arith.constant 1 : index
    %c0_96 = arith.constant 0 : index
    %93 = vector.load %arg15[%c0_93, %c1_94, %c1_95, %c0_96] : memref<2x8x8x128xf32, #tpu.memory_space<vmem>>, vector<2x1x1x128xf32>
    %94 = vector.shape_cast %93 : vector<2x1x1x128xf32> to vector<2x128xf32>
    %95 = arith.maximumf %92, %94 : vector<2x128xf32>
    %96 = arith.maximumf %90, %95 : vector<2x128xf32>
    %97 = arith.truncf %96 : vector<2x128xf32> to vector<2x128xbf16>
    %c0_97 = arith.constant 0 : index
    %c0_98 = arith.constant 0 : index
    %c2_99 = arith.constant 2 : index
    %c0_100 = arith.constant 0 : index
    %98 = vector.load %arg15[%c0_97, %c0_98, %c2_99, %c0_100] : memref<2x8x8x128xf32, #tpu.memory_space<vmem>>, vector<2x1x1x128xf32>
    %99 = vector.shape_cast %98 : vector<2x1x1x128xf32> to vector<2x128xf32>
    %c0_101 = arith.constant 0 : index
    %c0_102 = arith.constant 0 : index
    %c3_103 = arith.constant 3 : index
    %c0_104 = arith.constant 0 : index
    %100 = vector.load %arg15[%c0_101, %c0_102, %c3_103, %c0_104] : memref<2x8x8x128xf32, #tpu.memory_space<vmem>>, vector<2x1x1x128xf32>
    %101 = vector.shape_cast %100 : vector<2x1x1x128xf32> to vector<2x128xf32>
    %102 = arith.maximumf %99, %101 : vector<2x128xf32>
    %c0_105 = arith.constant 0 : index
    %c1_106 = arith.constant 1 : index
    %c2_107 = arith.constant 2 : index
    %c0_108 = arith.constant 0 : index
    %103 = vector.load %arg15[%c0_105, %c1_106, %c2_107, %c0_108] : memref<2x8x8x128xf32, #tpu.memory_space<vmem>>, vector<2x1x1x128xf32>
    %104 = vector.shape_cast %103 : vector<2x1x1x128xf32> to vector<2x128xf32>
    %c0_109 = arith.constant 0 : index
    %c1_110 = arith.constant 1 : index
    %c3_111 = arith.constant 3 : index
    %c0_112 = arith.constant 0 : index
    %105 = vector.load %arg15[%c0_109, %c1_110, %c3_111, %c0_112] : memref<2x8x8x128xf32, #tpu.memory_space<vmem>>, vector<2x1x1x128xf32>
    %106 = vector.shape_cast %105 : vector<2x1x1x128xf32> to vector<2x128xf32>
    %107 = arith.maximumf %104, %106 : vector<2x128xf32>
    %108 = arith.maximumf %102, %107 : vector<2x128xf32>
    %109 = arith.truncf %108 : vector<2x128xf32> to vector<2x128xbf16>
    %c0_113 = arith.constant 0 : index
    %c0_114 = arith.constant 0 : index
    %c4_115 = arith.constant 4 : index
    %c0_116 = arith.constant 0 : index
    %110 = vector.load %arg15[%c0_113, %c0_114, %c4_115, %c0_116] : memref<2x8x8x128xf32, #tpu.memory_space<vmem>>, vector<2x1x1x128xf32>
    %111 = vector.shape_cast %110 : vector<2x1x1x128xf32> to vector<2x128xf32>
    %c0_117 = arith.constant 0 : index
    %c0_118 = arith.constant 0 : index
    %c5_119 = arith.constant 5 : index
    %c0_120 = arith.constant 0 : index
    %112 = vector.load %arg15[%c0_117, %c0_118, %c5_119, %c0_120] : memref<2x8x8x128xf32, #tpu.memory_space<vmem>>, vector<2x1x1x128xf32>
    %113 = vector.shape_cast %112 : vector<2x1x1x128xf32> to vector<2x128xf32>
    %114 = arith.maximumf %111, %113 : vector<2x128xf32>
    %c0_121 = arith.constant 0 : index
    %c1_122 = arith.constant 1 : index
    %c4_123 = arith.constant 4 : index
    %c0_124 = arith.constant 0 : index
    %115 = vector.load %arg15[%c0_121, %c1_122, %c4_123, %c0_124] : memref<2x8x8x128xf32, #tpu.memory_space<vmem>>, vector<2x1x1x128xf32>
    %116 = vector.shape_cast %115 : vector<2x1x1x128xf32> to vector<2x128xf32>
    %c0_125 = arith.constant 0 : index
    %c1_126 = arith.constant 1 : index
    %c5_127 = arith.constant 5 : index
    %c0_128 = arith.constant 0 : index
    %117 = vector.load %arg15[%c0_125, %c1_126, %c5_127, %c0_128] : memref<2x8x8x128xf32, #tpu.memory_space<vmem>>, vector<2x1x1x128xf32>
    %118 = vector.shape_cast %117 : vector<2x1x1x128xf32> to vector<2x128xf32>
    %119 = arith.maximumf %116, %118 : vector<2x128xf32>
    %120 = arith.maximumf %114, %119 : vector<2x128xf32>
    %121 = arith.truncf %120 : vector<2x128xf32> to vector<2x128xbf16>
    %c0_129 = arith.constant 0 : index
    %c0_130 = arith.constant 0 : index
    %c6_131 = arith.constant 6 : index
    %c0_132 = arith.constant 0 : index
    %122 = vector.load %arg15[%c0_129, %c0_130, %c6_131, %c0_132] : memref<2x8x8x128xf32, #tpu.memory_space<vmem>>, vector<2x1x1x128xf32>
    %123 = vector.shape_cast %122 : vector<2x1x1x128xf32> to vector<2x128xf32>
    %c0_133 = arith.constant 0 : index
    %c0_134 = arith.constant 0 : index
    %c7_135 = arith.constant 7 : index
    %c0_136 = arith.constant 0 : index
    %124 = vector.load %arg15[%c0_133, %c0_134, %c7_135, %c0_136] : memref<2x8x8x128xf32, #tpu.memory_space<vmem>>, vector<2x1x1x128xf32>
    %125 = vector.shape_cast %124 : vector<2x1x1x128xf32> to vector<2x128xf32>
    %126 = arith.maximumf %123, %125 : vector<2x128xf32>
    %c0_137 = arith.constant 0 : index
    %c1_138 = arith.constant 1 : index
    %c6_139 = arith.constant 6 : index
    %c0_140 = arith.constant 0 : index
    %127 = vector.load %arg15[%c0_137, %c1_138, %c6_139, %c0_140] : memref<2x8x8x128xf32, #tpu.memory_space<vmem>>, vector<2x1x1x128xf32>
    %128 = vector.shape_cast %127 : vector<2x1x1x128xf32> to vector<2x128xf32>
    %c0_141 = arith.constant 0 : index
    %c1_142 = arith.constant 1 : index
    %c7_143 = arith.constant 7 : index
    %c0_144 = arith.constant 0 : index
    %129 = vector.load %arg15[%c0_141, %c1_142, %c7_143, %c0_144] : memref<2x8x8x128xf32, #tpu.memory_space<vmem>>, vector<2x1x1x128xf32>
    %130 = vector.shape_cast %129 : vector<2x1x1x128xf32> to vector<2x128xf32>
    %131 = arith.maximumf %128, %130 : vector<2x128xf32>
    %132 = arith.maximumf %126, %131 : vector<2x128xf32>
    %133 = arith.truncf %132 : vector<2x128xf32> to vector<2x128xbf16>
    %c0_145 = arith.constant 0 : index
    %c2_146 = arith.constant 2 : index
    %c0_147 = arith.constant 0 : index
    %c0_148 = arith.constant 0 : index
    %134 = vector.load %arg15[%c0_145, %c2_146, %c0_147, %c0_148] : memref<2x8x8x128xf32, #tpu.memory_space<vmem>>, vector<2x1x1x128xf32>
    %135 = vector.shape_cast %134 : vector<2x1x1x128xf32> to vector<2x128xf32>
    %c0_149 = arith.constant 0 : index
    %c2_150 = arith.constant 2 : index
    %c1_151 = arith.constant 1 : index
    %c0_152 = arith.constant 0 : index
    %136 = vector.load %arg15[%c0_149, %c2_150, %c1_151, %c0_152] : memref<2x8x8x128xf32, #tpu.memory_space<vmem>>, vector<2x1x1x128xf32>
    %137 = vector.shape_cast %136 : vector<2x1x1x128xf32> to vector<2x128xf32>
    %138 = arith.maximumf %135, %137 : vector<2x128xf32>
    %c0_153 = arith.constant 0 : index
    %c3_154 = arith.constant 3 : index
    %c0_155 = arith.constant 0 : index
    %c0_156 = arith.constant 0 : index
    %139 = vector.load %arg15[%c0_153, %c3_154, %c0_155, %c0_156] : memref<2x8x8x128xf32, #tpu.memory_space<vmem>>, vector<2x1x1x128xf32>
    %140 = vector.shape_cast %139 : vector<2x1x1x128xf32> to vector<2x128xf32>
    %c0_157 = arith.constant 0 : index
    %c3_158 = arith.constant 3 : index
    %c1_159 = arith.constant 1 : index
    %c0_160 = arith.constant 0 : index
    %141 = vector.load %arg15[%c0_157, %c3_158, %c1_159, %c0_160] : memref<2x8x8x128xf32, #tpu.memory_space<vmem>>, vector<2x1x1x128xf32>
    %142 = vector.shape_cast %141 : vector<2x1x1x128xf32> to vector<2x128xf32>
    %143 = arith.maximumf %140, %142 : vector<2x128xf32>
    %144 = arith.maximumf %138, %143 : vector<2x128xf32>
    %145 = arith.truncf %144 : vector<2x128xf32> to vector<2x128xbf16>
    %c0_161 = arith.constant 0 : index
    %c2_162 = arith.constant 2 : index
    %c2_163 = arith.constant 2 : index
    %c0_164 = arith.constant 0 : index
    %146 = vector.load %arg15[%c0_161, %c2_162, %c2_163, %c0_164] : memref<2x8x8x128xf32, #tpu.memory_space<vmem>>, vector<2x1x1x128xf32>
    %147 = vector.shape_cast %146 : vector<2x1x1x128xf32> to vector<2x128xf32>
    %c0_165 = arith.constant 0 : index
    %c2_166 = arith.constant 2 : index
    %c3_167 = arith.constant 3 : index
    %c0_168 = arith.constant 0 : index
    %148 = vector.load %arg15[%c0_165, %c2_166, %c3_167, %c0_168] : memref<2x8x8x128xf32, #tpu.memory_space<vmem>>, vector<2x1x1x128xf32>
    %149 = vector.shape_cast %148 : vector<2x1x1x128xf32> to vector<2x128xf32>
    %150 = arith.maximumf %147, %149 : vector<2x128xf32>
    %c0_169 = arith.constant 0 : index
    %c3_170 = arith.constant 3 : index
    %c2_171 = arith.constant 2 : index
    %c0_172 = arith.constant 0 : index
    %151 = vector.load %arg15[%c0_169, %c3_170, %c2_171, %c0_172] : memref<2x8x8x128xf32, #tpu.memory_space<vmem>>, vector<2x1x1x128xf32>
    %152 = vector.shape_cast %151 : vector<2x1x1x128xf32> to vector<2x128xf32>
    %c0_173 = arith.constant 0 : index
    %c3_174 = arith.constant 3 : index
    %c3_175 = arith.constant 3 : index
    %c0_176 = arith.constant 0 : index
    %153 = vector.load %arg15[%c0_173, %c3_174, %c3_175, %c0_176] : memref<2x8x8x128xf32, #tpu.memory_space<vmem>>, vector<2x1x1x128xf32>
    %154 = vector.shape_cast %153 : vector<2x1x1x128xf32> to vector<2x128xf32>
    %155 = arith.maximumf %152, %154 : vector<2x128xf32>
    %156 = arith.maximumf %150, %155 : vector<2x128xf32>
    %157 = arith.truncf %156 : vector<2x128xf32> to vector<2x128xbf16>
    %c0_177 = arith.constant 0 : index
    %c2_178 = arith.constant 2 : index
    %c4_179 = arith.constant 4 : index
    %c0_180 = arith.constant 0 : index
    %158 = vector.load %arg15[%c0_177, %c2_178, %c4_179, %c0_180] : memref<2x8x8x128xf32, #tpu.memory_space<vmem>>, vector<2x1x1x128xf32>
    %159 = vector.shape_cast %158 : vector<2x1x1x128xf32> to vector<2x128xf32>
    %c0_181 = arith.constant 0 : index
    %c2_182 = arith.constant 2 : index
    %c5_183 = arith.constant 5 : index
    %c0_184 = arith.constant 0 : index
    %160 = vector.load %arg15[%c0_181, %c2_182, %c5_183, %c0_184] : memref<2x8x8x128xf32, #tpu.memory_space<vmem>>, vector<2x1x1x128xf32>
    %161 = vector.shape_cast %160 : vector<2x1x1x128xf32> to vector<2x128xf32>
    %162 = arith.maximumf %159, %161 : vector<2x128xf32>
    %c0_185 = arith.constant 0 : index
    %c3_186 = arith.constant 3 : index
    %c4_187 = arith.constant 4 : index
    %c0_188 = arith.constant 0 : index
    %163 = vector.load %arg15[%c0_185, %c3_186, %c4_187, %c0_188] : memref<2x8x8x128xf32, #tpu.memory_space<vmem>>, vector<2x1x1x128xf32>
    %164 = vector.shape_cast %163 : vector<2x1x1x128xf32> to vector<2x128xf32>
    %c0_189 = arith.constant 0 : index
    %c3_190 = arith.constant 3 : index
    %c5_191 = arith.constant 5 : index
    %c0_192 = arith.constant 0 : index
    %165 = vector.load %arg15[%c0_189, %c3_190, %c5_191, %c0_192] : memref<2x8x8x128xf32, #tpu.memory_space<vmem>>, vector<2x1x1x128xf32>
    %166 = vector.shape_cast %165 : vector<2x1x1x128xf32> to vector<2x128xf32>
    %167 = arith.maximumf %164, %166 : vector<2x128xf32>
    %168 = arith.maximumf %162, %167 : vector<2x128xf32>
    %169 = arith.truncf %168 : vector<2x128xf32> to vector<2x128xbf16>
    %c0_193 = arith.constant 0 : index
    %c2_194 = arith.constant 2 : index
    %c6_195 = arith.constant 6 : index
    %c0_196 = arith.constant 0 : index
    %170 = vector.load %arg15[%c0_193, %c2_194, %c6_195, %c0_196] : memref<2x8x8x128xf32, #tpu.memory_space<vmem>>, vector<2x1x1x128xf32>
    %171 = vector.shape_cast %170 : vector<2x1x1x128xf32> to vector<2x128xf32>
    %c0_197 = arith.constant 0 : index
    %c2_198 = arith.constant 2 : index
    %c7_199 = arith.constant 7 : index
    %c0_200 = arith.constant 0 : index
    %172 = vector.load %arg15[%c0_197, %c2_198, %c7_199, %c0_200] : memref<2x8x8x128xf32, #tpu.memory_space<vmem>>, vector<2x1x1x128xf32>
    %173 = vector.shape_cast %172 : vector<2x1x1x128xf32> to vector<2x128xf32>
    %174 = arith.maximumf %171, %173 : vector<2x128xf32>
    %c0_201 = arith.constant 0 : index
    %c3_202 = arith.constant 3 : index
    %c6_203 = arith.constant 6 : index
    %c0_204 = arith.constant 0 : index
    %175 = vector.load %arg15[%c0_201, %c3_202, %c6_203, %c0_204] : memref<2x8x8x128xf32, #tpu.memory_space<vmem>>, vector<2x1x1x128xf32>
    %176 = vector.shape_cast %175 : vector<2x1x1x128xf32> to vector<2x128xf32>
    %c0_205 = arith.constant 0 : index
    %c3_206 = arith.constant 3 : index
    %c7_207 = arith.constant 7 : index
    %c0_208 = arith.constant 0 : index
    %177 = vector.load %arg15[%c0_205, %c3_206, %c7_207, %c0_208] : memref<2x8x8x128xf32, #tpu.memory_space<vmem>>, vector<2x1x1x128xf32>
    %178 = vector.shape_cast %177 : vector<2x1x1x128xf32> to vector<2x128xf32>
    %179 = arith.maximumf %176, %178 : vector<2x128xf32>
    %180 = arith.maximumf %174, %179 : vector<2x128xf32>
    %181 = arith.truncf %180 : vector<2x128xf32> to vector<2x128xbf16>
    %c0_209 = arith.constant 0 : index
    %c4_210 = arith.constant 4 : index
    %c0_211 = arith.constant 0 : index
    %c0_212 = arith.constant 0 : index
    %182 = vector.load %arg15[%c0_209, %c4_210, %c0_211, %c0_212] : memref<2x8x8x128xf32, #tpu.memory_space<vmem>>, vector<2x1x1x128xf32>
    %183 = vector.shape_cast %182 : vector<2x1x1x128xf32> to vector<2x128xf32>
    %c0_213 = arith.constant 0 : index
    %c4_214 = arith.constant 4 : index
    %c1_215 = arith.constant 1 : index
    %c0_216 = arith.constant 0 : index
    %184 = vector.load %arg15[%c0_213, %c4_214, %c1_215, %c0_216] : memref<2x8x8x128xf32, #tpu.memory_space<vmem>>, vector<2x1x1x128xf32>
    %185 = vector.shape_cast %184 : vector<2x1x1x128xf32> to vector<2x128xf32>
    %186 = arith.maximumf %183, %185 : vector<2x128xf32>
    %c0_217 = arith.constant 0 : index
    %c5_218 = arith.constant 5 : index
    %c0_219 = arith.constant 0 : index
    %c0_220 = arith.constant 0 : index
    %187 = vector.load %arg15[%c0_217, %c5_218, %c0_219, %c0_220] : memref<2x8x8x128xf32, #tpu.memory_space<vmem>>, vector<2x1x1x128xf32>
    %188 = vector.shape_cast %187 : vector<2x1x1x128xf32> to vector<2x128xf32>
    %c0_221 = arith.constant 0 : index
    %c5_222 = arith.constant 5 : index
    %c1_223 = arith.constant 1 : index
    %c0_224 = arith.constant 0 : index
    %189 = vector.load %arg15[%c0_221, %c5_222, %c1_223, %c0_224] : memref<2x8x8x128xf32, #tpu.memory_space<vmem>>, vector<2x1x1x128xf32>
    %190 = vector.shape_cast %189 : vector<2x1x1x128xf32> to vector<2x128xf32>
    %191 = arith.maximumf %188, %190 : vector<2x128xf32>
    %192 = arith.maximumf %186, %191 : vector<2x128xf32>
    %193 = arith.truncf %192 : vector<2x128xf32> to vector<2x128xbf16>
    %c0_225 = arith.constant 0 : index
    %c4_226 = arith.constant 4 : index
    %c2_227 = arith.constant 2 : index
    %c0_228 = arith.constant 0 : index
    %194 = vector.load %arg15[%c0_225, %c4_226, %c2_227, %c0_228] : memref<2x8x8x128xf32, #tpu.memory_space<vmem>>, vector<2x1x1x128xf32>
    %195 = vector.shape_cast %194 : vector<2x1x1x128xf32> to vector<2x128xf32>
    %c0_229 = arith.constant 0 : index
    %c4_230 = arith.constant 4 : index
    %c3_231 = arith.constant 3 : index
    %c0_232 = arith.constant 0 : index
    %196 = vector.load %arg15[%c0_229, %c4_230, %c3_231, %c0_232] : memref<2x8x8x128xf32, #tpu.memory_space<vmem>>, vector<2x1x1x128xf32>
    %197 = vector.shape_cast %196 : vector<2x1x1x128xf32> to vector<2x128xf32>
    %198 = arith.maximumf %195, %197 : vector<2x128xf32>
    %c0_233 = arith.constant 0 : index
    %c5_234 = arith.constant 5 : index
    %c2_235 = arith.constant 2 : index
    %c0_236 = arith.constant 0 : index
    %199 = vector.load %arg15[%c0_233, %c5_234, %c2_235, %c0_236] : memref<2x8x8x128xf32, #tpu.memory_space<vmem>>, vector<2x1x1x128xf32>
    %200 = vector.shape_cast %199 : vector<2x1x1x128xf32> to vector<2x128xf32>
    %c0_237 = arith.constant 0 : index
    %c5_238 = arith.constant 5 : index
    %c3_239 = arith.constant 3 : index
    %c0_240 = arith.constant 0 : index
    %201 = vector.load %arg15[%c0_237, %c5_238, %c3_239, %c0_240] : memref<2x8x8x128xf32, #tpu.memory_space<vmem>>, vector<2x1x1x128xf32>
    %202 = vector.shape_cast %201 : vector<2x1x1x128xf32> to vector<2x128xf32>
    %203 = arith.maximumf %200, %202 : vector<2x128xf32>
    %204 = arith.maximumf %198, %203 : vector<2x128xf32>
    %205 = arith.truncf %204 : vector<2x128xf32> to vector<2x128xbf16>
    %c0_241 = arith.constant 0 : index
    %c4_242 = arith.constant 4 : index
    %c4_243 = arith.constant 4 : index
    %c0_244 = arith.constant 0 : index
    %206 = vector.load %arg15[%c0_241, %c4_242, %c4_243, %c0_244] : memref<2x8x8x128xf32, #tpu.memory_space<vmem>>, vector<2x1x1x128xf32>
    %207 = vector.shape_cast %206 : vector<2x1x1x128xf32> to vector<2x128xf32>
    %c0_245 = arith.constant 0 : index
    %c4_246 = arith.constant 4 : index
    %c5_247 = arith.constant 5 : index
    %c0_248 = arith.constant 0 : index
    %208 = vector.load %arg15[%c0_245, %c4_246, %c5_247, %c0_248] : memref<2x8x8x128xf32, #tpu.memory_space<vmem>>, vector<2x1x1x128xf32>
    %209 = vector.shape_cast %208 : vector<2x1x1x128xf32> to vector<2x128xf32>
    %210 = arith.maximumf %207, %209 : vector<2x128xf32>
    %c0_249 = arith.constant 0 : index
    %c5_250 = arith.constant 5 : index
    %c4_251 = arith.constant 4 : index
    %c0_252 = arith.constant 0 : index
    %211 = vector.load %arg15[%c0_249, %c5_250, %c4_251, %c0_252] : memref<2x8x8x128xf32, #tpu.memory_space<vmem>>, vector<2x1x1x128xf32>
    %212 = vector.shape_cast %211 : vector<2x1x1x128xf32> to vector<2x128xf32>
    %c0_253 = arith.constant 0 : index
    %c5_254 = arith.constant 5 : index
    %c5_255 = arith.constant 5 : index
    %c0_256 = arith.constant 0 : index
    %213 = vector.load %arg15[%c0_253, %c5_254, %c5_255, %c0_256] : memref<2x8x8x128xf32, #tpu.memory_space<vmem>>, vector<2x1x1x128xf32>
    %214 = vector.shape_cast %213 : vector<2x1x1x128xf32> to vector<2x128xf32>
    %215 = arith.maximumf %212, %214 : vector<2x128xf32>
    %216 = arith.maximumf %210, %215 : vector<2x128xf32>
    %217 = arith.truncf %216 : vector<2x128xf32> to vector<2x128xbf16>
    %c0_257 = arith.constant 0 : index
    %c4_258 = arith.constant 4 : index
    %c6_259 = arith.constant 6 : index
    %c0_260 = arith.constant 0 : index
    %218 = vector.load %arg15[%c0_257, %c4_258, %c6_259, %c0_260] : memref<2x8x8x128xf32, #tpu.memory_space<vmem>>, vector<2x1x1x128xf32>
    %219 = vector.shape_cast %218 : vector<2x1x1x128xf32> to vector<2x128xf32>
    %c0_261 = arith.constant 0 : index
    %c4_262 = arith.constant 4 : index
    %c7_263 = arith.constant 7 : index
    %c0_264 = arith.constant 0 : index
    %220 = vector.load %arg15[%c0_261, %c4_262, %c7_263, %c0_264] : memref<2x8x8x128xf32, #tpu.memory_space<vmem>>, vector<2x1x1x128xf32>
    %221 = vector.shape_cast %220 : vector<2x1x1x128xf32> to vector<2x128xf32>
    %222 = arith.maximumf %219, %221 : vector<2x128xf32>
    %c0_265 = arith.constant 0 : index
    %c5_266 = arith.constant 5 : index
    %c6_267 = arith.constant 6 : index
    %c0_268 = arith.constant 0 : index
    %223 = vector.load %arg15[%c0_265, %c5_266, %c6_267, %c0_268] : memref<2x8x8x128xf32, #tpu.memory_space<vmem>>, vector<2x1x1x128xf32>
    %224 = vector.shape_cast %223 : vector<2x1x1x128xf32> to vector<2x128xf32>
    %c0_269 = arith.constant 0 : index
    %c5_270 = arith.constant 5 : index
    %c7_271 = arith.constant 7 : index
    %c0_272 = arith.constant 0 : index
    %225 = vector.load %arg15[%c0_269, %c5_270, %c7_271, %c0_272] : memref<2x8x8x128xf32, #tpu.memory_space<vmem>>, vector<2x1x1x128xf32>
    %226 = vector.shape_cast %225 : vector<2x1x1x128xf32> to vector<2x128xf32>
    %227 = arith.maximumf %224, %226 : vector<2x128xf32>
    %228 = arith.maximumf %222, %227 : vector<2x128xf32>
    %229 = arith.truncf %228 : vector<2x128xf32> to vector<2x128xbf16>
    %c0_273 = arith.constant 0 : index
    %c6_274 = arith.constant 6 : index
    %c0_275 = arith.constant 0 : index
    %c0_276 = arith.constant 0 : index
    %230 = vector.load %arg15[%c0_273, %c6_274, %c0_275, %c0_276] : memref<2x8x8x128xf32, #tpu.memory_space<vmem>>, vector<2x1x1x128xf32>
    %231 = vector.shape_cast %230 : vector<2x1x1x128xf32> to vector<2x128xf32>
    %c0_277 = arith.constant 0 : index
    %c6_278 = arith.constant 6 : index
    %c1_279 = arith.constant 1 : index
    %c0_280 = arith.constant 0 : index
    %232 = vector.load %arg15[%c0_277, %c6_278, %c1_279, %c0_280] : memref<2x8x8x128xf32, #tpu.memory_space<vmem>>, vector<2x1x1x128xf32>
    %233 = vector.shape_cast %232 : vector<2x1x1x128xf32> to vector<2x128xf32>
    %234 = arith.maximumf %231, %233 : vector<2x128xf32>
    %c0_281 = arith.constant 0 : index
    %c7_282 = arith.constant 7 : index
    %c0_283 = arith.constant 0 : index
    %c0_284 = arith.constant 0 : index
    %235 = vector.load %arg15[%c0_281, %c7_282, %c0_283, %c0_284] : memref<2x8x8x128xf32, #tpu.memory_space<vmem>>, vector<2x1x1x128xf32>
    %236 = vector.shape_cast %235 : vector<2x1x1x128xf32> to vector<2x128xf32>
    %c0_285 = arith.constant 0 : index
    %c7_286 = arith.constant 7 : index
    %c1_287 = arith.constant 1 : index
    %c0_288 = arith.constant 0 : index
    %237 = vector.load %arg15[%c0_285, %c7_286, %c1_287, %c0_288] : memref<2x8x8x128xf32, #tpu.memory_space<vmem>>, vector<2x1x1x128xf32>
    %238 = vector.shape_cast %237 : vector<2x1x1x128xf32> to vector<2x128xf32>
    %239 = arith.maximumf %236, %238 : vector<2x128xf32>
    %240 = arith.maximumf %234, %239 : vector<2x128xf32>
    %241 = arith.truncf %240 : vector<2x128xf32> to vector<2x128xbf16>
    %c0_289 = arith.constant 0 : index
    %c6_290 = arith.constant 6 : index
    %c2_291 = arith.constant 2 : index
    %c0_292 = arith.constant 0 : index
    %242 = vector.load %arg15[%c0_289, %c6_290, %c2_291, %c0_292] : memref<2x8x8x128xf32, #tpu.memory_space<vmem>>, vector<2x1x1x128xf32>
    %243 = vector.shape_cast %242 : vector<2x1x1x128xf32> to vector<2x128xf32>
    %c0_293 = arith.constant 0 : index
    %c6_294 = arith.constant 6 : index
    %c3_295 = arith.constant 3 : index
    %c0_296 = arith.constant 0 : index
    %244 = vector.load %arg15[%c0_293, %c6_294, %c3_295, %c0_296] : memref<2x8x8x128xf32, #tpu.memory_space<vmem>>, vector<2x1x1x128xf32>
    %245 = vector.shape_cast %244 : vector<2x1x1x128xf32> to vector<2x128xf32>
    %246 = arith.maximumf %243, %245 : vector<2x128xf32>
    %c0_297 = arith.constant 0 : index
    %c7_298 = arith.constant 7 : index
    %c2_299 = arith.constant 2 : index
    %c0_300 = arith.constant 0 : index
    %247 = vector.load %arg15[%c0_297, %c7_298, %c2_299, %c0_300] : memref<2x8x8x128xf32, #tpu.memory_space<vmem>>, vector<2x1x1x128xf32>
    %248 = vector.shape_cast %247 : vector<2x1x1x128xf32> to vector<2x128xf32>
    %c0_301 = arith.constant 0 : index
    %c7_302 = arith.constant 7 : index
    %c3_303 = arith.constant 3 : index
    %c0_304 = arith.constant 0 : index
    %249 = vector.load %arg15[%c0_301, %c7_302, %c3_303, %c0_304] : memref<2x8x8x128xf32, #tpu.memory_space<vmem>>, vector<2x1x1x128xf32>
    %250 = vector.shape_cast %249 : vector<2x1x1x128xf32> to vector<2x128xf32>
    %251 = arith.maximumf %248, %250 : vector<2x128xf32>
    %252 = arith.maximumf %246, %251 : vector<2x128xf32>
    %253 = arith.truncf %252 : vector<2x128xf32> to vector<2x128xbf16>
    %c0_305 = arith.constant 0 : index
    %c6_306 = arith.constant 6 : index
    %c4_307 = arith.constant 4 : index
    %c0_308 = arith.constant 0 : index
    %254 = vector.load %arg15[%c0_305, %c6_306, %c4_307, %c0_308] : memref<2x8x8x128xf32, #tpu.memory_space<vmem>>, vector<2x1x1x128xf32>
    %255 = vector.shape_cast %254 : vector<2x1x1x128xf32> to vector<2x128xf32>
    %c0_309 = arith.constant 0 : index
    %c6_310 = arith.constant 6 : index
    %c5_311 = arith.constant 5 : index
    %c0_312 = arith.constant 0 : index
    %256 = vector.load %arg15[%c0_309, %c6_310, %c5_311, %c0_312] : memref<2x8x8x128xf32, #tpu.memory_space<vmem>>, vector<2x1x1x128xf32>
    %257 = vector.shape_cast %256 : vector<2x1x1x128xf32> to vector<2x128xf32>
    %258 = arith.maximumf %255, %257 : vector<2x128xf32>
    %c0_313 = arith.constant 0 : index
    %c7_314 = arith.constant 7 : index
    %c4_315 = arith.constant 4 : index
    %c0_316 = arith.constant 0 : index
    %259 = vector.load %arg15[%c0_313, %c7_314, %c4_315, %c0_316] : memref<2x8x8x128xf32, #tpu.memory_space<vmem>>, vector<2x1x1x128xf32>
    %260 = vector.shape_cast %259 : vector<2x1x1x128xf32> to vector<2x128xf32>
    %c0_317 = arith.constant 0 : index
    %c7_318 = arith.constant 7 : index
    %c5_319 = arith.constant 5 : index
    %c0_320 = arith.constant 0 : index
    %261 = vector.load %arg15[%c0_317, %c7_318, %c5_319, %c0_320] : memref<2x8x8x128xf32, #tpu.memory_space<vmem>>, vector<2x1x1x128xf32>
    %262 = vector.shape_cast %261 : vector<2x1x1x128xf32> to vector<2x128xf32>
    %263 = arith.maximumf %260, %262 : vector<2x128xf32>
    %264 = arith.maximumf %258, %263 : vector<2x128xf32>
    %265 = arith.truncf %264 : vector<2x128xf32> to vector<2x128xbf16>
    %c0_321 = arith.constant 0 : index
    %c6_322 = arith.constant 6 : index
    %c6_323 = arith.constant 6 : index
    %c0_324 = arith.constant 0 : index
    %266 = vector.load %arg15[%c0_321, %c6_322, %c6_323, %c0_324] : memref<2x8x8x128xf32, #tpu.memory_space<vmem>>, vector<2x1x1x128xf32>
    %267 = vector.shape_cast %266 : vector<2x1x1x128xf32> to vector<2x128xf32>
    %c0_325 = arith.constant 0 : index
    %c6_326 = arith.constant 6 : index
    %c7_327 = arith.constant 7 : index
    %c0_328 = arith.constant 0 : index
    %268 = vector.load %arg15[%c0_325, %c6_326, %c7_327, %c0_328] : memref<2x8x8x128xf32, #tpu.memory_space<vmem>>, vector<2x1x1x128xf32>
    %269 = vector.shape_cast %268 : vector<2x1x1x128xf32> to vector<2x128xf32>
    %270 = arith.maximumf %267, %269 : vector<2x128xf32>
    %c0_329 = arith.constant 0 : index
    %c7_330 = arith.constant 7 : index
    %c6_331 = arith.constant 6 : index
    %c0_332 = arith.constant 0 : index
    %271 = vector.load %arg15[%c0_329, %c7_330, %c6_331, %c0_332] : memref<2x8x8x128xf32, #tpu.memory_space<vmem>>, vector<2x1x1x128xf32>
    %272 = vector.shape_cast %271 : vector<2x1x1x128xf32> to vector<2x128xf32>
    %c0_333 = arith.constant 0 : index
    %c7_334 = arith.constant 7 : index
    %c7_335 = arith.constant 7 : index
    %c0_336 = arith.constant 0 : index
    %273 = vector.load %arg15[%c0_333, %c7_334, %c7_335, %c0_336] : memref<2x8x8x128xf32, #tpu.memory_space<vmem>>, vector<2x1x1x128xf32>
    %274 = vector.shape_cast %273 : vector<2x1x1x128xf32> to vector<2x128xf32>
    %275 = arith.maximumf %272, %274 : vector<2x128xf32>
    %276 = arith.maximumf %270, %275 : vector<2x128xf32>
    %277 = arith.truncf %276 : vector<2x128xf32> to vector<2x128xbf16>
    %c0_337 = arith.constant 0 : index
    %c0_338 = arith.constant 0 : index
    %c0_339 = arith.constant 0 : index
    %278 = vector.load %arg5[%c0_337, %c0_338, %c0_339] : memref<9x128x256xbf16, #tpu.memory_space<vmem>>, vector<1x128x256xbf16>
    %279 = vector.shape_cast %278 : vector<1x128x256xbf16> to vector<128x256xbf16>
    %cst_340 = arith.constant dense<0.000000e+00> : vector<2x256xf32>
    %280 = tpu.matmul %97, %279, %cst_340 {dimension_numbers = #tpu.dot_dimension_numbers<[1], [0], [0], [1], [0, 0, 1, 1], [], []>} : vector<2x128xbf16>, vector<128x256xbf16>, vector<2x256xf32> -> vector<2x256xf32>
    %c1_341 = arith.constant 1 : index
    %c0_342 = arith.constant 0 : index
    %c0_343 = arith.constant 0 : index
    %281 = vector.load %arg5[%c1_341, %c0_342, %c0_343] : memref<9x128x256xbf16, #tpu.memory_space<vmem>>, vector<1x128x256xbf16>
    %282 = vector.shape_cast %281 : vector<1x128x256xbf16> to vector<128x256xbf16>
    %cst_344 = arith.constant dense<0.000000e+00> : vector<2x256xf32>
    %283 = tpu.matmul %109, %282, %cst_344 {dimension_numbers = #tpu.dot_dimension_numbers<[1], [0], [0], [1], [0, 0, 1, 1], [], []>} : vector<2x128xbf16>, vector<128x256xbf16>, vector<2x256xf32> -> vector<2x256xf32>
    %284 = arith.addf %280, %283 : vector<2x256xf32>
    %c2_345 = arith.constant 2 : index
    %c0_346 = arith.constant 0 : index
    %c0_347 = arith.constant 0 : index
    %285 = vector.load %arg5[%c2_345, %c0_346, %c0_347] : memref<9x128x256xbf16, #tpu.memory_space<vmem>>, vector<1x128x256xbf16>
    %286 = vector.shape_cast %285 : vector<1x128x256xbf16> to vector<128x256xbf16>
    %cst_348 = arith.constant dense<0.000000e+00> : vector<2x256xf32>
    %287 = tpu.matmul %121, %286, %cst_348 {dimension_numbers = #tpu.dot_dimension_numbers<[1], [0], [0], [1], [0, 0, 1, 1], [], []>} : vector<2x128xbf16>, vector<128x256xbf16>, vector<2x256xf32> -> vector<2x256xf32>
    %288 = arith.addf %284, %287 : vector<2x256xf32>
    %c3_349 = arith.constant 3 : index
    %c0_350 = arith.constant 0 : index
    %c0_351 = arith.constant 0 : index
    %289 = vector.load %arg5[%c3_349, %c0_350, %c0_351] : memref<9x128x256xbf16, #tpu.memory_space<vmem>>, vector<1x128x256xbf16>
    %290 = vector.shape_cast %289 : vector<1x128x256xbf16> to vector<128x256xbf16>
    %cst_352 = arith.constant dense<0.000000e+00> : vector<2x256xf32>
    %291 = tpu.matmul %145, %290, %cst_352 {dimension_numbers = #tpu.dot_dimension_numbers<[1], [0], [0], [1], [0, 0, 1, 1], [], []>} : vector<2x128xbf16>, vector<128x256xbf16>, vector<2x256xf32> -> vector<2x256xf32>
    %292 = arith.addf %288, %291 : vector<2x256xf32>
    %c4_353 = arith.constant 4 : index
    %c0_354 = arith.constant 0 : index
    %c0_355 = arith.constant 0 : index
    %293 = vector.load %arg5[%c4_353, %c0_354, %c0_355] : memref<9x128x256xbf16, #tpu.memory_space<vmem>>, vector<1x128x256xbf16>
    %294 = vector.shape_cast %293 : vector<1x128x256xbf16> to vector<128x256xbf16>
    %cst_356 = arith.constant dense<0.000000e+00> : vector<2x256xf32>
    %295 = tpu.matmul %157, %294, %cst_356 {dimension_numbers = #tpu.dot_dimension_numbers<[1], [0], [0], [1], [0, 0, 1, 1], [], []>} : vector<2x128xbf16>, vector<128x256xbf16>, vector<2x256xf32> -> vector<2x256xf32>
    %296 = arith.addf %292, %295 : vector<2x256xf32>
    %c5_357 = arith.constant 5 : index
    %c0_358 = arith.constant 0 : index
    %c0_359 = arith.constant 0 : index
    %297 = vector.load %arg5[%c5_357, %c0_358, %c0_359] : memref<9x128x256xbf16, #tpu.memory_space<vmem>>, vector<1x128x256xbf16>
    %298 = vector.shape_cast %297 : vector<1x128x256xbf16> to vector<128x256xbf16>
    %cst_360 = arith.constant dense<0.000000e+00> : vector<2x256xf32>
    %299 = tpu.matmul %169, %298, %cst_360 {dimension_numbers = #tpu.dot_dimension_numbers<[1], [0], [0], [1], [0, 0, 1, 1], [], []>} : vector<2x128xbf16>, vector<128x256xbf16>, vector<2x256xf32> -> vector<2x256xf32>
    %300 = arith.addf %296, %299 : vector<2x256xf32>
    %c6_361 = arith.constant 6 : index
    %c0_362 = arith.constant 0 : index
    %c0_363 = arith.constant 0 : index
    %301 = vector.load %arg5[%c6_361, %c0_362, %c0_363] : memref<9x128x256xbf16, #tpu.memory_space<vmem>>, vector<1x128x256xbf16>
    %302 = vector.shape_cast %301 : vector<1x128x256xbf16> to vector<128x256xbf16>
    %cst_364 = arith.constant dense<0.000000e+00> : vector<2x256xf32>
    %303 = tpu.matmul %193, %302, %cst_364 {dimension_numbers = #tpu.dot_dimension_numbers<[1], [0], [0], [1], [0, 0, 1, 1], [], []>} : vector<2x128xbf16>, vector<128x256xbf16>, vector<2x256xf32> -> vector<2x256xf32>
    %304 = arith.addf %300, %303 : vector<2x256xf32>
    %c7_365 = arith.constant 7 : index
    %c0_366 = arith.constant 0 : index
    %c0_367 = arith.constant 0 : index
    %305 = vector.load %arg5[%c7_365, %c0_366, %c0_367] : memref<9x128x256xbf16, #tpu.memory_space<vmem>>, vector<1x128x256xbf16>
    %306 = vector.shape_cast %305 : vector<1x128x256xbf16> to vector<128x256xbf16>
    %cst_368 = arith.constant dense<0.000000e+00> : vector<2x256xf32>
    %307 = tpu.matmul %205, %306, %cst_368 {dimension_numbers = #tpu.dot_dimension_numbers<[1], [0], [0], [1], [0, 0, 1, 1], [], []>} : vector<2x128xbf16>, vector<128x256xbf16>, vector<2x256xf32> -> vector<2x256xf32>
    %308 = arith.addf %304, %307 : vector<2x256xf32>
    %c8_369 = arith.constant 8 : index
    %c0_370 = arith.constant 0 : index
    %c0_371 = arith.constant 0 : index
    %309 = vector.load %arg5[%c8_369, %c0_370, %c0_371] : memref<9x128x256xbf16, #tpu.memory_space<vmem>>, vector<1x128x256xbf16>
    %310 = vector.shape_cast %309 : vector<1x128x256xbf16> to vector<128x256xbf16>
    %cst_372 = arith.constant dense<0.000000e+00> : vector<2x256xf32>
    %311 = tpu.matmul %217, %310, %cst_372 {dimension_numbers = #tpu.dot_dimension_numbers<[1], [0], [0], [1], [0, 0, 1, 1], [], []>} : vector<2x128xbf16>, vector<128x256xbf16>, vector<2x256xf32> -> vector<2x256xf32>
    %312 = arith.addf %308, %311 : vector<2x256xf32>
    %c0_373 = arith.constant 0 : index
    %c0_374 = arith.constant 0 : index
    %c0_375 = arith.constant 0 : index
    %313 = vector.load %arg5[%c0_373, %c0_374, %c0_375] : memref<9x128x256xbf16, #tpu.memory_space<vmem>>, vector<1x128x256xbf16>
    %314 = vector.shape_cast %313 : vector<1x128x256xbf16> to vector<128x256xbf16>
    %cst_376 = arith.constant dense<0.000000e+00> : vector<2x256xf32>
    %315 = tpu.matmul %109, %314, %cst_376 {dimension_numbers = #tpu.dot_dimension_numbers<[1], [0], [0], [1], [0, 0, 1, 1], [], []>} : vector<2x128xbf16>, vector<128x256xbf16>, vector<2x256xf32> -> vector<2x256xf32>
    %c1_377 = arith.constant 1 : index
    %c0_378 = arith.constant 0 : index
    %c0_379 = arith.constant 0 : index
    %316 = vector.load %arg5[%c1_377, %c0_378, %c0_379] : memref<9x128x256xbf16, #tpu.memory_space<vmem>>, vector<1x128x256xbf16>
    %317 = vector.shape_cast %316 : vector<1x128x256xbf16> to vector<128x256xbf16>
    %cst_380 = arith.constant dense<0.000000e+00> : vector<2x256xf32>
    %318 = tpu.matmul %121, %317, %cst_380 {dimension_numbers = #tpu.dot_dimension_numbers<[1], [0], [0], [1], [0, 0, 1, 1], [], []>} : vector<2x128xbf16>, vector<128x256xbf16>, vector<2x256xf32> -> vector<2x256xf32>
    %319 = arith.addf %315, %318 : vector<2x256xf32>
    %c2_381 = arith.constant 2 : index
    %c0_382 = arith.constant 0 : index
    %c0_383 = arith.constant 0 : index
    %320 = vector.load %arg5[%c2_381, %c0_382, %c0_383] : memref<9x128x256xbf16, #tpu.memory_space<vmem>>, vector<1x128x256xbf16>
    %321 = vector.shape_cast %320 : vector<1x128x256xbf16> to vector<128x256xbf16>
    %cst_384 = arith.constant dense<0.000000e+00> : vector<2x256xf32>
    %322 = tpu.matmul %133, %321, %cst_384 {dimension_numbers = #tpu.dot_dimension_numbers<[1], [0], [0], [1], [0, 0, 1, 1], [], []>} : vector<2x128xbf16>, vector<128x256xbf16>, vector<2x256xf32> -> vector<2x256xf32>
    %323 = arith.addf %319, %322 : vector<2x256xf32>
    %c3_385 = arith.constant 3 : index
    %c0_386 = arith.constant 0 : index
    %c0_387 = arith.constant 0 : index
    %324 = vector.load %arg5[%c3_385, %c0_386, %c0_387] : memref<9x128x256xbf16, #tpu.memory_space<vmem>>, vector<1x128x256xbf16>
    %325 = vector.shape_cast %324 : vector<1x128x256xbf16> to vector<128x256xbf16>
    %cst_388 = arith.constant dense<0.000000e+00> : vector<2x256xf32>
    %326 = tpu.matmul %157, %325, %cst_388 {dimension_numbers = #tpu.dot_dimension_numbers<[1], [0], [0], [1], [0, 0, 1, 1], [], []>} : vector<2x128xbf16>, vector<128x256xbf16>, vector<2x256xf32> -> vector<2x256xf32>
    %327 = arith.addf %323, %326 : vector<2x256xf32>
    %c4_389 = arith.constant 4 : index
    %c0_390 = arith.constant 0 : index
    %c0_391 = arith.constant 0 : index
    %328 = vector.load %arg5[%c4_389, %c0_390, %c0_391] : memref<9x128x256xbf16, #tpu.memory_space<vmem>>, vector<1x128x256xbf16>
    %329 = vector.shape_cast %328 : vector<1x128x256xbf16> to vector<128x256xbf16>
    %cst_392 = arith.constant dense<0.000000e+00> : vector<2x256xf32>
    %330 = tpu.matmul %169, %329, %cst_392 {dimension_numbers = #tpu.dot_dimension_numbers<[1], [0], [0], [1], [0, 0, 1, 1], [], []>} : vector<2x128xbf16>, vector<128x256xbf16>, vector<2x256xf32> -> vector<2x256xf32>
    %331 = arith.addf %327, %330 : vector<2x256xf32>
    %c5_393 = arith.constant 5 : index
    %c0_394 = arith.constant 0 : index
    %c0_395 = arith.constant 0 : index
    %332 = vector.load %arg5[%c5_393, %c0_394, %c0_395] : memref<9x128x256xbf16, #tpu.memory_space<vmem>>, vector<1x128x256xbf16>
    %333 = vector.shape_cast %332 : vector<1x128x256xbf16> to vector<128x256xbf16>
    %cst_396 = arith.constant dense<0.000000e+00> : vector<2x256xf32>
    %334 = tpu.matmul %181, %333, %cst_396 {dimension_numbers = #tpu.dot_dimension_numbers<[1], [0], [0], [1], [0, 0, 1, 1], [], []>} : vector<2x128xbf16>, vector<128x256xbf16>, vector<2x256xf32> -> vector<2x256xf32>
    %335 = arith.addf %331, %334 : vector<2x256xf32>
    %c6_397 = arith.constant 6 : index
    %c0_398 = arith.constant 0 : index
    %c0_399 = arith.constant 0 : index
    %336 = vector.load %arg5[%c6_397, %c0_398, %c0_399] : memref<9x128x256xbf16, #tpu.memory_space<vmem>>, vector<1x128x256xbf16>
    %337 = vector.shape_cast %336 : vector<1x128x256xbf16> to vector<128x256xbf16>
    %cst_400 = arith.constant dense<0.000000e+00> : vector<2x256xf32>
    %338 = tpu.matmul %205, %337, %cst_400 {dimension_numbers = #tpu.dot_dimension_numbers<[1], [0], [0], [1], [0, 0, 1, 1], [], []>} : vector<2x128xbf16>, vector<128x256xbf16>, vector<2x256xf32> -> vector<2x256xf32>
    %339 = arith.addf %335, %338 : vector<2x256xf32>
    %c7_401 = arith.constant 7 : index
    %c0_402 = arith.constant 0 : index
    %c0_403 = arith.constant 0 : index
    %340 = vector.load %arg5[%c7_401, %c0_402, %c0_403] : memref<9x128x256xbf16, #tpu.memory_space<vmem>>, vector<1x128x256xbf16>
    %341 = vector.shape_cast %340 : vector<1x128x256xbf16> to vector<128x256xbf16>
    %cst_404 = arith.constant dense<0.000000e+00> : vector<2x256xf32>
    %342 = tpu.matmul %217, %341, %cst_404 {dimension_numbers = #tpu.dot_dimension_numbers<[1], [0], [0], [1], [0, 0, 1, 1], [], []>} : vector<2x128xbf16>, vector<128x256xbf16>, vector<2x256xf32> -> vector<2x256xf32>
    %343 = arith.addf %339, %342 : vector<2x256xf32>
    %c8_405 = arith.constant 8 : index
    %c0_406 = arith.constant 0 : index
    %c0_407 = arith.constant 0 : index
    %344 = vector.load %arg5[%c8_405, %c0_406, %c0_407] : memref<9x128x256xbf16, #tpu.memory_space<vmem>>, vector<1x128x256xbf16>
    %345 = vector.shape_cast %344 : vector<1x128x256xbf16> to vector<128x256xbf16>
    %cst_408 = arith.constant dense<0.000000e+00> : vector<2x256xf32>
    %346 = tpu.matmul %229, %345, %cst_408 {dimension_numbers = #tpu.dot_dimension_numbers<[1], [0], [0], [1], [0, 0, 1, 1], [], []>} : vector<2x128xbf16>, vector<128x256xbf16>, vector<2x256xf32> -> vector<2x256xf32>
    %347 = arith.addf %343, %346 : vector<2x256xf32>
    %c0_409 = arith.constant 0 : index
    %c0_410 = arith.constant 0 : index
    %c0_411 = arith.constant 0 : index
    %348 = vector.load %arg5[%c0_409, %c0_410, %c0_411] : memref<9x128x256xbf16, #tpu.memory_space<vmem>>, vector<1x128x256xbf16>
    %349 = vector.shape_cast %348 : vector<1x128x256xbf16> to vector<128x256xbf16>
    %cst_412 = arith.constant dense<0.000000e+00> : vector<2x256xf32>
    %350 = tpu.matmul %145, %349, %cst_412 {dimension_numbers = #tpu.dot_dimension_numbers<[1], [0], [0], [1], [0, 0, 1, 1], [], []>} : vector<2x128xbf16>, vector<128x256xbf16>, vector<2x256xf32> -> vector<2x256xf32>
    %c1_413 = arith.constant 1 : index
    %c0_414 = arith.constant 0 : index
    %c0_415 = arith.constant 0 : index
    %351 = vector.load %arg5[%c1_413, %c0_414, %c0_415] : memref<9x128x256xbf16, #tpu.memory_space<vmem>>, vector<1x128x256xbf16>
    %352 = vector.shape_cast %351 : vector<1x128x256xbf16> to vector<128x256xbf16>
    %cst_416 = arith.constant dense<0.000000e+00> : vector<2x256xf32>
    %353 = tpu.matmul %157, %352, %cst_416 {dimension_numbers = #tpu.dot_dimension_numbers<[1], [0], [0], [1], [0, 0, 1, 1], [], []>} : vector<2x128xbf16>, vector<128x256xbf16>, vector<2x256xf32> -> vector<2x256xf32>
    %354 = arith.addf %350, %353 : vector<2x256xf32>
    %c2_417 = arith.constant 2 : index
    %c0_418 = arith.constant 0 : index
    %c0_419 = arith.constant 0 : index
    %355 = vector.load %arg5[%c2_417, %c0_418, %c0_419] : memref<9x128x256xbf16, #tpu.memory_space<vmem>>, vector<1x128x256xbf16>
    %356 = vector.shape_cast %355 : vector<1x128x256xbf16> to vector<128x256xbf16>
    %cst_420 = arith.constant dense<0.000000e+00> : vector<2x256xf32>
    %357 = tpu.matmul %169, %356, %cst_420 {dimension_numbers = #tpu.dot_dimension_numbers<[1], [0], [0], [1], [0, 0, 1, 1], [], []>} : vector<2x128xbf16>, vector<128x256xbf16>, vector<2x256xf32> -> vector<2x256xf32>
    %358 = arith.addf %354, %357 : vector<2x256xf32>
    %c3_421 = arith.constant 3 : index
    %c0_422 = arith.constant 0 : index
    %c0_423 = arith.constant 0 : index
    %359 = vector.load %arg5[%c3_421, %c0_422, %c0_423] : memref<9x128x256xbf16, #tpu.memory_space<vmem>>, vector<1x128x256xbf16>
    %360 = vector.shape_cast %359 : vector<1x128x256xbf16> to vector<128x256xbf16>
    %cst_424 = arith.constant dense<0.000000e+00> : vector<2x256xf32>
    %361 = tpu.matmul %193, %360, %cst_424 {dimension_numbers = #tpu.dot_dimension_numbers<[1], [0], [0], [1], [0, 0, 1, 1], [], []>} : vector<2x128xbf16>, vector<128x256xbf16>, vector<2x256xf32> -> vector<2x256xf32>
    %362 = arith.addf %358, %361 : vector<2x256xf32>
    %c4_425 = arith.constant 4 : index
    %c0_426 = arith.constant 0 : index
    %c0_427 = arith.constant 0 : index
    %363 = vector.load %arg5[%c4_425, %c0_426, %c0_427] : memref<9x128x256xbf16, #tpu.memory_space<vmem>>, vector<1x128x256xbf16>
    %364 = vector.shape_cast %363 : vector<1x128x256xbf16> to vector<128x256xbf16>
    %cst_428 = arith.constant dense<0.000000e+00> : vector<2x256xf32>
    %365 = tpu.matmul %205, %364, %cst_428 {dimension_numbers = #tpu.dot_dimension_numbers<[1], [0], [0], [1], [0, 0, 1, 1], [], []>} : vector<2x128xbf16>, vector<128x256xbf16>, vector<2x256xf32> -> vector<2x256xf32>
    %366 = arith.addf %362, %365 : vector<2x256xf32>
    %c5_429 = arith.constant 5 : index
    %c0_430 = arith.constant 0 : index
    %c0_431 = arith.constant 0 : index
    %367 = vector.load %arg5[%c5_429, %c0_430, %c0_431] : memref<9x128x256xbf16, #tpu.memory_space<vmem>>, vector<1x128x256xbf16>
    %368 = vector.shape_cast %367 : vector<1x128x256xbf16> to vector<128x256xbf16>
    %cst_432 = arith.constant dense<0.000000e+00> : vector<2x256xf32>
    %369 = tpu.matmul %217, %368, %cst_432 {dimension_numbers = #tpu.dot_dimension_numbers<[1], [0], [0], [1], [0, 0, 1, 1], [], []>} : vector<2x128xbf16>, vector<128x256xbf16>, vector<2x256xf32> -> vector<2x256xf32>
    %370 = arith.addf %366, %369 : vector<2x256xf32>
    %c6_433 = arith.constant 6 : index
    %c0_434 = arith.constant 0 : index
    %c0_435 = arith.constant 0 : index
    %371 = vector.load %arg5[%c6_433, %c0_434, %c0_435] : memref<9x128x256xbf16, #tpu.memory_space<vmem>>, vector<1x128x256xbf16>
    %372 = vector.shape_cast %371 : vector<1x128x256xbf16> to vector<128x256xbf16>
    %cst_436 = arith.constant dense<0.000000e+00> : vector<2x256xf32>
    %373 = tpu.matmul %241, %372, %cst_436 {dimension_numbers = #tpu.dot_dimension_numbers<[1], [0], [0], [1], [0, 0, 1, 1], [], []>} : vector<2x128xbf16>, vector<128x256xbf16>, vector<2x256xf32> -> vector<2x256xf32>
    %374 = arith.addf %370, %373 : vector<2x256xf32>
    %c7_437 = arith.constant 7 : index
    %c0_438 = arith.constant 0 : index
    %c0_439 = arith.constant 0 : index
    %375 = vector.load %arg5[%c7_437, %c0_438, %c0_439] : memref<9x128x256xbf16, #tpu.memory_space<vmem>>, vector<1x128x256xbf16>
    %376 = vector.shape_cast %375 : vector<1x128x256xbf16> to vector<128x256xbf16>
    %cst_440 = arith.constant dense<0.000000e+00> : vector<2x256xf32>
    %377 = tpu.matmul %253, %376, %cst_440 {dimension_numbers = #tpu.dot_dimension_numbers<[1], [0], [0], [1], [0, 0, 1, 1], [], []>} : vector<2x128xbf16>, vector<128x256xbf16>, vector<2x256xf32> -> vector<2x256xf32>
    %378 = arith.addf %374, %377 : vector<2x256xf32>
    %c8_441 = arith.constant 8 : index
    %c0_442 = arith.constant 0 : index
    %c0_443 = arith.constant 0 : index
    %379 = vector.load %arg5[%c8_441, %c0_442, %c0_443] : memref<9x128x256xbf16, #tpu.memory_space<vmem>>, vector<1x128x256xbf16>
    %380 = vector.shape_cast %379 : vector<1x128x256xbf16> to vector<128x256xbf16>
    %cst_444 = arith.constant dense<0.000000e+00> : vector<2x256xf32>
    %381 = tpu.matmul %265, %380, %cst_444 {dimension_numbers = #tpu.dot_dimension_numbers<[1], [0], [0], [1], [0, 0, 1, 1], [], []>} : vector<2x128xbf16>, vector<128x256xbf16>, vector<2x256xf32> -> vector<2x256xf32>
    %382 = arith.addf %378, %381 : vector<2x256xf32>
    %c0_445 = arith.constant 0 : index
    %c0_446 = arith.constant 0 : index
    %c0_447 = arith.constant 0 : index
    %383 = vector.load %arg5[%c0_445, %c0_446, %c0_447] : memref<9x128x256xbf16, #tpu.memory_space<vmem>>, vector<1x128x256xbf16>
    %384 = vector.shape_cast %383 : vector<1x128x256xbf16> to vector<128x256xbf16>
    %cst_448 = arith.constant dense<0.000000e+00> : vector<2x256xf32>
    %385 = tpu.matmul %157, %384, %cst_448 {dimension_numbers = #tpu.dot_dimension_numbers<[1], [0], [0], [1], [0, 0, 1, 1], [], []>} : vector<2x128xbf16>, vector<128x256xbf16>, vector<2x256xf32> -> vector<2x256xf32>
    %c1_449 = arith.constant 1 : index
    %c0_450 = arith.constant 0 : index
    %c0_451 = arith.constant 0 : index
    %386 = vector.load %arg5[%c1_449, %c0_450, %c0_451] : memref<9x128x256xbf16, #tpu.memory_space<vmem>>, vector<1x128x256xbf16>
    %387 = vector.shape_cast %386 : vector<1x128x256xbf16> to vector<128x256xbf16>
    %cst_452 = arith.constant dense<0.000000e+00> : vector<2x256xf32>
    %388 = tpu.matmul %169, %387, %cst_452 {dimension_numbers = #tpu.dot_dimension_numbers<[1], [0], [0], [1], [0, 0, 1, 1], [], []>} : vector<2x128xbf16>, vector<128x256xbf16>, vector<2x256xf32> -> vector<2x256xf32>
    %389 = arith.addf %385, %388 : vector<2x256xf32>
    %c2_453 = arith.constant 2 : index
    %c0_454 = arith.constant 0 : index
    %c0_455 = arith.constant 0 : index
    %390 = vector.load %arg5[%c2_453, %c0_454, %c0_455] : memref<9x128x256xbf16, #tpu.memory_space<vmem>>, vector<1x128x256xbf16>
    %391 = vector.shape_cast %390 : vector<1x128x256xbf16> to vector<128x256xbf16>
    %cst_456 = arith.constant dense<0.000000e+00> : vector<2x256xf32>
    %392 = tpu.matmul %181, %391, %cst_456 {dimension_numbers = #tpu.dot_dimension_numbers<[1], [0], [0], [1], [0, 0, 1, 1], [], []>} : vector<2x128xbf16>, vector<128x256xbf16>, vector<2x256xf32> -> vector<2x256xf32>
    %393 = arith.addf %389, %392 : vector<2x256xf32>
    %c3_457 = arith.constant 3 : index
    %c0_458 = arith.constant 0 : index
    %c0_459 = arith.constant 0 : index
    %394 = vector.load %arg5[%c3_457, %c0_458, %c0_459] : memref<9x128x256xbf16, #tpu.memory_space<vmem>>, vector<1x128x256xbf16>
    %395 = vector.shape_cast %394 : vector<1x128x256xbf16> to vector<128x256xbf16>
    %cst_460 = arith.constant dense<0.000000e+00> : vector<2x256xf32>
    %396 = tpu.matmul %205, %395, %cst_460 {dimension_numbers = #tpu.dot_dimension_numbers<[1], [0], [0], [1], [0, 0, 1, 1], [], []>} : vector<2x128xbf16>, vector<128x256xbf16>, vector<2x256xf32> -> vector<2x256xf32>
    %397 = arith.addf %393, %396 : vector<2x256xf32>
    %c4_461 = arith.constant 4 : index
    %c0_462 = arith.constant 0 : index
    %c0_463 = arith.constant 0 : index
    %398 = vector.load %arg5[%c4_461, %c0_462, %c0_463] : memref<9x128x256xbf16, #tpu.memory_space<vmem>>, vector<1x128x256xbf16>
    %399 = vector.shape_cast %398 : vector<1x128x256xbf16> to vector<128x256xbf16>
    %cst_464 = arith.constant dense<0.000000e+00> : vector<2x256xf32>
    %400 = tpu.matmul %217, %399, %cst_464 {dimension_numbers = #tpu.dot_dimension_numbers<[1], [0], [0], [1], [0, 0, 1, 1], [], []>} : vector<2x128xbf16>, vector<128x256xbf16>, vector<2x256xf32> -> vector<2x256xf32>
    %401 = arith.addf %397, %400 : vector<2x256xf32>
    %c5_465 = arith.constant 5 : index
    %c0_466 = arith.constant 0 : index
    %c0_467 = arith.constant 0 : index
    %402 = vector.load %arg5[%c5_465, %c0_466, %c0_467] : memref<9x128x256xbf16, #tpu.memory_space<vmem>>, vector<1x128x256xbf16>
    %403 = vector.shape_cast %402 : vector<1x128x256xbf16> to vector<128x256xbf16>
    %cst_468 = arith.constant dense<0.000000e+00> : vector<2x256xf32>
    %404 = tpu.matmul %229, %403, %cst_468 {dimension_numbers = #tpu.dot_dimension_numbers<[1], [0], [0], [1], [0, 0, 1, 1], [], []>} : vector<2x128xbf16>, vector<128x256xbf16>, vector<2x256xf32> -> vector<2x256xf32>
    %405 = arith.addf %401, %404 : vector<2x256xf32>
    %c6_469 = arith.constant 6 : index
    %c0_470 = arith.constant 0 : index
    %c0_471 = arith.constant 0 : index
    %406 = vector.load %arg5[%c6_469, %c0_470, %c0_471] : memref<9x128x256xbf16, #tpu.memory_space<vmem>>, vector<1x128x256xbf16>
    %407 = vector.shape_cast %406 : vector<1x128x256xbf16> to vector<128x256xbf16>
    %cst_472 = arith.constant dense<0.000000e+00> : vector<2x256xf32>
    %408 = tpu.matmul %253, %407, %cst_472 {dimension_numbers = #tpu.dot_dimension_numbers<[1], [0], [0], [1], [0, 0, 1, 1], [], []>} : vector<2x128xbf16>, vector<128x256xbf16>, vector<2x256xf32> -> vector<2x256xf32>
    %409 = arith.addf %405, %408 : vector<2x256xf32>
    %c7_473 = arith.constant 7 : index
    %c0_474 = arith.constant 0 : index
    %c0_475 = arith.constant 0 : index
    %410 = vector.load %arg5[%c7_473, %c0_474, %c0_475] : memref<9x128x256xbf16, #tpu.memory_space<vmem>>, vector<1x128x256xbf16>
    %411 = vector.shape_cast %410 : vector<1x128x256xbf16> to vector<128x256xbf16>
    %cst_476 = arith.constant dense<0.000000e+00> : vector<2x256xf32>
    %412 = tpu.matmul %265, %411, %cst_476 {dimension_numbers = #tpu.dot_dimension_numbers<[1], [0], [0], [1], [0, 0, 1, 1], [], []>} : vector<2x128xbf16>, vector<128x256xbf16>, vector<2x256xf32> -> vector<2x256xf32>
    %413 = arith.addf %409, %412 : vector<2x256xf32>
    %c8_477 = arith.constant 8 : index
    %c0_478 = arith.constant 0 : index
    %c0_479 = arith.constant 0 : index
    %414 = vector.load %arg5[%c8_477, %c0_478, %c0_479] : memref<9x128x256xbf16, #tpu.memory_space<vmem>>, vector<1x128x256xbf16>
    %415 = vector.shape_cast %414 : vector<1x128x256xbf16> to vector<128x256xbf16>
    %cst_480 = arith.constant dense<0.000000e+00> : vector<2x256xf32>
    %416 = tpu.matmul %277, %415, %cst_480 {dimension_numbers = #tpu.dot_dimension_numbers<[1], [0], [0], [1], [0, 0, 1, 1], [], []>} : vector<2x128xbf16>, vector<128x256xbf16>, vector<2x256xf32> -> vector<2x256xf32>
    %417 = arith.addf %413, %416 : vector<2x256xf32>
    %418 = arith.maximumf %312, %347 : vector<2x256xf32>
    %419 = arith.maximumf %382, %417 : vector<2x256xf32>
    %420 = arith.maximumf %418, %419 : vector<2x256xf32>
    %c0_481 = arith.constant 0 : index
    %c0_482 = arith.constant 0 : index
    %421 = vector.load %arg6[%c0_481, %c0_482] : memref<1x256xf32, #tpu.memory_space<vmem>>, vector<1x256xf32>
    %422 = vector.broadcast %421 : vector<1x256xf32> to vector<2x256xf32>
    %423 = arith.addf %420, %422 : vector<2x256xf32>
    %cst_483 = arith.constant 0.000000e+00 : f32
    %424 = vector.broadcast %cst_483 : f32 to vector<2x256xf32>
    %425 = arith.maximumf %423, %424 : vector<2x256xf32>
    %426 = arith.truncf %425 : vector<2x256xf32> to vector<2x256xbf16>
    %c0_484 = arith.constant 0 : index
    %c0_485 = arith.constant 0 : index
    %427 = vector.load %arg7[%c0_484, %c0_485] : memref<256x128xbf16, #tpu.memory_space<vmem>>, vector<256x128xbf16>
    %cst_486 = arith.constant dense<0.000000e+00> : vector<2x128xf32>
    %428 = tpu.matmul %426, %427, %cst_486 {dimension_numbers = #tpu.dot_dimension_numbers<[1], [0], [0], [1], [0, 0, 1, 1], [], []>} : vector<2x256xbf16>, vector<256x128xbf16>, vector<2x128xf32> -> vector<2x128xf32>
    %c0_487 = arith.constant 0 : index
    %c0_488 = arith.constant 0 : index
    %429 = vector.load %arg8[%c0_487, %c0_488] : memref<1x128xf32, #tpu.memory_space<vmem>>, vector<1x128xf32>
    %430 = vector.broadcast %429 : vector<1x128xf32> to vector<2x128xf32>
    %431 = arith.addf %428, %430 : vector<2x128xf32>
    %cst_489 = arith.constant 0.000000e+00 : f32
    %432 = vector.broadcast %cst_489 : f32 to vector<2x128xf32>
    %433 = arith.maximumf %431, %432 : vector<2x128xf32>
    %434 = arith.truncf %433 : vector<2x128xf32> to vector<2x128xbf16>
    %c0_490 = arith.constant 0 : index
    %c0_491 = arith.constant 0 : index
    %435 = vector.load %arg9[%c0_490, %c0_491] : memref<128x128xbf16, #tpu.memory_space<vmem>>, vector<128x128xbf16>
    %cst_492 = arith.constant dense<0.000000e+00> : vector<2x128xf32>
    %436 = tpu.matmul %434, %435, %cst_492 {dimension_numbers = #tpu.dot_dimension_numbers<[1], [0], [0], [1], [0, 0, 1, 1], [], []>} : vector<2x128xbf16>, vector<128x128xbf16>, vector<2x128xf32> -> vector<2x128xf32>
    %c0_493 = arith.constant 0 : index
    %c0_494 = arith.constant 0 : index
    %437 = vector.load %arg10[%c0_493, %c0_494] : memref<1x128xf32, #tpu.memory_space<vmem>>, vector<1x128xf32>
    %438 = vector.broadcast %437 : vector<1x128xf32> to vector<2x128xf32>
    %439 = arith.addf %436, %438 : vector<2x128xf32>
    %cst_495 = arith.constant 0.000000e+00 : f32
    %440 = vector.broadcast %cst_495 : f32 to vector<2x128xf32>
    %441 = arith.maximumf %439, %440 : vector<2x128xf32>
    %442 = arith.truncf %441 : vector<2x128xf32> to vector<2x128xbf16>
    %c0_496 = arith.constant 0 : index
    %c0_497 = arith.constant 0 : index
    %443 = vector.load %arg11[%c0_496, %c0_497] : memref<128x128xbf16, #tpu.memory_space<vmem>>, vector<128x128xbf16>
    %cst_498 = arith.constant dense<0.000000e+00> : vector<2x128xf32>
    %444 = tpu.matmul %442, %443, %cst_498 {dimension_numbers = #tpu.dot_dimension_numbers<[1], [0], [0], [1], [0, 0, 1, 1], [], []>} : vector<2x128xbf16>, vector<128x128xbf16>, vector<2x128xf32> -> vector<2x128xf32>
    %c0_499 = arith.constant 0 : index
    %c0_500 = arith.constant 0 : index
    %445 = vector.load %arg12[%c0_499, %c0_500] : memref<1x128xf32, #tpu.memory_space<vmem>>, vector<1x128xf32>
    %446 = vector.broadcast %445 : vector<1x128xf32> to vector<2x128xf32>
    %447 = arith.addf %444, %446 : vector<2x128xf32>
    %c0_501 = arith.constant 0 : index
    %c0_502 = arith.constant 0 : index
    %448 = vector.load %arg13[%c0_501, %c0_502] : memref<2x128xf32, #tpu.memory_space<vmem>>, vector<2x128xf32>
    tpu.vector_store %arg13[%c0_501, %c0_502], %447 {strides = array<i32>} : memref<2x128xf32, #tpu.memory_space<vmem>>, vector<2x128xf32>,
    return
  }
}

</mosaic_0001>

<bundles_post_ra>
// kernel: net_forward.1
= control target key start
LH: loop header
LB: loop body
LE: loop exit
PB: predicated region body
PF: predicated region fallthrough
CT: control target
= control target key end

     0   :  { %s12531_s0 = inlined_call_operand.vmem [shape: bf16[1280,128], index: 0, kind: input, shape index: {}]   ;;  %s12532_s1 = inlined_call_operand.vmem [shape: bf16[128,128], index: 1, kind: input, shape index: {}]   ;;  %s12533_s2 = inlined_call_operand.vmem [shape: f32[1,128], index: 2, kind: input, shape index: {}]   ;;  %s12534_s3 = inlined_call_operand.vmem [shape: bf16[9,128,128], index: 3, kind: input, shape index: {}]   ;;  %s12535_s4 = inlined_call_operand.vmem [shape: f32[1,128], index: 4, kind: input, shape index: {}]   ;;  %s12536_s5 = inlined_call_operand.vmem [shape: bf16[9,128,256], index: 5, kind: input, shape index: {}]   ;;  %s12537_s6 = inlined_call_operand.vmem [shape: f32[1,256], index: 6, kind: input, shape index: {}]   ;;  %s12538_s7 = inlined_call_operand.vmem [shape: bf16[256,128], index: 7, kind: input, shape index: {}]   ;;  %s12539_s8 = inlined_call_operand.vmem [shape: f32[1,128], index: 8, kind: input, shape index: {}]   ;;  %s12540_s9 = inlined_call_operand.vmem [shape: bf16[128,128], index: 9, kind: input, shape index: {}]   ;;  %s12541_s10 = inlined_call_operand.vmem [shape: f32[1,128], index: 10, kind: input, shape index: {}]   ;;  %s12542_s11 = inlined_call_operand.vmem [shape: bf16[128,128], index: 11, kind: input, shape index: {}]   ;;  %s12543_s12 = inlined_call_operand.vmem [shape: f32[1,128], index: 12, kind: input, shape index: {}]   ;;  %s12544_s13 = inlined_call_operand.hbm [shape: f32[2,128], index: 13, kind: output, shape index: {}]  }
   0x1   :  { %v8125_v0 = vld [vmem:[%s12532_s1 + $0x38] sm:$0xff]   ;;  %v8126_v1 = vld [vmem:[%s12532_s1 + $0x30] sm:$0xff]   ;;  %v8127_v2 = vld [vmem:[%s12532_s1 + $0x28] sm:$0xff]  }
   0x2   :  { %7617 = vmatprep.subr.bf16.mxu0 %v8125_v0  ;;  %v8128_v3 = vld [vmem:[%s12532_s1 + $0x20] sm:$0xff]   ;;  %v8129_v5 = vld [vmem:[%s12532_s1 + $0x18] sm:$0xff]   ;;  %v8130_v6 = vld [vmem:[%s12532_s1 + $0x10] sm:$0xff]  }
   0x3   :  { %7618 = vmatpush3.bf16.msra.mxu0 %v8125_v0  ;;  %v8133_v4 = vld [vmem:[%s12531_s0] sm:$0xff]   ;;  %v8131_v7 = vld [vmem:[%s12532_s1 + $0x8] sm:$0xff]   ;;  %v8135_v10 = vld [vmem:[%s12531_s0 + $0x10] sm:$0xff]  }
   0x4   :  { %7619 = vmatprep.subr.bf16.mxu0 %v8126_v1  ;;  %7633 = vmatprep.mubr.bf16.mxu0 %v8133_v4  ;;  %v8132_v8 = vld [vmem:[%s12532_s1] sm:$0xff]   ;;  %v8134_v9 = vld [vmem:[%s12531_s0 + $0x8] sm:$0xff]   ;;  %v8136_v11 = vld [vmem:[%s12531_s0 + $0x18] sm:$0xff]  }
   0x5   :  { %v8137_v12 = vld [vmem:[%s12531_s0 + $0x20] sm:$0xff]   ;;  %v8138_v13 = vld [vmem:[%s12531_s0 + $0x28] sm:$0xff]   ;;  %v8139_v14 = vld [vmem:[%s12531_s0 + $0x30] sm:$0xff]  }
   0x6   :  { %v8140_v15 = vld [vmem:[%s12531_s0 + $0x38] sm:$0xff]   ;;  %v8141_v16 = vld [vmem:[%s12531_s0 + $0x40] sm:$0xff]   ;;  %v8142_v17 = vld [vmem:[%s12531_s0 + $0x48] sm:$0xff]  }
   0x7   :  { %7620 = vmatpush3.bf16.msra.mxu0 %v8126_v1  ;;  %v8143_v18 = vld [vmem:[%s12531_s0 + $0x50] sm:$0xff]   ;;  %v8144_v19 = vld [vmem:[%s12531_s0 + $0x58] sm:$0xff]   ;;  %v8145_v20 = vld [vmem:[%s12531_s0 + $0x60] sm:$0xff]  }
   0x8   :  { %7621 = vmatprep.subr.bf16.mxu0 %v8127_v2  ;;  %v8146_v21 = vld [vmem:[%s12531_s0 + $0x68] sm:$0xff]   ;;  %v8147_v22 = vld [vmem:[%s12531_s0 + $0x70] sm:$0xff]   ;;  %v8148_v23 = vld [vmem:[%s12531_s0 + $0x78] sm:$0xff]  }
   0x9   :  { %v8149_v24 = vld [vmem:[%s12531_s0 + $0x80] sm:$0xff]   ;;  %v8150_v25 = vld [vmem:[%s12531_s0 + $0x88] sm:$0xff]   ;;  %v8151_v26 = vld [vmem:[%s12531_s0 + $0x90] sm:$0xff]  }
   0xa   :  { %v8152_v27 = vld [vmem:[%s12531_s0 + $0x98] sm:$0xff]   ;;  %v8153_v28 = vld [vmem:[%s12531_s0 + $0xa0] sm:$0xff]   ;;  %v8154_v29 = vld [vmem:[%s12531_s0 + $0xa8] sm:$0xff]  }
   0xb   :  { %7622 = vmatpush3.bf16.msra.mxu0 %v8127_v2  ;;  %v8155_v30 = vld [vmem:[%s12531_s0 + $0xb0] sm:$0xff]   ;;  %v8156_v31 = vld [vmem:[%s12531_s0 + $0xb8] sm:$0xff]   ;;  %v8157_v32 = vld [vmem:[%s12531_s0 + $0xc0] sm:$0xff]  }
   0xc   :  { %7623 = vmatprep.subr.bf16.mxu0 %v8128_v3  ;;  %v8158_v33 = vld [vmem:[%s12531_s0 + $0xc8] sm:$0xff]   ;;  %v8159_v34 = vld [vmem:[%s12531_s0 + $0xd0] sm:$0xff]   ;;  %v8160_v35 = vld [vmem:[%s12531_s0 + $0xd8] sm:$0xff]  }
   0xd   :  { %v8161_v36 = vld [vmem:[%s12531_s0 + $0xe0] sm:$0xff]   ;;  %v8162_v37 = vld [vmem:[%s12531_s0 + $0xe8] sm:$0xff]   ;;  %v8163_v38 = vld [vmem:[%s12531_s0 + $0xf0] sm:$0xff]  }
   0xe   :  { %v8164_v39 = vld [vmem:[%s12531_s0 + $0xf8] sm:$0xff]   ;;  %v8165_v40 = vld [vmem:[%s12531_s0 + $0x100] sm:$0xff]   ;;  %v8166_v41 = vld [vmem:[%s12531_s0 + $0x108] sm:$0xff]  }
   0xf   :  { %7624 = vmatpush3.bf16.msra.mxu0 %v8128_v3  ;;  %v8167_v42 = vld [vmem:[%s12531_s0 + $0x110] sm:$0xff]   ;;  %v8168_v43 = vld [vmem:[%s12531_s0 + $0x118] sm:$0xff]   ;;  %v8169_v44 = vld [vmem:[%s12531_s0 + $0x120] sm:$0xff]  }
  0x10   :  { %7625 = vmatprep.subr.bf16.mxu0 %v8129_v5  ;;  %v8170_v45 = vld [vmem:[%s12531_s0 + $0x128] sm:$0xff]   ;;  %v8171_v46 = vld [vmem:[%s12531_s0 + $0x130] sm:$0xff]   ;;  %v8172_v47 = vld [vmem:[%s12531_s0 + $0x138] sm:$0xff]  }
  0x11   :  { %v8173_v48 = vld [vmem:[%s12531_s0 + $0x140] sm:$0xff]   ;;  %v8174_v49 = vld [vmem:[%s12531_s0 + $0x148] sm:$0xff]   ;;  %v8175_v50 = vld [vmem:[%s12531_s0 + $0x150] sm:$0xff]  }
  0x12   :  { %v8176_v51 = vld [vmem:[%s12531_s0 + $0x158] sm:$0xff]   ;;  %v8177_v52 = vld [vmem:[%s12531_s0 + $0x160] sm:$0xff]  }
  0x13   :  { %7626 = vmatpush3.bf16.msra.mxu0 %v8129_v5 }
  0x14   :  { %7627 = vmatprep.subr.bf16.mxu0 %v8130_v6 }
  0x17   :  { %7628 = vmatpush3.bf16.msra.mxu0 %v8130_v6 }
  0x18   :  { %7629 = vmatprep.subr.bf16.mxu0 %v8131_v7 }
  0x1b   :  { %7630 = vmatpush3.bf16.msra.mxu0 %v8131_v7 }
  0x1c   :  { %7631 = vmatprep.subr.bf16.mxu0 %v8132_v8 }
  0x1f   :  { %7632 = vmatpush3.bf16.msra.mxu0 %v8132_v8 }
  0x22   :  { %7634 = vmatmul.mubr.bf16.vlgmr.msra.gmra.mxu0 %v8134_v9 }
  0x23   :  { %7637 = vmatprep.mubr.bf16.mxu0 %v8135_v10 }
  0x2a   :  { %7638 = vmatmul.mubr.bf16.gmra.mxu0 %v8136_v11 }
  0x2b   :  { %7641 = vmatprep.mubr.bf16.mxu0 %v8137_v12 }
  0x32   :  { %7642 = vmatmul.mubr.bf16.gmra.mxu0 %v8138_v13 }
  0x33   :  { %7645 = vmatprep.mubr.bf16.mxu0 %v8139_v14 }
  0x3a   :  { %7646 = vmatmul.mubr.bf16.gmra.mxu0 %v8140_v15 }
  0x3b   :  { %7649 = vmatprep.mubr.bf16.mxu0 %v8141_v16 }
  0x42   :  { %7650 = vmatmul.mubr.bf16.gmra.mxu0 %v8142_v17 }
  0x43   :  { %7653 = vmatprep.mubr.bf16.mxu0 %v8143_v18 }
  0x4a   :  { %7654 = vmatmul.mubr.bf16.gmra.mxu0 %v8144_v19 }
  0x4b   :  { %7657 = vmatprep.mubr.bf16.mxu0 %v8145_v20 }
  0x52   :  { %7658 = vmatmul.mubr.bf16.gmra.mxu0 %v8146_v21 }
  0x53   :  { %7661 = vmatprep.mubr.bf16.mxu0 %v8147_v22 }
  0x5a   :  { %7662 = vmatmul.mubr.bf16.gmra.mxu0 %v8148_v23 }
  0x5b   :  { %7665 = vmatprep.mubr.bf16.mxu0 %v8149_v24 }
  0x62   :  { %7666 = vmatmul.mubr.bf16.gmra.mxu0 %v8150_v25 }
  0x63   :  { %7669 = vmatprep.mubr.bf16.mxu0 %v8151_v26 }
  0x6a   :  { %7670 = vmatmul.mubr.bf16.gmra.mxu0 %v8152_v27 }
  0x6b   :  { %7673 = vmatprep.mubr.bf16.mxu0 %v8153_v28 }
  0x72   :  { %7674 = vmatmul.mubr.bf16.gmra.mxu0 %v8154_v29 }
  0x73   :  { %7677 = vmatprep.mubr.bf16.mxu0 %v8155_v30 }
  0x7a   :  { %7678 = vmatmul.mubr.bf16.gmra.mxu0 %v8156_v31 }
  0x7b   :  { %7681 = vmatprep.mubr.bf16.mxu0 %v8157_v32 }
  0x82   :  { %7682 = vmatmul.mubr.bf16.gmra.mxu0 %v8158_v33 }
  0x83   :  { %7685 = vmatprep.mubr.bf16.mxu0 %v8159_v34 }
  0x8a   :  { %7686 = vmatmul.mubr.bf16.gmra.mxu0 %v8160_v35 }
  0x8b   :  { %7689 = vmatprep.mubr.bf16.mxu0 %v8161_v36 }
  0x92   :  { %7690 = vmatmul.mubr.bf16.gmra.mxu0 %v8162_v37 }
  0x93   :  { %7693 = vmatprep.mubr.bf16.mxu0 %v8163_v38 }
  0x9a   :  { %7694 = vmatmul.mubr.bf16.gmra.mxu0 %v8164_v39 }
  0x9b   :  { %7697 = vmatprep.mubr.bf16.mxu0 %v8165_v40 }
  0xa2   :  { %7698 = vmatmul.mubr.bf16.gmra.mxu0 %v8166_v41 }
  0xa3   :  { %7701 = vmatprep.mubr.bf16.mxu0 %v8167_v42 }
  0xaa   :  { %7702 = vmatmul.mubr.bf16.gmra.mxu0 %v8168_v43 }
  0xab   :  { %7705 = vmatprep.mubr.bf16.mxu0 %v8169_v44 }
  0xb2   :  { %7706 = vmatmul.mubr.bf16.gmra.mxu0 %v8170_v45 }
  0xb3   :  { %7709 = vmatprep.mubr.bf16.mxu0 %v8171_v46 }
  0xba   :  { %7710 = vmatmul.mubr.bf16.gmra.mxu0 %v8172_v47 }
  0xbb   :  { %7713 = vmatprep.mubr.bf16.mxu0 %v8173_v48 }
  0xc2   :  { %7714 = vmatmul.mubr.bf16.gmra.mxu0 %v8174_v49 }
  0xc3   :  { %7717 = vmatprep.mubr.bf16.mxu0 %v8175_v50 }
  0xca   :  { %7718 = vmatmul.mubr.bf16.gmra.mxu0 %v8176_v51 }
  0xcb   :  { %7721 = vmatprep.mubr.bf16.mxu0 %v8177_v52 }
  0xcc   :  { %18 = vsyncpa [#allocation5], 0  ;;  %v8178_v53 = vld [vmem:[%s12531_s0 + $0x168] sm:$0xff]   ;;  %v8179_v54 = vld [vmem:[%s12531_s0 + $0x170] sm:$0xff]   ;;  %vm3813_vm0 = vcmask 1041409   ;;  %vm8735_vm1 = vmmov 0  }
  0xcd   :  { %v8180_v55 = vld [vmem:[%s12531_s0 + $0x178] sm:$0xff]   ;;  %v8181_v56 = vld [vmem:[%s12531_s0 + $0x180] sm:$0xff]   ;;  %v8182_v57 = vld [vmem:[%s12531_s0 + $0x188] sm:$0xff]  }
  0xce   :  { %v8183_v58 = vld [vmem:[%s12531_s0 + $0x190] sm:$0xff]   ;;  %v8184_v62 = vld [vmem:[%s12531_s0 + $0x198] sm:$0xff]   ;;  %v8185_v63 = vld [vmem:[%s12531_s0 + $0x1a0] sm:$0xff]  }
  0xcf   :  { %v8186_v4 = vld [vmem:[%s12531_s0 + $0x1a8] sm:$0xff]   ;;  %v8187_v5 = vld [vmem:[%s12531_s0 + $0x1b0] sm:$0xff]   ;;  %v8188_v10 = vld [vmem:[%s12531_s0 + $0x1b8] sm:$0xff]  }
  0xd0   :  { %v8189_v11 = vld [vmem:[%s12531_s0 + $0x1c0] sm:$0xff]   ;;  %v8190_v16 = vld [vmem:[%s12531_s0 + $0x1c8] sm:$0xff]   ;;  %v8191_v17 = vld [vmem:[%s12531_s0 + $0x1d0] sm:$0xff]  }
  0xd1   :  { %v8192_v22 = vld [vmem:[%s12531_s0 + $0x1d8] sm:$0xff]   ;;  %v8193_v23 = vld [vmem:[%s12531_s0 + $0x1e0] sm:$0xff]   ;;  %v8194_v28 = vld [vmem:[%s12531_s0 + $0x1e8] sm:$0xff]  }
  0xd2   :  { %7722 = vmatmul.mubr.bf16.gmra.mxu0 %v8178_v53  ;;  %v8195_v29 = vld [vmem:[%s12531_s0 + $0x1f0] sm:$0xff]   ;;  %v8196_v34 = vld [vmem:[%s12531_s0 + $0x1f8] sm:$0xff]   ;;  %v8197_v35 = vld [vmem:[%s12531_s0 + $0x200] sm:$0xff]  }
  0xd3   :  { %7725 = vmatprep.mubr.bf16.mxu0 %v8179_v54  ;;  %v8198_v40 = vld [vmem:[%s12531_s0 + $0x208] sm:$0xff]   ;;  %v8199_v41 = vld [vmem:[%s12531_s0 + $0x210] sm:$0xff]   ;;  %v8200_v46 = vld [vmem:[%s12531_s0 + $0x218] sm:$0xff]  }
  0xd4   :  { %v8201_v47 = vld [vmem:[%s12531_s0 + $0x220] sm:$0xff]   ;;  %v8202_v52 = vld [vmem:[%s12531_s0 + $0x228] sm:$0xff]   ;;  %v8203_v53 = vld [vmem:[%s12531_s0 + $0x230] sm:$0xff]  }
  0xda   :  { %7726 = vmatmul.mubr.bf16.gmra.mxu0 %v8180_v55 }
  0xdb   :  { %7729 = vmatprep.mubr.bf16.mxu0 %v8181_v56 }
  0xe2   :  { %v8984_v59 = vpop.f32.mrf.mxu0  ;;  %7730 = vmatmul.mubr.bf16.gmra.mxu0 %v8182_v57 }
  0xe3   :  { %7733 = vmatprep.mubr.bf16.mxu0 %v8183_v58  ;;  %v8204_v58 = vld [vmem:[%s12531_s0 + $0x238] sm:$0xff]  }
  0xe4   :  { %v8986_v60 = vpop.f32.mrf.mxu0 }
  0xe6   :  { %v8988_v61 = vpop.f32.mrf.mxu0 }
  0xe8   :  { %v8996_v0 = vpop.f32.mrf.mxu0 }
  0xea   :  { %v8998_v1 = vpop.f32.mrf.mxu0  ;;  %7734 = vmatmul.mubr.bf16.gmra.mxu0 %v8184_v62  ;;  %v8205_v62 = vld [vmem:[%s12531_s0 + $0x240] sm:$0xff]  }
  0xeb   :  { %7737 = vmatprep.mubr.bf16.mxu0 %v8185_v63 }
  0xec   :  { %v9000_v2 = vpop.f32.mrf.mxu0 }
  0xee   :  { %v9002_v3 = vpop.f32.mrf.mxu0 }
  0xf0   :  { %v9010_v6 = vpop.f32.mrf.mxu0 }
  0xf2   :  { %v9012_v7 = vpop.f32.mrf.mxu0  ;;  %7738 = vmatmul.mubr.bf16.gmra.mxu0 %v8186_v4 }
  0xf3   :  { %7741 = vmatprep.mubr.bf16.mxu0 %v8187_v5 }
  0xf4   :  { %v9014_v8 = vpop.f32.mrf.mxu0 }
  0xf6   :  { %v9016_v9 = vpop.f32.mrf.mxu0 }
  0xf8   :  { %v9024_v12 = vpop.f32.mrf.mxu0 }
  0xfa   :  { %v9026_v13 = vpop.f32.mrf.mxu0  ;;  %7742 = vmatmul.mubr.bf16.gmra.mxu0 %v8188_v10 }
  0xfb   :  { %7745 = vmatprep.mubr.bf16.mxu0 %v8189_v11  ;;  %v8206_v11 = vld [vmem:[%s12531_s0 + $0x248] sm:$0xff]  }
  0xfc   :  { %v9028_v14 = vpop.f32.mrf.mxu0 }
  0xfe   :  { %v9030_v15 = vpop.f32.mrf.mxu0 }
 0x100   :  { %v9038_v18 = vpop.f32.mrf.mxu0 }
 0x102   :  { %v9040_v19 = vpop.f32.mrf.mxu0  ;;  %7746 = vmatmul.mubr.bf16.gmra.mxu0 %v8190_v16  ;;  %v8207_v16 = vld [vmem:[%s12531_s0 + $0x250] sm:$0xff]  }
 0x103   :  { %7749 = vmatprep.mubr.bf16.mxu0 %v8191_v17 }
 0x104   :  { %v9042_v20 = vpop.f32.mrf.mxu0 }
 0x105   :  { %12701 = vst [vmem:[#allocation7_spill] sm:$0xff] %v9042_v20 }
 0x106   :  { %v9044_v21 = vpop.f32.mrf.mxu0 }
 0x107   :  { %12702 = vst [vmem:[#allocation8_spill] sm:$0xff] %v9044_v21 }
 0x108   :  { %v9052_v24 = vpop.f32.mrf.mxu0 }
 0x109   :  { %12703 = vst [vmem:[#allocation9_spill] sm:$0xff] %v9052_v24 }
 0x10a   :  { %v9054_v25 = vpop.f32.mrf.mxu0  ;;  %7750 = vmatmul.mubr.bf16.gmra.mxu0 %v8192_v22 }
 0x10b   :  { %12704 = vst [vmem:[#allocation10_spill] sm:$0xff] %v9054_v25  ;;  %7753 = vmatprep.mubr.bf16.mxu0 %v8193_v23 }
 0x10c   :  { %v9056_v26 = vpop.f32.mrf.mxu0 }
 0x10d   :  { %12705 = vst [vmem:[#allocation11_spill] sm:$0xff] %v9056_v26 }
 0x10e   :  { %v9058_v27 = vpop.f32.mrf.mxu0 }
 0x10f   :  { %12706 = vst [vmem:[#allocation12_spill] sm:$0xff] %v9058_v27 }
 0x110   :  { %v9066_v30 = vpop.f32.mrf.mxu0 }
 0x111   :  { %12707 = vst [vmem:[#allocation13_spill] sm:$0xff] %v9066_v30 }
 0x112   :  { %v9068_v31 = vpop.f32.mrf.mxu0  ;;  %7754 = vmatmul.mubr.bf16.gmra.mxu0 %v8194_v28 }
 0x113   :  { %12708 = vst [vmem:[#allocation14_spill] sm:$0xff] %v9068_v31  ;;  %7757 = vmatprep.mubr.bf16.mxu0 %v8195_v29  ;;  %v8208_v29 = vld [vmem:[%s12531_s0 + $0x258] sm:$0xff]  }
 0x114   :  { %v9070_v32 = vpop.f32.mrf.mxu0 }
 0x115   :  { %12709 = vst [vmem:[#allocation15_spill] sm:$0xff] %v9070_v32 }
 0x116   :  { %v9072_v33 = vpop.f32.mrf.mxu0 }
 0x117   :  { %12710 = vst [vmem:[#allocation16_spill] sm:$0xff] %v9072_v33 }
 0x118   :  { %v9080_v36 = vpop.f32.mrf.mxu0 }
 0x119   :  { %12711 = vst [vmem:[#allocation17_spill] sm:$0xff] %v9080_v36 }
 0x11a   :  { %v9082_v37 = vpop.f32.mrf.mxu0  ;;  %7758 = vmatmul.mubr.bf16.gmra.mxu0 %v8196_v34  ;;  %v8209_v34 = vld [vmem:[%s12531_s0 + $0x260] sm:$0xff]  }
 0x11b   :  { %12712 = vst [vmem:[#allocation18_spill] sm:$0xff] %v9082_v37  ;;  %7761 = vmatprep.mubr.bf16.mxu0 %v8197_v35 }
 0x11c   :  { %v9084_v38 = vpop.f32.mrf.mxu0 }
 0x11d   :  { %12713 = vst [vmem:[#allocation19_spill] sm:$0xff] %v9084_v38 }
 0x11e   :  { %v9086_v39 = vpop.f32.mrf.mxu0 }
 0x11f   :  { %12714 = vst [vmem:[#allocation20_spill] sm:$0xff] %v9086_v39  ;;  %v8220_v39 = vld [vmem:[%s12534_s3 + $0x40] sm:$0xff]  }
 0x120   :  { %v9094_v42 = vpop.f32.mrf.mxu0 }
 0x121   :  { %12715 = vst [vmem:[#allocation21_spill] sm:$0xff] %v9094_v42 }
 0x122   :  { %v9096_v43 = vpop.f32.mrf.mxu0  ;;  %7762 = vmatmul.mubr.bf16.gmra.mxu0 %v8198_v40 }
 0x123   :  { %12716 = vst [vmem:[#allocation22_spill] sm:$0xff] %v9096_v43  ;;  %7765 = vmatprep.mubr.bf16.mxu0 %v8199_v41 }
 0x124   :  { %v9098_v44 = vpop.f32.mrf.mxu0 }
 0x125   :  { %12717 = vst [vmem:[#allocation23_spill] sm:$0xff] %v9098_v44 }
 0x126   :  { %v9100_v45 = vpop.f32.mrf.mxu0 }
 0x127   :  { %12718 = vst [vmem:[#allocation24_spill] sm:$0xff] %v9100_v45 }
 0x128   :  { %v9108_v48 = vpop.f32.mrf.mxu0 }
 0x129   :  { %12719 = vst [vmem:[#allocation25_spill] sm:$0xff] %v9108_v48 }
 0x12a   :  { %v9110_v49 = vpop.f32.mrf.mxu0  ;;  %7766 = vmatmul.mubr.bf16.gmra.mxu0 %v8200_v46 }
 0x12b   :  { %12720 = vst [vmem:[#allocation26_spill] sm:$0xff] %v9110_v49  ;;  %7769 = vmatprep.mubr.bf16.mxu0 %v8201_v47  ;;  %v8210_v47 = vld [vmem:[%s12531_s0 + $0x268] sm:$0xff]  }
 0x12c   :  { %v9112_v50 = vpop.f32.mrf.mxu0 }
 0x12d   :  { %12721 = vst [vmem:[#allocation27_spill] sm:$0xff] %v9112_v50 }
 0x12e   :  { %v9114_v51 = vpop.f32.mrf.mxu0 }
 0x12f   :  { %12722 = vst [vmem:[#allocation28_spill] sm:$0xff] %v9114_v51  ;;  %v8216_v51 = vld [vmem:[%s12534_s3 + $0x60] sm:$0xff]  }
 0x130   :  { %v9122_v54 = vpop.f32.mrf.mxu0 }
 0x131   :  { %12723 = vst [vmem:[#allocation29_spill] sm:$0xff] %v9122_v54 }
 0x132   :  { %v9124_v55 = vpop.f32.mrf.mxu0  ;;  %7770 = vmatmul.mubr.bf16.gmra.mxu0 %v8202_v52  ;;  %v8211_v52 = vld [vmem:[%s12531_s0 + $0x270] sm:$0xff]  }
 0x133   :  { %7773 = vmatprep.mubr.bf16.mxu0 %v8203_v53 }
 0x134   :  { %v9126_v56 = vpop.f32.mrf.mxu0 }
 0x136   :  { %v9128_v57 = vpop.f32.mrf.mxu0 }
 0x138   :  { %v9136_v63 = vpop.f32.mrf.mxu0 }
 0x13a   :  { %v9138_v4 = vpop.f32.mrf.mxu0  ;;  %7774 = vmatmul.mubr.bf16.gmra.mxu0 %v8204_v58  ;;  %v8213_v58 = vld [vmem:[%s12534_s3 + $0x78] sm:$0xff]  }
 0x13b   :  { %7777 = vmatprep.mubr.bf16.mxu0 %v8205_v62  ;;  %7793 = vmatprep.subr.bf16.mxu1 %v8213_v58 }
 0x13c   :  { %v9140_v5 = vpop.f32.mrf.mxu0  ;;  %7794 = vmatpush3.bf16.msra.mxu1 %v8213_v58 }
 0x13e   :  { %v9142_v10 = vpop.f32.mrf.mxu0 }
 0x140   :  { %v9150_v17 = vpop.f32.mrf.mxu0 }
 0x142   :  { %v9152_v22 = vpop.f32.mrf.mxu0  ;;  %7778 = vmatmul.mubr.bf16.gmra.mxu0 %v8206_v11 }
 0x143   :  { %7781 = vmatprep.mubr.bf16.mxu0 %v8207_v16  ;;  %v8214_v16 = vld [vmem:[%s12534_s3 + $0x70] sm:$0xff]  }
 0x144   :  { %v9154_v23 = vpop.f32.mrf.mxu0  ;;  %7795 = vmatprep.subr.bf16.mxu1 %v8214_v16 }
 0x145   :  { %7796 = vmatpush3.bf16.msra.mxu1 %v8214_v16  ;;  %v8217_v16 = vld [vmem:[%s12534_s3 + $0x58] sm:$0xff]  }
 0x146   :  { %v9156_v28 = vpop.f32.mrf.mxu0 }
 0x148   :  { %v9164_v35 = vpop.f32.mrf.mxu0 }
 0x14a   :  { %v9166_v40 = vpop.f32.mrf.mxu0  ;;  %7782 = vmatmul.mubr.bf16.gmra.mxu0 %v8208_v29 }
 0x14b   :  { %7785 = vmatprep.mubr.bf16.mxu0 %v8209_v34  ;;  %v8212_v34 = vld [vmem:[%s12531_s0 + $0x278] sm:$0xff]  }
 0x14c   :  { %v9168_v41 = vpop.f32.mrf.mxu0 }
 0x14e   :  { %v9170_v46 = vpop.f32.mrf.mxu0 }
 0x150   :  { %v9178_v53 = vpop.f32.mrf.mxu0 }
 0x152   :  { %v9183_v62 = vpop.f32.mrf.mxu0  ;;  %7786 = vmatmul.mubr.bf16.gmra.mxu0 %v8210_v47  ;;  %v8215_v47 = vld [vmem:[%s12534_s3 + $0x68] sm:$0xff]  }
 0x153   :  { %7789 = vmatprep.mubr.bf16.mxu0 %v8211_v52  ;;  %7797 = vmatprep.subr.bf16.mxu1 %v8215_v47 }
 0x154   :  { %v9185_v11 = vpop.f32.mrf.mxu0  ;;  %7798 = vmatpush3.bf16.msra.mxu1 %v8215_v47  ;;  %v8218_v47 = vld [vmem:[%s12534_s3 + $0x50] sm:$0xff]  }
 0x155   :  { %12724 = vst [vmem:[#allocation30_spill] sm:$0xff] %v9185_v11  ;;  %7799 = vmatprep.subr.bf16.mxu1 %v8216_v51 }
 0x156   :  { %v9190_v29 = vpop.f32.mrf.mxu0 }
 0x157   :  { %12725 = vst [vmem:[#allocation31_spill] sm:$0xff] %v9190_v29 }
 0x158   :  { %v9195_v54 = vpop.f32.mrf.mxu0  ;;  %7800 = vmatpush3.bf16.msra.mxu1 %v8216_v51  ;;  %v8219_v51 = vld [vmem:[%s12534_s3 + $0x48] sm:$0xff]  }
 0x159   :  { %12726 = vst [vmem:[#allocation32_spill] sm:$0xff] %v9195_v54  ;;  %7801 = vmatprep.subr.bf16.mxu1 %v8217_v16 }
 0x15a   :  { %v9200_v52 = vpop.f32.mrf.mxu0  ;;  %7790 = vmatmul.mubr.bf16.gmra.mxu0 %v8212_v34 }
 0x15b   :  { %12727 = vst [vmem:[#allocation33_spill] sm:$0xff] %v9200_v52 }
 0x15c   :  { %v9202_v58 = vpop.f32.mrf.mxu0  ;;  %7802 = vmatpush3.bf16.msra.mxu1 %v8217_v16 }
 0x15d   :  { %12728 = vst [vmem:[#allocation34_spill] sm:$0xff] %v9202_v58  ;;  %7803 = vmatprep.subr.bf16.mxu1 %v8218_v47 }
 0x15e   :  { %v9207_v50 = vpop.f32.mrf.mxu0 }
 0x15f   :  { %12729 = vst [vmem:[#allocation35_spill] sm:$0xff] %v9207_v50 }
 0x160   :  { %v9209_v49 = vpop.f32.mrf.mxu0  ;;  %7804 = vmatpush3.bf16.msra.mxu1 %v8218_v47 }
 0x161   :  { %12730 = vst [vmem:[#allocation36_spill] sm:$0xff] %v9209_v49  ;;  %7805 = vmatprep.subr.bf16.mxu1 %v8219_v51 }
 0x162   :  { %v9214_v48 = vpop.f32.mrf.mxu0 }
 0x163   :  { %12731 = vst [vmem:[#allocation37_spill] sm:$0xff] %v9214_v48 }
 0x164   :  { %v9216_v34 = vpop.f32.mrf.mxu0  ;;  %7806 = vmatpush3.bf16.msra.mxu1 %v8219_v51 }
 0x165   :  { %12732 = vst [vmem:[#allocation38_spill] sm:$0xff] %v9216_v34  ;;  %7807 = vmatprep.subr.bf16.mxu1 %v8220_v39 }
 0x166   :  { %v9221_v45 = vpop.f32.mrf.mxu0 }
 0x167   :  { %12733 = vst [vmem:[#allocation39_spill] sm:$0xff] %v9221_v45 }
 0x168   :  { %v9223_v44 = vpop.f32.mrf.mxu0  ;;  %7808 = vmatpush3.bf16.msra.mxu1 %v8220_v39 }
 0x169   :  { %12734 = vst [vmem:[#allocation40_spill] sm:$0xff] %v9223_v44 }
 0x16a   :  { %v9228_v43 = vpop.f32.mrf.mxu0 }
 0x16b   :  { %12735 = vst [vmem:[#allocation41_spill] sm:$0xff] %v9228_v43 }
 0x16c   :  { %v9230_v42 = vpop.f32.mrf.mxu0 }
 0x16d   :  { %12736 = vst [vmem:[#allocation42_spill] sm:$0xff] %v9230_v42 }
 0x16e   :  { %v9232_v16 = vpop.f32.mrf.mxu0 }
 0x16f   :  { %12737 = vst [vmem:[#allocation43_spill] sm:$0xff] %v9232_v16 }
 0x170   :  { %v9237_v38 = vpop.f32.mrf.mxu0 }
 0x171   :  { %12738 = vst [vmem:[#allocation44_spill] sm:$0xff] %v9237_v38 }
 0x172   :  { %v9239_v47 = vpop.f32.mrf.mxu0 }
 0x173   :  { %12739 = vst [vmem:[#allocation45_spill] sm:$0xff] %v9239_v47 }
 0x174   :  { %v9241_v37 = vpop.f32.mrf.mxu0 }
 0x175   :  { %12740 = vst [vmem:[#allocation46_spill] sm:$0xff] %v9241_v37 }
 0x176   :  { %v9243_v36 = vpop.f32.mrf.mxu0 }
 0x177   :  { %12741 = vst [vmem:[#allocation47_spill] sm:$0xff] %v9243_v36 }
 0x178   :  { %v9245_v43 = vpop.f32.mrf.mxu0 }
 0x179   :  { %12742 = vst [vmem:[#allocation48_spill] sm:$0xff] %v9245_v43 }
 0x17a   :  { %v9247_v42 = vpop.f32.mrf.mxu0 }
 0x17b   :  { %12743 = vst [vmem:[#allocation49_spill] sm:$0xff] %v9247_v42 }
 0x17c   :  { %v9249_v51 = vpop.f32.mrf.mxu0 }
 0x17d   :  { %12744 = vst [vmem:[#allocation50_spill] sm:$0xff] %v9249_v51 }
 0x17e   :  { %v9251_v16 = vpop.f32.mrf.mxu0 }
 0x17f   :  { %12745 = vst [vmem:[#allocation51_spill] sm:$0xff] %v9251_v16  ;;  %v9270_v16 = vld [vmem:[%s12534_s3 + $0x38] sm:$0xff]  }
 0x180   :  { %v9253_v44 = vpop.f32.mrf.mxu0  ;;  %12747 = vst [vmem:[#allocation53_spill] sm:$0xff] %v9270_v16  ;;  %7825 = vmatprep.subr.bf16.mxu1 %v9270_v16 }
 0x181   :  { %12746 = vst [vmem:[#allocation52_spill] sm:$0xff] %v9253_v44 }
 0x182   :  { %v7715_v33 = vpop.f32.mrf.mxu0 }
 0x184   :  { %v1104_v38 = vpop.f32.mrf.mxu0 }
 0x186   :  { %v7716_v45 = vpop.f32.mrf.mxu0 }
 0x188   :  { %v9255_v39 = vpop.f32.mrf.mxu0 }
 0x18a   :  { %v9257_v47 = vpop.f32.mrf.mxu0 }
 0x18c   :  { %v9259_v37 = vpop.f32.mrf.mxu0 }
 0x18e   :  { %v9261_v36 = vpop.f32.mrf.mxu0 }
 0x190   :  { %v9263_v43 = vpop.f32.mrf.mxu0 }
 0x192   :  { %v9265_v42 = vpop.f32.mrf.mxu0 }
 0x194   :  { %v9272_v44 = vpop.f32.mrf.mxu0 }
 0x196   :  { %v9275_v51 = vpop.f32.mrf.mxu0 }
 0x198   :  { %v9277_v32 = vpop.f32.mrf.mxu0 }
 0x19a   :  { %v9279_v34 = vpop.f32.mrf.mxu0 }
 0x19c   :  { %v9281_v31 = vpop.f32.mrf.mxu0 }
 0x19e   :  { %v9283_v48 = vpop.f32.mrf.mxu0 }
 0x1a0   :  { %v9285_v30 = vpop.f32.mrf.mxu0 }
 0x1a2   :  { %v9287_v49 = vpop.f32.mrf.mxu0 }
 0x1a3   :  { %12748 = vst [vmem:[#allocation54_spill] sm:$0xff] %v9287_v49 }
 0x1a4   :  { %v9289_v27 = vpop.f32.mrf.mxu0 }
 0x1a5   :  { %12749 = vst [vmem:[#allocation55_spill] sm:$0xff] %v9289_v27 }
 0x1a6   :  { %v9291_v50 = vpop.f32.mrf.mxu0 }
 0x1a7   :  { %12750 = vst [vmem:[#allocation56_spill] sm:$0xff] %v9291_v50 }
 0x1a8   :  { %v9293_v26 = vpop.f32.mrf.mxu0 }
 0x1a9   :  { %12751 = vst [vmem:[#allocation57_spill] sm:$0xff] %v9293_v26 }
 0x1aa   :  { %v9295_v58 = vpop.f32.mrf.mxu0 }
 0x1ab   :  { %12752 = vst [vmem:[#allocation58_spill] sm:$0xff] %v9295_v58 }
 0x1ac   :  { %v9297_v25 = vpop.f32.mrf.mxu0 }
 0x1ad   :  { %12753 = vst [vmem:[#allocation59_spill] sm:$0xff] %v9297_v25 }
 0x1ae   :  { %v9299_v52 = vpop.f32.mrf.mxu0 }
 0x1af   :  { %12754 = vst [vmem:[#allocation60_spill] sm:$0xff] %v9299_v52 }
 0x1b0   :  { %v9301_v24 = vpop.f32.mrf.mxu0 }
 0x1b1   :  { %12755 = vst [vmem:[#allocation61_spill] sm:$0xff] %v9301_v24 }
 0x1b2   :  { %v9303_v54 = vpop.f32.mrf.mxu0 }
 0x1b3   :  { %12756 = vst [vmem:[#allocation62_spill] sm:$0xff] %v9303_v54 }
 0x1b4   :  { %v9305_v21 = vpop.f32.mrf.mxu0 }
 0x1b5   :  { %12757 = vst [vmem:[#allocation63_spill] sm:$0xff] %v9305_v21 }
 0x1b6   :  { %v9307_v29 = vpop.f32.mrf.mxu0 }
 0x1b7   :  { %12758 = vst [vmem:[#allocation64_spill] sm:$0xff] %v9307_v29 }
 0x1b8   :  { %v9309_v16 = vpop.f32.mrf.mxu0 }
 0x1b9   :  { %12759 = vst [vmem:[#allocation65_spill] sm:$0xff] %v9309_v16 }
 0x1ba   :  { %v9311_v27 = vpop.f32.mrf.mxu0 }
 0x1bb   :  { %12760 = vst [vmem:[#allocation66_spill] sm:$0xff] %v9311_v27 }
 0x1bc   :  { %v9313_v50 = vpop.f32.mrf.mxu0 }
 0x1bd   :  { %12761 = vst [vmem:[#allocation67_spill] sm:$0xff] %v9313_v50 }
 0x1be   :  { %v9315_v26 = vpop.f32.mrf.mxu0 }
 0x1bf   :  { %12762 = vst [vmem:[#allocation68_spill] sm:$0xff] %v9315_v26 }
 0x1c0   :  { %v9317_v58 = vpop.f32.mrf.mxu0 }
 0x1c1   :  { %12763 = vst [vmem:[#allocation69_spill] sm:$0xff] %v9317_v58  ;;  %v1425_v58 = vmax.f32 %v8984_v59, %v9124_v55 }
 0x1c2   :  { %v9319_v25 = vpop.f32.mrf.mxu0 }
 0x1c3   :  { %12764 = vst [vmem:[#allocation70_spill] sm:$0xff] %v9319_v25 }
 0x1c4   :  { %v9321_v52 = vpop.f32.mrf.mxu0 }
 0x1c5   :  { %12765 = vst [vmem:[#allocation71_spill] sm:$0xff] %v9321_v52  ;;  %v9340_v52 = vld [vmem:[%s12533_s2] ss:$0 sm:$0xff] }
 0x1c6   :  { %v9323_v24 = vpop.f32.mrf.mxu0 }
 0x1c7   :  { %12766 = vst [vmem:[#allocation72_spill] sm:$0xff] %v9323_v24 }
 0x1c8   :  { %v9325_v54 = vpop.f32.mrf.mxu0 }
 0x1c9   :  { %12767 = vst [vmem:[#allocation73_spill] sm:$0xff] %v9325_v54 }
 0x1ca   :  { %v9327_v21 = vpop.f32.mrf.mxu0 }
 0x1cb   :  { %12768 = vst [vmem:[#allocation74_spill] sm:$0xff] %v9327_v21  ;;  %v1423_v21 = vmax.f32 %v8986_v60, %v9126_v56  ;;  %v1430_v56 = vmax.f32 %v9002_v3, %v9142_v10 }
 0x1cc   :  { %v9329_v29 = vpop.f32.mrf.mxu0 }
 0x1cd   :  { %12769 = vst [vmem:[#allocation75_spill] sm:$0xff] %v9329_v29 }
 0x1ce   :  { %v9331_v16 = vpop.f32.mrf.mxu0 }
 0x1cf   :  { %12770 = vst [vmem:[#allocation76_spill] sm:$0xff] %v9331_v16 }
 0x1d0   :  { %v9333_v27 = vpop.f32.mrf.mxu0 }
 0x1d1   :  { %12771 = vst [vmem:[#allocation77_spill] sm:$0xff] %v9333_v27  ;;  %v1426_v27 = vmax.f32 %v8988_v61, %v9128_v57 }
 0x1d2   :  { %v7755_v50 = vpop.f32.mrf.mxu0 }
 0x1d3   :  { %v1465_v26 = vmax.f32 %v7715_v33, %v7755_v50  ;;  %v1424_v33 = vmax.f32 %v8996_v0, %v9136_v63 }
 0x1d4   :  { %v1264_v24 = vpop.f32.mrf.mxu0 }
 0x1d5   :  { %v1505_v54 = vmax.f32 %v1425_v58, %v1465_v26  ;;  %v1463_v29 = vmax.f32 %v1104_v38, %v1264_v24  ;;  %v1429_v24 = vmax.f32 %v8998_v1, %v9138_v4  ;;  %v1427_v38 = vmax.f32 %v9000_v2, %v9140_v5 }
 0x1d6   :  { %v7756_v25 = vpop.f32.mrf.mxu0 }
 0x1d7   :  { %v1552_v16 = vadd.f32 %v9340_v52, %v1505_v54  ;;  %v1503_v20 = vmax.f32 %v1423_v21, %v1463_v29  ;;  %v1466_v59 = vmax.f32 %v7716_v45, %v7756_v25 }
 0x1d8   :  { %v1267_v50 = vpop.f32.mrf.mxu0 }
 0x1d9   :  { %v9349_v55 = vmax.f32 %v1552_v16, 0.0  ;;  %v1550_v11 = vadd.f32 %v9340_v52, %v1503_v20  ;;  %v1506_v49 = vmax.f32 %v1426_v27, %v1466_v59  ;;  %v1464_v60 = vmax.f32 %v9255_v39, %v1267_v50 }
 0x1da   :  { %v7759_v26 = vpop.f32.mrf.mxu0  ;;  %v1433_v16 = vmax.f32 %v9012_v7, %v9152_v22  ;;  %v1431_v59 = vmax.f32 %v9014_v8, %v9154_v23 }
 0x1db   :  { %1632 = vst [vmem:[#allocation2 + $0x10] sm:$0xff] %v9349_v55  ;;  %v1590_v61 = vmax.f32 %v1550_v11, 0.0  ;;  %v1553_v21 = vadd.f32 %v9340_v52, %v1506_v49  ;;  %v1504_v25 = vmax.f32 %v1424_v33, %v1464_v60  ;;  %v1469_v0 = vmax.f32 %v9257_v47, %v7759_v26 }
 0x1dc   :  { %v1280_v45 = vpop.f32.mrf.mxu0  ;;  %v1428_v11 = vmax.f32 %v9010_v6, %v9150_v17  ;;  %v1434_v60 = vmax.f32 %v9016_v9, %v9156_v28 }
 0x1dd   :  { %1630 = vst [vmem:[#allocation2] sm:$0xff] %v1590_v61  ;;  %v1593_v20 = vmax.f32 %v1553_v21, 0.0  ;;  %v1551_v27 = vadd.f32 %v9340_v52, %v1504_v25  ;;  %v1509_v54 = vmax.f32 %v1429_v24, %v1469_v0  ;;  %v1467_v1 = vmax.f32 %v9259_v37, %v1280_v45 }
 0x1de   :  { %v7760_v57 = vpop.f32.mrf.mxu0  ;;  %v9365_v49 = vpack.c.bf16 %v9349_v55, %v1590_v61 }
 0x1df   :  { %1633 = vst [vmem:[#allocation2 + $0x18] sm:$0xff] %v1593_v20  ;;  %v1591_v63 = vmax.f32 %v1551_v27, 0.0  ;;  %v1556_v4 = vadd.f32 %v9340_v52, %v1509_v54  ;;  %v1507_v2 = vmax.f32 %v1427_v38, %v1467_v1  ;;  %v1470_v5 = vmax.f32 %v9261_v36, %v7760_v57 }
 0x1e0   :  { %v1283_v29 = vpop.f32.mrf.mxu0  ;;  %v1437_v27 = vmax.f32 %v9026_v13, %v9166_v40 }
 0x1e1   :  { %1631 = vst [vmem:[#allocation2 + $0x8] sm:$0xff] %v1591_v63  ;;  %v9371_v37 = vmax.f32 %v1556_v4, 0.0  ;;  %v1554_v3 = vadd.f32 %v9340_v52, %v1507_v2  ;;  %v1510_v10 = vmax.f32 %v1430_v56, %v1470_v5  ;;  %v1468_v58 = vmax.f32 %v9263_v43, %v1283_v29 }
 0x1e2   :  { %v7763_v47 = vpop.f32.mrf.mxu0  ;;  %v1438_v2 = vmax.f32 %v9030_v15, %v9170_v46 }
 0x1e3   :  { %1636 = vst [vmem:[#allocation2 + $0x30] sm:$0xff] %v9371_v37  ;;  %v9378_v39 = vmax.f32 %v1554_v3, 0.0  ;;  %v1557_v36 = vadd.f32 %v9340_v52, %v1510_v10  ;;  %v1508_v6 = vmax.f32 %v1428_v11, %v1468_v58  ;;  %v1473_v17 = vmax.f32 %v9265_v42, %v7763_v47 }
 0x1e4   :  { %v1296_v33 = vpop.f32.mrf.mxu0 }
 0x1e5   :  { %1634 = vst [vmem:[#allocation2 + $0x20] sm:$0xff] %v9378_v39  ;;  %v1597_v43 = vmax.f32 %v1557_v36, 0.0  ;;  %v1555_v50 = vadd.f32 %v9340_v52, %v1508_v6  ;;  %v1513_v7 = vmax.f32 %v1433_v16, %v1473_v17  ;;  %v1471_v22 = vmax.f32 %v9272_v44, %v1296_v33 }
 0x1e6   :  { %v7764_v24 = vpop.f32.mrf.mxu0  ;;  %v1687_v26 = vpack.c.bf16 %v9371_v37, %v9378_v39  ;;  %v1432_v44 = vmax.f32 %v9024_v12, %v9164_v35  ;;  %v9401_v20 = vld [vmem:[#allocation2 + $0x11] sm:$0xff] }
 0x1e7   :  { %1637 = vst [vmem:[#allocation2 + $0x38] sm:$0xff] %v1597_v43  ;;  %v1595_v8 = vmax.f32 %v1555_v50, 0.0  ;;  %v1560_v23 = vadd.f32 %v9340_v52, %v1513_v7  ;;  %v1511_v61 = vmax.f32 %v1431_v59, %v1471_v22  ;;  %v1474_v21 = vmax.f32 %v9275_v51, %v7764_v24  ;;  %v9436_v17 = vld [vmem:[#allocation2 + $0x12] sm:$0xff]  ;;  %v12772_v50 = vld [vmem:[#allocation54_spill] sm:$0xff] }
 0x1e8   :  { %v1299_v25 = vpop.f32.mrf.mxu0  ;;  %v1710_v0 = vld [vmem:[#allocation2 + $0x1] sm:$0xff]  ;;  %v8222_v59 = vld [vmem:[%s12534_s3 + $0x30] sm:$0xff]  }
 0x1e9   :  { %1635 = vst [vmem:[#allocation2 + $0x28] sm:$0xff] %v1595_v8  ;;  %v9397_v9 = vmax.f32 %v1560_v23, 0.0  ;;  %v1558_v28 = vadd.f32 %v9340_v52, %v1511_v61  ;;  %v1514_v38 = vmax.f32 %v1434_v60, %v1474_v21  ;;  %v1472_v45 = vmax.f32 %v9277_v32, %v1299_v25  ;;  %v12773_v22 = vld [vmem:[#allocation30_spill] sm:$0xff]  ;;  %v12774_v60 = vld [vmem:[#allocation7_spill] sm:$0xff] }
 0x1ea   :  { %v7767_v54 = vpop.f32.mrf.mxu0  ;;  %v1726_v51 = vpack.c.bf16 %v9401_v20, %v1710_v0  ;;  %v1435_v32 = vmax.f32 %v9028_v14, %v9168_v41  ;;  %v1439_v24 = vmax.f32 %v12774_v60, %v12773_v22  ;;  %v12776_v0 = vld [vmem:[#allocation53_spill] sm:$0xff]  ;;  %v12838_v14 = vld [vmem:[#allocation28_spill] sm:$0xff] }
 0x1eb   :  { %1640 = vst [vmem:[#allocation2 + $0x50] sm:$0xff] %v9397_v9  ;;  %v9407_v12 = vmax.f32 %v1558_v28, 0.0  ;;  %v1561_v35 = vadd.f32 %v9340_v52, %v1514_v38  ;;  %v1512_v1 = vmax.f32 %v1432_v44, %v1472_v45  ;;  %v1477_v56 = vmax.f32 %v9279_v34, %v7767_v54  ;;  %v12775_v44 = vld [vmem:[#allocation55_spill] sm:$0xff]  ;;  %v12778_v38 = vld [vmem:[#allocation8_spill] sm:$0xff] }
 0x1ec   :  { %7809 = vmatprep.mubr.bf16.mxu1 %v1726_v51  ;;  %v1312_v57 = vpop.f32.mrf.mxu0  ;;  %v12777_v28 = vld [vmem:[#allocation31_spill] sm:$0xff] }
 0x1ed   :  { %1638 = vst [vmem:[#allocation2 + $0x40] sm:$0xff] %v9407_v12  ;;  %v1601_v13 = vmax.f32 %v1561_v35, 0.0  ;;  %v1559_v40 = vadd.f32 %v9340_v52, %v1512_v1  ;;  %v1517_v63 = vmax.f32 %v1437_v27, %v1477_v56  ;;  %v1475_v4 = vmax.f32 %v9281_v31, %v1312_v57  ;;  %v8223_v54 = vld [vmem:[%s12534_s3 + $0x28] sm:$0xff]  }
 0x1ee   :  { %v7768_v5 = vpop.f32.mrf.mxu0  ;;  %v1688_v34 = vpack.c.bf16 %v9397_v9, %v9407_v12  ;;  %v1436_v31 = vmax.f32 %v9038_v18, %v9178_v53  ;;  %v9434_v6 = vld [vmem:[#allocation2 + $0x31] sm:$0xff]  ;;  %v1441_v18 = vmax.f32 %v9040_v19, %v9183_v62  ;;  %v1442_v45 = vmax.f32 %v12778_v38, %v12777_v28  ;;  %v12788_v38 = vld [vmem:[#allocation59_spill] sm:$0xff] }
 0x1ef   :  { %1641 = vst [vmem:[#allocation2 + $0x58] sm:$0xff] %v1601_v13  ;;  %v1599_v41 = vmax.f32 %v1559_v40, 0.0  ;;  %v1564_v11 = vadd.f32 %v9340_v52, %v1517_v63  ;;  %v1515_v29 = vmax.f32 %v1435_v32, %v1475_v4  ;;  %v1478_v3 = vmax.f32 %v9283_v48, %v7768_v5  ;;  %v12779_v57 = vld [vmem:[#allocation56_spill] sm:$0xff]  ;;  %v12781_v63 = vld [vmem:[#allocation9_spill] sm:$0xff] }
 0x1f0   :  { %v1315_v10 = vpop.f32.mrf.mxu0  ;;  %v9426_v58 = vld [vmem:[#allocation2 + $0x21] sm:$0xff]  ;;  %v12780_v40 = vld [vmem:[#allocation32_spill] sm:$0xff] }
 0x1f1   :  { %v9428_v15 = vld [vmem:[#allocation2 + $0x22] sm:$0xff]  ;;  %1639 = vst [vmem:[#allocation2 + $0x48] sm:$0xff] %v1599_v41  ;;  %v9430_v46 = vmax.f32 %v1564_v11, 0.0  ;;  %v1562_v16 = vadd.f32 %v9340_v52, %v1515_v29  ;;  %v1518_v47 = vmax.f32 %v1438_v2, %v1478_v3  ;;  %v1476_v36 = vmax.f32 %v9285_v30, %v1315_v10 }
 0x1f2   :  { %v7771_v48 = vpop.f32.mrf.mxu0  ;;  %v1727_v53 = vpack.c.bf16 %v9434_v6, %v9426_v58  ;;  %v1440_v4 = vmax.f32 %v12781_v63, %v12780_v40 }
 0x1f3   :  { %1644 = vst [vmem:[#allocation2 + $0x70] sm:$0xff] %v9430_v46  ;;  %v9450_v43 = vmax.f32 %v1562_v16, 0.0  ;;  %v1565_v19 = vadd.f32 %v9340_v52, %v1518_v47  ;;  %v1516_v62 = vmax.f32 %v1436_v31, %v1476_v36  ;;  %v1481_v7 = vmax.f32 %v12772_v50, %v7771_v48  ;;  %v12782_v31 = vld [vmem:[#allocation57_spill] sm:$0xff] }
 0x1f4   :  { %7810 = vmatmul.mubr.bf16.vlgmr.msra.gmra.mxu1 %v1727_v53  ;;  %v1328_v8 = vpop.f32.mrf.mxu0  ;;  %v9481_v47 = vld [vmem:[#allocation2 + $0x32] sm:$0xff] }
 0x1f5   :  { %1642 = vst [vmem:[#allocation2 + $0x60] sm:$0xff] %v9450_v43  ;;  %v1605_v23 = vmax.f32 %v1565_v19, 0.0  ;;  %v1563_v61 = vadd.f32 %v9340_v52, %v1516_v62  ;;  %v1521_v21 = vmax.f32 %v1441_v18, %v1481_v7  ;;  %v1479_v25 = vmax.f32 %v12775_v44, %v1328_v8  ;;  %7826 = vmatpush3.bf16.msra.mxu1 %v12776_v0  ;;  %v12783_v36 = vld [vmem:[#allocation33_spill] sm:$0xff]  ;;  %v12784_v18 = vld [vmem:[#allocation10_spill] sm:$0xff] }
 0x1f6   :  { %v7772_v27 = vpop.f32.mrf.mxu0  ;;  %7827 = vmatprep.subr.bf16.mxu1 %v8222_v59  ;;  %v1689_v51 = vpack.c.bf16 %v9430_v46, %v9450_v43  ;;  %v9479_v16 = vld [vmem:[#allocation2 + $0x51] sm:$0xff]  ;;  %v1445_v48 = vmax.f32 %v12784_v18, %v12783_v36  ;;  %v8224_v62 = vld [vmem:[%s12534_s3 + $0x20] sm:$0xff]  }
 0x1f7   :  { %1645 = vst [vmem:[#allocation2 + $0x78] sm:$0xff] %v1605_v23  ;;  %v1603_v1 = vmax.f32 %v1563_v61, 0.0  ;;  %v1568_v56 = vadd.f32 %v9340_v52, %v1521_v21  ;;  %v1519_v32 = vmax.f32 %v1439_v24, %v1479_v25  ;;  %v1482_v13 = vmax.f32 %v12779_v57, %v7772_v27  ;;  %v12785_v24 = vld [vmem:[#allocation58_spill] sm:$0xff]  ;;  %v12787_v61 = vld [vmem:[#allocation11_spill] sm:$0xff] }
 0x1f8   :  { %v1331_v2 = vpop.f32.mrf.mxu0  ;;  %v9473_v5 = vld [vmem:[#allocation2 + $0x41] sm:$0xff]  ;;  %v8225_v57 = vld [vmem:[%s12534_s3 + $0x18] sm:$0xff]  }
 0x1f9   :  { %v9475_v41 = vld [vmem:[#allocation2 + $0x42] sm:$0xff]  ;;  %1643 = vst [vmem:[#allocation2 + $0x68] sm:$0xff] %v1603_v1  ;;  %v1608_v11 = vmax.f32 %v1568_v56, 0.0  ;;  %v1566_v29 = vadd.f32 %v9340_v52, %v1519_v32  ;;  %v1522_v3 = vmax.f32 %v1442_v45, %v1482_v13  ;;  %v1480_v10 = vmax.f32 %v12782_v31, %v1331_v2  ;;  %7828 = vmatpush3.bf16.msra.mxu1 %v8222_v59  ;;  %v12786_v23 = vld [vmem:[#allocation34_spill] sm:$0xff]  ;;  %v12790_v1 = vld [vmem:[#allocation12_spill] sm:$0xff] }
 0x1fa   :  { %v7775_v53 = vpop.f32.mrf.mxu0  ;;  %v1728_v19 = vpack.c.bf16 %v9479_v16, %v9473_v5  ;;  %7829 = vmatprep.subr.bf16.mxu1 %v8223_v54  ;;  %v1443_v21 = vmax.f32 %v12787_v61, %v12786_v23  ;;  %v12789_v27 = vld [vmem:[#allocation35_spill] sm:$0xff]  ;;  %v12791_v2 = vld [vmem:[#allocation60_spill] sm:$0xff] }
 0x1fb   :  { %1648 = vst [vmem:[#allocation2 + $0x90] sm:$0xff] %v1608_v11  ;;  %v1606_v7 = vmax.f32 %v1566_v29, 0.0  ;;  %v1569_v22 = vadd.f32 %v9340_v52, %v1522_v3  ;;  %v1520_v60 = vmax.f32 %v1440_v4, %v1480_v10  ;;  %v1485_v8 = vmax.f32 %v12785_v24, %v7775_v53  ;;  %v12793_v29 = vld [vmem:[#allocation13_spill] sm:$0xff]  ;;  %v12826_v59 = vld [vmem:[#allocation24_spill] sm:$0xff] }
 0x1fc   :  { %7813 = vmatprep.mubr.bf16.mxu1 %v1728_v19  ;;  %v1344_v44 = vpop.f32.mrf.mxu0  ;;  %v1446_v56 = vmax.f32 %v12790_v1, %v12789_v27  ;;  %v12794_v19 = vld [vmem:[#allocation61_spill] sm:$0xff]  ;;  %v12798_v1 = vld [vmem:[#allocation38_spill] sm:$0xff] }
 0x1fd   :  { %1646 = vst [vmem:[#allocation2 + $0x80] sm:$0xff] %v1606_v7  ;;  %v1609_v25 = vmax.f32 %v1569_v22, 0.0  ;;  %v1567_v0 = vadd.f32 %v9340_v52, %v1520_v60  ;;  %v1525_v28 = vmax.f32 %v1445_v48, %v1485_v8  ;;  %v1483_v45 = vmax.f32 %v12788_v38, %v1344_v44  ;;  %7830 = vmatpush3.bf16.msra.mxu1 %v8223_v54  ;;  %v12792_v54 = vld [vmem:[#allocation36_spill] sm:$0xff]  ;;  %v9522_v60 = vld [vmem:[#allocation2 + $0x52] sm:$0xff]  ;;  %v12796_v8 = vld [vmem:[#allocation14_spill] sm:$0xff] }
 0x1fe   :  { %v7776_v32 = vpop.f32.mrf.mxu0  ;;  %7831 = vmatprep.subr.bf16.mxu1 %v8224_v62  ;;  %v9506_v13 = vpack.c.bf16 %v1606_v7, %v9430_v46  ;;  %v1444_v3 = vmax.f32 %v12793_v29, %v12792_v54  ;;  %v9520_v22 = vld [vmem:[#allocation2 + $0x71] sm:$0xff]  ;;  %v12801_v29 = vld [vmem:[#allocation39_spill] sm:$0xff] }
 0x1ff   :  { %1649 = vst [vmem:[#allocation2 + $0x98] sm:$0xff] %v1609_v25  ;;  %v1607_v40 = vmax.f32 %v1567_v0, 0.0  ;;  %v1572_v63 = vadd.f32 %v9340_v52, %v1525_v28  ;;  %v1523_v4 = vmax.f32 %v1443_v21, %v1483_v45  ;;  %v1486_v11 = vmax.f32 %v12791_v2, %v7776_v32  ;;  %v12795_v24 = vld [vmem:[#allocation37_spill] sm:$0xff]  ;;  %v12797_v45 = vld [vmem:[#allocation62_spill] sm:$0xff]  ;;  %v8235_v46 = vld [vmem:[%s12534_s3 + $0x88] sm:$0xff]  }
 0x200   :  { %v1347_v31 = vpop.f32.mrf.mxu0  ;;  %v9512_v10 = vld [vmem:[#allocation2 + $0x61] sm:$0xff]  ;;  %v1449_v23 = vmax.f32 %v12796_v8, %v12795_v24  ;;  %v8226_v44 = vld [vmem:[%s12534_s3 + $0x10] sm:$0xff]  }
 0x201   :  { %v9514_v36 = vld [vmem:[#allocation2 + $0x62] sm:$0xff]  ;;  %1647 = vst [vmem:[#allocation2 + $0x88] sm:$0xff] %v1607_v40  ;;  %v9516_v18 = vmax.f32 %v1572_v63, 0.0  ;;  %v1570_v48 = vadd.f32 %v9340_v52, %v1523_v4  ;;  %v1526_v53 = vmax.f32 %v1446_v56, %v1486_v11  ;;  %v1484_v7 = vmax.f32 %v12794_v19, %v1347_v31  ;;  %7832 = vmatpush3.bf16.msra.mxu1 %v8224_v62  ;;  %v12802_v31 = vld [vmem:[#allocation16_spill] sm:$0xff] }
 0x202   :  { %v7779_v61 = vpop.f32.mrf.mxu0  ;;  %v1729_v21 = vpack.c.bf16 %v9520_v22, %v9512_v10  ;;  %7833 = vmatprep.subr.bf16.mxu1 %v8225_v57  ;;  %v12799_v56 = vld [vmem:[#allocation15_spill] sm:$0xff] }
 0x203   :  { %1652 = vst [vmem:[#allocation2 + $0xb0] sm:$0xff] %v9516_v18  ;;  %v1610_v0 = vmax.f32 %v1570_v48, 0.0  ;;  %v1573_v28 = vadd.f32 %v9340_v52, %v1526_v53  ;;  %v1524_v38 = vmax.f32 %v1444_v3, %v1484_v7  ;;  %v1489_v27 = vmax.f32 %v12797_v45, %v7779_v61  ;;  %v12800_v11 = vld [vmem:[#allocation63_spill] sm:$0xff] }
 0x204   :  { %v1447_v32 = vmax.f32 %v12799_v56, %v12798_v1  ;;  %7814 = vmatmul.mubr.bf16.gmra.mxu1 %v1729_v21  ;;  %v1360_v40 = vpop.f32.mrf.mxu0  ;;  %v1450_v48 = vmax.f32 %v12802_v31, %v12801_v29  ;;  %v8227_v3 = vld [vmem:[%s12534_s3 + $0x8] sm:$0xff]   ;;  %v12805_v21 = vld [vmem:[#allocation17_spill] sm:$0xff]  ;;  %v12809_v31 = vld [vmem:[#allocation66_spill] sm:$0xff] }
 0x205   :  { %1650 = vst [vmem:[#allocation2 + $0xa0] sm:$0xff] %v1610_v0  ;;  %v1613_v63 = vmax.f32 %v1573_v28, 0.0  ;;  %v1571_v4 = vadd.f32 %v9340_v52, %v1524_v38  ;;  %v1529_v2 = vmax.f32 %v1449_v23, %v1489_v27  ;;  %v1487_v54 = vmax.f32 %v12800_v11, %v1360_v40  ;;  %7834 = vmatpush3.bf16.msra.mxu1 %v8225_v57  ;;  %v12803_v23 = vld [vmem:[#allocation64_spill] sm:$0xff]  ;;  %v12806_v56 = vld [vmem:[#allocation65_spill] sm:$0xff] }
 0x206   :  { %v7780_v53 = vpop.f32.mrf.mxu0  ;;  %7835 = vmatprep.subr.bf16.mxu1 %v8226_v44  ;;  %v9548_v19 = vpack.c.bf16 %v9516_v18, %v1610_v0  ;;  %v12804_v57 = vld [vmem:[#allocation40_spill] sm:$0xff]  ;;  %v12807_v40 = vld [vmem:[#allocation41_spill] sm:$0xff] }
 0x207   :  { %1653 = vst [vmem:[#allocation2 + $0xb8] sm:$0xff] %v1613_v63  ;;  %v1611_v7 = vmax.f32 %v1571_v4, 0.0  ;;  %v1576_v24 = vadd.f32 %v9340_v52, %v1529_v2  ;;  %v1527_v8 = vmax.f32 %v1447_v32, %v1487_v54  ;;  %v1490_v61 = vmax.f32 %v12803_v23, %v7780_v53  ;;  %v12808_v63 = vld [vmem:[#allocation18_spill] sm:$0xff] }
 0x208   :  { %v1448_v28 = vmax.f32 %v12805_v21, %v12804_v57  ;;  %v1363_v38 = vpop.f32.mrf.mxu0  ;;  %v1453_v4 = vmax.f32 %v12808_v63, %v12807_v40  ;;  %v8228_v32 = vld [vmem:[%s12534_s3] sm:$0xff]  }
 0x209   :  { %1651 = vst [vmem:[#allocation2 + $0xa8] sm:$0xff] %v1611_v7  ;;  %v9554_v45 = vmax.f32 %v1576_v24, 0.0  ;;  %v1574_v27 = vadd.f32 %v9340_v52, %v1527_v8  ;;  %v1530_v1 = vmax.f32 %v1450_v48, %v1490_v61  ;;  %v1488_v0 = vmax.f32 %v12806_v56, %v1363_v38  ;;  %7836 = vmatpush3.bf16.msra.mxu1 %v8226_v44  ;;  %v12810_v53 = vld [vmem:[#allocation42_spill] sm:$0xff]  ;;  %v12811_v44 = vld [vmem:[#allocation19_spill] sm:$0xff] }
 0x20a   :  { %v7783_v2 = vpop.f32.mrf.mxu0  ;;  %7837 = vmatprep.subr.bf16.mxu1 %v8227_v3  ;;  %v1451_v7 = vmax.f32 %v12811_v44, %v12810_v53  ;;  %v12812_v57 = vld [vmem:[#allocation67_spill] sm:$0xff] }
 0x20b   :  { %1656 = vst [vmem:[#allocation2 + $0xd0] sm:$0xff] %v9554_v45  ;;  %v9564_v11 = vmax.f32 %v1574_v27, 0.0  ;;  %v1577_v54 = vadd.f32 %v9340_v52, %v1530_v1  ;;  %v1528_v29 = vmax.f32 %v1448_v28, %v1488_v0  ;;  %v1493_v48 = vmax.f32 %v12809_v31, %v7783_v2  ;;  %v12813_v38 = vld [vmem:[#allocation43_spill] sm:$0xff]  ;;  %v12814_v27 = vld [vmem:[#allocation20_spill] sm:$0xff]  ;;  %v9578_v28 = vld [vmem:[%s12534_s3 + $0xb8] sm:$0xff]  }
 0x20c   :  { %v1376_v24 = vpop.f32.mrf.mxu0  ;;  %v1454_v56 = vmax.f32 %v12814_v27, %v12813_v38  ;;  %v12815_v2 = vld [vmem:[#allocation68_spill] sm:$0xff]  ;;  %v12817_v31 = vld [vmem:[#allocation21_spill] sm:$0xff]  ;;  %v12836_v40 = vld [vmem:[#allocation75_spill] sm:$0xff] }
 0x20d   :  { %1654 = vst [vmem:[#allocation2 + $0xc0] sm:$0xff] %v9564_v11  ;;  %v1617_v8 = vmax.f32 %v1577_v54, 0.0  ;;  %v1575_v23 = vadd.f32 %v9340_v52, %v1528_v29  ;;  %v1533_v61 = vmax.f32 %v1453_v4, %v1493_v48  ;;  %v1491_v21 = vmax.f32 %v12812_v57, %v1376_v24  ;;  %7838 = vmatpush3.bf16.msra.mxu1 %v8227_v3  ;;  %v12816_v29 = vld [vmem:[#allocation44_spill] sm:$0xff]  ;;  %v12818_v27 = vld [vmem:[#allocation69_spill] sm:$0xff] }
 0x20e   :  { %v7784_v1 = vpop.f32.mrf.mxu0  ;;  %7839 = vmatprep.subr.bf16.mxu1 %v8228_v32  ;;  %v1691_v0 = vpack.c.bf16 %v9554_v45, %v9564_v11  ;;  %v1452_v48 = vmax.f32 %v12817_v31, %v12816_v29  ;;  %v12823_v29 = vld [vmem:[#allocation23_spill] sm:$0xff] }
 0x20f   :  { %1657 = vst [vmem:[#allocation2 + $0xd8] sm:$0xff] %v1617_v8  ;;  %v1615_v63 = vmax.f32 %v1575_v23, 0.0  ;;  %v1580_v3 = vadd.f32 %v9340_v52, %v1533_v61  ;;  %v1531_v4 = vmax.f32 %v1451_v7, %v1491_v21  ;;  %v1494_v54 = vmax.f32 %v12815_v2, %v7784_v1  ;;  %v9592_v8 = vld [vmem:[#allocation2 + $0xb1] sm:$0xff]  ;;  %v12820_v7 = vld [vmem:[#allocation22_spill] sm:$0xff] }
 0x210   :  { %v1379_v53 = vpop.f32.mrf.mxu0  ;;  %v1718_v44 = vld [vmem:[#allocation2 + $0xa1] sm:$0xff]  ;;  %v12819_v23 = vld [vmem:[#allocation45_spill] sm:$0xff] }
 0x211   :  { %1655 = vst [vmem:[#allocation2 + $0xc8] sm:$0xff] %v1615_v63  ;;  %v9588_v24 = vmax.f32 %v1580_v3, 0.0  ;;  %v1578_v57 = vadd.f32 %v9340_v52, %v1531_v4  ;;  %v1534_v38 = vmax.f32 %v1454_v56, %v1494_v54  ;;  %v1492_v62 = vmax.f32 %v12818_v27, %v1379_v53  ;;  %7840 = vmatpush3.bf16.msra.mxu1 %v8228_v32  ;;  %v12821_v4 = vld [vmem:[#allocation70_spill] sm:$0xff] }
 0x212   :  { %v1457_v61 = vmax.f32 %v12820_v7, %v12819_v23  ;;  %v7787_v21 = vpop.f32.mrf.mxu0  ;;  %v1730_v1 = vpack.c.bf16 %v9592_v8, %v1718_v44  ;;  %7857 = vmatprep.subr.bf16.mxu1 %v9578_v28  ;;  %v12822_v54 = vld [vmem:[#allocation46_spill] sm:$0xff]  ;;  %v12824_v23 = vld [vmem:[#allocation71_spill] sm:$0xff] }
 0x213   :  { %1660 = vst [vmem:[#allocation2 + $0xf0] sm:$0xff] %v9588_v24  ;;  %v9599_v63 = vmax.f32 %v1578_v57, 0.0  ;;  %v1581_v3 = vadd.f32 %v9340_v52, %v1534_v38  ;;  %v1532_v56 = vmax.f32 %v1452_v48, %v1492_v62  ;;  %v1497_v2 = vmax.f32 %v12821_v4, %v7787_v21  ;;  %v12825_v57 = vld [vmem:[#allocation47_spill] sm:$0xff]  ;;  %v12827_v4 = vld [vmem:[#allocation72_spill] sm:$0xff] }
 0x214   :  { %v1455_v32 = vmax.f32 %v12823_v29, %v12822_v54  ;;  %7817 = vmatprep.mubr.bf16.mxu1 %v1730_v1  ;;  %v1392_v31 = vpop.f32.mrf.mxu0  ;;  %v1458_v30 = vmax.f32 %v12826_v59, %v12825_v57 }
 0x215   :  { %1658 = vst [vmem:[#allocation2 + $0xe0] sm:$0xff] %v9599_v63  ;;  %v1621_v53 = vmax.f32 %v1581_v3, 0.0  ;;  %v1579_v44 = vadd.f32 %v9340_v52, %v1532_v56  ;;  %v1537_v27 = vmax.f32 %v1457_v61, %v1497_v2  ;;  %v1495_v7 = vmax.f32 %v12824_v23, %v1392_v31  ;;  %v12828_v61 = vld [vmem:[#allocation48_spill] sm:$0xff]  ;;  %v12829_v2 = vld [vmem:[#allocation25_spill] sm:$0xff] }
 0x216   :  { %v7788_v38 = vpop.f32.mrf.mxu0  ;;  %v1692_v62 = vpack.c.bf16 %v9588_v24, %v9599_v63  ;;  %v1456_v54 = vmax.f32 %v12829_v2, %v12828_v61 }
 0x217   :  { %1661 = vst [vmem:[#allocation2 + $0xf8] sm:$0xff] %v1621_v53  ;;  %v1619_v21 = vmax.f32 %v1579_v44, 0.0  ;;  %v1584_v1 = vadd.f32 %v9340_v52, %v1537_v27  ;;  %v1535_v3 = vmax.f32 %v1455_v32, %v1495_v7  ;;  %v1498_v56 = vmax.f32 %v12827_v4, %v7788_v38  ;;  %v12830_v44 = vld [vmem:[#allocation73_spill] sm:$0xff]  ;;  %v12832_v38 = vld [vmem:[#allocation26_spill] sm:$0xff] }
 0x218   :  { %v1395_v29 = vpop.f32.mrf.mxu0  ;;  %v9618_v31 = vld [vmem:[#allocation2 + $0xc1] sm:$0xff]  ;;  %v9626_v27 = vld [vmem:[#allocation2 + $0xd1] sm:$0xff] }
 0x219   :  { %v9620_v59 = vld [vmem:[#allocation2 + $0xc2] sm:$0xff]  ;;  %1659 = vst [vmem:[#allocation2 + $0xe8] sm:$0xff] %v1619_v21  ;;  %v9622_v23 = vmax.f32 %v1584_v1, 0.0  ;;  %v1582_v57 = vadd.f32 %v9340_v52, %v1535_v3  ;;  %v1538_v53 = vmax.f32 %v1458_v30, %v1498_v56  ;;  %v1496_v25 = vmax.f32 %v12830_v44, %v1395_v29  ;;  %v9628_v32 = vld [vmem:[#allocation2 + $0xb2] sm:$0xff]  ;;  %v12833_v29 = vld [vmem:[#allocation74_spill] sm:$0xff] }
 0x21a   :  { %v12831_v7 = vld [vmem:[#allocation49_spill] sm:$0xff]  ;;  %v7791_v61 = vpop.f32.mrf.mxu0  ;;  %v1731_v2 = vpack.c.bf16 %v9626_v27, %v9618_v31 }
 0x21b   :  { %v1461_v4 = vmax.f32 %v12832_v38, %v12831_v7  ;;  %1664 = vst [vmem:[#allocation2 + $0x110] sm:$0xff] %v9622_v23  ;;  %v9639_v30 = vmax.f32 %v1582_v57, 0.0  ;;  %v1585_v3 = vadd.f32 %v9340_v52, %v1538_v53  ;;  %v1536_v56 = vmax.f32 %v1456_v54, %v1496_v25  ;;  %v12834_v7 = vld [vmem:[#allocation50_spill] sm:$0xff]  ;;  %v12835_v38 = vld [vmem:[#allocation27_spill] sm:$0xff] }
 0x21c   :  { %v1501_v44 = vmax.f32 %v12833_v29, %v7791_v61  ;;  %v1459_v50 = vmax.f32 %v12835_v38, %v12834_v7  ;;  %7818 = vmatmul.mubr.bf16.gmra.mxu1 %v1731_v2  ;;  %v1408_v33 = vpop.f32.mrf.mxu0  ;;  %v12837_v57 = vld [vmem:[#allocation51_spill] sm:$0xff]  ;;  %v12839_v29 = vld [vmem:[#allocation76_spill] sm:$0xff] }
 0x21d   :  { %1662 = vst [vmem:[#allocation2 + $0x100] sm:$0xff] %v9639_v30  ;;  %v1625_v21 = vmax.f32 %v1585_v3, 0.0  ;;  %v1583_v48 = vadd.f32 %v9340_v52, %v1536_v56  ;;  %v1499_v35 = vmax.f32 %v12836_v40, %v1408_v33  ;;  %v1462_v42 = vmax.f32 %v12838_v14, %v12837_v57 }
 0x21e   :  { %v1541_v1 = vmax.f32 %v1461_v4, %v1501_v44  ;;  %v7792_v53 = vpop.f32.mrf.mxu0  ;;  %v12840_v4 = vld [vmem:[#allocation52_spill] sm:$0xff]  ;;  %v12841_v44 = vld [vmem:[#allocation29_spill] sm:$0xff] }
 0x21f   :  { %1665 = vst [vmem:[#allocation2 + $0x118] sm:$0xff] %v1625_v21  ;;  %v1623_v61 = vmax.f32 %v1583_v48, 0.0  ;;  %v1539_v3 = vmax.f32 %v1459_v50, %v1499_v35  ;;  %v1502_v56 = vmax.f32 %v12839_v29, %v7792_v53  ;;  %v1460_v33 = vmax.f32 %v12841_v44, %v12840_v4  ;;  %v12842_v21 = vld [vmem:[#allocation77_spill] sm:$0xff] }
 0x220   :  { %v1588_v2 = vadd.f32 %v9340_v52, %v1541_v1  ;;  %v1411_v40 = vpop.f32.mrf.mxu0  ;;  %v9658_v7 = vld [vmem:[#allocation2 + $0xe1] sm:$0xff]  ;;  %v9664_v25 = vld [vmem:[#allocation2 + $0xf1] sm:$0xff] }
 0x221   :  { %v9660_v14 = vld [vmem:[#allocation2 + $0xe2] sm:$0xff]  ;;  %1663 = vst [vmem:[#allocation2 + $0x108] sm:$0xff] %v1623_v61  ;;  %v1586_v57 = vadd.f32 %v9340_v52, %v1539_v3  ;;  %v1542_v54 = vmax.f32 %v1462_v42, %v1502_v56  ;;  %v1500_v48 = vmax.f32 %v12842_v21, %v1411_v40  ;;  %v9666_v35 = vld [vmem:[#allocation2 + $0xd2] sm:$0xff]  ;;  %v1732_v50 = vpack.c.bf16 %v9664_v25, %v9658_v7 }
 0x222   :  { %v1628_v38 = vmax.f32 %v1588_v2, 0.0  ;;  %v2467_v1 = vpack.c.bf16 %v9658_v7, %v9626_v27  ;;  %v2669_v53 = vpack.c.bf16 %v9660_v14, %v9666_v35  ;;  %v9684_v40 = vld [vmem:[#allocation2 + $0xf2] sm:$0xff]  ;;  %v8260_v27 = vld [vmem:[%s12534_s3 + $0x140] sm:$0xff]  }
 0x223   :  { %v9674_v61 = vmax.f32 %v1586_v57, 0.0  ;;  %v1589_v42 = vadd.f32 %v9340_v52, %v1542_v54  ;;  %v1540_v2 = vmax.f32 %v1460_v33, %v1500_v48  ;;  %7821 = vmatprep.mubr.bf16.mxu1 %v1732_v50  ;;  %v8230_v48 = vld [vmem:[%s12534_s3 + $0xb0] sm:$0xff]   ;;  %v8231_v50 = vld [vmem:[%s12534_s3 + $0xa8] sm:$0xff]   ;;  %v8261_v7 = vld [vmem:[%s12534_s3 + $0x1b8] sm:$0xff]  }
 0x224   :  { %1668 = vst [vmem:[#allocation2 + $0x130] sm:$0xff] %v1628_v38 }
 0x225   :  { %1666 = vst [vmem:[#allocation2 + $0x120] sm:$0xff] %v9674_v61  ;;  %v1629_v3 = vmax.f32 %v1589_v42, 0.0  ;;  %v1587_v29 = vadd.f32 %v9340_v52, %v1540_v2  ;;  %v2267_v56 = vpack.c.bf16 %v9674_v61, %v9622_v23  ;;  %v9682_v4 = vpack.c.bf16 %v1628_v38, %v9674_v61  ;;  %v8237_v2 = vld [vmem:[%s12534_s3 + $0xf8] sm:$0xff]   ;;  %v9876_v61 = vld [vmem:[#allocation2 + $0x81] sm:$0xff] }
 0x226   :  { %v9688_v54 = vld [vmem:[#allocation2 + $0x111] sm:$0xff]  ;;  %v12843_v42 = vpack.c.bf16 %v9622_v23, %v9639_v30  ;;  %v12851_v23 = vpack.c.bf16 %v9473_v5, %v9434_v6  ;;  %v2465_v5 = vpack.c.bf16 %v9876_v61, %v9520_v22 }
 0x227   :  { %1669 = vst [vmem:[#allocation2 + $0x138] sm:$0xff] %v1629_v3  ;;  %v1627_v44 = vmax.f32 %v1587_v29, 0.0  ;;  %v9752_v3 = vpack.c.bf16 %v9481_v47, %v9428_v15  ;;  %v8238_v29 = vld [vmem:[%s12534_s3 + $0xf0] sm:$0xff]  }
 0x228   :  { %v9686_v57 = vld [vmem:[#allocation2 + $0x101] sm:$0xff]  ;;  %v8293_v6 = vld [vmem:[%s12536_s5 + $0x50] ss:$8 sps:$4 sm:$0xff]  }
 0x229   :  { %v9690_v33 = vld [vmem:[#allocation2 + $0x102] sm:$0xff]  ;;  %1667 = vst [vmem:[#allocation2 + $0x128] sm:$0xff] %v1627_v44  ;;  %v1733_v52 = vpack.c.bf16 %v9688_v54, %v9686_v57  ;;  %v2468_v21 = vpack.c.bf16 %v9686_v57, %v9664_v25  ;;  %v9759_v44 = vpack.c.bf16 %v9522_v60, %v9475_v41  ;;  %v8258_v22 = vld [vmem:[%s12534_s3 + $0x150] sm:$0xff]   ;;  %v12854_v25 = vpack.c.bf16 %v9428_v15, %v9436_v17 }
 0x22a   :  { %v2670_v38 = vpack.c.bf16 %v9690_v33, %v9684_v40  ;;  %v12855_v57 = vpack.c.bf16 %v9475_v41, %v9481_v47  ;;  %v12856_v15 = vpack.c.bf16 %v9514_v36, %v9522_v60  ;;  %v8264_v41 = vld [vmem:[%s12534_s3 + $0x1a0] sm:$0xff]   ;;  %v12857_v47 = vpack.c.bf16 %v9620_v59, %v9628_v32 }
 0x22b   :  { %7822 = vmatmul.mubr.bf16.gmra.mxu1 %v1733_v52  ;;  %v8239_v52 = vld [vmem:[%s12534_s3 + $0xe8] sm:$0xff]  }
 0x22c   :  { %7841 = vmatprep.mubr.bf16.mxu1 %v9365_v49  ;;  %v8232_v49 = vld [vmem:[%s12534_s3 + $0xa0] sm:$0xff]  }
 0x22d   :  { %v8294_v60 = vld [vmem:[%s12536_s5 + $0x44] ss:$8 sps:$4 sm:$0xff]  }
 0x233   :  { %7842 = vmatmul.mubr.bf16.vlgmr.msra.gmra.mxu1 %v1687_v26  ;;  %v8233_v26 = vld [vmem:[%s12534_s3 + $0x98] sm:$0xff]  }
 0x234   :  { %7858 = vmatpush3.bf16.msra.mxu1 %v9578_v28  ;;  %7845 = vmatprep.mubr.bf16.mxu1 %v1688_v34  ;;  %v8234_v34 = vld [vmem:[%s12534_s3 + $0x90] sm:$0xff]  }
 0x235   :  { %7859 = vmatprep.subr.bf16.mxu1 %v8230_v48  ;;  %v8269_v28 = vld [vmem:[%s12536_s5 + $0x70] ss:$8 sps:$4 sm:$0xff]  }
 0x238   :  { %7860 = vmatpush3.bf16.msra.mxu1 %v8230_v48  ;;  %v2049_v48 = vld [vmem:[#allocation2 + $0xa2] sm:$0xff] }
 0x239   :  { %7861 = vmatprep.subr.bf16.mxu1 %v8231_v50 }
 0x23b   :  { %7846 = vmatmul.mubr.bf16.gmra.mxu1 %v1689_v51  ;;  %v8267_v51 = vld [vmem:[%s12536_s5 + $0x74] ss:$8 sps:$4 sm:$0xff]  }
 0x23c   :  { %7862 = vmatpush3.bf16.msra.mxu1 %v8231_v50  ;;  %7849 = vmatprep.mubr.bf16.mxu1 %v9548_v19  ;;  %v2041_v19 = vld [vmem:[#allocation2 + $0x2] sm:$0xff]  ;;  %v9766_v50 = vld [vmem:[#allocation2 + $0x72] sm:$0xff] }
 0x23d   :  { %7863 = vmatprep.subr.bf16.mxu1 %v8232_v49  ;;  %4026 = vmatprep.subr.bf16.mxu0 %v8267_v51  ;;  %v9782_v51 = vpack.c.bf16 %v9666_v35, %v9620_v59  ;;  %v8266_v59 = vld [vmem:[%s12534_s3 + $0x190] sm:$0xff]  }
 0x23e   :  { %4027 = vmatpush1.bf16.msra.mxu0 %v8269_v28  ;;  %v9789_v28 = vpack.c.bf16 %v9684_v40, %v9660_v14  ;;  %v2852_v35 = vld [vmem:[#allocation2 + $0x30] sm:$0xff] }
 0x240   :  { %7864 = vmatpush3.bf16.msra.mxu1 %v8232_v49  ;;  %v9770_v49 = vpack.c.bf16 %v9766_v50, %v9514_v36  ;;  %v8265_v36 = vld [vmem:[%s12534_s3 + $0x198] sm:$0xff]  }
 0x241   :  { %7865 = vmatprep.subr.bf16.mxu1 %v8233_v26 }
 0x243   :  { %7850 = vmatmul.mubr.bf16.gmra.mxu1 %v1691_v0  ;;  %v8236_v0 = vld [vmem:[%s12534_s3 + $0x80] sm:$0xff]  }
 0x244   :  { %7866 = vmatpush3.bf16.msra.mxu1 %v8233_v26  ;;  %7853 = vmatprep.mubr.bf16.mxu1 %v1692_v62  ;;  %v2057_v62 = vpack.c.bf16 %v9436_v17, %v2041_v19  ;;  %v8240_v26 = vld [vmem:[%s12534_s3 + $0xe0] sm:$0xff]   ;;  %v8242_v19 = vld [vmem:[%s12534_s3 + $0xd0] sm:$0xff]   ;;  %v8263_v17 = vld [vmem:[%s12534_s3 + $0x1a8] sm:$0xff]  }
 0x245   :  { %7867 = vmatprep.subr.bf16.mxu1 %v8234_v34 }
 0x248   :  { %7868 = vmatpush3.bf16.msra.mxu1 %v8234_v34  ;;  %v2061_v34 = vpack.c.bf16 %v9628_v32, %v2049_v48  ;;  %v8280_v48 = vld [vmem:[%s12536_s5 + $0x64] ss:$8 sps:$4 sm:$0xff]  }
 0x249   :  { %7869 = vmatprep.subr.bf16.mxu1 %v8235_v46  ;;  %4028 = vmatprep.subr.bf16.mxu0 %v8280_v48  ;;  %v9967_v48 = vld [vmem:[#allocation2 + $0x122] sm:$0xff] }
 0x24b   :  { %7854 = vmatmul.mubr.bf16.gmra.mxu1 %v12843_v42 }
 0x24c   :  { %7870 = vmatpush3.bf16.msra.mxu1 %v8235_v46  ;;  %7873 = vmatprep.mubr.bf16.mxu1 %v2057_v62  ;;  %v8241_v46 = vld [vmem:[%s12534_s3 + $0xd8] sm:$0xff]  }
 0x24d   :  { %7871 = vmatprep.subr.bf16.mxu1 %v8236_v0  ;;  %v9796_v62 = vld [vmem:[#allocation2 + $0x112] sm:$0xff] }
 0x24e   :  { %v9800_v42 = vpack.c.bf16 %v9796_v62, %v9690_v33  ;;  %v2671_v14 = vpack.c.bf16 %v9967_v48, %v9796_v62  ;;  %v2855_v62 = vld [vmem:[#allocation2 + $0x60] sm:$0xff] }
 0x250   :  { %7872 = vmatpush3.bf16.msra.mxu1 %v8236_v0  ;;  %v8243_v0 = vld [vmem:[%s12534_s3 + $0xc8] sm:$0xff]  }
 0x251   :  { %7889 = vmatprep.subr.bf16.mxu1 %v8237_v2 }
 0x253   :  { %7874 = vmatmul.mubr.bf16.vlgmr.msra.gmra.mxu1 %v9752_v3 }
 0x254   :  { %7890 = vmatpush3.bf16.msra.mxu1 %v8237_v2  ;;  %7877 = vmatprep.mubr.bf16.mxu1 %v9759_v44  ;;  %v8244_v2 = vld [vmem:[%s12534_s3 + $0xc0] sm:$0xff]  }
 0x255   :  { %7891 = vmatprep.subr.bf16.mxu1 %v8238_v29 }
 0x258   :  { %7892 = vmatpush3.bf16.msra.mxu1 %v8238_v29  ;;  %v12844_v29 = vpack.c.bf16 %v9378_v39, %v9349_v55  ;;  %v8246_v55 = vld [vmem:[%s12534_s3 + $0x130] sm:$0xff]   ;;  %v12845_v39 = vpack.c.bf16 %v9407_v12, %v9371_v37  ;;  %v12847_v37 = vpack.c.bf16 %v9564_v11, %v9516_v18  ;;  %v8251_v18 = vld [vmem:[%s12534_s3 + $0x108] sm:$0xff]   ;;  %v8252_v11 = vld [vmem:[%s12534_s3 + $0x100] sm:$0xff]  }
 0x259   :  { %7893 = vmatprep.subr.bf16.mxu1 %v8239_v52  ;;  %v8250_v12 = vld [vmem:[%s12534_s3 + $0x110] sm:$0xff]  }
 0x25b   :  { %7878 = vmatmul.mubr.bf16.gmra.mxu1 %v9770_v49 }
 0x25c   :  { %7894 = vmatpush3.bf16.msra.mxu1 %v8239_v52  ;;  %7881 = vmatprep.mubr.bf16.mxu1 %v2061_v34  ;;  %v8245_v52 = vld [vmem:[%s12534_s3 + $0x138] sm:$0xff]   ;;  %v12846_v34 = vpack.c.bf16 %v9450_v43, %v9397_v9  ;;  %v12848_v43 = vpack.c.bf16 %v9599_v63, %v9554_v45  ;;  %v12850_v45 = vpack.c.bf16 %v9426_v58, %v9401_v20  ;;  %v8254_v63 = vld [vmem:[%s12534_s3 + $0x170] sm:$0xff]   ;;  %v8255_v58 = vld [vmem:[%s12534_s3 + $0x168] sm:$0xff]  }
 0x25d   :  { %7895 = vmatprep.subr.bf16.mxu1 %v8240_v26  ;;  %v8249_v9 = vld [vmem:[%s12534_s3 + $0x118] sm:$0xff]   ;;  %v12852_v20 = vpack.c.bf16 %v9512_v10, %v9479_v16  ;;  %v8256_v16 = vld [vmem:[%s12534_s3 + $0x160] sm:$0xff]   ;;  %v12853_v10 = vpack.c.bf16 %v9618_v31, %v9592_v8  ;;  %v8259_v8 = vld [vmem:[%s12534_s3 + $0x148] sm:$0xff]  }
 0x25e   :  { %v9907_v31 = vld [vmem:[#allocation2 + $0x121] sm:$0xff] }
 0x260   :  { %7896 = vmatpush3.bf16.msra.mxu1 %v8240_v26  ;;  %v8282_v26 = vld [vmem:[%s12536_s5 + $0x60] ss:$8 sps:$4 sm:$0xff]  }
 0x261   :  { %7897 = vmatprep.subr.bf16.mxu1 %v8241_v46  ;;  %4029 = vmatpush1.bf16.msra.mxu0 %v8282_v26  ;;  %v2851_v26 = vld [vmem:[#allocation2 + $0x20] sm:$0xff] }
 0x262   :  { %v2867_v40 = vpack.c.bf16 %v2852_v35, %v2851_v26  ;;  %v3056_v26 = vld [vmem:[#allocation2 + $0x51] sm:$0xff] }
 0x263   :  { %7882 = vmatmul.mubr.bf16.gmra.mxu1 %v9782_v51 }
 0x264   :  { %7898 = vmatpush3.bf16.msra.mxu1 %v8241_v46  ;;  %7885 = vmatprep.mubr.bf16.mxu1 %v9789_v28  ;;  %v8247_v46 = vld [vmem:[%s12534_s3 + $0x128] sm:$0xff]  }
 0x265   :  { %7899 = vmatprep.subr.bf16.mxu1 %v8242_v19 }
 0x268   :  { %7900 = vmatpush3.bf16.msra.mxu1 %v8242_v19  ;;  %v8248_v19 = vld [vmem:[%s12534_s3 + $0x120] sm:$0xff]  }
 0x269   :  { %7901 = vmatprep.subr.bf16.mxu1 %v8243_v0 }
 0x26b   :  { %7886 = vmatmul.mubr.bf16.gmra.mxu1 %v9800_v42 }
 0x26c   :  { %7902 = vmatpush3.bf16.msra.mxu1 %v8243_v0  ;;  %7905 = vmatprep.mubr.bf16.mxu1 %v12844_v29  ;;  %v8257_v0 = vld [vmem:[%s12534_s3 + $0x158] sm:$0xff]  }
 0x26d   :  { %7903 = vmatprep.subr.bf16.mxu1 %v8244_v2 }
 0x270   :  { %7904 = vmatpush3.bf16.msra.mxu1 %v8244_v2  ;;  %v2469_v2 = vpack.c.bf16 %v9907_v31, %v9688_v54  ;;  %v9932_v54 = vld [vmem:[#allocation2 + $0x82] sm:$0xff] }
 0x271   :  { %7921 = vmatprep.subr.bf16.mxu1 %v8245_v52 }
 0x273   :  { %7906 = vmatmul.mubr.bf16.vlgmr.msra.gmra.mxu1 %v12845_v39  ;;  %v2853_v39 = vld [vmem:[#allocation2 + $0x40] sm:$0xff] }
 0x274   :  { %7922 = vmatpush3.bf16.msra.mxu1 %v8245_v52  ;;  %7909 = vmatprep.mubr.bf16.mxu1 %v12846_v34  ;;  %v8270_v52 = vld [vmem:[%s12534_s3 + $0x188] sm:$0xff]  }
 0x275   :  { %7923 = vmatprep.subr.bf16.mxu1 %v8246_v55 }
 0x278   :  { %7924 = vmatpush3.bf16.msra.mxu1 %v8246_v55 }
 0x279   :  { %7925 = vmatprep.subr.bf16.mxu1 %v8247_v46 }
 0x27b   :  { %7910 = vmatmul.mubr.bf16.gmra.mxu1 %v9506_v13  ;;  %v12849_v13 = vpack.c.bf16 %v9639_v30, %v9588_v24  ;;  %v8253_v24 = vld [vmem:[%s12534_s3 + $0x178] sm:$0xff]  }
 0x27c   :  { %7926 = vmatpush3.bf16.msra.mxu1 %v8247_v46  ;;  %7913 = vmatprep.mubr.bf16.mxu1 %v12847_v37  ;;  %v2854_v46 = vld [vmem:[#allocation2 + $0x50] sm:$0xff] }
 0x27d   :  { %7927 = vmatprep.subr.bf16.mxu1 %v8248_v19  ;;  %v2856_v37 = vld [vmem:[#allocation2 + $0x70] sm:$0xff] }
 0x280   :  { %7928 = vmatpush3.bf16.msra.mxu1 %v8248_v19  ;;  %v2868_v19 = vpack.c.bf16 %v2854_v46, %v2853_v39  ;;  %v8285_v46 = vld [vmem:[%s12534_s3 + $0x228] sm:$0xff]  }
 0x281   :  { %7929 = vmatprep.subr.bf16.mxu1 %v8249_v9 }
 0x283   :  { %7914 = vmatmul.mubr.bf16.gmra.mxu1 %v12848_v43 }
 0x284   :  { %7930 = vmatpush3.bf16.msra.mxu1 %v8249_v9  ;;  %7917 = vmatprep.mubr.bf16.mxu1 %v12849_v13  ;;  %v8273_v9 = vld [vmem:[%s12534_s3 + $0x1f0] sm:$0xff]   ;;  %v8274_v13 = vld [vmem:[%s12534_s3 + $0x1e8] sm:$0xff]  }
 0x285   :  { %7931 = vmatprep.subr.bf16.mxu1 %v8250_v12 }
 0x288   :  { %7932 = vmatpush3.bf16.msra.mxu1 %v8250_v12  ;;  %v2869_v12 = vpack.c.bf16 %v2856_v37, %v2855_v62 }
 0x289   :  { %7933 = vmatprep.subr.bf16.mxu1 %v8251_v18 }
 0x28b   :  { %7918 = vmatmul.mubr.bf16.gmra.mxu1 %v2267_v56  ;;  %v8291_v56 = vld [vmem:[%s12536_s5 + $0x54] ss:$8 sps:$4 sm:$0xff]  }
 0x28c   :  { %7934 = vmatpush3.bf16.msra.mxu1 %v8251_v18  ;;  %7937 = vmatprep.mubr.bf16.mxu1 %v12850_v45  ;;  %v2857_v18 = vld [vmem:[#allocation2 + $0x80] sm:$0xff] }
 0x28d   :  { %7935 = vmatprep.subr.bf16.mxu1 %v8252_v11  ;;  %4030 = vmatprep.subr.bf16.mxu0 %v8291_v56  ;;  %v2859_v45 = vld [vmem:[#allocation2 + $0xc0] sm:$0xff] }
 0x28e   :  { %4031 = vmatpush1.bf16.msra.mxu0 %v8293_v6 }
 0x28f   :  { %4032 = vmatprep.subr.bf16.mxu0 %v8294_v60  ;;  %v8283_v60 = vld [vmem:[%s12534_s3 + $0x238] sm:$0xff]  }
 0x290   :  { %7936 = vmatpush3.bf16.msra.mxu1 %v8252_v11 }
 0x291   :  { %7953 = vmatprep.subr.bf16.mxu1 %v8253_v24 }
 0x293   :  { %7938 = vmatmul.mubr.bf16.vlgmr.msra.gmra.mxu1 %v12851_v23  ;;  %v2860_v23 = vld [vmem:[#allocation2 + $0xd0] sm:$0xff] }
 0x294   :  { %7954 = vmatpush3.bf16.msra.mxu1 %v8253_v24  ;;  %7941 = vmatprep.mubr.bf16.mxu1 %v12852_v20  ;;  %v2858_v24 = vld [vmem:[#allocation2 + $0x90] sm:$0xff]  ;;  %v8275_v20 = vld [vmem:[%s12534_s3 + $0x1e0] sm:$0xff]  }
 0x295   :  { %7955 = vmatprep.subr.bf16.mxu1 %v8254_v63 }
 0x298   :  { %7956 = vmatpush3.bf16.msra.mxu1 %v8254_v63  ;;  %v2870_v63 = vpack.c.bf16 %v2858_v24, %v2857_v18  ;;  %v8286_v24 = vld [vmem:[%s12534_s3 + $0x220] sm:$0xff]  }
 0x299   :  { %7957 = vmatprep.subr.bf16.mxu1 %v8255_v58 }
 0x29b   :  { %7942 = vmatmul.mubr.bf16.gmra.mxu1 %v2465_v5  ;;  %v8276_v5 = vld [vmem:[%s12534_s3 + $0x1d8] sm:$0xff]  }
 0x29c   :  { %7958 = vmatpush3.bf16.msra.mxu1 %v8255_v58  ;;  %7945 = vmatprep.mubr.bf16.mxu1 %v12853_v10  ;;  %v2871_v58 = vpack.c.bf16 %v2860_v23, %v2859_v45  ;;  %v2864_v10 = vld [vmem:[#allocation2 + $0x110] sm:$0xff] }
 0x29d   :  { %7959 = vmatprep.subr.bf16.mxu1 %v8256_v16  ;;  %v3062_v45 = vld [vmem:[#allocation2 + $0xd1] sm:$0xff] }
 0x2a0   :  { %7960 = vmatpush3.bf16.msra.mxu1 %v8256_v16  ;;  %v2861_v16 = vld [vmem:[#allocation2 + $0xe0] sm:$0xff] }
 0x2a1   :  { %7961 = vmatprep.subr.bf16.mxu1 %v8257_v0 }
 0x2a3   :  { %7946 = vmatmul.mubr.bf16.gmra.mxu1 %v2467_v1  ;;  %v8262_v1 = vld [vmem:[%s12534_s3 + $0x1b0] sm:$0xff]  }
 0x2a4   :  { %7962 = vmatpush3.bf16.msra.mxu1 %v8257_v0  ;;  %7949 = vmatprep.mubr.bf16.mxu1 %v2468_v21  ;;  %v2667_v21 = vpack.c.bf16 %v9932_v54, %v9766_v50  ;;  %v8296_v50 = vld [vmem:[%s12536_s5 + $0x40] ss:$8 sps:$4 sm:$0xff]   ;;  %v2862_v0 = vld [vmem:[#allocation2 + $0xf0] sm:$0xff] }
 0x2a5   :  { %7963 = vmatprep.subr.bf16.mxu1 %v8258_v22  ;;  %4033 = vmatpush1.bf16.msra.mxu0 %v8296_v50  ;;  %v3055_v50 = vld [vmem:[#allocation2 + $0x41] sm:$0xff] }
 0x2a6   :  { %v3070_v35 = vpack.c.bf16 %v3056_v26, %v3055_v50 }
 0x2a8   :  { %7964 = vmatpush3.bf16.msra.mxu1 %v8258_v22 }
 0x2a9   :  { %7965 = vmatprep.subr.bf16.mxu1 %v8259_v8 }
 0x2ab   :  { %7950 = vmatmul.mubr.bf16.gmra.mxu1 %v2469_v2  ;;  %v8277_v2 = vld [vmem:[%s12534_s3 + $0x1d0] sm:$0xff]  }
 0x2ac   :  { %7966 = vmatpush3.bf16.msra.mxu1 %v8259_v8  ;;  %7969 = vmatprep.mubr.bf16.mxu1 %v12854_v25  ;;  %v2872_v8 = vpack.c.bf16 %v2862_v0, %v2861_v16  ;;  %v3065_v16 = vld [vmem:[#allocation2 + $0x101] sm:$0xff] }
 0x2ad   :  { %7967 = vmatprep.subr.bf16.mxu1 %v8260_v27 }
 0x2b0   :  { %7968 = vmatpush3.bf16.msra.mxu1 %v8260_v27  ;;  %v2873_v27 = vpack.c.bf16 %v2864_v10, %v9639_v30  ;;  %v8299_v30 = vld [vmem:[%s12536_s5 + $0x30] ss:$8 sps:$4 sm:$0xff]  }
 0x2b1   :  { %7985 = vmatprep.subr.bf16.mxu1 %v8261_v7 }
 0x2b3   :  { %7970 = vmatmul.mubr.bf16.vlgmr.msra.gmra.mxu1 %v12855_v57  ;;  %v3053_v57 = vld [vmem:[#allocation2 + $0x21] sm:$0xff] }
 0x2b4   :  { %7986 = vmatpush3.bf16.msra.mxu1 %v8261_v7  ;;  %7973 = vmatprep.mubr.bf16.mxu1 %v12856_v15  ;;  %v9951_v29 = vpop.f32.mrf.mxu1  ;;  %v8278_v7 = vld [vmem:[%s12534_s3 + $0x1c8] sm:$0xff]  }
 0x2b5   :  { %7987 = vmatprep.subr.bf16.mxu1 %v8262_v1 }
 0x2b6   :  { %v9962_v32 = vpop.f32.mrf.mxu1 }
 0x2b8   :  { %7988 = vmatpush3.bf16.msra.mxu1 %v8262_v1  ;;  %v9969_v55 = vpop.f32.mrf.mxu1  ;;  %v8297_v1 = vld [vmem:[%s12536_s5 + $0x34] ss:$8 sps:$4 sm:$0xff]  }
 0x2b9   :  { %7989 = vmatprep.subr.bf16.mxu1 %v8263_v17  ;;  %4034 = vmatprep.subr.bf16.mxu0 %v8297_v1 }
 0x2ba   :  { %v9976_v33 = vpop.f32.mrf.mxu1  ;;  %4035 = vmatpush1.bf16.msra.mxu0 %v8299_v30  ;;  %v8289_v30 = vld [vmem:[%s12534_s3 + $0x208] sm:$0xff]  }
 0x2bb   :  { %7974 = vmatmul.mubr.bf16.gmra.mxu1 %v2667_v21  ;;  %v8279_v21 = vld [vmem:[%s12534_s3 + $0x1c0] sm:$0xff]  }
 0x2bc   :  { %7990 = vmatpush3.bf16.msra.mxu1 %v8263_v17  ;;  %7977 = vmatprep.mubr.bf16.mxu1 %v12857_v47  ;;  %v3054_v17 = vld [vmem:[#allocation2 + $0x31] sm:$0xff] }
 0x2bd   :  { %7991 = vmatprep.subr.bf16.mxu1 %v8264_v41 }
 0x2c0   :  { %7992 = vmatpush3.bf16.msra.mxu1 %v8264_v41  ;;  %v3069_v41 = vpack.c.bf16 %v3054_v17, %v3053_v57 }
 0x2c1   :  { %7993 = vmatprep.subr.bf16.mxu1 %v8265_v36 }
 0x2c3   :  { %7978 = vmatmul.mubr.bf16.gmra.mxu1 %v2669_v53  ;;  %v8271_v53 = vld [vmem:[%s12534_s3 + $0x180] sm:$0xff]  }
 0x2c4   :  { %7994 = vmatpush3.bf16.msra.mxu1 %v8265_v36  ;;  %7981 = vmatprep.mubr.bf16.mxu1 %v2670_v38  ;;  %v8272_v38 = vld [vmem:[%s12534_s3 + $0x1f8] sm:$0xff]   ;;  %v9981_v34 = vpop.f32.mrf.mxu1 }
 0x2c5   :  { %7995 = vmatprep.subr.bf16.mxu1 %v8266_v59 }
 0x2c6   :  { %v9986_v43 = vpop.f32.mrf.mxu1 }
 0x2c8   :  { %7996 = vmatpush3.bf16.msra.mxu1 %v8266_v59  ;;  %v9991_v11 = vpop.f32.mrf.mxu1 }
 0x2c9   :  { %7997 = vmatprep.subr.bf16.mxu1 %v8270_v52 }
 0x2ca   :  { %v9996_v56 = vpop.f32.mrf.mxu1 }
 0x2cb   :  { %7982 = vmatmul.mubr.bf16.gmra.mxu1 %v2671_v14 }
 0x2cc   :  { %7998 = vmatpush3.bf16.msra.mxu1 %v8270_v52  ;;  %8001 = vmatprep.mubr.bf16.mxu1 %v2867_v40  ;;  %v3057_v52 = vld [vmem:[#allocation2 + $0x61] sm:$0xff] }
 0x2cd   :  { %7999 = vmatprep.subr.bf16.mxu1 %v8271_v53 }
 0x2d0   :  { %8000 = vmatpush3.bf16.msra.mxu1 %v8271_v53  ;;  %v8284_v53 = vld [vmem:[%s12534_s3 + $0x230] sm:$0xff]  }
 0x2d1   :  { %8017 = vmatprep.subr.bf16.mxu1 %v8272_v38 }
 0x2d3   :  { %8002 = vmatmul.mubr.bf16.vlgmr.msra.gmra.mxu1 %v2868_v19 }
 0x2d4   :  { %8018 = vmatpush3.bf16.msra.mxu1 %v8272_v38  ;;  %8005 = vmatprep.mubr.bf16.mxu1 %v2869_v12 }
 0x2d5   :  { %8019 = vmatprep.subr.bf16.mxu1 %v8273_v9 }
 0x2d8   :  { %8020 = vmatpush3.bf16.msra.mxu1 %v8273_v9  ;;  %v3061_v9 = vld [vmem:[#allocation2 + $0xc1] sm:$0xff] }
 0x2d9   :  { %8021 = vmatprep.subr.bf16.mxu1 %v8274_v13 }
 0x2db   :  { %8006 = vmatmul.mubr.bf16.gmra.mxu1 %v2870_v63 }
 0x2dc   :  { %8022 = vmatpush3.bf16.msra.mxu1 %v8274_v13  ;;  %8009 = vmatprep.mubr.bf16.mxu1 %v2871_v58  ;;  %v9998_v6 = vpop.f32.mrf.mxu1  ;;  %v3060_v13 = vld [vmem:[#allocation2 + $0x91] sm:$0xff] }
 0x2dd   :  { %8023 = vmatprep.subr.bf16.mxu1 %v8275_v20  ;;  %v3072_v18 = vpack.c.bf16 %v3060_v13, %v9876_v61  ;;  %v8287_v61 = vld [vmem:[%s12534_s3 + $0x218] sm:$0xff]  }
 0x2de   :  { %v10003_v22 = vpop.f32.mrf.mxu1 }
 0x2e0   :  { %8024 = vmatpush3.bf16.msra.mxu1 %v8275_v20  ;;  %v10009_v25 = vpop.f32.mrf.mxu1 }
 0x2e1   :  { %8025 = vmatprep.subr.bf16.mxu1 %v8276_v5 }
 0x2e2   :  { %v10020_v15 = vpop.f32.mrf.mxu1 }
 0x2e3   :  { %8010 = vmatmul.mubr.bf16.gmra.mxu1 %v2872_v8 }
 0x2e4   :  { %8026 = vmatpush3.bf16.msra.mxu1 %v8276_v5  ;;  %8013 = vmatprep.mubr.bf16.mxu1 %v2873_v27  ;;  %v3063_v5 = vld [vmem:[#allocation2 + $0xe1] sm:$0xff]  ;;  %v8288_v27 = vld [vmem:[%s12534_s3 + $0x210] sm:$0xff]  }
 0x2e5   :  { %8027 = vmatprep.subr.bf16.mxu1 %v8277_v2 }
 0x2e8   :  { %8028 = vmatpush3.bf16.msra.mxu1 %v8277_v2  ;;  %v3066_v2 = vld [vmem:[#allocation2 + $0x111] sm:$0xff] }
 0x2e9   :  { %8029 = vmatprep.subr.bf16.mxu1 %v8278_v7 }
 0x2eb   :  { %v10025_v47 = vpop.f32.mrf.mxu1  ;;  %8014 = vmatmul.mubr.bf16.gmra.mxu1 %v9682_v4  ;;  %v3058_v4 = vld [vmem:[#allocation2 + $0x71] sm:$0xff] }
 0x2ec   :  { %8030 = vmatpush3.bf16.msra.mxu1 %v8278_v7  ;;  %8033 = vmatprep.mubr.bf16.mxu1 %v3069_v41  ;;  %v3071_v40 = vpack.c.bf16 %v3058_v4, %v3057_v52 }
 0x2ed   :  { %v10028_v36 = vpop.f32.mrf.mxu1  ;;  %8031 = vmatprep.subr.bf16.mxu1 %v8279_v21 }
 0x2ef   :  { %v10033_v59 = vpop.f32.mrf.mxu1 }
 0x2f0   :  { %8032 = vmatpush3.bf16.msra.mxu1 %v8279_v21 }
 0x2f1   :  { %v10035_v14 = vpop.f32.mrf.mxu1  ;;  %8049 = vmatprep.subr.bf16.mxu1 %v8283_v60 }
 0x2f3   :  { %v7843_v38 = vpop.f32.mrf.mxu1  ;;  %8034 = vmatmul.mubr.bf16.vlgmr.msra.gmra.mxu1 %v3070_v35 }
 0x2f4   :  { %v10041_v39 = vadd.f32 %v7843_v38, %v9951_v29  ;;  %8050 = vmatpush3.bf16.msra.mxu1 %v8283_v60  ;;  %8037 = vmatprep.mubr.bf16.mxu1 %v3071_v40 }
 0x2f5   :  { %v1978_v62 = vpop.f32.mrf.mxu1  ;;  %8051 = vmatprep.subr.bf16.mxu1 %v8284_v53 }
 0x2f6   :  { %v10047_v19 = vadd.f32 %v1978_v62, %v9962_v32  ;;  %v3073_v32 = vpack.c.bf16 %v3062_v45, %v3061_v9 }
 0x2f7   :  { %v7844_v37 = vpop.f32.mrf.mxu1 }
 0x2f8   :  { %v10050_v12 = vadd.f32 %v7844_v37, %v9969_v55  ;;  %8052 = vmatpush3.bf16.msra.mxu1 %v8284_v53  ;;  %v3262_v37 = vld [vmem:[#allocation2 + $0x92] sm:$0xff] }
 0x2f9   :  { %v1981_v29 = vpop.f32.mrf.mxu1  ;;  %8053 = vmatprep.subr.bf16.mxu1 %v8285_v46 }
 0x2fa   :  { %v10057_v63 = vadd.f32 %v1981_v29, %v9976_v33 }
 0x2fb   :  { %v7847_v23 = vpop.f32.mrf.mxu1  ;;  %8038 = vmatmul.mubr.bf16.gmra.mxu1 %v3072_v18 }
 0x2fc   :  { %v10060_v55 = vadd.f32 %v7847_v23, %v9981_v34  ;;  %8054 = vmatpush3.bf16.msra.mxu1 %v8285_v46  ;;  %8041 = vmatprep.mubr.bf16.mxu1 %v3073_v32  ;;  %v3064_v34 = vld [vmem:[#allocation2 + $0xf1] sm:$0xff] }
 0x2fd   :  { %v1994_v20 = vpop.f32.mrf.mxu1  ;;  %8055 = vmatprep.subr.bf16.mxu1 %v8286_v24  ;;  %v3074_v8 = vpack.c.bf16 %v3064_v34, %v3063_v5 }
 0x2fe   :  { %v10066_v58 = vadd.f32 %v1994_v20, %v9986_v43  ;;  %v3075_v43 = vpack.c.bf16 %v3066_v2, %v3065_v16  ;;  %v8303_v2 = vld [vmem:[%s12536_s5 + $0x14] ss:$8 sps:$4 sm:$0xff]  }
 0x2ff   :  { %v7848_v33 = vpop.f32.mrf.mxu1 }
 0x300   :  { %v10069_v10 = vadd.f32 %v7848_v33, %v9991_v11  ;;  %8056 = vmatpush3.bf16.msra.mxu1 %v8286_v24 }
 0x301   :  { %v1997_v0 = vpop.f32.mrf.mxu1  ;;  %8057 = vmatprep.subr.bf16.mxu1 %v8287_v61 }
 0x302   :  { %v10075_v7 = vadd.f32 %v1997_v0, %v9996_v56  ;;  %v3068_v56 = vld [vmem:[#allocation2 + $0x131] sm:$0xff] }
 0x303   :  { %v7851_v1 = vpop.f32.mrf.mxu1  ;;  %8042 = vmatmul.mubr.bf16.gmra.mxu1 %v3074_v8  ;;  %v3076_v50 = vpack.c.bf16 %v3068_v56, %v9907_v31  ;;  %v8300_v31 = vld [vmem:[%s12536_s5 + $0x24] ss:$8 sps:$4 sm:$0xff]  }
 0x304   :  { %v2019_v57 = vadd.f32 %v7851_v1, %v9998_v6  ;;  %8058 = vmatpush3.bf16.msra.mxu1 %v8287_v61  ;;  %8045 = vmatprep.mubr.bf16.mxu1 %v3075_v43  ;;  %v8290_v6 = vld [vmem:[%s12534_s3 + $0x200] sm:$0xff]  }
 0x305   :  { %v2010_v11 = vpop.f32.mrf.mxu1  ;;  %8059 = vmatprep.subr.bf16.mxu1 %v8288_v27  ;;  %4036 = vmatprep.subr.bf16.mxu0 %v8300_v31 }
 0x306   :  { %v2011_v17 = vadd.f32 %v2010_v11, %v10003_v22 }
 0x307   :  { %v7852_v21 = vpop.f32.mrf.mxu1 }
 0x308   :  { %v2022_v41 = vadd.f32 %v7852_v21, %v10009_v25  ;;  %8060 = vmatpush3.bf16.msra.mxu1 %v8288_v27 }
 0x309   :  { %v2013_v60 = vpop.f32.mrf.mxu1  ;;  %8061 = vmatprep.subr.bf16.mxu1 %v8289_v30 }
 0x30a   :  { %v10088_v52 = vadd.f32 %v2013_v60, %v10020_v15  ;;  %v8302_v15 = vld [vmem:[%s12536_s5 + $0x20] ss:$8 sps:$4 sm:$0xff]  }
 0x30b   :  { %v7855_v26 = vpop.f32.mrf.mxu1  ;;  %8046 = vmatmul.mubr.bf16.gmra.mxu1 %v3076_v50  ;;  %4037 = vmatpush1.bf16.msra.mxu0 %v8302_v15 }
 0x30c   :  { %v2035_v22 = vadd.f32 %v7855_v26, %v10025_v47  ;;  %8062 = vmatpush3.bf16.msra.mxu1 %v8289_v30  ;;  %8065 = vmatprep.mubr.bf16.mxu1 %v9752_v3 }
 0x30d   :  { %v2026_v25 = vpop.f32.mrf.mxu1  ;;  %8063 = vmatprep.subr.bf16.mxu1 %v8290_v6  ;;  %4038 = vmatprep.subr.bf16.mxu0 %v8303_v2  ;;  %v8315_v2 = vld [vmem:[%s12536_s5 + $0xd4] ss:$8 sps:$4 sm:$0xff]  }
 0x30e   :  { %v2027_v35 = vadd.f32 %v2026_v25, %v10028_v36 }
 0x30f   :  { %v7856_v4 = vpop.f32.mrf.mxu1 }
 0x310   :  { %v2038_v53 = vadd.f32 %v7856_v4, %v10033_v59  ;;  %8064 = vmatpush3.bf16.msra.mxu1 %v8290_v6 }
 0x311   :  { %v2029_v47 = vpop.f32.mrf.mxu1 }
 0x312   :  { %v10101_v3 = vadd.f32 %v2029_v47, %v10035_v14  ;;  %v3274_v14 = vpack.c.bf16 %v3262_v37, %v9932_v54 }
 0x313   :  { %v7875_v40 = vpop.f32.mrf.mxu1  ;;  %8066 = vmatmul.mubr.bf16.vlgmr.msra.gmra.mxu1 %v9759_v44 }
 0x314   :  { %v2229_v36 = vadd.f32 %v7875_v40, %v10041_v39  ;;  %8069 = vmatprep.mubr.bf16.mxu1 %v9770_v49 }
 0x315   :  { %v2164_v38 = vpop.f32.mrf.mxu1 }
 0x316   :  { %v2227_v59 = vadd.f32 %v2164_v38, %v10047_v19 }
 0x317   :  { %v7876_v62 = vpop.f32.mrf.mxu1 }
 0x318   :  { %v2230_v46 = vadd.f32 %v7876_v62, %v10050_v12 }
 0x319   :  { %v10108_v9 = vpop.f32.mrf.mxu1 }
 0x31b   :  { %v7879_v13 = vpop.f32.mrf.mxu1  ;;  %8070 = vmatmul.mubr.bf16.gmra.mxu1 %v3274_v14 }
 0x31c   :  { %v2233_v29 = vadd.f32 %v7879_v13, %v10060_v55  ;;  %8073 = vmatprep.mubr.bf16.mxu1 %v9782_v51  ;;  %v3270_v55 = vld [vmem:[#allocation2 + $0x132] sm:$0xff] }
 0x31d   :  { %v2180_v44 = vpop.f32.mrf.mxu1  ;;  %v3278_v20 = vpack.c.bf16 %v3270_v55, %v9967_v48  ;;  %v8305_v48 = vld [vmem:[%s12536_s5 + $0x10] ss:$8 sps:$4 sm:$0xff]   ;;  %v8309_v55 = vld [vmem:[%s12536_s5 + $0xf4] ss:$8 sps:$4 sm:$0xff]  }
 0x31e   :  { %v2231_v49 = vadd.f32 %v2180_v44, %v10066_v58  ;;  %4039 = vmatpush1.bf16.msra.mxu0 %v8305_v48  ;;  %3897 = vmatprep.subr.bf16.mxu1 %v8309_v55 }
 0x31f   :  { %v7880_v39 = vpop.f32.mrf.mxu1 }
 0x320   :  { %v2234_v19 = vadd.f32 %v7880_v39, %v10069_v10 }
 0x321   :  { %v10115_v18 = vpop.f32.mrf.mxu1 }
 0x323   :  { %v7883_v12 = vpop.f32.mrf.mxu1  ;;  %8074 = vmatmul.mubr.bf16.gmra.mxu1 %v9789_v28 }
 0x324   :  { %v2237_v45 = vadd.f32 %v7883_v12, %v2019_v57  ;;  %8077 = vmatprep.mubr.bf16.mxu1 %v9800_v42 }
 0x325   :  { %v2196_v54 = vpop.f32.mrf.mxu1 }
 0x326   :  { %v2235_v24 = vadd.f32 %v2196_v54, %v2011_v17 }
 0x327   :  { %v7884_v32 = vpop.f32.mrf.mxu1 }
 0x328   :  { %v2238_v23 = vadd.f32 %v7884_v32, %v2022_v41  ;;  %v8306_v32 = vld [vmem:[%s12536_s5 + $0x4] ss:$8 sps:$4 sm:$0xff]  }
 0x329   :  { %v10119_v51 = vpop.f32.mrf.mxu1  ;;  %4040 = vmatprep.subr.bf16.mxu0 %v8306_v32 }
 0x32b   :  { %v7887_v61 = vpop.f32.mrf.mxu1  ;;  %8078 = vmatmul.mubr.bf16.gmra.mxu1 %v3278_v20 }
 0x32c   :  { %v2241_v58 = vadd.f32 %v7887_v61, %v2035_v22  ;;  %v8308_v61 = vld [vmem:[%s12536_s5] ss:$8 sps:$4 sm:$0xff]  }
 0x32d   :  { %v2212_v5 = vpop.f32.mrf.mxu1  ;;  %4041 = vmatpush1.bf16.msra.mxu0 %v8308_v61 }
 0x32e   :  { %v2239_v33 = vadd.f32 %v2212_v5, %v2027_v35 }
 0x32f   :  { %v7888_v16 = vpop.f32.mrf.mxu1 }
 0x330   :  { %v2242_v10 = vadd.f32 %v7888_v16, %v2038_v53 }
 0x331   :  { %v10122_v28 = vpop.f32.mrf.mxu1 }
 0x333   :  { %v7907_v34 = vpop.f32.mrf.mxu1 }
 0x334   :  { %v2432_v42 = vadd.f32 %v7907_v34, %v2229_v36  ;;  %v8314_v34 = vld [vmem:[%s12536_s5 + $0xe0] ss:$8 sps:$4 sm:$0xff]  }
 0x335   :  { %v2367_v0 = vpop.f32.mrf.mxu1 }
 0x336   :  { %v2430_v8 = vadd.f32 %v2367_v0, %v2227_v59 }
 0x337   :  { %v7908_v27 = vpop.f32.mrf.mxu1 }
 0x338   :  { %v2433_v43 = vadd.f32 %v7908_v27, %v2230_v46 }
 0x339   :  { %v10130_v1 = vpop.f32.mrf.mxu1 }
 0x33b   :  { %v7911_v57 = vpop.f32.mrf.mxu1 }
 0x33c   :  { %v2436_v11 = vadd.f32 %v7911_v57, %v2233_v29 }
 0x33d   :  { %v2383_v30 = vpop.f32.mrf.mxu1 }
 0x33e   :  { %v2434_v17 = vadd.f32 %v2383_v30, %v2231_v49  ;;  %v8318_v30 = vld [vmem:[%s12536_s5 + $0xc4] ss:$8 sps:$4 sm:$0xff]  }
 0x33f   :  { %v7912_v21 = vpop.f32.mrf.mxu1 }
 0x340   :  { %v2437_v41 = vadd.f32 %v7912_v21, %v2234_v19 }
 0x341   :  { %v10132_v56 = vpop.f32.mrf.mxu1 }
 0x343   :  { %v7915_v60 = vpop.f32.mrf.mxu1 }
 0x344   :  { %v2440_v50 = vadd.f32 %v7915_v60, %v2237_v45 }
 0x345   :  { %v2399_v6 = vpop.f32.mrf.mxu1 }
 0x346   :  { %v2438_v26 = vadd.f32 %v2399_v6, %v2235_v24 }
 0x347   :  { %v7916_v22 = vpop.f32.mrf.mxu1 }
 0x348   :  { %v2441_v25 = vadd.f32 %v7916_v22, %v2238_v23 }
 0x349   :  { %v10134_v35 = vpop.f32.mrf.mxu1 }
 0x34b   :  { %v7919_v31 = vpop.f32.mrf.mxu1 }
 0x34c   :  { %v2444_v4 = vadd.f32 %v7919_v31, %v2241_v58  ;;  %v8311_v58 = vld [vmem:[%s12536_s5 + $0xf0] ss:$8 sps:$4 sm:$0xff]   ;;  %v8324_v31 = vld [vmem:[%s12536_s5 + $0xa4] ss:$8 sps:$4 sm:$0xff]  }
 0x34d   :  { %v2415_v53 = vpop.f32.mrf.mxu1  ;;  %3898 = vmatpush1.bf16.msra.mxu1 %v8311_v58 }
 0x34e   :  { %v2442_v15 = vadd.f32 %v2415_v53, %v2239_v33 }
 0x34f   :  { %v7920_v47 = vpop.f32.mrf.mxu1 }
 0x350   :  { %v2445_v40 = vadd.f32 %v7920_v47, %v2242_v10  ;;  %v8312_v10 = vld [vmem:[%s12536_s5 + $0xe4] ss:$8 sps:$4 sm:$0xff]   ;;  %v8335_v47 = vld [vmem:[%s12536_s5 + $0x1f4] ss:$8 sps:$4 sm:$0xff]  }
 0x351   :  { %v10136_v36 = vpop.f32.mrf.mxu1  ;;  %3899 = vmatprep.subr.bf16.mxu1 %v8312_v10  ;;  %4320 = vmatprep.subr.bf16.mxu0 %v8335_v47 }
 0x352   :  { %3900 = vmatpush1.bf16.msra.mxu1 %v8314_v34 }
 0x353   :  { %v7939_v38 = vpop.f32.mrf.mxu1  ;;  %3901 = vmatprep.subr.bf16.mxu1 %v8315_v2 }
 0x354   :  { %v2634_v59 = vadd.f32 %v7939_v38, %v2432_v42  ;;  %v12546_v38 = vmov 0  }
 0x355   :  { %v2569_v62 = vpop.f32.mrf.mxu1  ;;  %3929 = vmatprep.mubr.bf16.mxu1 %v12546_v38  ;;  %4058 = vmatprep.mubr.bf16.mxu0 %v12546_v38 }
 0x356   :  { %v2632_v46 = vadd.f32 %v2569_v62, %v2430_v8  ;;  %v8329_v62 = vld [vmem:[%s12536_s5 + $0x90] ss:$8 sps:$4 sm:$0xff]  }
 0x357   :  { %v7940_v37 = vpop.f32.mrf.mxu1 }
 0x358   :  { %v2635_v14 = vadd.f32 %v7940_v37, %v2433_v43  ;;  %v8317_v43 = vld [vmem:[%s12536_s5 + $0xd0] ss:$8 sps:$4 sm:$0xff]   ;;  %v8330_v37 = vld [vmem:[%s12536_s5 + $0x84] ss:$8 sps:$4 sm:$0xff]  }
 0x359   :  { %v10138_v13 = vpop.f32.mrf.mxu1  ;;  %3902 = vmatpush1.bf16.msra.mxu1 %v8317_v43 }
 0x35a   :  { %3903 = vmatprep.subr.bf16.mxu1 %v8318_v30 }
 0x35b   :  { %v7943_v29 = vpop.f32.mrf.mxu1 }
 0x35c   :  { %v2638_v44 = vadd.f32 %v7943_v29, %v2436_v11 }
 0x35d   :  { %v2585_v49 = vpop.f32.mrf.mxu1 }
 0x35e   :  { %v10140_v39 = vadd.f32 %v2585_v49, %v2434_v17  ;;  %v8320_v17 = vld [vmem:[%s12536_s5 + $0xc0] ss:$8 sps:$4 sm:$0xff]  }
 0x35f   :  { %v7944_v19 = vpop.f32.mrf.mxu1  ;;  %3904 = vmatpush1.bf16.msra.mxu1 %v8320_v17 }
 0x360   :  { %v10142_v12 = vadd.f32 %v7944_v19, %v2437_v41 }
 0x361   :  { %v10144_v45 = vpop.f32.mrf.mxu1 }
 0x363   :  { %v7947_v54 = vpop.f32.mrf.mxu1 }
 0x364   :  { %v10146_v24 = vadd.f32 %v7947_v54, %v2440_v50  ;;  %v8321_v50 = vld [vmem:[%s12536_s5 + $0xb4] ss:$8 sps:$4 sm:$0xff]  }
 0x365   :  { %v2601_v23 = vpop.f32.mrf.mxu1  ;;  %3905 = vmatprep.subr.bf16.mxu1 %v8321_v50  ;;  %v8333_v54 = vld [vmem:[%s12536_s5 + $0x174] ss:$8 sps:$4 sm:$0xff]  }
 0x366   :  { %v10154_v20 = vadd.f32 %v2601_v23, %v2438_v26  ;;  %v8323_v26 = vld [vmem:[%s12536_s5 + $0xb0] ss:$8 sps:$4 sm:$0xff]  }
 0x367   :  { %v7948_v5 = vpop.f32.mrf.mxu1  ;;  %3906 = vmatpush1.bf16.msra.mxu1 %v8323_v26 }
 0x368   :  { %v10162_v33 = vadd.f32 %v7948_v5, %v2441_v25  ;;  %3907 = vmatprep.subr.bf16.mxu1 %v8324_v31 }
 0x369   :  { %v10164_v16 = vpop.f32.mrf.mxu1 }
 0x36b   :  { %v7951_v42 = vpop.f32.mrf.mxu1 }
 0x36c   :  { %v2646_v0 = vadd.f32 %v7951_v42, %v2444_v4  ;;  %v8326_v4 = vld [vmem:[%s12536_s5 + $0xa0] ss:$8 sps:$4 sm:$0xff]  }
 0x36d   :  { %v2617_v8 = vpop.f32.mrf.mxu1  ;;  %3908 = vmatpush1.bf16.msra.mxu1 %v8326_v4 }
 0x36e   :  { %v2644_v27 = vadd.f32 %v2617_v8, %v2442_v15  ;;  %v8327_v15 = vld [vmem:[%s12536_s5 + $0x94] ss:$8 sps:$4 sm:$0xff]  }
 0x36f   :  { %v7952_v48 = vpop.f32.mrf.mxu1  ;;  %3909 = vmatprep.subr.bf16.mxu1 %v8327_v15 }
 0x370   :  { %v2647_v57 = vadd.f32 %v7952_v48, %v2445_v40 }
 0x371   :  { %v10178_v11 = vpop.f32.mrf.mxu1  ;;  %3910 = vmatpush1.bf16.msra.mxu1 %v8329_v62 }
 0x372   :  { %12858 = vst [vmem:[#allocation54_spill] sm:$0xff] %v10178_v11  ;;  %3911 = vmatprep.subr.bf16.mxu1 %v8330_v37 }
 0x373   :  { %v7971_v21 = vpop.f32.mrf.mxu1 }
 0x374   :  { %v10186_v41 = vadd.f32 %v7971_v21, %v2634_v59 }
 0x375   :  { %v2771_v60 = vpop.f32.mrf.mxu1 }
 0x376   :  { %v10191_v6 = vadd.f32 %v2771_v60, %v2632_v46 }
 0x377   :  { %v7972_v22 = vpop.f32.mrf.mxu1 }
 0x378   :  { %v10196_v25 = vadd.f32 %v7972_v22, %v2635_v14 }
 0x379   :  { %v10204_v53 = vpop.f32.mrf.mxu1 }
 0x37b   :  { %v7975_v40 = vpop.f32.mrf.mxu1 }
 0x37c   :  { %v10214_v59 = vadd.f32 %v7975_v40, %v2638_v44  ;;  %v8332_v44 = vld [vmem:[%s12536_s5 + $0x80] ss:$8 sps:$4 sm:$0xff]  }
 0x37d   :  { %v2787_v46 = vpop.f32.mrf.mxu1  ;;  %3912 = vmatpush1.bf16.msra.mxu1 %v8332_v44 }
 0x37e   :  { %v10223_v14 = vadd.f32 %v2787_v46, %v10140_v39  ;;  %4172 = vmatprep.subr.bf16.mxu1 %v8333_v54 }
 0x37f   :  { %v7976_v29 = vpop.f32.mrf.mxu1 }
 0x380   :  { %v10226_v49 = vadd.f32 %v7976_v29, %v10142_v12 }
 0x381   :  { %v10231_v19 = vpop.f32.mrf.mxu1 }
 0x383   :  { %v7979_v32 = vpop.f32.mrf.mxu1 }
 0x384   :  { %v10237_v39 = vadd.f32 %v7979_v32, %v10146_v24 }
 0x385   :  { %v2803_v23 = vpop.f32.mrf.mxu1 }
 0x386   :  { %v10240_v12 = vadd.f32 %v2803_v23, %v10154_v20 }
 0x387   :  { %v7980_v55 = vpop.f32.mrf.mxu1 }
 0x388   :  { %v10243_v61 = vadd.f32 %v7980_v55, %v10162_v33 }
 0x389   :  { %v10245_v58 = vpop.f32.mrf.mxu1 }
 0x38b   :  { %v7983_v5 = vpop.f32.mrf.mxu1 }
 0x38c   :  { %v10247_v10 = vadd.f32 %v7983_v5, %v2646_v0 }
 0x38d   :  { %v2819_v34 = vpop.f32.mrf.mxu1 }
 0x38e   :  { %v10249_v42 = vadd.f32 %v2819_v34, %v2644_v27 }
 0x38f   :  { %v7984_v24 = vpop.f32.mrf.mxu1 }
 0x390   :  { %12859 = vst [vmem:[#allocation30_spill] sm:$0xff] %v10249_v42  ;;  %v10251_v8 = vadd.f32 %v7984_v24, %v2647_v57  ;;  %v2228_v24 = vadd.f32 %v10108_v9, %v10057_v63 }
 0x391   :  { %v10253_v2 = vpop.f32.mrf.mxu1 }
 0x392   :  { %12860 = vst [vmem:[#allocation7_spill] sm:$0xff] %v10251_v8  ;;  %12861 = vst [vmem:[#allocation55_spill] sm:$0xff] %v10253_v2 }
 0x393   :  { %v8003_v43 = vpop.f32.mrf.mxu1 }
 0x395   :  { %v2974_v20 = vpop.f32.mrf.mxu1 }
 0x397   :  { %v8004_v48 = vpop.f32.mrf.mxu1 }
 0x398   :  { %v3040_v9 = vadd.f32 %v8004_v48, %v10196_v25 }
 0x399   :  { %v2977_v30 = vpop.f32.mrf.mxu1 }
 0x39b   :  { %v8007_v17 = vpop.f32.mrf.mxu1 }
 0x39d   :  { %v2990_v33 = vpop.f32.mrf.mxu1 }
 0x39f   :  { %v8008_v21 = vpop.f32.mrf.mxu1 }
 0x3a1   :  { %v10255_v60 = vpop.f32.mrf.mxu1 }
 0x3a3   :  { %v10257_v50 = vpop.f32.mrf.mxu1 }
 0x3a5   :  { %v10259_v0 = vpop.f32.mrf.mxu1 }
 0x3a7   :  { %v10261_v27 = vpop.f32.mrf.mxu1 }
 0x3a9   :  { %v10263_v26 = vpop.f32.mrf.mxu1 }
 0x3ab   :  { %v10265_v57 = vpop.f32.mrf.mxu1 }
 0x3ad   :  { %v10267_v22 = vpop.f32.mrf.mxu1 }
 0x3ae   :  { %12862 = vst [vmem:[#allocation53_spill] sm:$0xff] %v10267_v22  ;;  %v3037_v22 = vadd.f32 %v2974_v20, %v10191_v6 }
 0x3af   :  { %v10269_v31 = vpop.f32.mrf.mxu1 }
 0x3b0   :  { %12863 = vst [vmem:[#allocation31_spill] sm:$0xff] %v10269_v31  ;;  %v3039_v31 = vadd.f32 %v8003_v43, %v10186_v41  ;;  %v2232_v41 = vadd.f32 %v10115_v18, %v10075_v7  ;;  %v3041_v7 = vadd.f32 %v2990_v33, %v10223_v14  ;;  %v2236_v14 = vadd.f32 %v10119_v51, %v10088_v52 }
 0x3b1   :  { %v10271_v4 = vpop.f32.mrf.mxu1 }
 0x3b2   :  { %12864 = vst [vmem:[#allocation8_spill] sm:$0xff] %v10271_v4  ;;  %v2431_v4 = vadd.f32 %v10130_v1, %v2228_v24 }
 0x3b3   :  { %v8035_v15 = vpop.f32.mrf.mxu1 }
 0x3b4   :  { %v2633_v2 = vadd.f32 %v10138_v13, %v2431_v4  ;;  %v3241_v42 = vadd.f32 %v8035_v15, %v3039_v31  ;;  %v2435_v31 = vadd.f32 %v10132_v56, %v2232_v41  ;;  %v3043_v15 = vadd.f32 %v8007_v17, %v10214_v59 }
 0x3b5   :  { %v3176_v47 = vpop.f32.mrf.mxu1  ;;  %v3044_v59 = vadd.f32 %v8008_v21, %v10226_v49  ;;  %v2439_v49 = vadd.f32 %v10134_v35, %v2236_v14  ;;  %v3047_v21 = vadd.f32 %v10257_v50, %v10237_v39 }
 0x3b6   :  { %v2835_v63 = vadd.f32 %v10204_v53, %v2633_v2  ;;  %v3239_v1 = vadd.f32 %v3176_v47, %v3037_v22 }
 0x3b7   :  { %v8036_v40 = vpop.f32.mrf.mxu1 }
 0x3b8   :  { %v3038_v13 = vadd.f32 %v2977_v30, %v2835_v63  ;;  %v3242_v4 = vadd.f32 %v8036_v40, %v3040_v9 }
 0x3b9   :  { %v3179_v62 = vpop.f32.mrf.mxu1 }
 0x3bb   :  { %v8039_v46 = vpop.f32.mrf.mxu1 }
 0x3bd   :  { %v3192_v37 = vpop.f32.mrf.mxu1 }
 0x3be   :  { %v3243_v47 = vadd.f32 %v3192_v37, %v3041_v7  ;;  %v12870_v7 = vld [vmem:[#allocation53_spill] sm:$0xff] }
 0x3bf   :  { %v8040_v29 = vpop.f32.mrf.mxu1 }
 0x3c1   :  { %v3195_v44 = vpop.f32.mrf.mxu1 }
 0x3c3   :  { %v10273_v54 = vpop.f32.mrf.mxu1 }
 0x3c4   :  { %v3249_v41 = vadd.f32 %v10273_v54, %v3047_v21  ;;  %v2240_v54 = vadd.f32 %v10122_v28, %v10101_v3 }
 0x3c5   :  { %v10275_v32 = vpop.f32.mrf.mxu1 }
 0x3c7   :  { %v10277_v23 = vpop.f32.mrf.mxu1 }
 0x3c9   :  { %v10279_v55 = vpop.f32.mrf.mxu1 }
 0x3cb   :  { %v10281_v5 = vpop.f32.mrf.mxu1 }
 0x3cd   :  { %v10283_v34 = vpop.f32.mrf.mxu1 }
 0x3ce   :  { %12865 = vst [vmem:[#allocation56_spill] sm:$0xff] %v10283_v34  ;;  %v10298_v34 = vld [vmem:[%s12535_s4] ss:$0 sm:$0xff] }
 0x3cf   :  { %v10287_v38 = vpop.f32.mrf.mxu1 }
 0x3d0   :  { %12866 = vst [vmem:[#allocation32_spill] sm:$0xff] %v10287_v38  ;;  %v3240_v38 = vadd.f32 %v3179_v62, %v3038_v13 }
 0x3d1   :  { %v10291_v8 = vpop.f32.mrf.mxu1 }
 0x3d2   :  { %12867 = vst [vmem:[#allocation9_spill] sm:$0xff] %v10291_v8 }
 0x3d3   :  { %v8067_v11 = vpop.f32.mrf.mxu1 }
 0x3d4   :  { %v3443_v24 = vadd.f32 %v8067_v11, %v3241_v42  ;;  %v2637_v11 = vadd.f32 %v10144_v45, %v2435_v31  ;;  %v3245_v42 = vadd.f32 %v8039_v46, %v3043_v15  ;;  %v3246_v46 = vadd.f32 %v8040_v29, %v3044_v59 }
 0x3d5   :  { %v3378_v43 = vpop.f32.mrf.mxu1  ;;  %v3045_v29 = vadd.f32 %v10259_v0, %v10240_v12  ;;  %v3051_v15 = vadd.f32 %v10265_v57, %v10247_v10 }
 0x3d6   :  { %v3466_v6 = vadd.f32 %v10298_v34, %v3443_v24  ;;  %v3441_v20 = vadd.f32 %v3378_v43, %v3239_v1  ;;  %v2839_v56 = vadd.f32 %v10231_v19, %v2637_v11  ;;  %v12869_v11 = vld [vmem:[#allocation30_spill] sm:$0xff] }
 0x3d7   :  { %v8068_v8 = vpop.f32.mrf.mxu1 }
 0x3d8   :  { %v3482_v53 = vmax.f32 %v3466_v6, 0.0  ;;  %v3464_v25 = vadd.f32 %v10298_v34, %v3441_v20  ;;  %v3444_v2 = vadd.f32 %v8068_v8, %v3242_v4  ;;  %v3042_v33 = vadd.f32 %v10255_v60, %v2839_v56  ;;  %v12873_v56 = vld [vmem:[#allocation31_spill] sm:$0xff] }
 0x3d9   :  { %v3381_v18 = vpop.f32.mrf.mxu1  ;;  %v2641_v60 = vadd.f32 %v10164_v16, %v2439_v49  ;;  %v3247_v4 = vadd.f32 %v10275_v32, %v3045_v29  ;;  %v2443_v32 = vadd.f32 %v10136_v36, %v2240_v54 }
 0x3da   :  { %3498 = vst [vmem:[#allocation3 + $0x10] sm:$0xff] %v3482_v53  ;;  %v3480_v48 = vmax.f32 %v3464_v25, 0.0  ;;  %v3467_v30 = vadd.f32 %v10298_v34, %v3444_v2  ;;  %v3442_v22 = vadd.f32 %v3381_v18, %v3240_v38  ;;  %v3244_v9 = vadd.f32 %v3195_v44, %v3042_v33  ;;  %v12868_v2 = vld [vmem:[#allocation54_spill] sm:$0xff]  ;;  %v12875_v33 = vld [vmem:[#allocation8_spill] sm:$0xff] }
 0x3db   :  { %v8071_v17 = vpop.f32.mrf.mxu1  ;;  %v2843_v50 = vadd.f32 %v10245_v58, %v2641_v60  ;;  %v3048_v44 = vadd.f32 %v10261_v27, %v10243_v61  ;;  %v3049_v18 = vadd.f32 %v12870_v7, %v12869_v11 }
 0x3dc   :  { %3496 = vst [vmem:[#allocation3] sm:$0xff] %v3480_v48  ;;  %v3483_v40 = vmax.f32 %v3467_v30, 0.0  ;;  %v3465_v8 = vadd.f32 %v10298_v34, %v3442_v22  ;;  %v3447_v45 = vadd.f32 %v8071_v17, %v3245_v42  ;;  %v3253_v48 = vadd.f32 %v10281_v5, %v3051_v15  ;;  %v12871_v30 = vld [vmem:[#allocation55_spill] sm:$0xff] }
 0x3dd   :  { %v3394_v62 = vpop.f32.mrf.mxu1  ;;  %v3046_v6 = vadd.f32 %v10263_v26, %v2843_v50  ;;  %v3250_v31 = vadd.f32 %v10277_v23, %v3048_v44  ;;  %v2645_v23 = vadd.f32 %v12868_v2, %v2443_v32  ;;  %v12872_v22 = vld [vmem:[#allocation7_spill] sm:$0xff] }
 0x3de   :  { %3499 = vst [vmem:[#allocation3 + $0x18] sm:$0xff] %v3483_v40  ;;  %v3481_v38 = vmax.f32 %v3465_v8, 0.0  ;;  %v3470_v19 = vadd.f32 %v10298_v34, %v3447_v45  ;;  %v3445_v63 = vadd.f32 %v3394_v62, %v3243_v47  ;;  %v3052_v59 = vadd.f32 %v12873_v56, %v12872_v22  ;;  %v12874_v47 = vld [vmem:[#allocation56_spill] sm:$0xff] }
 0x3df   :  { %v8072_v37 = vpop.f32.mrf.mxu1  ;;  %v3248_v25 = vadd.f32 %v10279_v55, %v3046_v6  ;;  %v2847_v55 = vadd.f32 %v12871_v30, %v2645_v23  ;;  %v3251_v40 = vadd.f32 %v12874_v47, %v3049_v18 }
 0x3e0   :  { %3497 = vst [vmem:[#allocation3 + $0x8] sm:$0xff] %v3481_v38  ;;  %v3486_v1 = vmax.f32 %v3470_v19, 0.0  ;;  %v3468_v52 = vadd.f32 %v10298_v34, %v3445_v63  ;;  %v3448_v51 = vadd.f32 %v8072_v37, %v3246_v46  ;;  %v12876_v46 = vld [vmem:[#allocation32_spill] sm:$0xff]  ;;  %v12877_v37 = vld [vmem:[#allocation9_spill] sm:$0xff] }
 0x3e1   :  { %v3397_v24 = vpop.f32.mrf.mxu1  ;;  %v3050_v5 = vadd.f32 %v12875_v33, %v2847_v55  ;;  %v3254_v38 = vadd.f32 %v12876_v46, %v3052_v59  ;;  %v10376_v33 = vld [vmem:[%s12536_s5 + $0x164] ss:$8 sps:$4 sm:$0xff]   ;;  %v10388_v46 = vld [vmem:[%s12536_s5 + $0x160] ss:$8 sps:$4 sm:$0xff]  }
 0x3e2   :  { %3502 = vst [vmem:[#allocation3 + $0x30] sm:$0xff] %v3486_v1  ;;  %v3484_v35 = vmax.f32 %v3468_v52, 0.0  ;;  %v3471_v43 = vadd.f32 %v10298_v34, %v3448_v51  ;;  %v3446_v39 = vadd.f32 %v3397_v24, %v3244_v9 }
 0x3e3   :  { %v8075_v13 = vpop.f32.mrf.mxu1  ;;  %v3252_v9 = vadd.f32 %v12877_v37, %v3050_v5  ;;  %v3529_v44 = vld [vmem:[#allocation3 + $0x2] sm:$0x1]  ;;  %v3514_v54 = vld [vmem:[#allocation3 + $0x1] sm:$0x1] }
 0x3e4   :  { %3500 = vst [vmem:[#allocation3 + $0x20] sm:$0xff] %v3484_v35  ;;  %v3487_v16 = vmax.f32 %v3471_v43, 0.0  ;;  %v3469_v12 = vadd.f32 %v10298_v34, %v3446_v39  ;;  %v3451_v0 = vadd.f32 %v8075_v13, %v3249_v41  ;;  %v3531_v13 = vld [vmem:[#allocation3 + $0x3] sm:$0x1] }
 0x3e5   :  { %v3410_v20 = vpop.f32.mrf.mxu1 }
 0x3e6   :  { %3503 = vst [vmem:[#allocation3 + $0x38] sm:$0xff] %v3487_v16  ;;  %v3485_v58 = vmax.f32 %v3469_v12, 0.0  ;;  %v3474_v61 = vadd.f32 %v10298_v34, %v3451_v0  ;;  %v3449_v27 = vadd.f32 %v3410_v20, %v3247_v4  ;;  %v3512_v0 = vld [vmem:[#allocation3] sm:$0x1] }
 0x3e7   :  { %v8076_v53 = vpop.f32.mrf.mxu1  ;;  %v3535_v29 = vld [vmem:[#allocation3 + $0xa] sm:$0x1]  ;;  %v3537_v24 = vld [vmem:[#allocation3 + $0xb] sm:$0x1]  ;;  %v3519_v39 = vld [vmem:[#allocation3 + $0x8] sm:$0x1] }
 0x3e8   :  { %3501 = vst [vmem:[#allocation3 + $0x28] sm:$0xff] %v3485_v58  ;;  %v3490_v3 = vmax.f32 %v3474_v61, 0.0  ;;  %v3472_v28 = vadd.f32 %v10298_v34, %v3449_v27  ;;  %v3452_v26 = vadd.f32 %v8076_v53, %v3250_v31  ;;  %v3521_v50 = vld [vmem:[#allocation3 + $0x9] sm:$0x1]  ;;  %v3539_v12 = vmax.f32 %v3535_v29, %v3537_v24 }
 0x3e9   :  { %v3413_v42 = vpop.f32.mrf.mxu1  ;;  %v3523_v31 = vmax.f32 %v3519_v39, %v3521_v50  ;;  %v3533_v61 = vmax.f32 %v3529_v44, %v3531_v13  ;;  %v10438_v44 = vld [vmem:[%s12536_s5 + $0x140] ss:$8 sps:$4 sm:$0xff]  }
 0x3ea   :  { %3506 = vst [vmem:[#allocation3 + $0x50] sm:$0xff] %v3490_v3  ;;  %v3488_v36 = vmax.f32 %v3472_v28, 0.0  ;;  %v3475_v10 = vadd.f32 %v10298_v34, %v3452_v26  ;;  %v3450_v57 = vadd.f32 %v3413_v42, %v3248_v25  ;;  %v3516_v25 = vmax.f32 %v3512_v0, %v3514_v54  ;;  %v10443_v13 = vld [vmem:[%s12536_s5 + $0x1c0] ss:$8 sps:$4 sm:$0xff]   ;;  %v3553_v0 = vld [vmem:[#allocation3 + $0xd] sm:$0x1] }
 0x3eb   :  { %v8079_v17 = vpop.f32.mrf.mxu1  ;;  %v3541_v2 = vmax.f32 %v3533_v61, %v3539_v12  ;;  %v3551_v12 = vld [vmem:[#allocation3 + $0xc] sm:$0x1]  ;;  %v3545_v61 = vld [vmem:[#allocation3 + $0x4] sm:$0x1] }
 0x3ec   :  { %3504 = vst [vmem:[#allocation3 + $0x40] sm:$0xff] %v3488_v36  ;;  %v3491_v8 = vmax.f32 %v3475_v10, 0.0  ;;  %v3473_v45 = vadd.f32 %v10298_v34, %v3450_v57  ;;  %v3455_v14 = vadd.f32 %v8079_v17, %v3253_v48  ;;  %v3525_v7 = vmax.f32 %v3516_v25, %v3523_v31  ;;  %v3585_v31 = vld [vmem:[#allocation3 + $0x18] sm:$0x1]  ;;  %v3578_v25 = vld [vmem:[#allocation3 + $0x10] sm:$0x1] }
 0x3ed   :  { %v3426_v62 = vpop.f32.mrf.mxu1  ;;  %v3543_v48 = vpack.c.bf16 %v3541_v2, %v3541_v2 }
 0x3ee   :  { %3507 = vst [vmem:[#allocation3 + $0x58] sm:$0xff] %v3491_v8  ;;  %v3489_v19 = vmax.f32 %v3473_v45, 0.0  ;;  %v3478_v63 = vadd.f32 %v10298_v34, %v3455_v14  ;;  %v3453_v49 = vadd.f32 %v3426_v62, %v3251_v40  ;;  %v3527_v10 = vpack.c.bf16 %v3525_v7, %v3525_v7  ;;  %v10363_v40 = vld [vmem:[%s12536_s5 + $0x170] ss:$8 sps:$4 sm:$0xff]   ;;  %v10381_v62 = vld [vmem:[%s12536_s5 + $0x1e4] ss:$8 sps:$4 sm:$0xff]  }
 0x3ef   :  { %v8080_v21 = vpop.f32.mrf.mxu1  ;;  %v3810_v22 = vunpack.c.l.b16 %v3543_v48  ;;  %v10371_v14 = vld [vmem:[%s12536_s5 + $0x1f0] ss:$8 sps:$4 sm:$0xff]  }
 0x3f0   :  { %3505 = vst [vmem:[#allocation3 + $0x48] sm:$0xff] %v3489_v19  ;;  %v3494_v1 = vmax.f32 %v3478_v63, 0.0  ;;  %v3476_v52 = vadd.f32 %v10298_v34, %v3453_v49  ;;  %v3456_v51 = vadd.f32 %v8080_v21, %v3254_v38  ;;  %v3940_v59 = vunpack.c.l.b16 %v3527_v10  ;;  %v10395_v38 = vld [vmem:[%s12536_s5 + $0x1e0] ss:$8 sps:$4 sm:$0xff]   ;;  %v10400_v19 = vld [vmem:[%s12536_s5 + $0x154] ss:$8 sps:$4 sm:$0xff]  }
 0x3f1   :  { %v3429_v60 = vpop.f32.mrf.mxu1  ;;  %v10406_v63 = vld [vmem:[%s12536_s5 + $0x1d4] ss:$8 sps:$4 sm:$0xff]   ;;  %v12878_v49 = vmov 0   ;;  %v10412_v21 = vld [vmem:[%s12536_s5 + $0x150] ss:$8 sps:$4 sm:$0xff]  }
 0x3f2   :  { %3510 = vst [vmem:[#allocation3 + $0x70] sm:$0xff] %v3494_v1  ;;  %v3492_v41 = vmax.f32 %v3476_v52, 0.0  ;;  %v3479_v35 = vadd.f32 %v10298_v34, %v3456_v51  ;;  %v3454_v43 = vadd.f32 %v3429_v60, %v3252_v9  ;;  %v10419_v1 = vld [vmem:[%s12536_s5 + $0x1d0] ss:$8 sps:$4 sm:$0xff]   ;;  %v10426_v60 = vld [vmem:[%s12536_s5 + $0x144] ss:$8 sps:$4 sm:$0xff]  }
 0x3f3   :  { %v3530_v6 = vld [vmem:[#allocation3 + $0x42] sm:$0x1]  ;;  %v3532_v20 = vld [vmem:[#allocation3 + $0x43] sm:$0x1]  ;;  %v3513_v27 = vld [vmem:[#allocation3 + $0x40] sm:$0x1] }
 0x3f4   :  { %3508 = vst [vmem:[#allocation3 + $0x60] sm:$0xff] %v3492_v41  ;;  %v3495_v4 = vmax.f32 %v3479_v35, 0.0  ;;  %v3477_v16 = vadd.f32 %v10298_v34, %v3454_v43  ;;  %v3515_v32 = vld [vmem:[#allocation3 + $0x41] sm:$0x1]  ;;  %v3534_v28 = vmax.f32 %v3530_v6, %v3532_v20  ;;  %v3546_v29 = vld [vmem:[#allocation3 + $0x44] sm:$0x1] }
 0x3f5   :  { %v3517_v23 = vmax.f32 %v3513_v27, %v3515_v32  ;;  %v3586_v52 = vld [vmem:[#allocation3 + $0x58] sm:$0x1]  ;;  %v3588_v51 = vld [vmem:[#allocation3 + $0x59] sm:$0x1]  ;;  %v3548_v24 = vld [vmem:[#allocation3 + $0x45] sm:$0x1] }
 0x3f6   :  { %3511 = vst [vmem:[#allocation3 + $0x78] sm:$0xff] %v3495_v4  ;;  %v3493_v58 = vmax.f32 %v3477_v16, 0.0  ;;  %v10432_v41 = vld [vmem:[%s12536_s5 + $0x1c4] ss:$8 sps:$4 sm:$0xff]   ;;  %v3579_v43 = vld [vmem:[#allocation3 + $0x50] sm:$0x1]  ;;  %v3590_v50 = vmax.f32 %v3586_v52, %v3588_v51  ;;  %v3550_v4 = vmax.f32 %v3546_v29, %v3548_v24 }
 0x3f7   :  { %v3536_v15 = vld [vmem:[#allocation3 + $0x4a] sm:$0x1]  ;;  %v3538_v53 = vld [vmem:[#allocation3 + $0x4b] sm:$0x1]  ;;  %v3520_v3 = vld [vmem:[#allocation3 + $0x48] sm:$0x1] }
 0x3f8   :  { %3509 = vst [vmem:[#allocation3 + $0x68] sm:$0xff] %v3493_v58  ;;  %v3540_v26 = vmax.f32 %v3536_v15, %v3538_v53  ;;  %v3522_v34 = vld [vmem:[#allocation3 + $0x49] sm:$0x1]  ;;  %v3552_v37 = vld [vmem:[#allocation3 + $0x4c] sm:$0x1]  ;;  %v3555_v53 = vmax.f32 %v3551_v12, %v3553_v0 }
 0x3f9   :  { %v3524_v11 = vmax.f32 %v3520_v3, %v3522_v34  ;;  %v3554_v9 = vld [vmem:[#allocation3 + $0x4d] sm:$0x1]  ;;  %v3581_v39 = vld [vmem:[#allocation3 + $0x51] sm:$0x1]  ;;  %v10450_v16 = vld [vmem:[%s12536_s5 + $0x134] ss:$8 sps:$4 sm:$0xff]  }
 0x3fa   :  { %v3542_v18 = vmax.f32 %v3534_v28, %v3540_v26  ;;  %v3556_v35 = vmax.f32 %v3552_v37, %v3554_v9  ;;  %v3583_v54 = vmax.f32 %v3579_v43, %v3581_v39  ;;  %v10456_v6 = vld [vmem:[%s12536_s5 + $0x1b4] ss:$8 sps:$4 sm:$0xff]   ;;  %v3587_v58 = vld [vmem:[#allocation3 + $0x19] sm:$0x1]  ;;  %v3547_v27 = vld [vmem:[#allocation3 + $0x5] sm:$0x1] }
 0x3fb   :  { %v3526_v42 = vmax.f32 %v3517_v23, %v3524_v11  ;;  %v10462_v15 = vld [vmem:[%s12536_s5 + $0x130] ss:$8 sps:$4 sm:$0xff]   ;;  %v10474_v26 = vld [vmem:[%s12536_s5 + $0x124] ss:$8 sps:$4 sm:$0xff]   ;;  %v3589_v2 = vmax.f32 %v3585_v31, %v3587_v58  ;;  %v3549_v23 = vmax.f32 %v3545_v61, %v3547_v27  ;;  %v10498_v10 = vld [vmem:[%s12536_s5 + $0x114] ss:$8 sps:$4 sm:$0xff]  }
 0x3fc   :  { %v3544_v36 = vpack.c.bf16 %v3542_v18, %v3542_v18  ;;  %v3558_v20 = vmax.f32 %v3550_v4, %v3556_v35  ;;  %v3592_v32 = vmax.f32 %v3583_v54, %v3590_v50  ;;  %v3580_v3 = vld [vmem:[#allocation3 + $0x11] sm:$0x1]  ;;  %v10480_v34 = vld [vmem:[%s12536_s5 + $0x1a4] ss:$8 sps:$4 sm:$0xff]   ;;  %v10534_v52 = vld [vmem:[%s12536_s5 + $0x100] ss:$8 sps:$4 sm:$0xff]  }
 0x3fd   :  { %v3528_v57 = vpack.c.bf16 %v3526_v42, %v3526_v42  ;;  %v10469_v28 = vld [vmem:[%s12536_s5 + $0x1b0] ss:$8 sps:$4 sm:$0xff]   ;;  %v3582_v7 = vmax.f32 %v3578_v25, %v3580_v3  ;;  %v10486_v42 = vld [vmem:[%s12536_s5 + $0x120] ss:$8 sps:$4 sm:$0xff]   ;;  %v3557_v48 = vmax.f32 %v3549_v23, %v3555_v53  ;;  %v10546_v35 = vld [vmem:[%s12536_s5 + $0x274] ss:$8 sps:$4 sm:$0xff]  }
 0x3fe   :  { %v3811_v30 = vunpack.c.l.b16 %v3544_v36  ;;  %v3560_v11 = vpack.c.bf16 %v3558_v20, %v3558_v20  ;;  %v3594_v18 = vpack.c.bf16 %v3592_v32, %v3592_v32  ;;  %v10493_v36 = vld [vmem:[%s12536_s5 + $0x1a0] ss:$8 sps:$4 sm:$0xff]   ;;  %v10553_v39 = vld [vmem:[%s12536_s5 + $0x2f4] ss:$8 sps:$4 sm:$0xff]   ;;  %v10560_v4 = vld [vmem:[%s12536_s5 + $0x270] ss:$8 sps:$4 sm:$0xff]  }
 0x3ff   :  { %v3941_v55 = vunpack.c.l.b16 %v3528_v57  ;;  %v3591_v57 = vmax.f32 %v3582_v7, %v3589_v2  ;;  %v10541_v29 = vld [vmem:[%s12536_s5 + $0x180] ss:$8 sps:$4 sm:$0xff]   ;;  %12882 = vst [vmem:[#allocation58_spill] sm:$0xff] %v10553_v39  ;;  %v10569_v0 = vld [vmem:[%s12536_s5 + $0x2f0] ss:$8 sps:$4 sm:$0xff]  }
 0x400   :  { %v3812_v56 = vrot.slane %v3811_v30, 7  ;;  %v10504_v30 = vld [vmem:[%s12536_s5 + $0x194] ss:$8 sps:$4 sm:$0xff]   ;;  %12881 = vst [vmem:[#allocation10_spill] sm:$0xff] %v10541_v29  ;;  %12883 = vst [vmem:[#allocation34_spill] sm:$0xff] %v10569_v0 }
 0x401   :  { %v3942_v17 = vrot.slane %v3941_v55, 7  ;;  %v4087_v55 = vunpack.c.l.b16 %v3560_v11  ;;  %v10574_v54 = vld [vmem:[%s12536_s5 + $0x264] ss:$8 sps:$4 sm:$0xff]   ;;  %v10590_v58 = vld [vmem:[%s12536_s5 + $0x260] ss:$8 sps:$4 sm:$0xff]  }
 0x402   :  { %v3814_v47 = vsel %vm3813_vm0, %v3812_v56, %v3810_v22  ;;  %v4235_v22 = vunpack.c.l.b16 %v3594_v18  ;;  %v10510_v56 = vld [vmem:[%s12536_s5 + $0x110] ss:$8 sps:$4 sm:$0xff]   ;;  %v10582_v31 = vld [vmem:[%s12536_s5 + $0x2e4] ss:$8 sps:$4 sm:$0xff]   ;;  %v10597_v61 = vld [vmem:[%s12536_s5 + $0x2e0] ss:$8 sps:$4 sm:$0xff]  }
 0x403   :  { %v10365_v8 = vpack.c.b16 %v3814_v47, %v3814_v47  ;;  %v3943_v45 = vsel %vm3813_vm0, %v3942_v17, %v3940_v59  ;;  %v3559_v59 = vpack.c.bf16 %v3557_v48, %v3557_v48  ;;  %v10517_v17 = vld [vmem:[%s12536_s5 + $0x190] ss:$8 sps:$4 sm:$0xff]   ;;  %v10522_v47 = vld [vmem:[%s12536_s5 + $0x104] ss:$8 sps:$4 sm:$0xff]   ;;  %v4088_v37 = vrot.slane %v4087_v55, 7  ;;  %12885 = vst [vmem:[#allocation59_spill] sm:$0xff] %v10582_v31 }
 0x404   :  { %v3944_v5 = vpack.c.b16 %v3943_v45, %v3943_v45  ;;  %12879 = vst [vmem:[#allocation57_spill] sm:$0xff] %v10517_v17  ;;  %v3593_v45 = vpack.c.bf16 %v3591_v57, %v3591_v57  ;;  %v4236_v9 = vrot.slane %v4235_v22, 7  ;;  %12886 = vst [vmem:[#allocation35_spill] sm:$0xff] %v10597_v61  ;;  %v10602_v27 = vld [vmem:[%s12536_s5 + $0x254] ss:$8 sps:$4 sm:$0xff]  }
 0x405   :  { %3930 = vmatmul.mubr.bf16.vlgmr.msra.gmra.mxu1 %v10365_v8  ;;  %v4086_v51 = vunpack.c.l.b16 %v3559_v59  ;;  %v10608_v32 = vld [vmem:[%s12536_s5 + $0x2d4] ss:$8 sps:$4 sm:$0xff]   ;;  %v10614_v53 = vld [vmem:[%s12536_s5 + $0x250] ss:$8 sps:$4 sm:$0xff]   ;;  %v10628_v7 = vld [vmem:[%s12536_s5 + $0x244] ss:$8 sps:$4 sm:$0xff]  }
 0x406   :  { %4059 = vmatmul.mubr.bf16.vlgmr.msra.gmra.mxu0 %v3944_v5  ;;  %4173 = vmatpush1.bf16.msra.mxu1 %v10363_v40  ;;  %v10528_v5 = vld [vmem:[%s12536_s5 + $0x184] ss:$8 sps:$4 sm:$0xff]   ;;  %v4234_v24 = vunpack.c.l.b16 %v3593_v45  ;;  %12887 = vst [vmem:[#allocation12_spill] sm:$0xff] %v10608_v32  ;;  %v3602_v25 = vld [vmem:[#allocation3 + $0x5a] sm:$0x1] }
 0x407   :  { %4321 = vmatpush1.bf16.msra.mxu0 %v10371_v14  ;;  %4174 = vmatprep.subr.bf16.mxu1 %v10376_v33  ;;  %12880 = vst [vmem:[#allocation33_spill] sm:$0xff] %v10528_v5  ;;  %v4089_v43 = vsel %vm3813_vm0, %v4088_v37, %v4086_v51  ;;  %v3604_v3 = vld [vmem:[#allocation3 + $0x5b] sm:$0x1]  ;;  %v3618_v23 = vld [vmem:[#allocation3 + $0x5c] sm:$0x1] }
 0x408   :  { %4322 = vmatprep.subr.bf16.mxu0 %v10381_v62  ;;  %4204 = vmatprep.mubr.bf16.mxu1 %v12878_v49  ;;  %v4237_v50 = vsel %vm3813_vm0, %v4236_v9, %v4234_v24  ;;  %v10563_v12 = vpack.c.b16 %v4089_v43, %v4089_v43  ;;  %v10621_v2 = vld [vmem:[%s12536_s5 + $0x2d0] ss:$8 sps:$4 sm:$0xff]   ;;  %v3620_v11 = vld [vmem:[#allocation3 + $0x5d] sm:$0x1]  ;;  %v10634_v57 = vld [vmem:[%s12536_s5 + $0x2c4] ss:$8 sps:$4 sm:$0xff]   ;;  %v3606_v55 = vmax.f32 %v3602_v25, %v3604_v3 }
 0x409   :  { %4352 = vmatprep.mubr.bf16.mxu0 %v12878_v49  ;;  %v10576_v20 = vpack.c.b16 %v4237_v50, %v4237_v50  ;;  %12888 = vst [vmem:[#allocation60_spill] sm:$0xff] %v10621_v2  ;;  %v3596_v18 = vld [vmem:[#allocation3 + $0x52] sm:$0x1]  ;;  %v3598_v48 = vld [vmem:[#allocation3 + $0x53] sm:$0x1]  ;;  %12889 = vst [vmem:[#allocation36_spill] sm:$0xff] %v10634_v57  ;;  %v3622_v45 = vmax.f32 %v3618_v23, %v3620_v11 }
 0x40a   :  { %4175 = vmatpush1.bf16.msra.mxu1 %v10388_v46  ;;  %v3612_v22 = vld [vmem:[#allocation3 + $0x54] sm:$0x1]  ;;  %v3614_v59 = vld [vmem:[#allocation3 + $0x55] sm:$0x1]  ;;  %v10640_v37 = vld [vmem:[%s12536_s5 + $0x240] ss:$8 sps:$4 sm:$0xff]   ;;  %v3600_v51 = vmax.f32 %v3596_v18, %v3598_v48 }
 0x40b   :  { %4323 = vmatpush1.bf16.msra.mxu0 %v10395_v38  ;;  %4176 = vmatprep.subr.bf16.mxu1 %v10400_v19  ;;  %12884 = vst [vmem:[#allocation11_spill] sm:$0xff] %v10576_v20  ;;  %v10645_v9 = vld [vmem:[%s12536_s5 + $0x2c0] ss:$8 sps:$4 sm:$0xff]   ;;  %v10652_v24 = vld [vmem:[%s12536_s5 + $0x234] ss:$8 sps:$4 sm:$0xff]   ;;  %v3616_v25 = vmax.f32 %v3612_v22, %v3614_v59 }
 0x40c   :  { %4324 = vmatprep.subr.bf16.mxu0 %v10406_v63  ;;  %12890 = vst [vmem:[#allocation13_spill] sm:$0xff] %v10645_v9  ;;  %v3601_v43 = vld [vmem:[#allocation3 + $0x1a] sm:$0x1]  ;;  %v3603_v50 = vld [vmem:[#allocation3 + $0x1b] sm:$0x1]  ;;  %v3608_v23 = vmax.f32 %v3600_v51, %v3606_v55 }
 0x40d   :  { %v10658_v3 = vld [vmem:[%s12536_s5 + $0x2b4] ss:$8 sps:$4 sm:$0xff]   ;;  %v3595_v48 = vld [vmem:[#allocation3 + $0x12] sm:$0x1]  ;;  %v3605_v22 = vmax.f32 %v3601_v43, %v3603_v50  ;;  %v10682_v43 = vld [vmem:[%s12536_s5 + $0x2a4] ss:$8 sps:$4 sm:$0xff]  }
 0x40e   :  { %4177 = vmatpush1.bf16.msra.mxu1 %v10412_v21  ;;  %12891 = vst [vmem:[#allocation61_spill] sm:$0xff] %v10658_v3  ;;  %v3617_v11 = vld [vmem:[#allocation3 + $0x1c] sm:$0x1]  ;;  %v3619_v18 = vld [vmem:[#allocation3 + $0x1d] sm:$0x1]  ;;  %12893 = vst [vmem:[#allocation14_spill] sm:$0xff] %v10682_v43 }
 0x40f   :  { %4325 = vmatpush1.bf16.msra.mxu0 %v10419_v1  ;;  %4178 = vmatprep.subr.bf16.mxu1 %v10426_v60  ;;  %v3611_v59 = vld [vmem:[#allocation3 + $0x14] sm:$0x1]  ;;  %v10671_v55 = vld [vmem:[%s12536_s5 + $0x2b0] ss:$8 sps:$4 sm:$0xff]   ;;  %v3621_v51 = vmax.f32 %v3617_v11, %v3619_v18  ;;  %v10695_v11 = vld [vmem:[%s12536_s5 + $0x2a0] ss:$8 sps:$4 sm:$0xff]  }
 0x410   :  { %4326 = vmatprep.subr.bf16.mxu0 %v10432_v41  ;;  %12892 = vst [vmem:[#allocation37_spill] sm:$0xff] %v10671_v55  ;;  %12894 = vst [vmem:[#allocation62_spill] sm:$0xff] %v10695_v11 }
 0x412   :  { %4179 = vmatpush1.bf16.msra.mxu1 %v10438_v44 }
 0x413   :  { %4327 = vmatpush1.bf16.msra.mxu0 %v10443_v13  ;;  %4180 = vmatprep.subr.bf16.mxu1 %v10450_v16 }
 0x414   :  { %4328 = vmatprep.subr.bf16.mxu0 %v10456_v6 }
 0x416   :  { %4181 = vmatpush1.bf16.msra.mxu1 %v10462_v15 }
 0x417   :  { %4329 = vmatpush1.bf16.msra.mxu0 %v10469_v28  ;;  %4182 = vmatprep.subr.bf16.mxu1 %v10474_v26 }
 0x418   :  { %4330 = vmatprep.subr.bf16.mxu0 %v10480_v34 }
 0x41a   :  { %4183 = vmatpush1.bf16.msra.mxu1 %v10486_v42 }
 0x41b   :  { %4331 = vmatpush1.bf16.msra.mxu0 %v10493_v36  ;;  %4184 = vmatprep.subr.bf16.mxu1 %v10498_v10 }
 0x41c   :  { %4332 = vmatprep.subr.bf16.mxu0 %v10504_v30 }
 0x41e   :  { %4185 = vmatpush1.bf16.msra.mxu1 %v10510_v56 }
 0x41f   :  { %4333 = vmatpush1.bf16.msra.mxu0 %v10517_v17  ;;  %4186 = vmatprep.subr.bf16.mxu1 %v10522_v47 }
 0x420   :  { %4334 = vmatprep.subr.bf16.mxu0 %v10528_v5 }
 0x422   :  { %4187 = vmatpush1.bf16.msra.mxu1 %v10534_v52 }
 0x423   :  { %4335 = vmatpush1.bf16.msra.mxu0 %v10541_v29  ;;  %4468 = vmatprep.subr.bf16.mxu1 %v10546_v35 }
 0x424   :  { %4616 = vmatprep.subr.bf16.mxu0 %v10553_v39  ;;  %v3662_v39 = vld [vmem:[#allocation3 + $0x62] sm:$0x1] }
 0x425   :  { %4205 = vmatmul.mubr.bf16.vlgmr.msra.gmra.mxu1 %v10563_v12 }
 0x426   :  { %4353 = vmatmul.mubr.bf16.vlgmr.msra.gmra.mxu0 %v10576_v20  ;;  %4469 = vmatpush1.bf16.msra.mxu1 %v10560_v4  ;;  %v3597_v20 = vld [vmem:[#allocation3 + $0x13] sm:$0x1] }
 0x427   :  { %4617 = vmatpush1.bf16.msra.mxu0 %v10569_v0  ;;  %4470 = vmatprep.subr.bf16.mxu1 %v10574_v54  ;;  %v3599_v50 = vmax.f32 %v3595_v48, %v3597_v20  ;;  %v10700_v20 = vld [vmem:[%s12536_s5 + $0x214] ss:$8 sps:$4 sm:$0xff]   ;;  %v10712_v48 = vld [vmem:[%s12536_s5 + $0x210] ss:$8 sps:$4 sm:$0xff]  }
 0x428   :  { %4618 = vmatprep.subr.bf16.mxu0 %v10582_v31  ;;  %4500 = vmatprep.mubr.bf16.mxu1 %v12878_v49  ;;  %v10688_v31 = vld [vmem:[%s12536_s5 + $0x220] ss:$8 sps:$4 sm:$0xff]   ;;  %12896 = vst [vmem:[#allocation15_spill] sm:$0xff] %v10712_v48 }
 0x429   :  { %4648 = vmatprep.mubr.bf16.mxu0 %v12878_v49  ;;  %v3607_v0 = vmax.f32 %v3599_v50, %v3605_v22 }
 0x42a   :  { %4471 = vmatpush1.bf16.msra.mxu1 %v10590_v58 }
 0x42b   :  { %4619 = vmatpush1.bf16.msra.mxu0 %v10597_v61  ;;  %4472 = vmatprep.subr.bf16.mxu1 %v10602_v27  ;;  %v3609_v22 = vpack.c.bf16 %v3607_v0, %v3607_v0  ;;  %v10730_v0 = vld [vmem:[%s12536_s5 + $0x284] ss:$8 sps:$4 sm:$0xff]  }
 0x42c   :  { %4620 = vmatprep.subr.bf16.mxu0 %v10608_v32  ;;  %v10664_v32 = vld [vmem:[%s12536_s5 + $0x230] ss:$8 sps:$4 sm:$0xff]   ;;  %12899 = vst [vmem:[#allocation16_spill] sm:$0xff] %v10730_v0 }
 0x42e   :  { %4473 = vmatpush1.bf16.msra.mxu1 %v10614_v53 }
 0x42f   :  { %4621 = vmatpush1.bf16.msra.mxu0 %v10621_v2  ;;  %4474 = vmatprep.subr.bf16.mxu1 %v10628_v7  ;;  %v3624_v2 = vmax.f32 %v3616_v25, %v3622_v45  ;;  %v10676_v45 = vld [vmem:[%s12536_s5 + $0x224] ss:$8 sps:$4 sm:$0xff]   ;;  %v3610_v25 = vpack.c.bf16 %v3608_v23, %v3608_v23 }
 0x430   :  { %4622 = vmatprep.subr.bf16.mxu0 %v10634_v57  ;;  %v3613_v57 = vld [vmem:[#allocation3 + $0x15] sm:$0x1] }
 0x431   :  { %v3626_v61 = vpack.c.bf16 %v3624_v2, %v3624_v2  ;;  %v4383_v23 = vunpack.c.l.b16 %v3610_v25  ;;  %v10736_v25 = vld [vmem:[%s12536_s5 + $0x200] ss:$8 sps:$4 sm:$0xff]  }
 0x432   :  { %4475 = vmatpush1.bf16.msra.mxu1 %v10640_v37  ;;  %12900 = vst [vmem:[#allocation64_spill] sm:$0xff] %v10736_v25 }
 0x433   :  { %4623 = vmatpush1.bf16.msra.mxu0 %v10645_v9  ;;  %4476 = vmatprep.subr.bf16.mxu1 %v10652_v24  ;;  %v3615_v9 = vmax.f32 %v3611_v59, %v3613_v57  ;;  %v10706_v57 = vld [vmem:[%s12536_s5 + $0x294] ss:$8 sps:$4 sm:$0xff]   ;;  %v4531_v18 = vunpack.c.l.b16 %v3626_v61  ;;  %v10724_v61 = vld [vmem:[%s12536_s5 + $0x204] ss:$8 sps:$4 sm:$0xff]  }
 0x434   :  { %4624 = vmatprep.subr.bf16.mxu0 %v10658_v3  ;;  %12895 = vst [vmem:[#allocation38_spill] sm:$0xff] %v10706_v57  ;;  %12898 = vst [vmem:[#allocation39_spill] sm:$0xff] %v10724_v61  ;;  %v3668_v3 = vld [vmem:[#allocation3 + $0x6a] sm:$0x1] }
 0x435   :  { %v3623_v2 = vmax.f32 %v3615_v9, %v3621_v51  ;;  %v10719_v9 = vld [vmem:[%s12536_s5 + $0x290] ss:$8 sps:$4 sm:$0xff]   ;;  %v4384_v51 = vrot.slane %v4383_v23, 7  ;;  %v4532_v50 = vrot.slane %v4531_v18, 7  ;;  %v10748_v23 = vld [vmem:[%s12536_s5 + $0x374] ss:$8 sps:$4 sm:$0xff]  }
 0x436   :  { %4477 = vmatpush1.bf16.msra.mxu1 %v10664_v32  ;;  %12897 = vst [vmem:[#allocation63_spill] sm:$0xff] %v10719_v9  ;;  %12902 = vst [vmem:[#allocation17_spill] sm:$0xff] %v10748_v23 }
 0x437   :  { %4625 = vmatpush1.bf16.msra.mxu0 %v10671_v55  ;;  %4478 = vmatprep.subr.bf16.mxu1 %v10676_v45  ;;  %v3625_v59 = vpack.c.bf16 %v3623_v2, %v3623_v2  ;;  %v10743_v2 = vld [vmem:[%s12536_s5 + $0x280] ss:$8 sps:$4 sm:$0xff]  }
 0x438   :  { %4626 = vmatprep.subr.bf16.mxu0 %v10682_v43  ;;  %12901 = vst [vmem:[#allocation40_spill] sm:$0xff] %v10743_v2  ;;  %v3654_v55 = vld [vmem:[#allocation3 + $0x69] sm:$0x1] }
 0x43a   :  { %4479 = vmatpush1.bf16.msra.mxu1 %v10688_v31 }
 0x43b   :  { %4627 = vmatpush1.bf16.msra.mxu0 %v10695_v11  ;;  %4480 = vmatprep.subr.bf16.mxu1 %v10700_v20  ;;  %v4382_v11 = vunpack.c.l.b16 %v3609_v22  ;;  %v10755_v22 = vld [vmem:[%s12536_s5 + $0x3f4] ss:$8 sps:$4 sm:$0xff]  }
 0x43c   :  { %4628 = vmatprep.subr.bf16.mxu0 %v10706_v57  ;;  %v4530_v57 = vunpack.c.l.b16 %v3625_v59  ;;  %12903 = vst [vmem:[#allocation65_spill] sm:$0xff] %v10755_v22  ;;  %v10762_v59 = vld [vmem:[%s12536_s5 + $0x370] ss:$8 sps:$4 sm:$0xff]  }
 0x43d   :  { %v4385_v18 = vsel %vm3813_vm0, %v4384_v51, %v4382_v11  ;;  %12904 = vst [vmem:[#allocation41_spill] sm:$0xff] %v10762_v59  ;;  %v10771_v11 = vld [vmem:[%s12536_s5 + $0x3f0] ss:$8 sps:$4 sm:$0xff]  }
 0x43e   :  { %4481 = vmatpush1.bf16.msra.mxu1 %v10712_v48  ;;  %v10765_v43 = vpack.c.b16 %v4385_v18, %v4385_v18  ;;  %12906 = vst [vmem:[#allocation66_spill] sm:$0xff] %v10771_v11  ;;  %v10792_v18 = vld [vmem:[%s12536_s5 + $0x360] ss:$8 sps:$4 sm:$0xff]   ;;  %v10866_v48 = vld [vmem:[%s12536_s5 + $0x330] ss:$8 sps:$4 sm:$0xff]  }
 0x43f   :  { %4629 = vmatpush1.bf16.msra.mxu0 %v10719_v9  ;;  %4482 = vmatprep.subr.bf16.mxu1 %v10724_v61  ;;  %v4533_v9 = vsel %vm3813_vm0, %v4532_v50, %v4530_v57  ;;  %v10776_v57 = vld [vmem:[%s12536_s5 + $0x364] ss:$8 sps:$4 sm:$0xff]   ;;  %12910 = vst [vmem:[#allocation43_spill] sm:$0xff] %v10792_v18  ;;  %v3644_v61 = vld [vmem:[#allocation3 + $0x20] sm:$0x1] }
 0x440   :  { %4630 = vmatprep.subr.bf16.mxu0 %v10730_v0  ;;  %12905 = vst [vmem:[#allocation18_spill] sm:$0xff] %v10765_v43  ;;  %12907 = vst [vmem:[#allocation42_spill] sm:$0xff] %v10776_v57  ;;  %v10778_v51 = vpack.c.b16 %v4533_v9, %v4533_v9  ;;  %v10784_v50 = vld [vmem:[%s12536_s5 + $0x3e4] ss:$8 sps:$4 sm:$0xff]   ;;  %v10799_v9 = vld [vmem:[%s12536_s5 + $0x3e0] ss:$8 sps:$4 sm:$0xff]  }
 0x441   :  { %12909 = vst [vmem:[#allocation67_spill] sm:$0xff] %v10784_v50  ;;  %12911 = vst [vmem:[#allocation20_spill] sm:$0xff] %v10799_v9  ;;  %v3652_v0 = vld [vmem:[#allocation3 + $0x68] sm:$0x1] }
 0x442   :  { %4483 = vmatpush1.bf16.msra.mxu1 %v10736_v25  ;;  %12908 = vst [vmem:[#allocation19_spill] sm:$0xff] %v10778_v51  ;;  %v3664_v25 = vld [vmem:[#allocation3 + $0x63] sm:$0x1] }
 0x443   :  { %4631 = vmatpush1.bf16.msra.mxu0 %v10743_v2  ;;  %4764 = vmatprep.subr.bf16.mxu1 %v10748_v23  ;;  %v10810_v2 = vld [vmem:[%s12536_s5 + $0x3d4] ss:$8 sps:$4 sm:$0xff]   ;;  %v3656_v23 = vmax.f32 %v3652_v0, %v3654_v55  ;;  %v3651_v55 = vld [vmem:[#allocation3 + $0x28] sm:$0x1]  ;;  %v3653_v0 = vld [vmem:[#allocation3 + $0x29] sm:$0x1] }
 0x444   :  { %4912 = vmatprep.subr.bf16.mxu0 %v10755_v22  ;;  %v10804_v22 = vld [vmem:[%s12536_s5 + $0x354] ss:$8 sps:$4 sm:$0xff]   ;;  %12913 = vst [vmem:[#allocation44_spill] sm:$0xff] %v10810_v2 }
 0x445   :  { %4501 = vmatmul.mubr.bf16.vlgmr.msra.gmra.mxu1 %v10765_v43  ;;  %12912 = vst [vmem:[#allocation68_spill] sm:$0xff] %v10804_v22  ;;  %v3647_v43 = vld [vmem:[#allocation3 + $0x61] sm:$0x1] }
 0x446   :  { %4649 = vmatmul.mubr.bf16.vlgmr.msra.gmra.mxu0 %v10778_v51  ;;  %4765 = vmatpush1.bf16.msra.mxu1 %v10762_v59  ;;  %v10830_v59 = vld [vmem:[%s12536_s5 + $0x344] ss:$8 sps:$4 sm:$0xff]   ;;  %v3645_v51 = vld [vmem:[#allocation3 + $0x60] sm:$0x1] }
 0x447   :  { %4913 = vmatpush1.bf16.msra.mxu0 %v10771_v11  ;;  %4766 = vmatprep.subr.bf16.mxu1 %v10776_v57  ;;  %v10816_v11 = vld [vmem:[%s12536_s5 + $0x350] ss:$8 sps:$4 sm:$0xff]   ;;  %v3670_v57 = vld [vmem:[#allocation3 + $0x6b] sm:$0x1]  ;;  %12916 = vst [vmem:[#allocation45_spill] sm:$0xff] %v10830_v59  ;;  %v3649_v29 = vmax.f32 %v3645_v51, %v3647_v43 }
 0x448   :  { %4914 = vmatprep.subr.bf16.mxu0 %v10784_v50  ;;  %4796 = vmatprep.mubr.bf16.mxu1 %v12878_v49  ;;  %12914 = vst [vmem:[#allocation21_spill] sm:$0xff] %v10816_v11  ;;  %v10823_v50 = vld [vmem:[%s12536_s5 + $0x3d0] ss:$8 sps:$4 sm:$0xff]   ;;  %v3667_v51 = vld [vmem:[#allocation3 + $0x2a] sm:$0x1] }
 0x449   :  { %4944 = vmatprep.mubr.bf16.mxu0 %v12878_v49  ;;  %12915 = vst [vmem:[#allocation69_spill] sm:$0xff] %v10823_v50  ;;  %v3658_v43 = vmax.f32 %v3649_v29, %v3656_v23  ;;  %v10873_v29 = vld [vmem:[%s12536_s5 + $0x3b0] ss:$8 sps:$4 sm:$0xff]   ;;  %v10878_v23 = vld [vmem:[%s12536_s5 + $0x324] ss:$8 sps:$4 sm:$0xff]  }
 0x44a   :  { %4767 = vmatpush1.bf16.msra.mxu1 %v10792_v18  ;;  %v10836_v18 = vld [vmem:[%s12536_s5 + $0x3c4] ss:$8 sps:$4 sm:$0xff]   ;;  %12922 = vst [vmem:[#allocation47_spill] sm:$0xff] %v10873_v29 }
 0x44b   :  { %4915 = vmatpush1.bf16.msra.mxu0 %v10799_v9  ;;  %4768 = vmatprep.subr.bf16.mxu1 %v10804_v22  ;;  %12917 = vst [vmem:[#allocation22_spill] sm:$0xff] %v10836_v18  ;;  %v3672_v9 = vmax.f32 %v3668_v3, %v3670_v57  ;;  %v10842_v22 = vld [vmem:[%s12536_s5 + $0x340] ss:$8 sps:$4 sm:$0xff]   ;;  %v10854_v3 = vld [vmem:[%s12536_s5 + $0x334] ss:$8 sps:$4 sm:$0xff]   ;;  %v3666_v57 = vmax.f32 %v3662_v39, %v3664_v25 }
 0x44c   :  { %4916 = vmatprep.subr.bf16.mxu0 %v10810_v2  ;;  %12918 = vst [vmem:[#allocation70_spill] sm:$0xff] %v10842_v22  ;;  %v10847_v2 = vld [vmem:[%s12536_s5 + $0x3c0] ss:$8 sps:$4 sm:$0xff]   ;;  %12920 = vst [vmem:[#allocation23_spill] sm:$0xff] %v10854_v3  ;;  %v3655_v39 = vmax.f32 %v3651_v55, %v3653_v0  ;;  %v10884_v55 = vld [vmem:[%s12536_s5 + $0x3a4] ss:$8 sps:$4 sm:$0xff]  }
 0x44d   :  { %12919 = vst [vmem:[#allocation46_spill] sm:$0xff] %v10847_v2  ;;  %v3674_v5 = vmax.f32 %v3666_v57, %v3672_v9  ;;  %v3661_v25 = vld [vmem:[#allocation3 + $0x22] sm:$0x1]  ;;  %12923 = vst [vmem:[#allocation24_spill] sm:$0xff] %v10884_v55  ;;  %v3660_v57 = vpack.c.bf16 %v3658_v43, %v3658_v43 }
 0x44e   :  { %4769 = vmatpush1.bf16.msra.mxu1 %v10816_v11  ;;  %v10860_v11 = vld [vmem:[%s12536_s5 + $0x3b4] ss:$8 sps:$4 sm:$0xff]  }
 0x44f   :  { %4917 = vmatpush1.bf16.msra.mxu0 %v10823_v50  ;;  %4770 = vmatprep.subr.bf16.mxu1 %v10830_v59  ;;  %12921 = vst [vmem:[#allocation71_spill] sm:$0xff] %v10860_v11  ;;  %v3669_v50 = vld [vmem:[#allocation3 + $0x2b] sm:$0x1]  ;;  %v3646_v59 = vld [vmem:[#allocation3 + $0x21] sm:$0x1] }
 0x450   :  { %4918 = vmatprep.subr.bf16.mxu0 %v10836_v18  ;;  %v3663_v18 = vld [vmem:[#allocation3 + $0x23] sm:$0x1]  ;;  %v3671_v9 = vmax.f32 %v3667_v51, %v3669_v50  ;;  %v3648_v0 = vmax.f32 %v3644_v61, %v3646_v59  ;;  %v10908_v59 = vld [vmem:[%s12536_s5 + $0x394] ss:$8 sps:$4 sm:$0xff]   ;;  %v10914_v51 = vld [vmem:[%s12536_s5 + $0x310] ss:$8 sps:$4 sm:$0xff]  }
 0x451   :  { %v10897_v50 = vld [vmem:[%s12536_s5 + $0x3a0] ss:$8 sps:$4 sm:$0xff]   ;;  %12925 = vst [vmem:[#allocation48_spill] sm:$0xff] %v10908_v59 }
 0x452   :  { %4771 = vmatpush1.bf16.msra.mxu1 %v10842_v22  ;;  %v10890_v22 = vld [vmem:[%s12536_s5 + $0x320] ss:$8 sps:$4 sm:$0xff]   ;;  %v3657_v17 = vmax.f32 %v3648_v0, %v3655_v39  ;;  %12924 = vst [vmem:[#allocation72_spill] sm:$0xff] %v10897_v50 }
 0x453   :  { %4919 = vmatpush1.bf16.msra.mxu0 %v10847_v2  ;;  %4772 = vmatprep.subr.bf16.mxu1 %v10854_v3  ;;  %v3665_v2 = vmax.f32 %v3661_v25, %v3663_v18  ;;  %v3676_v3 = vpack.c.bf16 %v3674_v5, %v3674_v5  ;;  %v10902_v5 = vld [vmem:[%s12536_s5 + $0x314] ss:$8 sps:$4 sm:$0xff]   ;;  %v4679_v18 = vunpack.c.l.b16 %v3660_v57  ;;  %v10938_v57 = vld [vmem:[%s12536_s5 + $0x300] ss:$8 sps:$4 sm:$0xff]  }
 0x454   :  { %4920 = vmatprep.subr.bf16.mxu0 %v10860_v11  ;;  %v3659_v39 = vpack.c.bf16 %v3657_v17, %v3657_v17  ;;  %v10932_v17 = vld [vmem:[%s12536_s5 + $0x384] ss:$8 sps:$4 sm:$0xff]   ;;  %v11027_v11 = vld [vmem:[%s12536_s5 + $0xd4] ss:$8 sps:$4 sm:$0xff]  }
 0x455   :  { %v3673_v61 = vmax.f32 %v3665_v2, %v3671_v9  ;;  %v4827_v43 = vunpack.c.l.b16 %v3676_v3  ;;  %v10921_v2 = vld [vmem:[%s12536_s5 + $0x390] ss:$8 sps:$4 sm:$0xff]   ;;  %v10926_v3 = vld [vmem:[%s12536_s5 + $0x304] ss:$8 sps:$4 sm:$0xff]   ;;  %12927 = vst [vmem:[#allocation73_spill] sm:$0xff] %v10932_v17  ;;  %v4680_v9 = vrot.slane %v4679_v18, 7 }
 0x456   :  { %4773 = vmatpush1.bf16.msra.mxu1 %v10866_v48  ;;  %12926 = vst [vmem:[#allocation25_spill] sm:$0xff] %v10921_v2  ;;  %v10950_v18 = vld [vmem:[%s12536_s5 + $0x474] ss:$8 sps:$4 sm:$0xff]   ;;  %12941 = vst [vmem:[#allocation30_spill] sm:$0xff] %v11027_v11 }
 0x457   :  { %4921 = vmatpush1.bf16.msra.mxu0 %v10873_v29  ;;  %4774 = vmatprep.subr.bf16.mxu1 %v10878_v23  ;;  %v3675_v25 = vpack.c.bf16 %v3673_v61, %v3673_v61  ;;  %v4828_v0 = vrot.slane %v4827_v43, 7  ;;  %v10945_v61 = vld [vmem:[%s12536_s5 + $0x380] ss:$8 sps:$4 sm:$0xff]   ;;  %v3680_v29 = vld [vmem:[#allocation3 + $0x65] sm:$0x1] }
 0x458   :  { %4922 = vmatprep.subr.bf16.mxu0 %v10884_v55  ;;  %12928 = vst [vmem:[#allocation49_spill] sm:$0xff] %v10945_v61  ;;  %v3678_v55 = vld [vmem:[#allocation3 + $0x64] sm:$0x1] }
 0x45a   :  { %4775 = vmatpush1.bf16.msra.mxu1 %v10890_v22 }
 0x45b   :  { %4923 = vmatpush1.bf16.msra.mxu0 %v10897_v50  ;;  %4776 = vmatprep.subr.bf16.mxu1 %v10902_v5  ;;  %v4678_v50 = vunpack.c.l.b16 %v3659_v39 }
 0x45c   :  { %4924 = vmatprep.subr.bf16.mxu0 %v10908_v59  ;;  %v4826_v59 = vunpack.c.l.b16 %v3675_v25 }
 0x45d   :  { %v4681_v43 = vsel %vm3813_vm0, %v4680_v9, %v4678_v50  ;;  %v10984_v9 = vld [vmem:[%s12536_s5 + $0x460] ss:$8 sps:$4 sm:$0xff]  }
 0x45e   :  { %4777 = vmatpush1.bf16.msra.mxu1 %v10914_v51  ;;  %v4829_v39 = vsel %vm3813_vm0, %v4828_v0, %v4826_v59  ;;  %v10962_v25 = vpack.c.b16 %v4681_v43, %v4681_v43  ;;  %v10975_v59 = vld [vmem:[%s12536_s5 + $0xf4] ss:$8 sps:$4 sm:$0xff]   ;;  %12934 = vst [vmem:[#allocation51_spill] sm:$0xff] %v10984_v9  ;;  %v10989_v0 = vld [vmem:[%s12536_s5 + $0xf0] ss:$8 sps:$4 sm:$0xff]  }
 0x45f   :  { %4925 = vmatpush1.bf16.msra.mxu0 %v10921_v2  ;;  %4778 = vmatprep.subr.bf16.mxu1 %v10926_v3  ;;  %v10959_v2 = vld [vmem:[%s12536_s5 + $0x470] ss:$8 sps:$4 sm:$0xff]   ;;  %v10970_v50 = vpack.c.b16 %v4829_v39, %v4829_v39  ;;  %12933 = vst [vmem:[#allocation75_spill] sm:$0xff] %v10975_v59  ;;  %12935 = vst [vmem:[#allocation28_spill] sm:$0xff] %v10989_v0  ;;  %v10996_v43 = vld [vmem:[%s12536_s5 + $0x454] ss:$8 sps:$4 sm:$0xff]  }
 0x460   :  { %4926 = vmatprep.subr.bf16.mxu0 %v10932_v17  ;;  %12929 = vst [vmem:[#allocation26_spill] sm:$0xff] %v10959_v2  ;;  %12930 = vst [vmem:[#allocation74_spill] sm:$0xff] %v10962_v25  ;;  %v10968_v17 = vld [vmem:[%s12536_s5 + $0x464] ss:$8 sps:$4 sm:$0xff]  }
 0x461   :  { %12931 = vst [vmem:[#allocation50_spill] sm:$0xff] %v10968_v17  ;;  %12932 = vst [vmem:[#allocation27_spill] sm:$0xff] %v10970_v50  ;;  %v11001_v39 = vld [vmem:[%s12536_s5 + $0xe4] ss:$8 sps:$4 sm:$0xff]  }
 0x462   :  { %4779 = vmatpush1.bf16.msra.mxu1 %v10938_v57  ;;  %12936 = vst [vmem:[#allocation76_spill] sm:$0xff] %v10996_v43  ;;  %12937 = vst [vmem:[#allocation52_spill] sm:$0xff] %v11001_v39 }
 0x463   :  { %4927 = vmatpush1.bf16.msra.mxu0 %v10945_v61  ;;  %5060 = vmatprep.subr.bf16.mxu1 %v10950_v18  ;;  %v11015_v61 = vld [vmem:[%s12536_s5 + $0xe0] ss:$8 sps:$4 sm:$0xff]  }
 0x464   :  { %5103 = vmatprep.subr.bf16.mxu0 %v10975_v59  ;;  %v11010_v59 = vld [vmem:[%s12536_s5 + $0x450] ss:$8 sps:$4 sm:$0xff]   ;;  %12939 = vst [vmem:[#allocation77_spill] sm:$0xff] %v11015_v61 }
 0x465   :  { %4797 = vmatmul.mubr.bf16.vlgmr.msra.gmra.mxu1 %v10962_v25  ;;  %v3684_v25 = vld [vmem:[#allocation3 + $0x6c] sm:$0x1]  ;;  %12938 = vst [vmem:[#allocation29_spill] sm:$0xff] %v11010_v59 }
 0x466   :  { %4945 = vmatmul.mubr.bf16.vlgmr.msra.gmra.mxu0 %v10970_v50  ;;  %5061 = vmatpush1.bf16.msra.mxu1 %v10959_v2  ;;  %v3679_v2 = vld [vmem:[#allocation3 + $0x25] sm:$0x1]  ;;  %v11063_v50 = vld [vmem:[%s12536_s5 + $0xc0] ss:$8 sps:$4 sm:$0xff]  }
 0x467   :  { %5104 = vmatpush1.bf16.msra.mxu0 %v10989_v0  ;;  %5062 = vmatprep.subr.bf16.mxu1 %v10968_v17  ;;  %v3686_v0 = vld [vmem:[#allocation3 + $0x6d] sm:$0x1]  ;;  %v11039_v17 = vld [vmem:[%s12536_s5 + $0xd0] ss:$8 sps:$4 sm:$0xff]   ;;  %12945 = vst [vmem:[#allocation31_spill] sm:$0xff] %v11063_v50 }
 0x468   :  { %5105 = vmatprep.subr.bf16.mxu0 %v11001_v39  ;;  %5092 = vmatprep.mubr.bf16.mxu1 %v12878_v49  ;;  %v11022_v39 = vld [vmem:[%s12536_s5 + $0x444] ss:$8 sps:$4 sm:$0xff]   ;;  %12942 = vst [vmem:[#allocation53_spill] sm:$0xff] %v11039_v17 }
 0x469   :  { %5135 = vmatprep.mubr.bf16.mxu0 %v12878_v49  ;;  %12940 = vst [vmem:[#allocation54_spill] sm:$0xff] %v11022_v39 }
 0x46a   :  { %5063 = vmatpush1.bf16.msra.mxu1 %v10984_v9  ;;  %v3688_v9 = vmax.f32 %v3684_v25, %v3686_v0  ;;  %v11046_v25 = vld [vmem:[%s12536_s5 + $0x434] ss:$8 sps:$4 sm:$0xff]   ;;  %v3683_v0 = vld [vmem:[#allocation3 + $0x2c] sm:$0x1] }
 0x46b   :  { %5106 = vmatpush1.bf16.msra.mxu0 %v11015_v61  ;;  %5064 = vmatprep.subr.bf16.mxu1 %v10996_v43  ;;  %v11034_v61 = vld [vmem:[%s12536_s5 + $0x440] ss:$8 sps:$4 sm:$0xff]   ;;  %v3682_v43 = vmax.f32 %v3678_v55, %v3680_v29  ;;  %12943 = vst [vmem:[#allocation55_spill] sm:$0xff] %v11046_v25  ;;  %v11051_v29 = vld [vmem:[%s12536_s5 + $0xc4] ss:$8 sps:$4 sm:$0xff]  }
 0x46c   :  { %5107 = vmatprep.subr.bf16.mxu0 %v11027_v11  ;;  %v3685_v11 = vld [vmem:[#allocation3 + $0x2d] sm:$0x1]  ;;  %12944 = vst [vmem:[#allocation7_spill] sm:$0xff] %v11051_v29 }
 0x46d   :  { %v3690_v55 = vmax.f32 %v3682_v43, %v3688_v9  ;;  %v11070_v9 = vld [vmem:[%s12536_s5 + $0x424] ss:$8 sps:$4 sm:$0xff]   ;;  %v11075_v43 = vld [vmem:[%s12536_s5 + $0xb4] ss:$8 sps:$4 sm:$0xff]  }
 0x46e   :  { %5065 = vmatpush1.bf16.msra.mxu1 %v11010_v59  ;;  %v3677_v59 = vld [vmem:[#allocation3 + $0x24] sm:$0x1]  ;;  %12946 = vst [vmem:[#allocation56_spill] sm:$0xff] %v11075_v43 }
 0x46f   :  { %5108 = vmatpush1.bf16.msra.mxu0 %v11039_v17  ;;  %5066 = vmatprep.subr.bf16.mxu1 %v11022_v39  ;;  %v11058_v17 = vld [vmem:[%s12536_s5 + $0x430] ss:$8 sps:$4 sm:$0xff]   ;;  %v3687_v39 = vmax.f32 %v3683_v0, %v3685_v11  ;;  %v3681_v11 = vmax.f32 %v3677_v59, %v3679_v2  ;;  %v3692_v0 = vpack.c.bf16 %v3690_v55, %v3690_v55  ;;  %v11094_v2 = vld [vmem:[%s12536_s5 + $0x414] ss:$8 sps:$4 sm:$0xff]   ;;  %v11099_v59 = vld [vmem:[%s12536_s5 + $0xa4] ss:$8 sps:$4 sm:$0xff]  }
 0x470   :  { %5109 = vmatprep.subr.bf16.mxu0 %v11051_v29  ;;  %12948 = vst [vmem:[#allocation32_spill] sm:$0xff] %v11094_v2  ;;  %12949 = vst [vmem:[#allocation9_spill] sm:$0xff] %v11099_v59  ;;  %v11106_v55 = vld [vmem:[%s12536_s5 + $0x410] ss:$8 sps:$4 sm:$0xff]  }
 0x471   :  { %v3689_v29 = vmax.f32 %v3681_v11, %v3687_v39  ;;  %v4975_v39 = vunpack.c.l.b16 %v3692_v0  ;;  %v11118_v0 = vld [vmem:[%s12536_s5 + $0x404] ss:$8 sps:$4 sm:$0xff]  }
 0x472   :  { %5067 = vmatpush1.bf16.msra.mxu1 %v11034_v61  ;;  %12951 = vst [vmem:[#allocation79_spill] sm:$0xff] %v11118_v0 }
 0x473   :  { %5110 = vmatpush1.bf16.msra.mxu0 %v11063_v50  ;;  %5068 = vmatprep.subr.bf16.mxu1 %v11046_v25  ;;  %v11082_v50 = vld [vmem:[%s12536_s5 + $0x420] ss:$8 sps:$4 sm:$0xff]   ;;  %v11087_v25 = vld [vmem:[%s12536_s5 + $0xb0] ss:$8 sps:$4 sm:$0xff]   ;;  %v3691_v11 = vpack.c.bf16 %v3689_v29, %v3689_v29  ;;  %v4976_v29 = vrot.slane %v4975_v39, 7 }
 0x474   :  { %5111 = vmatprep.subr.bf16.mxu0 %v11075_v43  ;;  %12947 = vst [vmem:[#allocation8_spill] sm:$0xff] %v11087_v25  ;;  %v11142_v39 = vld [vmem:[%s12536_s5 + $0x84] ss:$8 sps:$4 sm:$0xff]  }
 0x475   :  { %v4974_v43 = vunpack.c.l.b16 %v3691_v11  ;;  %12954 = vst [vmem:[#allocation82_spill] sm:$0xff] %v11142_v39  ;;  %v11150_v11 = vld [vmem:[%s12536_s5 + $0x80] ss:$8 sps:$4 sm:$0xff]  }
 0x476   :  { %5069 = vmatpush1.bf16.msra.mxu1 %v11058_v17  ;;  %12955 = vst [vmem:[#allocation83_spill] sm:$0xff] %v11150_v11 }
 0x477   :  { %5112 = vmatpush1.bf16.msra.mxu0 %v11087_v25  ;;  %5070 = vmatprep.subr.bf16.mxu1 %v11070_v9  ;;  %v11111_v25 = vld [vmem:[%s12536_s5 + $0xa0] ss:$8 sps:$4 sm:$0xff]  }
 0x478   :  { %5113 = vmatprep.subr.bf16.mxu0 %v11099_v59  ;;  %12950 = vst [vmem:[#allocation78_spill] sm:$0xff] %v11111_v25  ;;  %v11123_v59 = vld [vmem:[%s12536_s5 + $0x94] ss:$8 sps:$4 sm:$0xff]  }
 0x479   :  { %12952 = vst [vmem:[#allocation80_spill] sm:$0xff] %v11123_v59 }
 0x47a   :  { %5071 = vmatpush1.bf16.msra.mxu1 %v11082_v50 }
 0x47b   :  { %5114 = vmatpush1.bf16.msra.mxu0 %v11111_v25  ;;  %5072 = vmatprep.subr.bf16.mxu1 %v11094_v2  ;;  %v11130_v25 = vld [vmem:[%s12536_s5 + $0x400] ss:$8 sps:$4 sm:$0xff]   ;;  %v11135_v2 = vld [vmem:[%s12536_s5 + $0x90] ss:$8 sps:$4 sm:$0xff]  }
 0x47c   :  { %5115 = vmatprep.subr.bf16.mxu0 %v11123_v59  ;;  %12953 = vst [vmem:[#allocation81_spill] sm:$0xff] %v11135_v2  ;;  %v4977_v59 = vsel %vm3813_vm0, %v4976_v29, %v4974_v43  ;;  %v11164_v43 = vld [vmem:[%s12536_s5 + $0x174] ss:$8 sps:$4 sm:$0xff]   ;;  %v11179_v29 = vld [vmem:[%s12536_s5 + $0x64] ss:$8 sps:$4 sm:$0xff]  }
 0x47d   :  { %12957 = vst [vmem:[#allocation85_spill] sm:$0xff] %v11164_v43  ;;  %12959 = vst [vmem:[#allocation87_spill] sm:$0xff] %v11179_v29 }
 0x47e   :  { %5073 = vmatpush1.bf16.msra.mxu1 %v11106_v55 }
 0x47f   :  { %5116 = vmatpush1.bf16.msra.mxu0 %v11135_v2  ;;  %5074 = vmatprep.subr.bf16.mxu1 %v11118_v0  ;;  %v11153_v2 = vpack.c.b16 %v4977_v59, %v4977_v59  ;;  %v11158_v0 = vld [vmem:[%s12536_s5 + $0x74] ss:$8 sps:$4 sm:$0xff]   ;;  %v11172_v59 = vld [vmem:[%s12536_s5 + $0x70] ss:$8 sps:$4 sm:$0xff]  }
 0x480   :  { %5117 = vmatprep.subr.bf16.mxu0 %v11142_v39  ;;  %12958 = vst [vmem:[#allocation86_spill] sm:$0xff] %v11172_v59  ;;  %v3564_v39 = vld [vmem:[#allocation3 + $0x47] sm:$0x1] }
 0x481   :  { %12956 = vst [vmem:[#allocation84_spill] sm:$0xff] %v11153_v2 }
 0x482   :  { %5075 = vmatpush1.bf16.msra.mxu1 %v11130_v25 }
 0x483   :  { %5118 = vmatpush1.bf16.msra.mxu0 %v11150_v11  ;;  %5144 = vmatprep.subr.bf16.mxu1 %v11158_v0  ;;  %v11195_v11 = vld [vmem:[%s12536_s5 + $0x54] ss:$8 sps:$4 sm:$0xff]  }
 0x484   :  { %5193 = vmatprep.subr.bf16.mxu0 %v11164_v43  ;;  %v3570_v43 = vld [vmem:[#allocation3 + $0x4f] sm:$0x1]  ;;  %12961 = vst [vmem:[#allocation89_spill] sm:$0xff] %v11195_v11 }
 0x485   :  { %5093 = vmatmul.mubr.bf16.vlgmr.msra.gmra.mxu1 %v11153_v2 }
 0x486   :  { %5136 = vmatmul.mubr.bf16.vlgmr.msra.gmra.mxu0 %v10563_v12  ;;  %5145 = vmatpush1.bf16.msra.mxu1 %v11172_v59  ;;  %v11188_v12 = vld [vmem:[%s12536_s5 + $0x60] ss:$8 sps:$4 sm:$0xff]  }
 0x487   :  { %5194 = vmatpush1.bf16.msra.mxu0 %v10363_v40  ;;  %5146 = vmatprep.subr.bf16.mxu1 %v11179_v29  ;;  %12960 = vst [vmem:[#allocation88_spill] sm:$0xff] %v11188_v12  ;;  %v3568_v40 = vld [vmem:[#allocation3 + $0x4e] sm:$0x1]  ;;  %v11216_v59 = vld [vmem:[%s12536_s5 + $0x40] ss:$8 sps:$4 sm:$0xff]  }
 0x488   :  { %5195 = vmatprep.subr.bf16.mxu0 %v10376_v33  ;;  %5176 = vmatprep.mubr.bf16.mxu1 %v12878_v49  ;;  %v3562_v33 = vld [vmem:[#allocation3 + $0x46] sm:$0x1]  ;;  %v3572_v29 = vmax.f32 %v3568_v40, %v3570_v43  ;;  %v3567_v43 = vld [vmem:[#allocation3 + $0xe] sm:$0x1]  ;;  %v3569_v40 = vld [vmem:[#allocation3 + $0xf] sm:$0x1] }
 0x489   :  { %5225 = vmatprep.mubr.bf16.mxu0 %v12878_v49 }
 0x48a   :  { %5147 = vmatpush1.bf16.msra.mxu1 %v11188_v12  ;;  %v11202_v12 = vld [vmem:[%s12536_s5 + $0x50] ss:$8 sps:$4 sm:$0xff]  }
 0x48b   :  { %5196 = vmatpush1.bf16.msra.mxu0 %v10388_v46  ;;  %5148 = vmatprep.subr.bf16.mxu1 %v11195_v11  ;;  %12962 = vst [vmem:[#allocation90_spill] sm:$0xff] %v11202_v12  ;;  %v11209_v46 = vld [vmem:[%s12536_s5 + $0x44] ss:$8 sps:$4 sm:$0xff]  }
 0x48c   :  { %5197 = vmatprep.subr.bf16.mxu0 %v10400_v19  ;;  %v3566_v19 = vmax.f32 %v3562_v33, %v3564_v39  ;;  %v11223_v39 = vld [vmem:[%s12536_s5 + $0x34] ss:$8 sps:$4 sm:$0xff]  }
 0x48e   :  { %5149 = vmatpush1.bf16.msra.mxu1 %v11202_v12  ;;  %v3574_v11 = vmax.f32 %v3566_v19, %v3572_v29  ;;  %v3563_v12 = vld [vmem:[#allocation3 + $0x7] sm:$0x1]  ;;  %v11230_v19 = vld [vmem:[%s12536_s5 + $0x30] ss:$8 sps:$4 sm:$0xff]  }
 0x48f   :  { %5198 = vmatpush1.bf16.msra.mxu0 %v10412_v21  ;;  %5150 = vmatprep.subr.bf16.mxu1 %v11209_v46  ;;  %v3561_v21 = vld [vmem:[#allocation3 + $0x6] sm:$0x1] }
 0x490   :  { %5199 = vmatprep.subr.bf16.mxu0 %v10426_v60  ;;  %v3571_v60 = vmax.f32 %v3567_v43, %v3569_v40  ;;  %v3565_v29 = vmax.f32 %v3561_v21, %v3563_v12  ;;  %v3576_v33 = vpack.c.bf16 %v3574_v11, %v3574_v11  ;;  %v11244_v11 = vld [vmem:[%s12536_s5 + $0x20] ss:$8 sps:$4 sm:$0xff]   ;;  %v11258_v40 = vld [vmem:[%s12536_s5 + $0x10] ss:$8 sps:$4 sm:$0xff]  }
 0x492   :  { %5151 = vmatpush1.bf16.msra.mxu1 %v11216_v59  ;;  %v3573_v43 = vmax.f32 %v3565_v29, %v3571_v60  ;;  %v11273_v60 = vld [vmem:[%s12536_s5] ss:$8 sps:$4 sm:$0xff]  }
 0x493   :  { %5200 = vmatpush1.bf16.msra.mxu0 %v10438_v44  ;;  %5152 = vmatprep.subr.bf16.mxu1 %v11223_v39  ;;  %v11237_v44 = vld [vmem:[%s12536_s5 + $0x24] ss:$8 sps:$4 sm:$0xff]  }
 0x494   :  { %5201 = vmatprep.subr.bf16.mxu0 %v10450_v16  ;;  %v5188_v16 = vunpack.c.l.b16 %v3576_v33  ;;  %v3575_v12 = vpack.c.bf16 %v3573_v43, %v3573_v43  ;;  %v3628_v33 = vld [vmem:[#allocation3 + $0x56] sm:$0x1]  ;;  %v3630_v43 = vld [vmem:[#allocation3 + $0x57] sm:$0x1] }
 0x496   :  { %5153 = vmatpush1.bf16.msra.mxu1 %v11230_v19  ;;  %v5187_v21 = vunpack.c.l.b16 %v3575_v12  ;;  %v12980_v12 = vld [vmem:[#allocation68_spill] sm:$0xff] }
 0x497   :  { %5202 = vmatpush1.bf16.msra.mxu0 %v10462_v15  ;;  %5154 = vmatprep.subr.bf16.mxu1 %v11237_v44  ;;  %v11251_v15 = vld [vmem:[%s12536_s5 + $0x14] ss:$8 sps:$4 sm:$0xff]  }
 0x498   :  { %5203 = vmatprep.subr.bf16.mxu0 %v10474_v26  ;;  %v5189_v26 = vrot.slane %v5188_v16, 7 }
 0x49a   :  { %5155 = vmatpush1.bf16.msra.mxu1 %v11244_v11 }
 0x49b   :  { %5204 = vmatpush1.bf16.msra.mxu0 %v10486_v42  ;;  %5156 = vmatprep.subr.bf16.mxu1 %v11251_v15  ;;  %v11265_v42 = vld [vmem:[%s12536_s5 + $0x4] ss:$8 sps:$4 sm:$0xff]  }
 0x49c   :  { %5205 = vmatprep.subr.bf16.mxu0 %v10498_v10  ;;  %v5190_v10 = vsel %vm3813_vm0, %v5189_v26, %v5187_v21  ;;  %v12981_v21 = vld [vmem:[#allocation60_spill] sm:$0xff] }
 0x49d   :  { %v5191_v29 = vpack.c.b16 %v5190_v10, %v5190_v10  ;;  %v3632_v10 = vmax.f32 %v3628_v33, %v3630_v43  ;;  %v12995_v33 = vld [vmem:[#allocation40_spill] sm:$0xff]  ;;  %v12996_v43 = vld [vmem:[#allocation65_spill] sm:$0xff] }
 0x49e   :  { %5157 = vmatpush1.bf16.msra.mxu1 %v11258_v40 }
 0x49f   :  { %5206 = vmatpush1.bf16.msra.mxu0 %v10510_v56  ;;  %5158 = vmatprep.subr.bf16.mxu1 %v11265_v42  ;;  %v11280_v56 = vld [vmem:[%s12536_s5 + $0x1f4] ss:$8 sps:$4 sm:$0xff]  }
 0x4a0   :  { %5207 = vmatprep.subr.bf16.mxu0 %v10522_v47 }
 0x4a2   :  { %5159 = vmatpush1.bf16.msra.mxu1 %v11273_v60 }
 0x4a3   :  { %5208 = vmatpush1.bf16.msra.mxu0 %v10534_v52  ;;  %5236 = vmatprep.subr.bf16.mxu1 %v11280_v56  ;;  %v12974_v52 = vld [vmem:[#allocation41_spill] sm:$0xff] }
 0x4a4   :  { %5279 = vmatprep.subr.bf16.mxu0 %v10546_v35 }
 0x4a5   :  { %5177 = vmatmul.mubr.bf16.vlgmr.msra.gmra.mxu1 %v10365_v8  ;;  %v12963_v8 = vld [vmem:[#allocation57_spill] sm:$0xff] }
 0x4a6   :  { %5226 = vmatmul.mubr.bf16.vlgmr.msra.gmra.mxu0 %v5191_v29  ;;  %5237 = vmatpush1.bf16.msra.mxu1 %v10371_v14  ;;  %v12964_v14 = vld [vmem:[#allocation15_spill] sm:$0xff]  ;;  %v12982_v29 = vld [vmem:[#allocation21_spill] sm:$0xff] }
 0x4a7   :  { %5280 = vmatpush1.bf16.msra.mxu0 %v10560_v4  ;;  %5238 = vmatprep.subr.bf16.mxu1 %v10381_v62  ;;  %v12965_v62 = vld [vmem:[#allocation33_spill] sm:$0xff]  ;;  %v12975_v4 = vld [vmem:[#allocation59_spill] sm:$0xff] }
 0x4a8   :  { %5281 = vmatprep.subr.bf16.mxu0 %v10574_v54  ;;  %5268 = vmatprep.mubr.bf16.mxu1 %v12878_v49 }
 0x4a9   :  { %5311 = vmatprep.mubr.bf16.mxu0 %v12878_v49 }
 0x4aa   :  { %5239 = vmatpush1.bf16.msra.mxu1 %v10395_v38  ;;  %v12966_v38 = vld [vmem:[#allocation39_spill] sm:$0xff] }
 0x4ab   :  { %5282 = vmatpush1.bf16.msra.mxu0 %v10590_v58  ;;  %5240 = vmatprep.subr.bf16.mxu1 %v10406_v63  ;;  %v12967_v63 = vld [vmem:[#allocation10_spill] sm:$0xff] }
 0x4ac   :  { %5283 = vmatprep.subr.bf16.mxu0 %v10602_v27 }
 0x4ae   :  { %5241 = vmatpush1.bf16.msra.mxu1 %v10419_v1  ;;  %v12968_v1 = vld [vmem:[#allocation64_spill] sm:$0xff] }
 0x4af   :  { %5284 = vmatpush1.bf16.msra.mxu0 %v10614_v53  ;;  %5242 = vmatprep.subr.bf16.mxu1 %v10432_v41  ;;  %v12969_v41 = vld [vmem:[#allocation58_spill] sm:$0xff] }
 0x4b0   :  { %5285 = vmatprep.subr.bf16.mxu0 %v10628_v7  ;;  %v3636_v53 = vld [vmem:[#allocation3 + $0x5f] sm:$0x1] }
 0x4b2   :  { %5243 = vmatpush1.bf16.msra.mxu1 %v10443_v13  ;;  %v12970_v13 = vld [vmem:[#allocation17_spill] sm:$0xff] }
 0x4b3   :  { %5286 = vmatpush1.bf16.msra.mxu0 %v10640_v37  ;;  %5244 = vmatprep.subr.bf16.mxu1 %v10456_v6  ;;  %v12971_v6 = vld [vmem:[#allocation18_spill] sm:$0xff]  ;;  %v12977_v37 = vld [vmem:[#allocation35_spill] sm:$0xff] }
 0x4b4   :  { %5287 = vmatprep.subr.bf16.mxu0 %v10652_v24  ;;  %v12978_v24 = vld [vmem:[#allocation43_spill] sm:$0xff] }
 0x4b6   :  { %5245 = vmatpush1.bf16.msra.mxu1 %v10469_v28 }
 0x4b7   :  { %5288 = vmatpush1.bf16.msra.mxu0 %v10664_v32  ;;  %5246 = vmatprep.subr.bf16.mxu1 %v10480_v34  ;;  %v12972_v34 = vld [vmem:[#allocation19_spill] sm:$0xff]  ;;  %v3634_v32 = vld [vmem:[#allocation3 + $0x5e] sm:$0x1] }
 0x4b8   :  { %5289 = vmatprep.subr.bf16.mxu0 %v10676_v45  ;;  %v3638_v26 = vmax.f32 %v3634_v32, %v3636_v53  ;;  %v12991_v53 = vld [vmem:[#allocation62_spill] sm:$0xff] }
 0x4ba   :  { %5247 = vmatpush1.bf16.msra.mxu1 %v10493_v36 }
 0x4bb   :  { %5290 = vmatpush1.bf16.msra.mxu0 %v10688_v31  ;;  %5248 = vmatprep.subr.bf16.mxu1 %v10504_v30  ;;  %v12973_v30 = vld [vmem:[#allocation34_spill] sm:$0xff] }
 0x4bc   :  { %5291 = vmatprep.subr.bf16.mxu0 %v10700_v20  ;;  %v12976_v31 = vld [vmem:[#allocation42_spill] sm:$0xff]  ;;  %v12979_v20 = vld [vmem:[#allocation12_spill] sm:$0xff] }
 0x4be   :  { %5249 = vmatpush1.bf16.msra.mxu1 %v12963_v8  ;;  %v12983_v8 = vld [vmem:[#allocation36_spill] sm:$0xff] }
 0x4bf   :  { %5292 = vmatpush1.bf16.msra.mxu0 %v12964_v14  ;;  %5250 = vmatprep.subr.bf16.mxu1 %v12965_v62  ;;  %v3633_v14 = vld [vmem:[#allocation3 + $0x1e] sm:$0x1]  ;;  %v3635_v62 = vld [vmem:[#allocation3 + $0x1f] sm:$0x1] }
 0x4c0   :  { %5293 = vmatprep.subr.bf16.mxu0 %v12966_v38  ;;  %v12984_v38 = vld [vmem:[#allocation45_spill] sm:$0xff] }
 0x4c2   :  { %5251 = vmatpush1.bf16.msra.mxu1 %v12967_v63  ;;  %v3640_v63 = vmax.f32 %v3632_v10, %v3638_v26  ;;  %v12999_v26 = vld [vmem:[#allocation26_spill] sm:$0xff] }
 0x4c3   :  { %5294 = vmatpush1.bf16.msra.mxu0 %v12968_v1  ;;  %5330 = vmatprep.subr.bf16.mxu1 %v12969_v41  ;;  %v3627_v1 = vld [vmem:[#allocation3 + $0x16] sm:$0x1]  ;;  %v3629_v41 = vld [vmem:[#allocation3 + $0x17] sm:$0x1] }
 0x4c4   :  { %5373 = vmatprep.subr.bf16.mxu0 %v12970_v13  ;;  %v12985_v13 = vld [vmem:[#allocation13_spill] sm:$0xff] }
 0x4c5   :  { %5269 = vmatmul.mubr.bf16.vlgmr.msra.gmra.mxu1 %v12971_v6  ;;  %v3931_v28 = vpop.f32.mrf.mxu1 }
 0x4c6   :  { %5312 = vmatmul.mubr.bf16.vlgmr.msra.gmra.mxu0 %v12972_v34  ;;  %v4060_v36 = vpop.f32.mrf.mxu0  ;;  %5331 = vmatpush1.bf16.msra.mxu1 %v12973_v30  ;;  %v12987_v30 = vld [vmem:[#allocation61_spill] sm:$0xff] }
 0x4c7   :  { %v11322_v47 = vadd.f32 %v4060_v36, %v3931_v28  ;;  %5374 = vmatpush1.bf16.msra.mxu0 %v12974_v52  ;;  %v3933_v35 = vpop.f32.mrf.mxu1  ;;  %5332 = vmatprep.subr.bf16.mxu1 %v12975_v4  ;;  %v3637_v28 = vmax.f32 %v3633_v14, %v3635_v62  ;;  %v12986_v36 = vld [vmem:[#allocation70_spill] sm:$0xff]  ;;  %v12988_v52 = vld [vmem:[#allocation23_spill] sm:$0xff]  ;;  %v3642_v4 = vpack.c.bf16 %v3640_v63, %v3640_v63  ;;  %v3700_v63 = vld [vmem:[#allocation3 + $0x6e] sm:$0x1] }
 0x4c8   :  { %v4062_v54 = vpop.f32.mrf.mxu0  ;;  %5375 = vmatprep.subr.bf16.mxu0 %v12976_v31  ;;  %5362 = vmatprep.mubr.bf16.mxu1 %v12878_v49 }
 0x4c9   :  { %v11328_v58 = vadd.f32 %v4062_v54, %v3933_v35  ;;  %v3935_v27 = vpop.f32.mrf.mxu1  ;;  %5405 = vmatprep.mubr.bf16.mxu0 %v12878_v49  ;;  %v3631_v35 = vmax.f32 %v3627_v1, %v3629_v41  ;;  %v12989_v54 = vld [vmem:[#allocation37_spill] sm:$0xff]  ;;  %v5325_v32 = vunpack.c.l.b16 %v3642_v4  ;;  %v3702_v1 = vld [vmem:[#allocation3 + $0x6f] sm:$0x1]  ;;  %v13003_v41 = vld [vmem:[#allocation51_spill] sm:$0xff] }
 0x4ca   :  { %v4064_v7 = vpop.f32.mrf.mxu0  ;;  %5333 = vmatpush1.bf16.msra.mxu1 %v12977_v37  ;;  %v12990_v27 = vld [vmem:[#allocation14_spill] sm:$0xff]  ;;  %v13006_v4 = vld [vmem:[#allocation69_spill] sm:$0xff] }
 0x4cb   :  { %5376 = vmatpush1.bf16.msra.mxu0 %v12978_v24  ;;  %v3936_v45 = vpop.f32.mrf.mxu1  ;;  %5334 = vmatprep.subr.bf16.mxu1 %v12979_v20  ;;  %v3639_v31 = vmax.f32 %v3631_v35, %v3637_v28  ;;  %v12992_v37 = vld [vmem:[#allocation38_spill] sm:$0xff]  ;;  %v5326_v24 = vrot.slane %v5325_v32, 7  ;;  %v13004_v28 = vld [vmem:[#allocation44_spill] sm:$0xff]  ;;  %v3704_v35 = vmax.f32 %v3700_v63, %v3702_v1 }
 0x4cc   :  { %v4065_v16 = vpop.f32.mrf.mxu0  ;;  %5377 = vmatprep.subr.bf16.mxu0 %v12980_v12  ;;  %v12993_v45 = vld [vmem:[#allocation63_spill] sm:$0xff]  ;;  %v13009_v32 = vld [vmem:[#allocation54_spill] sm:$0xff] }
 0x4cd   :  { %v3641_v7 = vpack.c.bf16 %v3639_v31, %v3639_v31  ;;  %v12997_v12 = vld [vmem:[#allocation27_spill] sm:$0xff]  ;;  %v13008_v31 = vld [vmem:[#allocation22_spill] sm:$0xff] }
 0x4ce   :  { %5335 = vmatpush1.bf16.msra.mxu1 %v12981_v21 }
 0x4cf   :  { %5378 = vmatpush1.bf16.msra.mxu0 %v12982_v29  ;;  %5336 = vmatprep.subr.bf16.mxu1 %v12983_v8  ;;  %v5324_v20 = vunpack.c.l.b16 %v3641_v7  ;;  %v3701_v7 = vld [vmem:[#allocation3 + $0x2f] sm:$0x1] }
 0x4d0   :  { %5379 = vmatprep.subr.bf16.mxu0 %v12984_v38  ;;  %v13002_v38 = vld [vmem:[#allocation20_spill] sm:$0xff] }
 0x4d2   :  { %5337 = vmatpush1.bf16.msra.mxu1 %v12985_v13 }
 0x4d3   :  { %5380 = vmatpush1.bf16.msra.mxu0 %v12986_v36  ;;  %5338 = vmatprep.subr.bf16.mxu1 %v12987_v30  ;;  %v13005_v36 = vld [vmem:[#allocation76_spill] sm:$0xff]  ;;  %v3694_v30 = vld [vmem:[#allocation3 + $0x66] sm:$0x1] }
 0x4d4   :  { %5381 = vmatprep.subr.bf16.mxu0 %v12988_v52  ;;  %v3696_v52 = vld [vmem:[#allocation3 + $0x67] sm:$0x1] }
 0x4d6   :  { %5339 = vmatpush1.bf16.msra.mxu1 %v12989_v54  ;;  %v13007_v54 = vld [vmem:[#allocation29_spill] sm:$0xff] }
 0x4d7   :  { %5382 = vmatpush1.bf16.msra.mxu0 %v10866_v48  ;;  %5340 = vmatprep.subr.bf16.mxu1 %v12990_v27  ;;  %v12994_v48 = vld [vmem:[#allocation16_spill] sm:$0xff]  ;;  %v3698_v27 = vmax.f32 %v3694_v30, %v3696_v52 }
 0x4d8   :  { %5383 = vmatprep.subr.bf16.mxu0 %v10878_v23  ;;  %v5327_v23 = vsel %vm3813_vm0, %v5326_v24, %v5324_v20  ;;  %v13010_v24 = vld [vmem:[#allocation46_spill] sm:$0xff]  ;;  %v3695_v20 = vld [vmem:[#allocation3 + $0x27] sm:$0x1] }
 0x4da   :  { %5341 = vmatpush1.bf16.msra.mxu1 %v12991_v53  ;;  %v3699_v53 = vld [vmem:[#allocation3 + $0x2e] sm:$0x1] }
 0x4db   :  { %5384 = vmatpush1.bf16.msra.mxu0 %v10890_v22  ;;  %5342 = vmatprep.subr.bf16.mxu1 %v12992_v37  ;;  %v11358_v22 = vpack.c.b16 %v5327_v23, %v5327_v23  ;;  %v3706_v37 = vmax.f32 %v3698_v27, %v3704_v35  ;;  %v3703_v23 = vmax.f32 %v3699_v53, %v3701_v7  ;;  %v13027_v35 = vld [vmem:[#allocation87_spill] sm:$0xff]  ;;  %v13031_v7 = vld [vmem:[#allocation89_spill] sm:$0xff] }
 0x4dc   :  { %5385 = vmatprep.subr.bf16.mxu0 %v10902_v5 }
 0x4de   :  { %5343 = vmatpush1.bf16.msra.mxu1 %v12993_v45  ;;  %v3693_v45 = vld [vmem:[#allocation3 + $0x26] sm:$0x1] }
 0x4df   :  { %5386 = vmatpush1.bf16.msra.mxu0 %v10914_v51  ;;  %5344 = vmatprep.subr.bf16.mxu1 %v12994_v48  ;;  %v13011_v48 = vld [vmem:[#allocation71_spill] sm:$0xff] }
 0x4e0   :  { %5387 = vmatprep.subr.bf16.mxu0 %v10926_v3  ;;  %v12998_v3 = vld [vmem:[#allocation66_spill] sm:$0xff] }
 0x4e2   :  { %5345 = vmatpush1.bf16.msra.mxu1 %v12995_v33  ;;  %v13012_v33 = vld [vmem:[#allocation55_spill] sm:$0xff] }
 0x4e3   :  { %5388 = vmatpush1.bf16.msra.mxu0 %v10938_v57  ;;  %5416 = vmatprep.subr.bf16.mxu1 %v12996_v43  ;;  %v13000_v57 = vld [vmem:[#allocation67_spill] sm:$0xff]  ;;  %v3697_v43 = vmax.f32 %v3693_v45, %v3695_v20  ;;  %v13036_v20 = vld [vmem:[#allocation56_spill] sm:$0xff] }
 0x4e4   :  { %5467 = vmatprep.subr.bf16.mxu0 %v10950_v18  ;;  %v13001_v18 = vld [vmem:[#allocation50_spill] sm:$0xff]  ;;  %v13035_v45 = vld [vmem:[#allocation31_spill] sm:$0xff] }
 0x4e5   :  { %v4206_v5 = vpop.f32.mrf.mxu1  ;;  %5363 = vmatmul.mubr.bf16.vlgmr.msra.gmra.mxu1 %v11358_v22 }
 0x4e6   :  { %v4213_v51 = vadd.f32 %v4206_v5, %v11322_v47  ;;  %v4354_v16 = vpop.f32.mrf.mxu0  ;;  %5406 = vmatmul.mubr.bf16.vlgmr.msra.gmra.mxu0 %v12997_v12  ;;  %5417 = vmatpush1.bf16.msra.mxu1 %v12998_v3  ;;  %v3708_v5 = vpack.c.bf16 %v3706_v37, %v3706_v37  ;;  %v3705_v3 = vmax.f32 %v3697_v43, %v3703_v23  ;;  %v13033_v37 = vld [vmem:[#allocation90_spill] sm:$0xff]  ;;  %v13038_v23 = vld [vmem:[#allocation9_spill] sm:$0xff] }
 0x4e7   :  { %5468 = vmatpush1.bf16.msra.mxu0 %v12999_v26  ;;  %v4208_v21 = vpop.f32.mrf.mxu1  ;;  %5418 = vmatprep.subr.bf16.mxu1 %v13000_v57 }
 0x4e8   :  { %v4361_v10 = vadd.f32 %v4354_v16, %v4213_v51  ;;  %v4214_v29 = vadd.f32 %v4208_v21, %v11328_v58  ;;  %v4356_v8 = vpop.f32.mrf.mxu0  ;;  %5469 = vmatprep.subr.bf16.mxu0 %v13001_v18  ;;  %5448 = vmatprep.mubr.bf16.mxu1 %v12878_v49  ;;  %v13013_v51 = vld [vmem:[#allocation47_spill] sm:$0xff]  ;;  %v13014_v16 = vld [vmem:[#allocation24_spill] sm:$0xff]  ;;  %v5462_v26 = vunpack.c.l.b16 %v3708_v5  ;;  %v3707_v57 = vpack.c.bf16 %v3705_v3, %v3705_v3  ;;  %v13018_v18 = vld [vmem:[#allocation25_spill] sm:$0xff] }
 0x4e9   :  { %v4210_v14 = vpop.f32.mrf.mxu1  ;;  %5499 = vmatprep.mubr.bf16.mxu0 %v12878_v49  ;;  %v13015_v21 = vld [vmem:[#allocation72_spill] sm:$0xff]  ;;  %v13045_v5 = vld [vmem:[#allocation11_spill] sm:$0xff] }
 0x4ea   :  { %v11372_v47 = vadd.f32 %v4356_v8, %v4214_v29  ;;  %v4358_v62 = vpop.f32.mrf.mxu0  ;;  %5419 = vmatpush1.bf16.msra.mxu1 %v13002_v38  ;;  %v13017_v29 = vld [vmem:[#allocation32_spill] sm:$0xff]  ;;  %v5463_v8 = vrot.slane %v5462_v26, 7  ;;  %v5461_v14 = vunpack.c.l.b16 %v3707_v57  ;;  %v13021_v38 = vld [vmem:[#allocation49_spill] sm:$0xff] }
 0x4eb   :  { %5470 = vmatpush1.bf16.msra.mxu0 %v13003_v41  ;;  %v4211_v13 = vpop.f32.mrf.mxu1  ;;  %5420 = vmatprep.subr.bf16.mxu1 %v13004_v28  ;;  %v13020_v62 = vld [vmem:[#allocation79_spill] sm:$0xff]  ;;  %v13025_v28 = vld [vmem:[#allocation86_spill] sm:$0xff] }
 0x4ec   :  { %v4359_v58 = vpop.f32.mrf.mxu0  ;;  %5471 = vmatprep.subr.bf16.mxu0 %v13005_v36  ;;  %v13024_v13 = vld [vmem:[#allocation28_spill] sm:$0xff] }
 0x4ed   :  { %v13026_v36 = vld [vmem:[#allocation52_spill] sm:$0xff] }
 0x4ee   :  { %5421 = vmatpush1.bf16.msra.mxu1 %v13006_v4  ;;  %v11467_v26 = vld [vmem:[%s12536_s5 + $0x1e4] ss:$8 sps:$4 sm:$0xff]  }
 0x4ef   :  { %5472 = vmatpush1.bf16.msra.mxu0 %v13007_v54  ;;  %5422 = vmatprep.subr.bf16.mxu1 %v13008_v31  ;;  %v13028_v54 = vld [vmem:[#allocation77_spill] sm:$0xff]  ;;  %v13029_v31 = vld [vmem:[#allocation88_spill] sm:$0xff] }
 0x4f0   :  { %5473 = vmatprep.subr.bf16.mxu0 %v13009_v32  ;;  %v13030_v32 = vld [vmem:[#allocation30_spill] sm:$0xff] }
 0x4f2   :  { %5423 = vmatpush1.bf16.msra.mxu1 %v13010_v24  ;;  %v13034_v24 = vld [vmem:[#allocation7_spill] sm:$0xff] }
 0x4f3   :  { %5474 = vmatpush1.bf16.msra.mxu0 %v11034_v61  ;;  %5424 = vmatprep.subr.bf16.mxu1 %v13011_v48  ;;  %v13016_v61 = vld [vmem:[#allocation48_spill] sm:$0xff] }
 0x4f4   :  { %5475 = vmatprep.subr.bf16.mxu0 %v13012_v33  ;;  %v13037_v48 = vld [vmem:[#allocation8_spill] sm:$0xff]  ;;  %v13039_v33 = vld [vmem:[#allocation78_spill] sm:$0xff] }
 0x4f6   :  { %5425 = vmatpush1.bf16.msra.mxu1 %v13013_v51 }
 0x4f7   :  { %5476 = vmatpush1.bf16.msra.mxu0 %v11058_v17  ;;  %5426 = vmatprep.subr.bf16.mxu1 %v13014_v16  ;;  %v13019_v17 = vld [vmem:[#allocation73_spill] sm:$0xff] }
 0x4f8   :  { %5477 = vmatprep.subr.bf16.mxu0 %v11070_v9  ;;  %v5464_v9 = vsel %vm3813_vm0, %v5463_v8, %v5461_v14  ;;  %v11483_v8 = vld [vmem:[%s12536_s5 + $0x1e0] ss:$8 sps:$4 sm:$0xff]  }
 0x4f9   :  { %v11402_v63 = vpack.c.b16 %v5464_v9, %v5464_v9  ;;  %v11501_v9 = vld [vmem:[%s12536_s5 + $0x150] ss:$8 sps:$4 sm:$0xff]  }
 0x4fa   :  { %5427 = vmatpush1.bf16.msra.mxu1 %v13015_v21 }
 0x4fb   :  { %5478 = vmatpush1.bf16.msra.mxu0 %v11082_v50  ;;  %5428 = vmatprep.subr.bf16.mxu1 %v13016_v61  ;;  %v13022_v50 = vld [vmem:[#allocation75_spill] sm:$0xff]  ;;  %13023 = vst [vmem:[#allocation57_spill] sm:$0xff] %v11402_v63 }
 0x4fc   :  { %5479 = vmatprep.subr.bf16.mxu0 %v13017_v29  ;;  %v11477_v29 = vld [vmem:[%s12536_s5 + $0x160] ss:$8 sps:$4 sm:$0xff]  }
 0x4fe   :  { %5429 = vmatpush1.bf16.msra.mxu1 %v13018_v18 }
 0x4ff   :  { %5480 = vmatpush1.bf16.msra.mxu0 %v11106_v55  ;;  %5430 = vmatprep.subr.bf16.mxu1 %v13019_v17  ;;  %v11489_v17 = vld [vmem:[%s12536_s5 + $0x154] ss:$8 sps:$4 sm:$0xff]  }
 0x500   :  { %5481 = vmatprep.subr.bf16.mxu0 %v13020_v62  ;;  %v11495_v62 = vld [vmem:[%s12536_s5 + $0x1d4] ss:$8 sps:$4 sm:$0xff]  }
 0x502   :  { %5431 = vmatpush1.bf16.msra.mxu1 %v13021_v38  ;;  %v11507_v38 = vld [vmem:[%s12536_s5 + $0x1d0] ss:$8 sps:$4 sm:$0xff]  }
 0x503   :  { %5482 = vmatpush1.bf16.msra.mxu0 %v11130_v25  ;;  %5510 = vmatprep.subr.bf16.mxu1 %v13022_v50  ;;  %v11513_v50 = vld [vmem:[%s12536_s5 + $0x144] ss:$8 sps:$4 sm:$0xff]  }
 0x504   :  { %5551 = vmatprep.subr.bf16.mxu0 %v11158_v0 }
 0x505   :  { %v4502_v1 = vpop.f32.mrf.mxu1  ;;  %5449 = vmatmul.mubr.bf16.vlgmr.msra.gmra.mxu1 %v11153_v2 }
 0x506   :  { %v4509_v55 = vadd.f32 %v4502_v1, %v4361_v10  ;;  %v4650_v41 = vpop.f32.mrf.mxu0  ;;  %5500 = vmatmul.mubr.bf16.vlgmr.msra.gmra.mxu0 %v11402_v63  ;;  %5511 = vmatpush1.bf16.msra.mxu1 %v13024_v13  ;;  %v11519_v1 = vld [vmem:[%s12536_s5 + $0x1c4] ss:$8 sps:$4 sm:$0xff]   ;;  %v11537_v13 = vld [vmem:[%s12536_s5 + $0x134] ss:$8 sps:$4 sm:$0xff]   ;;  %v11785_v63 = vld [vmem:[%s12536_s5 + $0x2a0] ss:$8 sps:$4 sm:$0xff]  }
 0x507   :  { %5552 = vmatpush1.bf16.msra.mxu0 %v13025_v28  ;;  %v4504_v58 = vpop.f32.mrf.mxu1  ;;  %5512 = vmatprep.subr.bf16.mxu1 %v13026_v36  ;;  %v11543_v28 = vld [vmem:[%s12536_s5 + $0x1b4] ss:$8 sps:$4 sm:$0xff]   ;;  %v11555_v36 = vld [vmem:[%s12536_s5 + $0x1b0] ss:$8 sps:$4 sm:$0xff]   ;;  %13061 = vst [vmem:[#allocation43_spill] sm:$0xff] %v11785_v63 }
 0x508   :  { %v4657_v25 = vadd.f32 %v4650_v41, %v4509_v55  ;;  %v4510_v30 = vadd.f32 %v4504_v58, %v11372_v47  ;;  %v4652_v52 = vpop.f32.mrf.mxu0  ;;  %5553 = vmatprep.subr.bf16.mxu0 %v13027_v35  ;;  %5542 = vmatprep.mubr.bf16.mxu1 %v12878_v49  ;;  %v13032_v47 = vld [vmem:[#allocation53_spill] sm:$0xff]  ;;  %v11525_v55 = vld [vmem:[%s12536_s5 + $0x140] ss:$8 sps:$4 sm:$0xff]  }
 0x509   :  { %v4506_v0 = vpop.f32.mrf.mxu1  ;;  %5583 = vmatprep.mubr.bf16.mxu0 %v12878_v49  ;;  %v11531_v41 = vld [vmem:[%s12536_s5 + $0x1c0] ss:$8 sps:$4 sm:$0xff]   ;;  %v11549_v58 = vld [vmem:[%s12536_s5 + $0x130] ss:$8 sps:$4 sm:$0xff]  }
 0x50a   :  { %v4658_v10 = vadd.f32 %v4652_v52, %v4510_v30  ;;  %v4654_v4 = vpop.f32.mrf.mxu0  ;;  %5513 = vmatpush1.bf16.msra.mxu1 %v13028_v54  ;;  %v11567_v30 = vld [vmem:[%s12536_s5 + $0x1a4] ss:$8 sps:$4 sm:$0xff]   ;;  %v11573_v52 = vld [vmem:[%s12536_s5 + $0x120] ss:$8 sps:$4 sm:$0xff]   ;;  %v11585_v0 = vld [vmem:[%s12536_s5 + $0x114] ss:$8 sps:$4 sm:$0xff]  }
 0x50b   :  { %5554 = vmatpush1.bf16.msra.mxu0 %v13029_v31  ;;  %v4507_v27 = vpop.f32.mrf.mxu1  ;;  %5514 = vmatprep.subr.bf16.mxu1 %v13030_v32  ;;  %v11579_v35 = vld [vmem:[%s12536_s5 + $0x1a0] ss:$8 sps:$4 sm:$0xff]   ;;  %v11597_v4 = vld [vmem:[%s12536_s5 + $0x110] ss:$8 sps:$4 sm:$0xff]   ;;  %v11609_v31 = vld [vmem:[%s12536_s5 + $0x104] ss:$8 sps:$4 sm:$0xff]  }
 0x50c   :  { %v4655_v53 = vpop.f32.mrf.mxu0  ;;  %5555 = vmatprep.subr.bf16.mxu0 %v13031_v7  ;;  %v11603_v54 = vld [vmem:[%s12536_s5 + $0x190] ss:$8 sps:$4 sm:$0xff]   ;;  %v11615_v27 = vld [vmem:[%s12536_s5 + $0x184] ss:$8 sps:$4 sm:$0xff]   ;;  %v11621_v32 = vld [vmem:[%s12536_s5 + $0x100] ss:$8 sps:$4 sm:$0xff]  }
 0x50d   :  { %13046 = vst [vmem:[#allocation15_spill] sm:$0xff] %v11603_v54  ;;  %13047 = vst [vmem:[#allocation33_spill] sm:$0xff] %v11615_v27  ;;  %v11627_v53 = vld [vmem:[%s12536_s5 + $0x180] ss:$8 sps:$4 sm:$0xff]   ;;  %v11633_v7 = vld [vmem:[%s12536_s5 + $0x274] ss:$8 sps:$4 sm:$0xff]  }
 0x50e   :  { %5515 = vmatpush1.bf16.msra.mxu1 %v13032_v47  ;;  %13048 = vst [vmem:[#allocation39_spill] sm:$0xff] %v11627_v53  ;;  %v11639_v47 = vld [vmem:[%s12536_s5 + $0x2f4] ss:$8 sps:$4 sm:$0xff]  }
 0x50f   :  { %5556 = vmatpush1.bf16.msra.mxu0 %v13033_v37  ;;  %5516 = vmatprep.subr.bf16.mxu1 %v13034_v24  ;;  %13049 = vst [vmem:[#allocation10_spill] sm:$0xff] %v11639_v47 }
 0x510   :  { %5557 = vmatprep.subr.bf16.mxu0 %v11209_v46  ;;  %v13040_v46 = vld [vmem:[#allocation80_spill] sm:$0xff] }
 0x512   :  { %5517 = vmatpush1.bf16.msra.mxu1 %v13035_v45 }
 0x513   :  { %5558 = vmatpush1.bf16.msra.mxu0 %v11216_v59  ;;  %5518 = vmatprep.subr.bf16.mxu1 %v13036_v20  ;;  %v13041_v59 = vld [vmem:[#allocation81_spill] sm:$0xff]  ;;  %v13050_v20 = vld [vmem:[#allocation74_spill] sm:$0xff] }
 0x514   :  { %5559 = vmatprep.subr.bf16.mxu0 %v11223_v39  ;;  %v13042_v39 = vld [vmem:[#allocation82_spill] sm:$0xff] }
 0x516   :  { %5519 = vmatpush1.bf16.msra.mxu1 %v13037_v48  ;;  %v11652_v48 = vld [vmem:[%s12536_s5 + $0x270] ss:$8 sps:$4 sm:$0xff]  }
 0x517   :  { %5560 = vmatpush1.bf16.msra.mxu0 %v11230_v19  ;;  %5520 = vmatprep.subr.bf16.mxu1 %v13038_v23  ;;  %v13043_v19 = vld [vmem:[#allocation83_spill] sm:$0xff]  ;;  %v11658_v23 = vld [vmem:[%s12536_s5 + $0x2f0] ss:$8 sps:$4 sm:$0xff]  }
 0x518   :  { %5561 = vmatprep.subr.bf16.mxu0 %v11237_v44  ;;  %v13044_v44 = vld [vmem:[#allocation85_spill] sm:$0xff]  ;;  %13051 = vst [vmem:[#allocation64_spill] sm:$0xff] %v11658_v23 }
 0x51a   :  { %5521 = vmatpush1.bf16.msra.mxu1 %v13039_v33 }
 0x51b   :  { %5562 = vmatpush1.bf16.msra.mxu0 %v11244_v11  ;;  %5522 = vmatprep.subr.bf16.mxu1 %v13040_v46  ;;  %v11664_v46 = vld [vmem:[%s12536_s5 + $0x264] ss:$8 sps:$4 sm:$0xff]  }
 0x51c   :  { %5563 = vmatprep.subr.bf16.mxu0 %v11251_v15 }
 0x51e   :  { %5523 = vmatpush1.bf16.msra.mxu1 %v13041_v59 }
 0x51f   :  { %5564 = vmatpush1.bf16.msra.mxu0 %v11258_v40  ;;  %5524 = vmatprep.subr.bf16.mxu1 %v13042_v39  ;;  %v11447_v40 = vld [vmem:[%s12536_s5 + $0x170] ss:$8 sps:$4 sm:$0xff]  }
 0x520   :  { %5565 = vmatprep.subr.bf16.mxu0 %v11265_v42  ;;  %v11453_v42 = vld [vmem:[%s12536_s5 + $0x1f0] ss:$8 sps:$4 sm:$0xff]  }
 0x522   :  { %5525 = vmatpush1.bf16.msra.mxu1 %v13043_v19  ;;  %v11675_v19 = vld [vmem:[%s12536_s5 + $0x2e4] ss:$8 sps:$4 sm:$0xff]  }
 0x523   :  { %5566 = vmatpush1.bf16.msra.mxu0 %v11273_v60  ;;  %5592 = vmatprep.subr.bf16.mxu1 %v13044_v44  ;;  %13052 = vst [vmem:[#allocation58_spill] sm:$0xff] %v11675_v19 }
 0x524   :  { %5635 = vmatprep.subr.bf16.mxu0 %v11280_v56  ;;  %v11459_v56 = vld [vmem:[%s12536_s5 + $0x164] ss:$8 sps:$4 sm:$0xff]  }
 0x525   :  { %v4798_v11 = vpop.f32.mrf.mxu1  ;;  %5543 = vmatmul.mubr.bf16.vlgmr.msra.gmra.mxu1 %v12971_v6 }
 0x526   :  { %v4805_v15 = vadd.f32 %v4798_v11, %v4657_v25  ;;  %v4946_v43 = vpop.f32.mrf.mxu0  ;;  %5584 = vmatmul.mubr.bf16.vlgmr.msra.gmra.mxu0 %v13045_v5  ;;  %5593 = vmatpush1.bf16.msra.mxu1 %v11447_v40  ;;  %v11561_v25 = vld [vmem:[%s12536_s5 + $0x124] ss:$8 sps:$4 sm:$0xff]  }
 0x527   :  { %5636 = vmatpush1.bf16.msra.mxu0 %v11453_v42  ;;  %v4800_v60 = vpop.f32.mrf.mxu1  ;;  %5594 = vmatprep.subr.bf16.mxu1 %v11459_v56 }
 0x528   :  { %v11462_v51 = vadd.f32 %v4946_v43, %v4805_v15  ;;  %v4806_v16 = vadd.f32 %v4800_v60, %v4658_v10  ;;  %v4948_v3 = vpop.f32.mrf.mxu0  ;;  %5637 = vmatprep.subr.bf16.mxu0 %v11467_v26  ;;  %5624 = vmatprep.mubr.bf16.mxu1 %v12878_v49  ;;  %v11591_v10 = vld [vmem:[%s12536_s5 + $0x194] ss:$8 sps:$4 sm:$0xff]   ;;  %v11683_v15 = vld [vmem:[%s12536_s5 + $0x260] ss:$8 sps:$4 sm:$0xff]  }
 0x529   :  { %v4802_v21 = vpop.f32.mrf.mxu1  ;;  %5667 = vmatprep.mubr.bf16.mxu0 %v12878_v49  ;;  %v11689_v43 = vld [vmem:[%s12536_s5 + $0x2e0] ss:$8 sps:$4 sm:$0xff]   ;;  %v11695_v60 = vld [vmem:[%s12536_s5 + $0x254] ss:$8 sps:$4 sm:$0xff]  }
 0x52a   :  { %v11472_v61 = vadd.f32 %v4948_v3, %v4806_v16  ;;  %v4950_v57 = vpop.f32.mrf.mxu0  ;;  %5595 = vmatpush1.bf16.msra.mxu1 %v11477_v29  ;;  %13053 = vst [vmem:[#allocation17_spill] sm:$0xff] %v11689_v43  ;;  %v11701_v16 = vld [vmem:[%s12536_s5 + $0x2d4] ss:$8 sps:$4 sm:$0xff]   ;;  %v11707_v3 = vld [vmem:[%s12536_s5 + $0x250] ss:$8 sps:$4 sm:$0xff]  }
 0x52b   :  { %5638 = vmatpush1.bf16.msra.mxu0 %v11483_v8  ;;  %v4803_v18 = vpop.f32.mrf.mxu1  ;;  %5596 = vmatprep.subr.bf16.mxu1 %v11489_v17  ;;  %13054 = vst [vmem:[#allocation18_spill] sm:$0xff] %v11701_v16  ;;  %v11713_v21 = vld [vmem:[%s12536_s5 + $0x2d0] ss:$8 sps:$4 sm:$0xff]   ;;  %v11725_v57 = vld [vmem:[%s12536_s5 + $0x2c4] ss:$8 sps:$4 sm:$0xff]  }
 0x52c   :  { %v4951_v14 = vpop.f32.mrf.mxu0  ;;  %5639 = vmatprep.subr.bf16.mxu0 %v11495_v62  ;;  %13055 = vst [vmem:[#allocation19_spill] sm:$0xff] %v11713_v21  ;;  %13056 = vst [vmem:[#allocation34_spill] sm:$0xff] %v11725_v57  ;;  %v11731_v18 = vld [vmem:[%s12536_s5 + $0x240] ss:$8 sps:$4 sm:$0xff]  }
 0x52d   :  { %v11737_v14 = vld [vmem:[%s12536_s5 + $0x2c0] ss:$8 sps:$4 sm:$0xff]  }
 0x52e   :  { %5597 = vmatpush1.bf16.msra.mxu1 %v11501_v9  ;;  %13057 = vst [vmem:[#allocation41_spill] sm:$0xff] %v11737_v14 }
 0x52f   :  { %5640 = vmatpush1.bf16.msra.mxu0 %v11507_v38  ;;  %5598 = vmatprep.subr.bf16.mxu1 %v11513_v50 }
 0x530   :  { %5641 = vmatprep.subr.bf16.mxu0 %v11519_v1 }
 0x532   :  { %5599 = vmatpush1.bf16.msra.mxu1 %v11525_v55 }
 0x533   :  { %5642 = vmatpush1.bf16.msra.mxu0 %v11531_v41  ;;  %5600 = vmatprep.subr.bf16.mxu1 %v11537_v13 }
 0x534   :  { %5643 = vmatprep.subr.bf16.mxu0 %v11543_v28 }
 0x536   :  { %5601 = vmatpush1.bf16.msra.mxu1 %v11549_v58 }
 0x537   :  { %5644 = vmatpush1.bf16.msra.mxu0 %v11555_v36  ;;  %5602 = vmatprep.subr.bf16.mxu1 %v11561_v25 }
 0x538   :  { %5645 = vmatprep.subr.bf16.mxu0 %v11567_v30 }
 0x53a   :  { %5603 = vmatpush1.bf16.msra.mxu1 %v11573_v52 }
 0x53b   :  { %5646 = vmatpush1.bf16.msra.mxu0 %v11579_v35  ;;  %5604 = vmatprep.subr.bf16.mxu1 %v11585_v0 }
 0x53c   :  { %5647 = vmatprep.subr.bf16.mxu0 %v11591_v10 }
 0x53e   :  { %5605 = vmatpush1.bf16.msra.mxu1 %v11597_v4 }
 0x53f   :  { %5648 = vmatpush1.bf16.msra.mxu0 %v11603_v54  ;;  %5606 = vmatprep.subr.bf16.mxu1 %v11609_v31 }
 0x540   :  { %5649 = vmatprep.subr.bf16.mxu0 %v11615_v27  ;;  %v11909_v27 = vld [vmem:[%s12536_s5 + $0x350] ss:$8 sps:$4 sm:$0xff]  }
 0x541   :  { %13080 = vst [vmem:[#allocation66_spill] sm:$0xff] %v11909_v27 }
 0x542   :  { %5607 = vmatpush1.bf16.msra.mxu1 %v11621_v32 }
 0x543   :  { %5650 = vmatpush1.bf16.msra.mxu0 %v11627_v53  ;;  %5678 = vmatprep.subr.bf16.mxu1 %v11633_v7 }
 0x544   :  { %5721 = vmatprep.subr.bf16.mxu0 %v11639_v47  ;;  %v3720_v47 = vld [vmem:[#allocation3 + $0x79] sm:$0x1] }
 0x545   :  { %v5094_v37 = vpop.f32.mrf.mxu1  ;;  %5625 = vmatmul.mubr.bf16.vlgmr.msra.gmra.mxu1 %v12972_v34 }
 0x546   :  { %v11644_v24 = vadd.f32 %v5094_v37, %v11462_v51  ;;  %v11646_v45 = vpop.f32.mrf.mxu0  ;;  %5668 = vmatmul.mubr.bf16.vlgmr.msra.gmra.mxu0 %v13050_v20  ;;  %5679 = vmatpush1.bf16.msra.mxu1 %v11652_v48  ;;  %v11743_v37 = vld [vmem:[%s12536_s5 + $0x234] ss:$8 sps:$4 sm:$0xff]  }
 0x547   :  { %5722 = vmatpush1.bf16.msra.mxu0 %v11658_v23  ;;  %v5096_v33 = vpop.f32.mrf.mxu1  ;;  %5680 = vmatprep.subr.bf16.mxu1 %v11664_v46  ;;  %v11749_v20 = vld [vmem:[%s12536_s5 + $0x2b4] ss:$8 sps:$4 sm:$0xff]   ;;  %v11860_v23 = vld [vmem:[%s12536_s5 + $0x3f0] ss:$8 sps:$4 sm:$0xff]  }
 0x548   :  { %v11668_v59 = vadd.f32 %v5096_v33, %v11472_v61  ;;  %v11670_v39 = vpop.f32.mrf.mxu0  ;;  %5723 = vmatprep.subr.bf16.mxu0 %v11675_v19  ;;  %5710 = vmatprep.mubr.bf16.mxu1 %v12878_v49  ;;  %v11719_v61 = vld [vmem:[%s12536_s5 + $0x244] ss:$8 sps:$4 sm:$0xff]   ;;  %13058 = vst [vmem:[#allocation59_spill] sm:$0xff] %v11749_v20  ;;  %v11755_v33 = vld [vmem:[%s12536_s5 + $0x230] ss:$8 sps:$4 sm:$0xff]   ;;  %13073 = vst [vmem:[#allocation14_spill] sm:$0xff] %v11860_v23 }
 0x549   :  { %v5098_v44 = vpop.f32.mrf.mxu1  ;;  %5753 = vmatprep.mubr.bf16.mxu0 %v12878_v49  ;;  %v11854_v19 = vld [vmem:[%s12536_s5 + $0x370] ss:$8 sps:$4 sm:$0xff]  }
 0x54a   :  { %v5141_v11 = vpop.f32.mrf.mxu0  ;;  %5681 = vmatpush1.bf16.msra.mxu1 %v11683_v15  ;;  %v11761_v44 = vld [vmem:[%s12536_s5 + $0x2b0] ss:$8 sps:$4 sm:$0xff]   ;;  %13072 = vst [vmem:[#allocation37_spill] sm:$0xff] %v11854_v19 }
 0x54b   :  { %5724 = vmatpush1.bf16.msra.mxu0 %v11689_v43  ;;  %v5099_v5 = vpop.f32.mrf.mxu1  ;;  %5682 = vmatprep.subr.bf16.mxu1 %v11695_v60  ;;  %13059 = vst [vmem:[#allocation42_spill] sm:$0xff] %v11761_v44  ;;  %v11767_v11 = vld [vmem:[%s12536_s5 + $0x224] ss:$8 sps:$4 sm:$0xff]  }
 0x54c   :  { %v5142_v51 = vpop.f32.mrf.mxu0  ;;  %5725 = vmatprep.subr.bf16.mxu0 %v11701_v16  ;;  %v11773_v5 = vld [vmem:[%s12536_s5 + $0x2a4] ss:$8 sps:$4 sm:$0xff]  }
 0x54d   :  { %13060 = vst [vmem:[#allocation35_spill] sm:$0xff] %v11773_v5  ;;  %v11779_v51 = vld [vmem:[%s12536_s5 + $0x220] ss:$8 sps:$4 sm:$0xff]  }
 0x54e   :  { %5683 = vmatpush1.bf16.msra.mxu1 %v11707_v3 }
 0x54f   :  { %5726 = vmatpush1.bf16.msra.mxu0 %v11713_v21  ;;  %5684 = vmatprep.subr.bf16.mxu1 %v11719_v61  ;;  %v11839_v21 = vld [vmem:[%s12536_s5 + $0x374] ss:$8 sps:$4 sm:$0xff]  }
 0x550   :  { %5727 = vmatprep.subr.bf16.mxu0 %v11725_v57  ;;  %v11827_v57 = vld [vmem:[%s12536_s5 + $0x200] ss:$8 sps:$4 sm:$0xff]   ;;  %13070 = vst [vmem:[#allocation61_spill] sm:$0xff] %v11839_v21 }
 0x551   :  { %13068 = vst [vmem:[#allocation13_spill] sm:$0xff] %v11827_v57 }
 0x552   :  { %5685 = vmatpush1.bf16.msra.mxu1 %v11731_v18 }
 0x553   :  { %5728 = vmatpush1.bf16.msra.mxu0 %v11737_v14  ;;  %5686 = vmatprep.subr.bf16.mxu1 %v11743_v37  ;;  %v11815_v14 = vld [vmem:[%s12536_s5 + $0x204] ss:$8 sps:$4 sm:$0xff]  }
 0x554   :  { %5729 = vmatprep.subr.bf16.mxu0 %v11749_v20  ;;  %v11803_v20 = vld [vmem:[%s12536_s5 + $0x210] ss:$8 sps:$4 sm:$0xff]   ;;  %13066 = vst [vmem:[#allocation36_spill] sm:$0xff] %v11815_v14 }
 0x555   :  { %13064 = vst [vmem:[#allocation60_spill] sm:$0xff] %v11803_v20 }
 0x556   :  { %5687 = vmatpush1.bf16.msra.mxu1 %v11755_v33 }
 0x557   :  { %5730 = vmatpush1.bf16.msra.mxu0 %v11761_v44  ;;  %5688 = vmatprep.subr.bf16.mxu1 %v11767_v11  ;;  %v11791_v44 = vld [vmem:[%s12536_s5 + $0x214] ss:$8 sps:$4 sm:$0xff]  }
 0x558   :  { %5731 = vmatprep.subr.bf16.mxu0 %v11773_v5  ;;  %13062 = vst [vmem:[#allocation12_spill] sm:$0xff] %v11791_v44  ;;  %v11797_v5 = vld [vmem:[%s12536_s5 + $0x294] ss:$8 sps:$4 sm:$0xff]  }
 0x559   :  { %13063 = vst [vmem:[#allocation68_spill] sm:$0xff] %v11797_v5 }
 0x55a   :  { %5689 = vmatpush1.bf16.msra.mxu1 %v11779_v51 }
 0x55b   :  { %5732 = vmatpush1.bf16.msra.mxu0 %v11785_v63  ;;  %5690 = vmatprep.subr.bf16.mxu1 %v11791_v44  ;;  %v11809_v63 = vld [vmem:[%s12536_s5 + $0x290] ss:$8 sps:$4 sm:$0xff]  }
 0x55c   :  { %5733 = vmatprep.subr.bf16.mxu0 %v11797_v5  ;;  %13065 = vst [vmem:[#allocation21_spill] sm:$0xff] %v11809_v63  ;;  %v11821_v5 = vld [vmem:[%s12536_s5 + $0x284] ss:$8 sps:$4 sm:$0xff]   ;;  %v3729_v44 = vld [vmem:[#allocation3 + $0x33] sm:$0x1] }
 0x55d   :  { %13067 = vst [vmem:[#allocation45_spill] sm:$0xff] %v11821_v5 }
 0x55e   :  { %5691 = vmatpush1.bf16.msra.mxu1 %v11803_v20  ;;  %v3712_v20 = vld [vmem:[#allocation3 + $0x31] sm:$0x1] }
 0x55f   :  { %5734 = vmatpush1.bf16.msra.mxu0 %v11809_v63  ;;  %5692 = vmatprep.subr.bf16.mxu1 %v11815_v14  ;;  %v11833_v63 = vld [vmem:[%s12536_s5 + $0x280] ss:$8 sps:$4 sm:$0xff]  }
 0x560   :  { %5735 = vmatprep.subr.bf16.mxu0 %v11821_v5  ;;  %13069 = vst [vmem:[#allocation70_spill] sm:$0xff] %v11833_v63  ;;  %v11845_v5 = vld [vmem:[%s12536_s5 + $0x3f4] ss:$8 sps:$4 sm:$0xff]  }
 0x561   :  { %13071 = vst [vmem:[#allocation23_spill] sm:$0xff] %v11845_v5 }
 0x562   :  { %5693 = vmatpush1.bf16.msra.mxu1 %v11827_v57  ;;  %v11903_v57 = vld [vmem:[%s12536_s5 + $0x3d4] ss:$8 sps:$4 sm:$0xff]  }
 0x563   :  { %5736 = vmatpush1.bf16.msra.mxu0 %v11833_v63  ;;  %5772 = vmatprep.subr.bf16.mxu1 %v11839_v21  ;;  %v3718_v21 = vld [vmem:[#allocation3 + $0x78] sm:$0x1]  ;;  %13079 = vst [vmem:[#allocation65_spill] sm:$0xff] %v11903_v57 }
 0x564   :  { %5823 = vmatprep.subr.bf16.mxu0 %v11845_v5  ;;  %v3722_v53 = vmax.f32 %v3718_v21, %v3720_v47  ;;  %v11921_v47 = vld [vmem:[%s12536_s5 + $0x344] ss:$8 sps:$4 sm:$0xff]   ;;  %v3717_v21 = vld [vmem:[#allocation3 + $0x38] sm:$0x1] }
 0x565   :  { %v5178_v16 = vpop.f32.mrf.mxu1  ;;  %5711 = vmatmul.mubr.bf16.vlgmr.msra.gmra.mxu1 %v12997_v12  ;;  %v11875_v12 = vld [vmem:[%s12536_s5 + $0x3e4] ss:$8 sps:$4 sm:$0xff]   ;;  %13082 = vst [vmem:[#allocation67_spill] sm:$0xff] %v11921_v47 }
 0x566   :  { %v5179_v43 = vadd.f32 %v5178_v16, %v11646_v45  ;;  %v5227_v63 = vpop.f32.mrf.mxu0  ;;  %5754 = vmatmul.mubr.bf16.vlgmr.msra.gmra.mxu0 %v11153_v2  ;;  %5773 = vmatpush1.bf16.msra.mxu1 %v11854_v19  ;;  %v11866_v45 = vld [vmem:[%s12536_s5 + $0x364] ss:$8 sps:$4 sm:$0xff]   ;;  %13075 = vst [vmem:[#allocation38_spill] sm:$0xff] %v11875_v12 }
 0x567   :  { %5824 = vmatpush1.bf16.msra.mxu0 %v11860_v23  ;;  %v5180_v5 = vpop.f32.mrf.mxu1  ;;  %13074 = vst [vmem:[#allocation62_spill] sm:$0xff] %v11866_v45  ;;  %5774 = vmatprep.subr.bf16.mxu1 %v11866_v45 }
 0x568   :  { %v11869_v16 = vadd.f32 %v5227_v63, %v5179_v43  ;;  %v5181_v2 = vadd.f32 %v5180_v5, %v11670_v39  ;;  %v5229_v19 = vpop.f32.mrf.mxu0  ;;  %5825 = vmatprep.subr.bf16.mxu0 %v11875_v12  ;;  %5804 = vmatprep.mubr.bf16.mxu1 %v12878_v49  ;;  %v11885_v39 = vld [vmem:[%s12536_s5 + $0x360] ss:$8 sps:$4 sm:$0xff]   ;;  %v3734_v43 = vld [vmem:[#allocation3 + $0x7a] sm:$0x1]  ;;  %v3736_v5 = vld [vmem:[#allocation3 + $0x7b] sm:$0x1] }
 0x569   :  { %v5182_v23 = vpop.f32.mrf.mxu1  ;;  %5855 = vmatprep.mubr.bf16.mxu0 %v12878_v49  ;;  %13076 = vst [vmem:[#allocation63_spill] sm:$0xff] %v11885_v39  ;;  %v3738_v14 = vmax.f32 %v3734_v43, %v3736_v5  ;;  %v3719_v43 = vld [vmem:[#allocation3 + $0x39] sm:$0x1] }
 0x56a   :  { %v11880_v45 = vadd.f32 %v5229_v19, %v5181_v2  ;;  %v5231_v63 = vpop.f32.mrf.mxu0  ;;  %5775 = vmatpush1.bf16.msra.mxu1 %v11885_v39  ;;  %v11891_v23 = vld [vmem:[%s12536_s5 + $0x3e0] ss:$8 sps:$4 sm:$0xff]   ;;  %v11897_v2 = vld [vmem:[%s12536_s5 + $0x354] ss:$8 sps:$4 sm:$0xff]   ;;  %v3711_v19 = vld [vmem:[#allocation3 + $0x70] sm:$0x1] }
 0x56b   :  { %13077 = vst [vmem:[#allocation16_spill] sm:$0xff] %v11891_v23  ;;  %5826 = vmatpush1.bf16.msra.mxu0 %v11891_v23  ;;  %v5183_v12 = vpop.f32.mrf.mxu1  ;;  %13078 = vst [vmem:[#allocation40_spill] sm:$0xff] %v11897_v2  ;;  %5776 = vmatprep.subr.bf16.mxu1 %v11897_v2  ;;  %v3713_v63 = vld [vmem:[#allocation3 + $0x71] sm:$0x1]  ;;  %v3728_v23 = vld [vmem:[#allocation3 + $0x72] sm:$0x1] }
 0x56c   :  { %v5232_v39 = vpop.f32.mrf.mxu0  ;;  %5827 = vmatprep.subr.bf16.mxu0 %v11903_v57  ;;  %v3730_v12 = vld [vmem:[#allocation3 + $0x73] sm:$0x1]  ;;  %v3715_v2 = vmax.f32 %v3711_v19, %v3713_v63  ;;  %v11927_v19 = vld [vmem:[%s12536_s5 + $0x3c4] ss:$8 sps:$4 sm:$0xff]   ;;  %v3733_v57 = vld [vmem:[#allocation3 + $0x3a] sm:$0x1] }
 0x56d   :  { %v11915_v39 = vld [vmem:[%s12536_s5 + $0x3d0] ss:$8 sps:$4 sm:$0xff]   ;;  %v3732_v5 = vmax.f32 %v3728_v23, %v3730_v12  ;;  %13083 = vst [vmem:[#allocation50_spill] sm:$0xff] %v11927_v19  ;;  %v3721_v23 = vmax.f32 %v3717_v21, %v3719_v43 }
 0x56e   :  { %5777 = vmatpush1.bf16.msra.mxu1 %v11909_v27  ;;  %13081 = vst [vmem:[#allocation26_spill] sm:$0xff] %v11915_v39  ;;  %v3724_v63 = vmax.f32 %v3715_v2, %v3722_v53  ;;  %v3710_v27 = vld [vmem:[#allocation3 + $0x30] sm:$0x1]  ;;  %v3727_v12 = vld [vmem:[#allocation3 + $0x32] sm:$0x1] }
 0x56f   :  { %5828 = vmatpush1.bf16.msra.mxu0 %v11915_v39  ;;  %5778 = vmatprep.subr.bf16.mxu1 %v11921_v47  ;;  %v3735_v39 = vld [vmem:[#allocation3 + $0x3b] sm:$0x1]  ;;  %v3740_v54 = vmax.f32 %v3732_v5, %v3738_v14  ;;  %v11933_v47 = vld [vmem:[%s12536_s5 + $0x340] ss:$8 sps:$4 sm:$0xff]   ;;  %v11945_v53 = vld [vmem:[%s12536_s5 + $0x334] ss:$8 sps:$4 sm:$0xff]   ;;  %v3714_v21 = vmax.f32 %v3710_v27, %v3712_v20  ;;  %v3731_v5 = vmax.f32 %v3727_v12, %v3729_v44 }
 0x570   :  { %5829 = vmatprep.subr.bf16.mxu0 %v11927_v19  ;;  %13084 = vst [vmem:[#allocation20_spill] sm:$0xff] %v11933_v47  ;;  %v11939_v19 = vld [vmem:[%s12536_s5 + $0x3c0] ss:$8 sps:$4 sm:$0xff]   ;;  %13086 = vst [vmem:[#allocation44_spill] sm:$0xff] %v11945_v53  ;;  %v3737_v14 = vmax.f32 %v3733_v57, %v3735_v39  ;;  %v11951_v2 = vld [vmem:[%s12536_s5 + $0x3b4] ss:$8 sps:$4 sm:$0xff]   ;;  %v3726_v43 = vpack.c.bf16 %v3724_v63, %v3724_v63 }
 0x571   :  { %13085 = vst [vmem:[#allocation51_spill] sm:$0xff] %v11939_v19  ;;  %13087 = vst [vmem:[#allocation76_spill] sm:$0xff] %v11951_v2  ;;  %v11963_v57 = vld [vmem:[%s12536_s5 + $0x3b0] ss:$8 sps:$4 sm:$0xff]   ;;  %v11969_v27 = vld [vmem:[%s12536_s5 + $0x324] ss:$8 sps:$4 sm:$0xff]  }
 0x572   :  { %5779 = vmatpush1.bf16.msra.mxu1 %v11933_v47  ;;  %v3742_v47 = vpack.c.bf16 %v3740_v54, %v3740_v54  ;;  %13088 = vst [vmem:[#allocation69_spill] sm:$0xff] %v11963_v57  ;;  %v3739_v54 = vmax.f32 %v3731_v5, %v3737_v14  ;;  %v11975_v20 = vld [vmem:[%s12536_s5 + $0x3a4] ss:$8 sps:$4 sm:$0xff]   ;;  %v5767_v44 = vunpack.c.l.b16 %v3726_v43  ;;  %v11981_v63 = vld [vmem:[%s12536_s5 + $0x320] ss:$8 sps:$4 sm:$0xff]  }
 0x573   :  { %5830 = vmatpush1.bf16.msra.mxu0 %v11939_v19  ;;  %5780 = vmatprep.subr.bf16.mxu1 %v11945_v53  ;;  %v11957_v19 = vld [vmem:[%s12536_s5 + $0x330] ss:$8 sps:$4 sm:$0xff]   ;;  %v3723_v53 = vmax.f32 %v3714_v21, %v3721_v23  ;;  %13089 = vst [vmem:[#allocation29_spill] sm:$0xff] %v11975_v20  ;;  %v11987_v12 = vld [vmem:[%s12536_s5 + $0x3a0] ss:$8 sps:$4 sm:$0xff]  }
 0x574   :  { %5831 = vmatprep.subr.bf16.mxu0 %v11951_v2  ;;  %v5818_v39 = vunpack.c.l.b16 %v3742_v47  ;;  %13090 = vst [vmem:[#allocation22_spill] sm:$0xff] %v11987_v12  ;;  %v11993_v14 = vld [vmem:[%s12536_s5 + $0x314] ss:$8 sps:$4 sm:$0xff]   ;;  %v3741_v47 = vpack.c.bf16 %v3739_v54, %v3739_v54  ;;  %v12005_v5 = vld [vmem:[%s12536_s5 + $0x310] ss:$8 sps:$4 sm:$0xff]  }
 0x575   :  { %v3725_v23 = vpack.c.bf16 %v3723_v53, %v3723_v53  ;;  %v11999_v21 = vld [vmem:[%s12536_s5 + $0x394] ss:$8 sps:$4 sm:$0xff]   ;;  %v5768_v53 = vrot.slane %v5767_v44, 7  ;;  %v12011_v54 = vld [vmem:[%s12536_s5 + $0x390] ss:$8 sps:$4 sm:$0xff]  }
 0x576   :  { %5781 = vmatpush1.bf16.msra.mxu1 %v11957_v19  ;;  %13091 = vst [vmem:[#allocation54_spill] sm:$0xff] %v11999_v21  ;;  %v5819_v43 = vrot.slane %v5818_v39, 7  ;;  %13092 = vst [vmem:[#allocation46_spill] sm:$0xff] %v12011_v54  ;;  %v12017_v44 = vld [vmem:[%s12536_s5 + $0x304] ss:$8 sps:$4 sm:$0xff]   ;;  %v5817_v39 = vunpack.c.l.b16 %v3741_v47 }
 0x577   :  { %5832 = vmatpush1.bf16.msra.mxu0 %v11963_v57  ;;  %5782 = vmatprep.subr.bf16.mxu1 %v11969_v27  ;;  %v12037_v47 = vld [vmem:[%s12536_s5 + $0x380] ss:$8 sps:$4 sm:$0xff]  }
 0x578   :  { %5833 = vmatprep.subr.bf16.mxu0 %v11975_v20  ;;  %v5820_v20 = vsel %vm3813_vm0, %v5819_v43, %v5817_v39  ;;  %13095 = vst [vmem:[#allocation47_spill] sm:$0xff] %v12037_v47  ;;  %v8662_v43 = vld [vmem:[%s12536_s5 + $0xf4] ss:$8 sps:$4 sm:$0xff]  }
 0x57a   :  { %5783 = vmatpush1.bf16.msra.mxu1 %v11981_v63 }
 0x57b   :  { %5834 = vmatpush1.bf16.msra.mxu0 %v11987_v12  ;;  %5784 = vmatprep.subr.bf16.mxu1 %v11993_v14  ;;  %v5766_v12 = vunpack.c.l.b16 %v3725_v23 }
 0x57c   :  { %5835 = vmatprep.subr.bf16.mxu0 %v11999_v21  ;;  %v12023_v21 = vld [vmem:[%s12536_s5 + $0x384] ss:$8 sps:$4 sm:$0xff]  }
 0x57d   :  { %13093 = vst [vmem:[#allocation71_spill] sm:$0xff] %v12023_v21  ;;  %v5769_v23 = vsel %vm3813_vm0, %v5768_v53, %v5766_v12  ;;  %v12043_v12 = vld [vmem:[%s12536_s5 + $0x474] ss:$8 sps:$4 sm:$0xff]   ;;  %v12046_v53 = vpack.c.b16 %v5820_v20, %v5820_v20  ;;  %v8664_v20 = vld [vmem:[%s12536_s5 + $0xf0] ss:$8 sps:$4 sm:$0xff]  }
 0x57e   :  { %5785 = vmatpush1.bf16.msra.mxu1 %v12005_v5  ;;  %v5770_v57 = vpack.c.b16 %v5769_v23, %v5769_v23  ;;  %13096 = vst [vmem:[#allocation24_spill] sm:$0xff] %v12043_v12  ;;  %v12056_v23 = vld [vmem:[%s12536_s5 + $0x470] ss:$8 sps:$4 sm:$0xff]  }
 0x57f   :  { %5836 = vmatpush1.bf16.msra.mxu0 %v12011_v54  ;;  %5786 = vmatprep.subr.bf16.mxu1 %v12017_v44  ;;  %v12031_v54 = vld [vmem:[%s12536_s5 + $0x300] ss:$8 sps:$4 sm:$0xff]   ;;  %13097 = vst [vmem:[#allocation72_spill] sm:$0xff] %v12046_v53  ;;  %13098 = vst [vmem:[#allocation48_spill] sm:$0xff] %v12056_v23 }
 0x580   :  { %5837 = vmatprep.subr.bf16.mxu0 %v12023_v21  ;;  %13094 = vst [vmem:[#allocation55_spill] sm:$0xff] %v12031_v54 }
 0x582   :  { %5787 = vmatpush1.bf16.msra.mxu1 %v12031_v54 }
 0x583   :  { %5838 = vmatpush1.bf16.msra.mxu0 %v12037_v47  ;;  %5874 = vmatprep.subr.bf16.mxu1 %v12043_v12  ;;  %v3752_v12 = vld [vmem:[#allocation3 + $0x7d] sm:$0x1] }
 0x584   :  { %5917 = vmatprep.subr.bf16.mxu0 %v8662_v43 }
 0x585   :  { %v5270_v39 = vpop.f32.mrf.mxu1  ;;  %5805 = vmatmul.mubr.bf16.vlgmr.msra.gmra.mxu1 %v5770_v57 }
 0x586   :  { %v5277_v21 = vadd.f32 %v5270_v39, %v11869_v16  ;;  %v5313_v47 = vpop.f32.mrf.mxu0  ;;  %5856 = vmatmul.mubr.bf16.vlgmr.msra.gmra.mxu0 %v12046_v53  ;;  %5875 = vmatpush1.bf16.msra.mxu1 %v12056_v23  ;;  %v12065_v16 = vld [vmem:[%s12536_s5 + $0x464] ss:$8 sps:$4 sm:$0xff]   ;;  %v3750_v53 = vld [vmem:[#allocation3 + $0x7c] sm:$0x1] }
 0x587   :  { %5918 = vmatpush1.bf16.msra.mxu0 %v8664_v20  ;;  %v5272_v43 = vpop.f32.mrf.mxu1  ;;  %13099 = vst [vmem:[#allocation32_spill] sm:$0xff] %v12065_v16  ;;  %5876 = vmatprep.subr.bf16.mxu1 %v12065_v16  ;;  %v8666_v23 = vld [vmem:[%s12536_s5 + $0xe4] ss:$8 sps:$4 sm:$0xff]  }
 0x588   :  { %v12068_v57 = vadd.f32 %v5313_v47, %v5277_v21  ;;  %v5278_v39 = vadd.f32 %v5272_v43, %v11880_v45  ;;  %v5315_v2 = vpop.f32.mrf.mxu0  ;;  %5919 = vmatprep.subr.bf16.mxu0 %v8666_v23  ;;  %5906 = vmatprep.mubr.bf16.mxu1 %v12878_v49  ;;  %v12081_v45 = vld [vmem:[%s12536_s5 + $0x460] ss:$8 sps:$4 sm:$0xff]   ;;  %v12090_v23 = vld [vmem:[%s12536_s5 + $0x454] ss:$8 sps:$4 sm:$0xff]  }
 0x589   :  { %v5274_v20 = vpop.f32.mrf.mxu1  ;;  %5949 = vmatprep.mubr.bf16.mxu0 %v12878_v49  ;;  %13100 = vst [vmem:[#allocation25_spill] sm:$0xff] %v12081_v45  ;;  %v8668_v21 = vld [vmem:[%s12536_s5 + $0xe0] ss:$8 sps:$4 sm:$0xff]   ;;  %13101 = vst [vmem:[#allocation73_spill] sm:$0xff] %v12090_v23  ;;  %v3746_v43 = vld [vmem:[#allocation3 + $0x75] sm:$0x1] }
 0x58a   :  { %v12076_v54 = vadd.f32 %v5315_v2, %v5278_v39  ;;  %v5317_v16 = vpop.f32.mrf.mxu0  ;;  %5877 = vmatpush1.bf16.msra.mxu1 %v12081_v45  ;;  %v3744_v2 = vld [vmem:[#allocation3 + $0x74] sm:$0x1]  ;;  %v3754_v20 = vmax.f32 %v3750_v53, %v3752_v12  ;;  %v3749_v12 = vld [vmem:[#allocation3 + $0x3c] sm:$0x1]  ;;  %v3751_v53 = vld [vmem:[#allocation3 + $0x3d] sm:$0x1] }
 0x58b   :  { %5920 = vmatpush1.bf16.msra.mxu0 %v8668_v21  ;;  %v5275_v47 = vpop.f32.mrf.mxu1  ;;  %5878 = vmatprep.subr.bf16.mxu1 %v12090_v23  ;;  %v8670_v39 = vld [vmem:[%s12536_s5 + $0xd4] ss:$8 sps:$4 sm:$0xff]   ;;  %v12099_v21 = vld [vmem:[%s12536_s5 + $0x450] ss:$8 sps:$4 sm:$0xff]   ;;  %v3753_v45 = vmax.f32 %v3749_v12, %v3751_v53 }
 0x58c   :  { %v5318_v16 = vpop.f32.mrf.mxu0  ;;  %5921 = vmatprep.subr.bf16.mxu0 %v8670_v39  ;;  %13102 = vst [vmem:[#allocation79_spill] sm:$0xff] %v12099_v21  ;;  %v3748_v47 = vmax.f32 %v3744_v2, %v3746_v43  ;;  %v8672_v23 = vld [vmem:[%s12536_s5 + $0xd0] ss:$8 sps:$4 sm:$0xff]   ;;  %v8674_v39 = vld [vmem:[%s12536_s5 + $0xc4] ss:$8 sps:$4 sm:$0xff]  }
 0x58d   :  { %v12108_v16 = vld [vmem:[%s12536_s5 + $0x444] ss:$8 sps:$4 sm:$0xff]   ;;  %v3743_v43 = vld [vmem:[#allocation3 + $0x34] sm:$0x1]  ;;  %v12135_v12 = vld [vmem:[%s12536_s5 + $0x430] ss:$8 sps:$4 sm:$0xff]  }
 0x58e   :  { %5879 = vmatpush1.bf16.msra.mxu1 %v12099_v21  ;;  %13103 = vst [vmem:[#allocation49_spill] sm:$0xff] %v12108_v16  ;;  %v3756_v2 = vmax.f32 %v3748_v47, %v3754_v20  ;;  %v3745_v21 = vld [vmem:[#allocation3 + $0x35] sm:$0x1]  ;;  %v8680_v53 = vld [vmem:[%s12536_s5 + $0xb0] ss:$8 sps:$4 sm:$0xff]  }
 0x58f   :  { %5922 = vmatpush1.bf16.msra.mxu0 %v8672_v23  ;;  %5880 = vmatprep.subr.bf16.mxu1 %v12108_v16  ;;  %v12117_v23 = vld [vmem:[%s12536_s5 + $0x440] ss:$8 sps:$4 sm:$0xff]   ;;  %v8678_v20 = vld [vmem:[%s12536_s5 + $0xb4] ss:$8 sps:$4 sm:$0xff]   ;;  %v3747_v47 = vmax.f32 %v3743_v43, %v3745_v21  ;;  %v8682_v21 = vld [vmem:[%s12536_s5 + $0xa4] ss:$8 sps:$4 sm:$0xff]  }
 0x590   :  { %5923 = vmatprep.subr.bf16.mxu0 %v8674_v39  ;;  %13104 = vst [vmem:[#allocation75_spill] sm:$0xff] %v12117_v23  ;;  %v8676_v16 = vld [vmem:[%s12536_s5 + $0xc0] ss:$8 sps:$4 sm:$0xff]   ;;  %v12126_v39 = vld [vmem:[%s12536_s5 + $0x434] ss:$8 sps:$4 sm:$0xff]  }
 0x591   :  { %13105 = vst [vmem:[#allocation28_spill] sm:$0xff] %v12126_v39 }
 0x592   :  { %5881 = vmatpush1.bf16.msra.mxu1 %v12117_v23  ;;  %v3758_v23 = vpack.c.bf16 %v3756_v2, %v3756_v2 }
 0x593   :  { %5924 = vmatpush1.bf16.msra.mxu0 %v8676_v16  ;;  %5882 = vmatprep.subr.bf16.mxu1 %v12126_v39  ;;  %v3755_v16 = vmax.f32 %v3747_v47, %v3753_v45  ;;  %v12144_v39 = vld [vmem:[%s12536_s5 + $0x424] ss:$8 sps:$4 sm:$0xff]   ;;  %v12153_v45 = vld [vmem:[%s12536_s5 + $0x420] ss:$8 sps:$4 sm:$0xff]   ;;  %v12162_v47 = vld [vmem:[%s12536_s5 + $0x414] ss:$8 sps:$4 sm:$0xff]  }
 0x594   :  { %5925 = vmatprep.subr.bf16.mxu0 %v8678_v20  ;;  %v5869_v2 = vunpack.c.l.b16 %v3758_v23  ;;  %v8684_v20 = vld [vmem:[%s12536_s5 + $0xa0] ss:$8 sps:$4 sm:$0xff]   ;;  %13106 = vst [vmem:[#allocation86_spill] sm:$0xff] %v12162_v47  ;;  %v8686_v23 = vld [vmem:[%s12536_s5 + $0x94] ss:$8 sps:$4 sm:$0xff]  }
 0x595   :  { %v3757_v43 = vpack.c.bf16 %v3755_v16, %v3755_v16  ;;  %v12171_v16 = vld [vmem:[%s12536_s5 + $0x410] ss:$8 sps:$4 sm:$0xff]  }
 0x596   :  { %5883 = vmatpush1.bf16.msra.mxu1 %v12135_v12  ;;  %13107 = vst [vmem:[#allocation52_spill] sm:$0xff] %v12171_v16 }
 0x597   :  { %5926 = vmatpush1.bf16.msra.mxu0 %v8680_v53  ;;  %5884 = vmatprep.subr.bf16.mxu1 %v12144_v39  ;;  %v5870_v53 = vrot.slane %v5869_v2, 7  ;;  %v8690_v2 = vld [vmem:[%s12536_s5 + $0x84] ss:$8 sps:$4 sm:$0xff]  }
 0x598   :  { %5927 = vmatprep.subr.bf16.mxu0 %v8682_v21  ;;  %v5868_v21 = vunpack.c.l.b16 %v3757_v43  ;;  %v12190_v43 = vld [vmem:[%s12536_s5 + $0x400] ss:$8 sps:$4 sm:$0xff]  }
 0x599   :  { %13109 = vst [vmem:[#allocation77_spill] sm:$0xff] %v12190_v43 }
 0x59a   :  { %5885 = vmatpush1.bf16.msra.mxu1 %v12153_v45 }
 0x59b   :  { %5928 = vmatpush1.bf16.msra.mxu0 %v8684_v20  ;;  %5886 = vmatprep.subr.bf16.mxu1 %v12162_v47  ;;  %v8688_v20 = vld [vmem:[%s12536_s5 + $0x90] ss:$8 sps:$4 sm:$0xff]   ;;  %v12180_v47 = vld [vmem:[%s12536_s5 + $0x404] ss:$8 sps:$4 sm:$0xff]  }
 0x59c   :  { %5929 = vmatprep.subr.bf16.mxu0 %v8686_v23  ;;  %13108 = vst [vmem:[#allocation87_spill] sm:$0xff] %v12180_v47  ;;  %v5871_v23 = vsel %vm3813_vm0, %v5870_v53, %v5868_v21  ;;  %v8694_v53 = vld [vmem:[%s12536_s5 + $0x174] ss:$8 sps:$4 sm:$0xff]  }
 0x59e   :  { %5887 = vmatpush1.bf16.msra.mxu1 %v12171_v16 }
 0x59f   :  { %5930 = vmatpush1.bf16.msra.mxu0 %v8688_v20  ;;  %5888 = vmatprep.subr.bf16.mxu1 %v12180_v47  ;;  %v8692_v20 = vld [vmem:[%s12536_s5 + $0x80] ss:$8 sps:$4 sm:$0xff]   ;;  %v12196_v47 = vpack.c.b16 %v5871_v23, %v5871_v23  ;;  %v8695_v23 = vld [vmem:[%s12536_s5 + $0x70] ss:$8 sps:$4 sm:$0xff]  }
 0x5a0   :  { %5931 = vmatprep.subr.bf16.mxu0 %v8690_v2  ;;  %v8693_v2 = vld [vmem:[%s12536_s5 + $0x74] ss:$8 sps:$4 sm:$0xff]  }
 0x5a1   :  { %13110 = vst [vmem:[#allocation88_spill] sm:$0xff] %v12196_v47 }
 0x5a2   :  { %5889 = vmatpush1.bf16.msra.mxu1 %v12190_v43 }
 0x5a3   :  { %5932 = vmatpush1.bf16.msra.mxu0 %v8692_v20  ;;  %5958 = vmatprep.subr.bf16.mxu1 %v8693_v2  ;;  %v8696_v2 = vld [vmem:[%s12536_s5 + $0x64] ss:$8 sps:$4 sm:$0xff]  }
 0x5a4   :  { %5999 = vmatprep.subr.bf16.mxu0 %v8694_v53 }
 0x5a5   :  { %v5364_v21 = vpop.f32.mrf.mxu1  ;;  %5907 = vmatmul.mubr.bf16.vlgmr.msra.gmra.mxu1 %v12196_v47 }
 0x5a6   :  { %v5371_v43 = vadd.f32 %v5364_v21, %v12068_v57  ;;  %v5407_v16 = vpop.f32.mrf.mxu0  ;;  %5950 = vmatmul.mubr.bf16.vlgmr.msra.gmra.mxu0 %v12972_v34  ;;  %5959 = vmatpush1.bf16.msra.mxu1 %v8695_v23 }
 0x5a7   :  { %6000 = vmatpush1.bf16.msra.mxu0 %v11447_v40  ;;  %v5366_v20 = vpop.f32.mrf.mxu1  ;;  %5960 = vmatprep.subr.bf16.mxu1 %v8696_v2  ;;  %v8697_v40 = vld [vmem:[%s12536_s5 + $0x60] ss:$8 sps:$4 sm:$0xff]  }
 0x5a8   :  { %v5414_v53 = vadd.f32 %v5407_v16, %v5371_v43  ;;  %v5372_v47 = vadd.f32 %v5366_v20, %v12076_v54  ;;  %v5409_v57 = vpop.f32.mrf.mxu0  ;;  %6001 = vmatprep.subr.bf16.mxu0 %v11459_v56  ;;  %5990 = vmatprep.mubr.bf16.mxu1 %v12878_v49  ;;  %v8698_v54 = vld [vmem:[%s12536_s5 + $0x54] ss:$8 sps:$4 sm:$0xff]   ;;  %v8701_v43 = vld [vmem:[%s12536_s5 + $0x40] ss:$8 sps:$4 sm:$0xff]  }
 0x5a9   :  { %v5368_v34 = vpop.f32.mrf.mxu1  ;;  %6031 = vmatprep.mubr.bf16.mxu0 %v12878_v49 }
 0x5aa   :  { %v5415_v21 = vadd.f32 %v5409_v57, %v5372_v47  ;;  %v5411_v23 = vpop.f32.mrf.mxu0  ;;  %5961 = vmatpush1.bf16.msra.mxu1 %v8697_v40  ;;  %v8699_v47 = vld [vmem:[%s12536_s5 + $0x50] ss:$8 sps:$4 sm:$0xff]  }
 0x5ab   :  { %6002 = vmatpush1.bf16.msra.mxu0 %v11477_v29  ;;  %v5369_v16 = vpop.f32.mrf.mxu1  ;;  %5962 = vmatprep.subr.bf16.mxu1 %v8698_v54  ;;  %v8700_v29 = vld [vmem:[%s12536_s5 + $0x44] ss:$8 sps:$4 sm:$0xff]  }
 0x5ac   :  { %v5412_v56 = vpop.f32.mrf.mxu0  ;;  %6003 = vmatprep.subr.bf16.mxu0 %v11489_v17  ;;  %v8702_v17 = vld [vmem:[%s12536_s5 + $0x34] ss:$8 sps:$4 sm:$0xff]   ;;  %v13127_v54 = vld [vmem:[#allocation63_spill] sm:$0xff] }
 0x5ad   :  { %v13126_v16 = vld [vmem:[#allocation17_spill] sm:$0xff] }
 0x5ae   :  { %5963 = vmatpush1.bf16.msra.mxu1 %v8699_v47  ;;  %v13128_v47 = vld [vmem:[#allocation18_spill] sm:$0xff] }
 0x5af   :  { %6004 = vmatpush1.bf16.msra.mxu0 %v11501_v9  ;;  %5964 = vmatprep.subr.bf16.mxu1 %v8700_v29  ;;  %v8703_v9 = vld [vmem:[%s12536_s5 + $0x30] ss:$8 sps:$4 sm:$0xff]  }
 0x5b0   :  { %6005 = vmatprep.subr.bf16.mxu0 %v11513_v50  ;;  %v8704_v50 = vld [vmem:[%s12536_s5 + $0x24] ss:$8 sps:$4 sm:$0xff]  }
 0x5b2   :  { %5965 = vmatpush1.bf16.msra.mxu1 %v8701_v43  ;;  %v13129_v43 = vld [vmem:[#allocation40_spill] sm:$0xff] }
 0x5b3   :  { %6006 = vmatpush1.bf16.msra.mxu0 %v11525_v55  ;;  %5966 = vmatprep.subr.bf16.mxu1 %v8702_v17  ;;  %v8705_v55 = vld [vmem:[%s12536_s5 + $0x20] ss:$8 sps:$4 sm:$0xff]  }
 0x5b4   :  { %6007 = vmatprep.subr.bf16.mxu0 %v11537_v13  ;;  %v8706_v13 = vld [vmem:[%s12536_s5 + $0x14] ss:$8 sps:$4 sm:$0xff]   ;;  %v13130_v17 = vld [vmem:[#allocation19_spill] sm:$0xff] }
 0x5b6   :  { %5967 = vmatpush1.bf16.msra.mxu1 %v8703_v9  ;;  %v13131_v9 = vld [vmem:[#allocation66_spill] sm:$0xff] }
 0x5b7   :  { %6008 = vmatpush1.bf16.msra.mxu0 %v11549_v58  ;;  %5968 = vmatprep.subr.bf16.mxu1 %v8704_v50  ;;  %v8707_v58 = vld [vmem:[%s12536_s5 + $0x10] ss:$8 sps:$4 sm:$0xff]  }
 0x5b8   :  { %6009 = vmatprep.subr.bf16.mxu0 %v11561_v25  ;;  %v8708_v25 = vld [vmem:[%s12536_s5 + $0x4] ss:$8 sps:$4 sm:$0xff]   ;;  %v13132_v50 = vld [vmem:[#allocation34_spill] sm:$0xff] }
 0x5ba   :  { %5969 = vmatpush1.bf16.msra.mxu1 %v8705_v55  ;;  %v13133_v55 = vld [vmem:[#allocation67_spill] sm:$0xff] }
 0x5bb   :  { %6010 = vmatpush1.bf16.msra.mxu0 %v11573_v52  ;;  %5970 = vmatprep.subr.bf16.mxu1 %v8706_v13  ;;  %v8709_v52 = vld [vmem:[%s12536_s5] ss:$8 sps:$4 sm:$0xff]   ;;  %v13134_v13 = vld [vmem:[#allocation41_spill] sm:$0xff] }
 0x5bc   :  { %6011 = vmatprep.subr.bf16.mxu0 %v11585_v0  ;;  %v8710_v0 = vld [vmem:[%s12536_s5 + $0x1f4] ss:$8 sps:$4 sm:$0xff]  }
 0x5be   :  { %5971 = vmatpush1.bf16.msra.mxu1 %v8707_v58  ;;  %v13135_v58 = vld [vmem:[#allocation20_spill] sm:$0xff] }
 0x5bf   :  { %6012 = vmatpush1.bf16.msra.mxu0 %v11597_v4  ;;  %5972 = vmatprep.subr.bf16.mxu1 %v8708_v25  ;;  %v13136_v25 = vld [vmem:[#allocation59_spill] sm:$0xff] }
 0x5c0   :  { %6013 = vmatprep.subr.bf16.mxu0 %v11609_v31 }
 0x5c2   :  { %5973 = vmatpush1.bf16.msra.mxu1 %v8709_v52  ;;  %v13137_v52 = vld [vmem:[#allocation44_spill] sm:$0xff] }
 0x5c3   :  { %6014 = vmatpush1.bf16.msra.mxu0 %v11621_v32  ;;  %6042 = vmatprep.subr.bf16.mxu1 %v8710_v0  ;;  %v13138_v0 = vld [vmem:[#allocation42_spill] sm:$0xff] }
 0x5c4   :  { %6085 = vmatprep.subr.bf16.mxu0 %v11633_v7 }
 0x5c5   :  { %v5450_v4 = vpop.f32.mrf.mxu1  ;;  %5991 = vmatmul.mubr.bf16.vlgmr.msra.gmra.mxu1 %v12971_v6 }
 0x5c6   :  { %v5457_v20 = vadd.f32 %v5450_v4, %v5414_v53  ;;  %v5501_v2 = vpop.f32.mrf.mxu0  ;;  %6032 = vmatmul.mubr.bf16.vlgmr.msra.gmra.mxu0 %v11358_v22  ;;  %6043 = vmatpush1.bf16.msra.mxu1 %v11453_v42  ;;  %v13125_v53 = vld [vmem:[#allocation62_spill] sm:$0xff]  ;;  %v13139_v4 = vld [vmem:[#allocation35_spill] sm:$0xff] }
 0x5c7   :  { %6086 = vmatpush1.bf16.msra.mxu0 %v11652_v48  ;;  %v5452_v31 = vpop.f32.mrf.mxu1  ;;  %6044 = vmatprep.subr.bf16.mxu1 %v11467_v26 }
 0x5c8   :  { %v12279_v32 = vadd.f32 %v5501_v2, %v5457_v20  ;;  %v5458_v57 = vadd.f32 %v5452_v31, %v5415_v21  ;;  %v5503_v34 = vpop.f32.mrf.mxu0  ;;  %6087 = vmatprep.subr.bf16.mxu0 %v11664_v46  ;;  %6074 = vmatprep.mubr.bf16.mxu1 %v12878_v49  ;;  %v13140_v20 = vld [vmem:[#allocation43_spill] sm:$0xff]  ;;  %v13141_v2 = vld [vmem:[#allocation68_spill] sm:$0xff]  ;;  %v13142_v31 = vld [vmem:[#allocation21_spill] sm:$0xff] }
 0x5c9   :  { %v5454_v6 = vpop.f32.mrf.mxu1  ;;  %6117 = vmatprep.mubr.bf16.mxu0 %v12878_v49 }
 0x5ca   :  { %v6308_v22 = vmax.f32 %v11644_v24, %v12279_v32  ;;  %v12286_v42 = vadd.f32 %v5503_v34, %v5458_v57  ;;  %v5505_v7 = vpop.f32.mrf.mxu0  ;;  %6045 = vmatpush1.bf16.msra.mxu1 %v11483_v8  ;;  %v13111_v8 = vld [vmem:[#allocation12_spill] sm:$0xff]  ;;  %v13143_v57 = vld [vmem:[#allocation45_spill] sm:$0xff]  ;;  %v13145_v34 = vld [vmem:[#allocation55_spill] sm:$0xff] }
 0x5cb   :  { %6088 = vmatpush1.bf16.msra.mxu0 %v11683_v15  ;;  %v5455_v26 = vpop.f32.mrf.mxu1  ;;  %6046 = vmatprep.subr.bf16.mxu1 %v11495_v62  ;;  %v13112_v62 = vld [vmem:[#allocation15_spill] sm:$0xff]  ;;  %v13147_v6 = vld [vmem:[#allocation24_spill] sm:$0xff]  ;;  %v13148_v7 = vld [vmem:[#allocation57_spill] sm:$0xff] }
 0x5cc   :  { %v6309_v48 = vmax.f32 %v11668_v59, %v12286_v42  ;;  %v5506_v46 = vpop.f32.mrf.mxu0  ;;  %6089 = vmatprep.subr.bf16.mxu0 %v11695_v60  ;;  %v8522_v24 = vld [vmem:[%s12540_s9 + $0x10] sm:$0xff]   ;;  %v8523_v32 = vld [vmem:[%s12540_s9 + $0x8] sm:$0xff]   ;;  %v8524_v59 = vld [vmem:[%s12540_s9] sm:$0xff]  }
 0x5cd   :  { %v13149_v46 = vld [vmem:[#allocation72_spill] sm:$0xff] }
 0x5ce   :  { %6047 = vmatpush1.bf16.msra.mxu1 %v11507_v38  ;;  %v13113_v38 = vld [vmem:[#allocation60_spill] sm:$0xff] }
 0x5cf   :  { %6090 = vmatpush1.bf16.msra.mxu0 %v11707_v3  ;;  %6048 = vmatprep.subr.bf16.mxu1 %v11519_v1  ;;  %v13114_v1 = vld [vmem:[#allocation33_spill] sm:$0xff]  ;;  %v13121_v3 = vld [vmem:[#allocation84_spill] sm:$0xff] }
 0x5d0   :  { %6091 = vmatprep.subr.bf16.mxu0 %v11719_v61  ;;  %v13122_v61 = vld [vmem:[#allocation64_spill] sm:$0xff] }
 0x5d1   :  { %v8526_v42 = vld [vmem:[%s12542_s11 + $0x30] sm:$0xff]  }
 0x5d2   :  { %6049 = vmatpush1.bf16.msra.mxu1 %v11531_v41  ;;  %v13115_v41 = vld [vmem:[#allocation36_spill] sm:$0xff] }
 0x5d3   :  { %6092 = vmatpush1.bf16.msra.mxu0 %v11731_v18  ;;  %6050 = vmatprep.subr.bf16.mxu1 %v11543_v28  ;;  %v13116_v28 = vld [vmem:[#allocation39_spill] sm:$0xff] }
 0x5d4   :  { %6093 = vmatprep.subr.bf16.mxu0 %v11743_v37  ;;  %v13123_v37 = vld [vmem:[#allocation37_spill] sm:$0xff] }
 0x5d6   :  { %6051 = vmatpush1.bf16.msra.mxu1 %v11555_v36  ;;  %v13117_v36 = vld [vmem:[#allocation13_spill] sm:$0xff] }
 0x5d7   :  { %6094 = vmatpush1.bf16.msra.mxu0 %v11755_v33  ;;  %6052 = vmatprep.subr.bf16.mxu1 %v11567_v30  ;;  %v13118_v30 = vld [vmem:[#allocation10_spill] sm:$0xff] }
 0x5d8   :  { %6095 = vmatprep.subr.bf16.mxu0 %v11767_v11  ;;  %v13124_v11 = vld [vmem:[#allocation58_spill] sm:$0xff] }
 0x5da   :  { %6053 = vmatpush1.bf16.msra.mxu1 %v11579_v35  ;;  %v13119_v35 = vld [vmem:[#allocation61_spill] sm:$0xff] }
 0x5db   :  { %6096 = vmatpush1.bf16.msra.mxu0 %v11779_v51  ;;  %6054 = vmatprep.subr.bf16.mxu1 %v11591_v10  ;;  %v13120_v10 = vld [vmem:[#allocation27_spill] sm:$0xff] }
 0x5dc   :  { %6097 = vmatprep.subr.bf16.mxu0 %v13111_v8  ;;  %v13151_v8 = vld [vmem:[#allocation48_spill] sm:$0xff] }
 0x5de   :  { %6055 = vmatpush1.bf16.msra.mxu1 %v13112_v62  ;;  %v13152_v62 = vld [vmem:[#allocation38_spill] sm:$0xff] }
 0x5df   :  { %6098 = vmatpush1.bf16.msra.mxu0 %v13113_v38  ;;  %6056 = vmatprep.subr.bf16.mxu1 %v13114_v1 }
 0x5e0   :  { %6099 = vmatprep.subr.bf16.mxu0 %v13115_v41 }
 0x5e2   :  { %6057 = vmatpush1.bf16.msra.mxu1 %v13116_v28  ;;  %v13153_v28 = vld [vmem:[#allocation32_spill] sm:$0xff] }
 0x5e3   :  { %6100 = vmatpush1.bf16.msra.mxu0 %v13117_v36  ;;  %6128 = vmatprep.subr.bf16.mxu1 %v13118_v30 }
 0x5e4   :  { %6171 = vmatprep.subr.bf16.mxu0 %v13119_v35 }
 0x5e5   :  { %v5544_v15 = vpop.f32.mrf.mxu1  ;;  %6075 = vmatmul.mubr.bf16.vlgmr.msra.gmra.mxu1 %v13120_v10  ;;  %v3766_v10 = vld [vmem:[#allocation3 + $0x7e] sm:$0x1] }
 0x5e6   :  { %v5585_v60 = vpop.f32.mrf.mxu0  ;;  %6118 = vmatmul.mubr.bf16.vlgmr.msra.gmra.mxu0 %v13121_v3  ;;  %6129 = vmatpush1.bf16.msra.mxu1 %v13122_v61  ;;  %v13155_v3 = vld [vmem:[#allocation25_spill] sm:$0xff] }
 0x5e7   :  { %v5586_v18 = vadd.f32 %v5585_v60, %v5544_v15  ;;  %6172 = vmatpush1.bf16.msra.mxu0 %v13123_v37  ;;  %v5546_v33 = vpop.f32.mrf.mxu1  ;;  %6130 = vmatprep.subr.bf16.mxu1 %v13124_v11  ;;  %v13154_v15 = vld [vmem:[#allocation16_spill] sm:$0xff]  ;;  %v3768_v60 = vld [vmem:[#allocation3 + $0x7f] sm:$0x1]  ;;  %v3760_v11 = vld [vmem:[#allocation3 + $0x76] sm:$0x1] }
 0x5e8   :  { %v5587_v51 = vpop.f32.mrf.mxu0  ;;  %6173 = vmatprep.subr.bf16.mxu0 %v13125_v53  ;;  %6160 = vmatprep.mubr.bf16.mxu1 %v12878_v49  ;;  %v3770_v53 = vmax.f32 %v3766_v10, %v3768_v60 }
 0x5e9   :  { %v5588_v21 = vadd.f32 %v5587_v51, %v5546_v33  ;;  %v5548_v23 = vpop.f32.mrf.mxu1  ;;  %6203 = vmatprep.mubr.bf16.mxu0 %v12878_v49  ;;  %v13157_v33 = vld [vmem:[#allocation73_spill] sm:$0xff] }
 0x5ea   :  { %v5589_v40 = vpop.f32.mrf.mxu0  ;;  %6131 = vmatpush1.bf16.msra.mxu1 %v13126_v16  ;;  %v3762_v51 = vld [vmem:[#allocation3 + $0x77] sm:$0x1]  ;;  %v13160_v23 = vld [vmem:[#allocation50_spill] sm:$0xff] }
 0x5eb   :  { %6174 = vmatpush1.bf16.msra.mxu0 %v13127_v54  ;;  %v5549_v56 = vpop.f32.mrf.mxu1  ;;  %6132 = vmatprep.subr.bf16.mxu1 %v13128_v47  ;;  %v3764_v40 = vmax.f32 %v3760_v11, %v3762_v51  ;;  %v13161_v16 = vld [vmem:[#allocation49_spill] sm:$0xff]  ;;  %v3765_v54 = vld [vmem:[#allocation3 + $0x3e] sm:$0x1] }
 0x5ec   :  { %v5590_v29 = vpop.f32.mrf.mxu0  ;;  %6175 = vmatprep.subr.bf16.mxu0 %v13129_v43  ;;  %v3767_v56 = vld [vmem:[#allocation3 + $0x3f] sm:$0x1]  ;;  %v3759_v43 = vld [vmem:[#allocation3 + $0x36] sm:$0x1] }
 0x5ed   :  { %v3772_v47 = vmax.f32 %v3764_v40, %v3770_v53  ;;  %v13162_v29 = vld [vmem:[#allocation51_spill] sm:$0xff]  ;;  %v8502_v40 = vld [vmem:[%s12538_s7 + $0x38] sm:$0xff]  }
 0x5ee   :  { %6133 = vmatpush1.bf16.msra.mxu1 %v13130_v17  ;;  %v3761_v17 = vld [vmem:[#allocation3 + $0x37] sm:$0x1] }
 0x5ef   :  { %6176 = vmatpush1.bf16.msra.mxu0 %v13131_v9  ;;  %6134 = vmatprep.subr.bf16.mxu1 %v13132_v50  ;;  %v13163_v9 = vld [vmem:[#allocation75_spill] sm:$0xff]  ;;  %v13164_v50 = vld [vmem:[#allocation76_spill] sm:$0xff] }
 0x5f0   :  { %6177 = vmatprep.subr.bf16.mxu0 %v13133_v55  ;;  %v3769_v55 = vmax.f32 %v3765_v54, %v3767_v56  ;;  %v8504_v54 = vld [vmem:[%s12538_s7 + $0x30] sm:$0xff]   ;;  %v8505_v56 = vld [vmem:[%s12538_s7 + $0x68] sm:$0xff]  }
 0x5f2   :  { %6135 = vmatpush1.bf16.msra.mxu1 %v13134_v13  ;;  %v13165_v13 = vld [vmem:[#allocation28_spill] sm:$0xff] }
 0x5f3   :  { %6178 = vmatpush1.bf16.msra.mxu0 %v13135_v58  ;;  %6136 = vmatprep.subr.bf16.mxu1 %v13136_v25  ;;  %v3763_v58 = vmax.f32 %v3759_v43, %v3761_v17  ;;  %v3774_v25 = vpack.c.bf16 %v3772_v47, %v3772_v47  ;;  %v8506_v47 = vld [vmem:[%s12538_s7 + $0x28] sm:$0xff]   ;;  %v8508_v43 = vld [vmem:[%s12538_s7 + $0x20] sm:$0xff]  }
 0x5f4   :  { %6179 = vmatprep.subr.bf16.mxu0 %v13137_v52  ;;  %v13166_v52 = vld [vmem:[#allocation69_spill] sm:$0xff] }
 0x5f6   :  { %6137 = vmatpush1.bf16.msra.mxu1 %v13138_v0  ;;  %v13167_v0 = vld [vmem:[#allocation29_spill] sm:$0xff] }
 0x5f7   :  { %6180 = vmatpush1.bf16.msra.mxu0 %v11957_v19  ;;  %6138 = vmatprep.subr.bf16.mxu1 %v13139_v4  ;;  %v13144_v19 = vld [vmem:[#allocation70_spill] sm:$0xff]  ;;  %v3771_v4 = vmax.f32 %v3763_v58, %v3769_v55 }
 0x5f8   :  { %6181 = vmatprep.subr.bf16.mxu0 %v11969_v27  ;;  %v13146_v27 = vld [vmem:[#allocation23_spill] sm:$0xff] }
 0x5fa   :  { %6139 = vmatpush1.bf16.msra.mxu1 %v13140_v20  ;;  %v6260_v20 = vunpack.c.l.b16 %v3774_v25 }
 0x5fb   :  { %6182 = vmatpush1.bf16.msra.mxu0 %v11981_v63  ;;  %6140 = vmatprep.subr.bf16.mxu1 %v13141_v2  ;;  %v13168_v2 = vld [vmem:[#allocation22_spill] sm:$0xff] }
 0x5fc   :  { %6183 = vmatprep.subr.bf16.mxu0 %v11993_v14 }
 0x5fe   :  { %6141 = vmatpush1.bf16.msra.mxu1 %v13142_v31  ;;  %v13169_v31 = vld [vmem:[#allocation54_spill] sm:$0xff] }
 0x5ff   :  { %6184 = vmatpush1.bf16.msra.mxu0 %v12005_v5  ;;  %6142 = vmatprep.subr.bf16.mxu1 %v13143_v57  ;;  %v13150_v5 = vld [vmem:[#allocation14_spill] sm:$0xff]  ;;  %v3773_v57 = vpack.c.bf16 %v3771_v4, %v3771_v4 }
 0x600   :  { %6185 = vmatprep.subr.bf16.mxu0 %v12017_v44 }
 0x602   :  { %6143 = vmatpush1.bf16.msra.mxu1 %v13144_v19  ;;  %v13170_v19 = vld [vmem:[#allocation86_spill] sm:$0xff] }
 0x603   :  { %6186 = vmatpush1.bf16.msra.mxu0 %v13145_v34  ;;  %6214 = vmatprep.subr.bf16.mxu1 %v13146_v27  ;;  %v6261_v34 = vrot.slane %v6260_v20, 7  ;;  %v13171_v27 = vld [vmem:[#allocation46_spill] sm:$0xff] }
 0x604   :  { %6265 = vmatprep.subr.bf16.mxu0 %v13147_v6  ;;  %v13172_v6 = vld [vmem:[#allocation52_spill] sm:$0xff]  ;;  %v8509_v20 = vld [vmem:[%s12538_s7 + $0x58] sm:$0xff]  }
 0x605   :  { %v5626_v63 = vpop.f32.mrf.mxu1  ;;  %6161 = vmatmul.mubr.bf16.vlgmr.msra.gmra.mxu1 %v13148_v7  ;;  %v13174_v7 = vld [vmem:[#allocation87_spill] sm:$0xff] }
 0x606   :  { %v5633_v14 = vadd.f32 %v5626_v63, %v5586_v18  ;;  %v5669_v26 = vpop.f32.mrf.mxu0  ;;  %6204 = vmatmul.mubr.bf16.vlgmr.msra.gmra.mxu0 %v13149_v46  ;;  %6215 = vmatpush1.bf16.msra.mxu1 %v13150_v5  ;;  %v13156_v18 = vld [vmem:[#allocation65_spill] sm:$0xff]  ;;  %v6259_v63 = vunpack.c.l.b16 %v3773_v57  ;;  %v13177_v5 = vld [vmem:[#allocation88_spill] sm:$0xff] }
 0x607   :  { %6266 = vmatpush1.bf16.msra.mxu0 %v13151_v8  ;;  %v5628_v44 = vpop.f32.mrf.mxu1  ;;  %6216 = vmatprep.subr.bf16.mxu1 %v13152_v62  ;;  %v8512_v57 = vld [vmem:[%s12538_s7 + $0x10] sm:$0xff]  }
 0x608   :  { %v5676_v38 = vadd.f32 %v5669_v26, %v5633_v14  ;;  %v5634_v1 = vadd.f32 %v5628_v44, %v5588_v21  ;;  %v5671_v41 = vpop.f32.mrf.mxu0  ;;  %6267 = vmatprep.subr.bf16.mxu0 %v13153_v28  ;;  %6246 = vmatprep.mubr.bf16.mxu1 %v12878_v49  ;;  %v13158_v21 = vld [vmem:[#allocation26_spill] sm:$0xff]  ;;  %v13175_v14 = vld [vmem:[#allocation47_spill] sm:$0xff] }
 0x609   :  { %v5630_v36 = vpop.f32.mrf.mxu1  ;;  %6297 = vmatprep.mubr.bf16.mxu0 %v12878_v49  ;;  %v13159_v49 = vld [vmem:[#allocation79_spill] sm:$0xff] }
 0x60a   :  { %v5677_v30 = vadd.f32 %v5671_v41, %v5634_v1  ;;  %v5673_v35 = vpop.f32.mrf.mxu0  ;;  %6217 = vmatpush1.bf16.msra.mxu1 %v13154_v15 }
 0x60b   :  { %6268 = vmatpush1.bf16.msra.mxu0 %v13155_v3  ;;  %v5631_v61 = vpop.f32.mrf.mxu1  ;;  %6218 = vmatprep.subr.bf16.mxu1 %v13156_v18 }
 0x60c   :  { %v5674_v37 = vpop.f32.mrf.mxu0  ;;  %6269 = vmatprep.subr.bf16.mxu0 %v13157_v33 }
 0x60e   :  { %6219 = vmatpush1.bf16.msra.mxu1 %v13158_v21 }
 0x60f   :  { %6270 = vmatpush1.bf16.msra.mxu0 %v13159_v49  ;;  %6220 = vmatprep.subr.bf16.mxu1 %v13160_v23 }
 0x610   :  { %6271 = vmatprep.subr.bf16.mxu0 %v13161_v16  ;;  %v8503_v16 = vld [vmem:[%s12538_s7 + $0x70] sm:$0xff]  }
 0x612   :  { %6221 = vmatpush1.bf16.msra.mxu1 %v13162_v29  ;;  %v8507_v29 = vld [vmem:[%s12538_s7 + $0x60] sm:$0xff]  }
 0x613   :  { %6272 = vmatpush1.bf16.msra.mxu0 %v13163_v9  ;;  %6222 = vmatprep.subr.bf16.mxu1 %v13164_v50 }
 0x614   :  { %6273 = vmatprep.subr.bf16.mxu0 %v13165_v13 }
 0x616   :  { %6223 = vmatpush1.bf16.msra.mxu1 %v13166_v52 }
 0x617   :  { %6274 = vmatpush1.bf16.msra.mxu0 %v12135_v12  ;;  %6224 = vmatprep.subr.bf16.mxu1 %v13167_v0  ;;  %v13173_v12 = vld [vmem:[#allocation71_spill] sm:$0xff] }
 0x618   :  { %6275 = vmatprep.subr.bf16.mxu0 %v12144_v39  ;;  %v6262_v39 = vsel %vm3813_vm0, %v6261_v34, %v6259_v63  ;;  %v8517_v34 = vld [vmem:[%s12540_s9 + $0x38] sm:$0xff]   ;;  %v8515_v63 = vld [vmem:[%s12538_s7 + $0x40] sm:$0xff]  }
 0x619   :  { %v6263_v26 = vpack.c.b16 %v6262_v39, %v6262_v39  ;;  %v8519_v39 = vld [vmem:[%s12540_s9 + $0x28] sm:$0xff]  }
 0x61a   :  { %6225 = vmatpush1.bf16.msra.mxu1 %v13168_v2  ;;  %v8510_v2 = vld [vmem:[%s12538_s7 + $0x18] sm:$0xff]  }
 0x61b   :  { %6276 = vmatpush1.bf16.msra.mxu0 %v12153_v45  ;;  %6226 = vmatprep.subr.bf16.mxu1 %v13169_v31  ;;  %v13176_v45 = vld [vmem:[#allocation77_spill] sm:$0xff] }
 0x61c   :  { %6277 = vmatprep.subr.bf16.mxu0 %v13170_v19  ;;  %v8511_v31 = vld [vmem:[%s12538_s7 + $0x50] sm:$0xff]   ;;  %v8513_v19 = vld [vmem:[%s12538_s7 + $0x48] sm:$0xff]  }
 0x61e   :  { %6227 = vmatpush1.bf16.msra.mxu1 %v13171_v27  ;;  %v8734_v27 = vmov 0.0  }
 0x61f   :  { %6278 = vmatpush1.bf16.msra.mxu0 %v13172_v6  ;;  %6228 = vmatprep.subr.bf16.mxu1 %v13173_v12  ;;  %v8514_v6 = vld [vmem:[%s12538_s7 + $0x8] sm:$0xff]   ;;  %v8518_v12 = vld [vmem:[%s12540_s9 + $0x30] sm:$0xff]  }
 0x620   :  { %6279 = vmatprep.subr.bf16.mxu0 %v13174_v7  ;;  %v8516_v7 = vld [vmem:[%s12538_s7] sm:$0xff]  }
 0x622   :  { %6229 = vmatpush1.bf16.msra.mxu1 %v13175_v14  ;;  %v8520_v14 = vld [vmem:[%s12540_s9 + $0x20] sm:$0xff]  }
 0x623   :  { %6280 = vmatpush1.bf16.msra.mxu0 %v13176_v45 }
 0x624   :  { %8081 = vmatprep.subr.bf16.mxu0 %v8734_v27 }
 0x625   :  { %v5712_v46 = vpop.f32.mrf.mxu1  ;;  %6247 = vmatmul.mubr.bf16.vlgmr.msra.gmra.mxu1 %v13177_v5 }
 0x626   :  { %v5719_v8 = vadd.f32 %v5712_v46, %v5676_v38  ;;  %v5755_v44 = vpop.f32.mrf.mxu0  ;;  %6298 = vmatmul.mubr.bf16.vlgmr.msra.gmra.mxu0 %v6263_v26  ;;  %v8521_v26 = vld [vmem:[%s12540_s9 + $0x18] sm:$0xff]  }
 0x627   :  { %v5714_v62 = vpop.f32.mrf.mxu1  ;;  %8082 = vmatpush3.bf16.msra.mxu0 %v8517_v34  ;;  %8097 = vmatprep.mubr.msk.bf16.mxu0 %vm8735_vm1, %v8734_v27 }
 0x628   :  { %v5762_v1 = vadd.f32 %v5755_v44, %v5719_v8  ;;  %v5720_v41 = vadd.f32 %v5714_v62, %v5677_v30  ;;  %v5757_v28 = vpop.f32.mrf.mxu0  ;;  %v8501_v30 = vld [vmem:[%s12538_s7 + $0x78] sm:$0xff]   ;;  %8083 = vmatprep.subr.bf16.mxu0 %v8734_v27 }
 0x629   :  { %v5716_v36 = vpop.f32.mrf.mxu1  ;;  %7577 = vmatprep.subr.bf16.mxu1 %v8501_v30 }
 0x62a   :  { %v5763_v35 = vadd.f32 %v5757_v28, %v5720_v41  ;;  %v5759_v15 = vpop.f32.mrf.mxu0  ;;  %7578 = vmatpush3.bf16.msra.mxu1 %v8502_v40 }
 0x62b   :  { %v5717_v10 = vpop.f32.mrf.mxu1  ;;  %7579 = vmatprep.subr.bf16.mxu1 %v8503_v16  ;;  %8084 = vmatpush3.bf16.msra.mxu0 %v8518_v12 }
 0x62c   :  { %v5760_v60 = vpop.f32.mrf.mxu0  ;;  %8085 = vmatprep.subr.bf16.mxu0 %v8734_v27 }
 0x62e   :  { %7580 = vmatpush3.bf16.msra.mxu1 %v8504_v54 }
 0x62f   :  { %7581 = vmatprep.subr.bf16.mxu1 %v8505_v56  ;;  %8086 = vmatpush3.bf16.msra.mxu0 %v8519_v39 }
 0x630   :  { %8087 = vmatprep.subr.bf16.mxu0 %v8734_v27 }
 0x632   :  { %7582 = vmatpush3.bf16.msra.mxu1 %v8506_v47  ;;  %v6316_v47 = vlaneseq }
 0x633   :  { %7583 = vmatprep.subr.bf16.mxu1 %v8507_v29  ;;  %8088 = vmatpush3.bf16.msra.mxu0 %v8520_v14 }
 0x634   :  { %8089 = vmatprep.subr.bf16.mxu0 %v8734_v27 }
 0x636   :  { %7584 = vmatpush3.bf16.msra.mxu1 %v8508_v43 }
 0x637   :  { %7585 = vmatprep.subr.bf16.mxu1 %v8509_v20  ;;  %8090 = vmatpush3.bf16.msra.mxu0 %v8521_v26  ;;  %v6314_v20 = vld [vmem:[%s12537_s6] sm:$0x3] }
 0x638   :  { %8091 = vmatprep.subr.bf16.mxu0 %v8734_v27 }
 0x63a   :  { %7586 = vmatpush3.bf16.msra.mxu1 %v8510_v2 }
 0x63b   :  { %7587 = vmatprep.subr.bf16.mxu1 %v8511_v31  ;;  %8092 = vmatpush3.bf16.msra.mxu0 %v8522_v24 }
 0x63c   :  { %8093 = vmatprep.subr.bf16.mxu0 %v8734_v27 }
 0x63e   :  { %7588 = vmatpush3.bf16.msra.mxu1 %v8512_v57 }
 0x63f   :  { %7589 = vmatprep.subr.bf16.mxu1 %v8513_v19  ;;  %8094 = vmatpush3.bf16.msra.mxu0 %v8523_v32 }
 0x640   :  { %8095 = vmatprep.subr.bf16.mxu0 %v8734_v27 }
 0x642   :  { %7590 = vmatpush3.bf16.msra.mxu1 %v8514_v6 }
 0x643   :  { %7591 = vmatprep.subr.bf16.mxu1 %v8515_v63  ;;  %8096 = vmatpush3.bf16.msra.mxu0 %v8524_v59 }
 0x645   :  { %v5806_v3 = vpop.f32.mrf.mxu1 }
 0x646   :  { %v5813_v61 = vadd.f32 %v5806_v3, %v5762_v1  ;;  %v5857_v18 = vpop.f32.mrf.mxu0  ;;  %7592 = vmatpush3.bf16.msra.mxu1 %v8516_v7 }
 0x647   :  { %v5808_v37 = vpop.f32.mrf.mxu1  ;;  %8101 = vmatprep.subr.bf16.mxu1 %v8734_v27 }
 0x648   :  { %v5864_v33 = vadd.f32 %v5857_v18, %v5813_v61  ;;  %v5814_v11 = vadd.f32 %v5808_v37, %v5763_v35  ;;  %v5859_v51 = vpop.f32.mrf.mxu0 }
 0x649   :  { %v5810_v53 = vpop.f32.mrf.mxu1 }
 0x64a   :  { %v5865_v38 = vadd.f32 %v5859_v51, %v5814_v11  ;;  %v5861_v21 = vpop.f32.mrf.mxu0 }
 0x64b   :  { %v5811_v49 = vpop.f32.mrf.mxu1 }
 0x64c   :  { %v5862_v23 = vpop.f32.mrf.mxu0 }
 0x665   :  { %v5908_v17 = vpop.f32.mrf.mxu1 }
 0x666   :  { %v12414_v9 = vadd.f32 %v5908_v17, %v5864_v33  ;;  %v5951_v50 = vpop.f32.mrf.mxu0 }
 0x667   :  { %v5910_v55 = vpop.f32.mrf.mxu1 }
 0x668   :  { %v12416_v13 = vadd.f32 %v5910_v55, %v5865_v38  ;;  %v5953_v58 = vpop.f32.mrf.mxu0 }
 0x669   :  { %v5912_v25 = vpop.f32.mrf.mxu1 }
 0x66a   :  { %v5955_v52 = vpop.f32.mrf.mxu0 }
 0x66b   :  { %v5913_v0 = vpop.f32.mrf.mxu1 }
 0x66c   :  { %v5956_v4 = vpop.f32.mrf.mxu0 }
 0x685   :  { %v5992_v45 = vpop.f32.mrf.mxu1 }
 0x686   :  { %v5993_v46 = vadd.f32 %v5992_v45, %v5951_v50  ;;  %v6033_v5 = vpop.f32.mrf.mxu0  ;;  %v6317_v50 = vshrl.u32 %v6316_v47, 7 }
 0x687   :  { %v5994_v8 = vpop.f32.mrf.mxu1 }
 0x688   :  { %v6040_v44 = vadd.f32 %v6033_v5, %v5993_v46  ;;  %v5995_v62 = vadd.f32 %v5994_v8, %v5953_v58  ;;  %v6035_v1 = vpop.f32.mrf.mxu0  ;;  %v6318_v4 = vsub.s32 0, %v6317_v50  ;;  %v6322_v34 = vsub.s32 1, %v6317_v50 }
 0x689   :  { %v5996_v41 = vpop.f32.mrf.mxu1 }
 0x68a   :  { %v6041_v28 = vadd.f32 %v6035_v1, %v5995_v62  ;;  %v6037_v36 = vpop.f32.mrf.mxu0  ;;  %v6319_v63 = vrot.slane %v6314_v20, %v6318_v4  ;;  %v6323_v5 = vrot.slane %v6314_v20, %v6322_v34 }
 0x68b   :  { %v5997_v35 = vpop.f32.mrf.mxu1  ;;  %v8529_v36 = vld [vmem:[%s12542_s11 + $0x18] sm:$0xff]  }
 0x68c   :  { %v6038_v15 = vpop.f32.mrf.mxu0  ;;  %v8530_v35 = vld [vmem:[%s12542_s11 + $0x10] sm:$0xff]  }
 0x6a5   :  { %v6076_v10 = vpop.f32.mrf.mxu1 }
 0x6a6   :  { %v6119_v60 = vpop.f32.mrf.mxu0  ;;  %v6083_v16 = vadd.f32 %v6076_v10, %v6040_v44  ;;  %v7310_v10 = vld [vmem:[%s12539_s8] ss:$0 sm:$0xff] }
 0x6a7   :  { %v6078_v3 = vpop.f32.mrf.mxu1 }
 0x6a8   :  { %v6121_v61 = vpop.f32.mrf.mxu0  ;;  %v6084_v54 = vadd.f32 %v6078_v3, %v6041_v28  ;;  %v6126_v56 = vadd.f32 %v6119_v60, %v6083_v16 }
 0x6a9   :  { %v6080_v18 = vpop.f32.mrf.mxu1 }
 0x6aa   :  { %v6123_v37 = vpop.f32.mrf.mxu0  ;;  %v6127_v29 = vadd.f32 %v6121_v61, %v6084_v54 }
 0x6ab   :  { %v6081_v33 = vpop.f32.mrf.mxu1 }
 0x6ac   :  { %v6124_v11 = vpop.f32.mrf.mxu0 }
 0x6c5   :  { %v6162_v51 = vpop.f32.mrf.mxu1 }
 0x6c6   :  { %v6205_v53 = vpop.f32.mrf.mxu0  ;;  %v6169_v43 = vadd.f32 %v6162_v51, %v6126_v56  ;;  %v8531_v51 = vld [vmem:[%s12542_s11 + $0x8] sm:$0xff]   ;;  %v7336_v56 = vld [vmem:[%s12543_s12] ss:$0 sm:$0xff] }
 0x6c7   :  { %v6164_v38 = vpop.f32.mrf.mxu1 }
 0x6c8   :  { %v6207_v21 = vpop.f32.mrf.mxu0  ;;  %v6170_v17 = vadd.f32 %v6164_v38, %v6127_v29  ;;  %v6212_v55 = vadd.f32 %v6205_v53, %v6169_v43  ;;  %v8532_v53 = vld [vmem:[%s12542_s11] sm:$0xff]  }
 0x6c9   :  { %v6166_v49 = vpop.f32.mrf.mxu1  ;;  %v7327_v38 = vld [vmem:[%s12541_s10] ss:$0 sm:$0xff] }
 0x6ca   :  { %v6209_v23 = vpop.f32.mrf.mxu0  ;;  %v6213_v25 = vadd.f32 %v6207_v21, %v6170_v17 }
 0x6cb   :  { %v6167_v30 = vpop.f32.mrf.mxu1 }
 0x6cc   :  { %v6210_v40 = vpop.f32.mrf.mxu0 }
 0x6e5   :  { %v6248_v58 = vpop.f32.mrf.mxu1 }
 0x6e6   :  { %v6255_v52 = vadd.f32 %v6248_v58, %v6212_v55  ;;  %v6299_v0 = vpop.f32.mrf.mxu0 }
 0x6e7   :  { %v6250_v2 = vpop.f32.mrf.mxu1 }
 0x6e8   :  { %v6306_v31 = vadd.f32 %v6299_v0, %v6255_v52  ;;  %v6256_v57 = vadd.f32 %v6250_v2, %v6213_v25  ;;  %v6301_v19 = vpop.f32.mrf.mxu0 }
 0x6e9   :  { %v6252_v6 = vpop.f32.mrf.mxu1 }
 0x6ea   :  { %v6310_v12 = vmax.f32 %v12414_v9, %v6306_v31  ;;  %v6307_v7 = vadd.f32 %v6301_v19, %v6256_v57  ;;  %v6303_v39 = vpop.f32.mrf.mxu0 }
 0x6eb   :  { %v6253_v14 = vpop.f32.mrf.mxu1 }
 0x6ec   :  { %v6312_v45 = vmax.f32 %v6308_v22, %v6310_v12  ;;  %v6311_v26 = vmax.f32 %v12416_v13, %v6307_v7  ;;  %v6304_v46 = vpop.f32.mrf.mxu0  ;;  %v8525_v22 = vld [vmem:[%s12542_s11 + $0x38] sm:$0xff]   ;;  %v8528_v13 = vld [vmem:[%s12542_s11 + $0x20] sm:$0xff]  }
 0x6ee   :  { %v6326_v8 = vadd.f32 %v6319_v63, %v6312_v45  ;;  %v6313_v44 = vmax.f32 %v6309_v48, %v6311_v26  ;;  %v8527_v48 = vld [vmem:[%s12542_s11 + $0x28] sm:$0xff]   ;;  %s8736_s11 = smov [#allocation4]  }
 0x6ef   :  { %s6740_s1 = sshll.u32 %s8736_s11, 4  ;;  %s6741_s1 = int_to_ptr.vmem [resolvable:$true] %s6740_s1 }
 0x6f0   :  { %v6327_v62 = vadd.f32 %v6323_v5, %v6313_v44  ;;  %v6328_v1 = vmax.f32 %v6326_v8, 0.0  ;;  %s8711_s10 = scalar_lea.vmem %s6741_s1, 32  ;;  %p8716_p1 = scmp.lt.s32.totalorder %s6741_s1, %s6741_s1 }
 0x6f1   :  { %p8712_p0 = scmp.ne.s32.totalorder %s6741_s1, %s8711_s10  ;;  %p8717_p2 = scmp.lt.s32.totalorder %s8711_s10, %s8711_s10 }
 0x6f2   :  { %v6329_v9 = vmax.f32 %v6327_v62, 0.0  ;;  %v6330_v28 = vpack.c.bf16 %v6328_v1, %v6328_v1 }
 0x6f3   :  { %p8718_p3 = por %p8717_p2, %p8716_p1 }
 0x6f4   :  { %v6331_v41 = vpack.c.bf16 %v6329_v9, %v6329_v9 }
 0x6f5   :  { %p8719_p4 = pnand %p8718_p3, %p8712_p0 }
 0x6f6   :  { %6499 = vmatprep.mubr.bf16.mxu1 %v6331_v41 }
 0x6f7   :  { %6500 = vmatmul.mubr.bf16.vlgmr.msra.gmra.mxu1 %v6330_v28 }
 0x6f8   :  { %8117 = vmatprep.mubr.msk.bf16.mxu1 %vm8735_vm1, %v8734_v27  ;;  %8102 = vmatpush3.bf16.msra.mxu1 %v8525_v22 }
 0x6f9   :  { %8103 = vmatprep.subr.bf16.mxu1 %v8734_v27 }
 0x6fc   :  { %8104 = vmatpush3.bf16.msra.mxu1 %v8526_v42 }
 0x6fd   :  { %8105 = vmatprep.subr.bf16.mxu1 %v8734_v27 }
 0x700   :  { %8106 = vmatpush3.bf16.msra.mxu1 %v8527_v48 }
 0x701   :  { %8107 = vmatprep.subr.bf16.mxu1 %v8734_v27 }
 0x704   :  { %8108 = vmatpush3.bf16.msra.mxu1 %v8528_v13 }
 0x705   :  { %8109 = vmatprep.subr.bf16.mxu1 %v8734_v27 }
 0x708   :  { %8110 = vmatpush3.bf16.msra.mxu1 %v8529_v36 }
 0x709   :  { %8111 = vmatprep.subr.bf16.mxu1 %v8734_v27 }
 0x70c   :  { %8112 = vmatpush3.bf16.msra.mxu1 %v8530_v35 }
 0x70d   :  { %8113 = vmatprep.subr.bf16.mxu1 %v8734_v27 }
 0x710   :  { %8114 = vmatpush3.bf16.msra.mxu1 %v8531_v51 }
 0x711   :  { %8115 = vmatprep.subr.bf16.mxu1 %v8734_v27 }
 0x714   :  { %8116 = vmatpush3.bf16.msra.mxu1 %v8532_v53 }
 0x7b7   :  { %v7593_v15 = vpop.f32.mrf.mxu1 }
 0x7b9   :  { %v7594_v60 = vpop.f32.mrf.mxu1 }
 0x7ba   :  { %v7595_v3 = vadd.f32 %v7594_v60, %v7593_v15 }
 0x7bb   :  { %v7596_v61 = vpop.f32.mrf.mxu1 }
 0x7bc   :  { %v6502_v18 = vadd.f32 %v7595_v3, %v7310_v10 }
 0x7bd   :  { %v7597_v37 = vpop.f32.mrf.mxu1 }
 0x7be   :  { %v6507_v33 = vmax.f32 %v6502_v18, 0.0 }
 0x7c0   :  { %v6508_v11 = vpack.c.bf16 %v6507_v33, %v6507_v33 }
 0x7c2   :  { %8098 = vmatmul.mubr.bf16.vlgmr.msra.gmra.mxu0 %v6508_v11 }
 0x882   :  { %v6614_v21 = vpop.f32.mrf.mxu0 }
 0x883   :  { %v6615_v49 = vadd.f32 %v7327_v38, %v6614_v21 }
 0x884   :  { %v8099_v23 = vpop.f32.mrf.mxu0 }
 0x885   :  { %v6620_v30 = vmax.f32 %v6615_v49, 0.0 }
 0x886   :  { %v6617_v40 = vpop.f32.mrf.mxu0 }
 0x887   :  { %v6621_v16 = vpack.c.bf16 %v6620_v30, %v6620_v30 }
 0x888   :  { %v8100_v54 = vpop.f32.mrf.mxu0 }
 0x889   :  { %8118 = vmatmul.mubr.bf16.vlgmr.msra.gmra.mxu1 %v6621_v16 }
 0x949   :  { %v6727_v27 = vpop.f32.mrf.mxu1 }
 0x94a   :  { %v6728_v47 = vadd.f32 %v7336_v56, %v6727_v27 }
 0x94b   :  { %v8119_v29 = vpop.f32.mrf.mxu1 }
 0x94c   :  { %6733 = vst [vmem:[#allocation4] sm:$0x3] %v6728_v47 }
 0x94d   :  { %v6730_v43 = vpop.f32.mrf.mxu1 }
 0x94e   :  { %8722 = shalt.err (!%p8719_p4)
}
 0x94f   :  { %6743 = dma.vmem_to_hbm [thread:$0]  %s6741_s1, 32, %s12544_s13, [#allocation5]   ;;  %v8120_v17 = vpop.f32.mrf.mxu1 }
 0x950   :  { %8731 = dma.done.wait [#allocation5], 32  }
 0x951   :  { %8732 = vsyncadd [#allocation5], 4294967264 }
 0x952   :  { %6747 = vsyncpa [#allocation5], 1 }

</bundles_post_ra>
